<compile_context>
chip_gen: v7x
topology: tpu7x:2x2x1
jax: 0.10.0
libtpu: 0.0.40
codegen_flags: <defaults>
</compile_context>

<pallas_src>
import functools

import jax
import jax.numpy as jnp
import numpy as np
from jax.experimental import pallas as pl
from jax.experimental.pallas import tpu as pltpu

BATCH = 2
LATENT_DIM = 8
PRE_FLATTEN = (None, 72, 1, 1)
OUTPUT_DIM = (3, 61, 61)
N_FILTERS = (72, 48, 24, 12, 3)
KSIZE = 5
STRIDE = 2
HIDDEN_1 = 1000
EPS = 1e-5

_CP = pltpu.CompilerParams(vmem_limit_bytes=16 * 1024 * 1024)


def _round_up(x, m):
    return (x + m - 1) // m * m


def _geometry(batch):
    """Static per-layer geometry: output sizes, padded lane widths, BN counts."""
    h = 1
    ohs, np_widths, bn_counts = [], [], []
    for i in range(4):
        oh = (h - 1) * STRIDE + KSIZE
        ohs.append(oh)
        np_widths.append(_round_up(oh * N_FILTERS[i + 1], 128))
        if i < 3:
            bn_counts.append(batch * oh * oh)
        h = oh
    return ohs, np_widths, bn_counts


# ------------------------------- fused kernel ------------------------------------


def decoder_kernel(
        # dense stack
        x_ref, w1_ref, dense_aux_ref, w2_ref, b2_ref,
        # deconv 1 (+BN)
        m1_ref, s1_ref, aux1_ref, r1_ref, rt1_ref,
        # deconv 2 (+BN) -- weights streamed manually from HBM
        m2_hbm, s2_ref, aux2_ref, r2_ref, rt2_ref,
        # deconv 3 (+BN)
        m3_hbm, s3_ref, aux3_ref, r3_ref, rt3_ref,
        # deconv 4 (+sigmoid)
        m4_hbm, s4_ref, aux4_ref,
        # output
        out_ref,
        # scratch
        m2_buf, m3_buf, m4_buf, dma_sem,
        *, bn_counts, np_widths, batch):
    f32, bf16 = jnp.float32, jnp.bfloat16

    # Kick off HBM->VMEM prefetch of later-layer deconv weights so they stream
    # in underneath the dense-stack / earlier-layer compute.
    cp2 = pltpu.make_async_copy(m2_hbm, m2_buf, dma_sem.at[0])
    cp3 = pltpu.make_async_copy(m3_hbm, m3_buf, dma_sem.at[1])
    cp4 = pltpu.make_async_copy(m4_hbm, m4_buf, dma_sem.at[2])
    cp2.start()
    cp3.start()
    cp4.start()

    def dotf(a, b):                      # f32 @ f32 -> f32
        return jnp.dot(a, b, preferred_element_type=f32)

    def dotw(a, w):                      # f32 activation @ bf16 weight -> f32 acc
        return jnp.dot(a.astype(bf16), w, preferred_element_type=f32)

    # ---- invert_latent_mean: Linear -> ReLU -> BatchNorm1d -> Linear -> ReLU ----
    da = dense_aux_ref[...]                                   # [b1; g1; be1]
    h = jnp.maximum(dotw(x_ref[...], w1_ref[...]) + da[0:1, :], 0.0)
    inv_b = 1.0 / batch
    mu = jnp.sum(h, axis=0, keepdims=True) * inv_b
    var = jnp.sum(jnp.square(h - mu), axis=0, keepdims=True) * inv_b
    h = (h - mu) * jax.lax.rsqrt(var + EPS) * da[1:2, :] + da[2:3, :]
    h = jnp.maximum(dotw(h, w2_ref[...]) + b2_ref[...], 0.0)  # (B*1, 1*72)

    def deconv(x, m, s_ref, bias, npw):
        # One wide x @ [M_0|...|M_4] matmul, then 5 lane-aligned row-scatter
        # matmuls (constant 0/1 S_kh) summed as a tree. Column scatter and the
        # channel contraction are folded into the constant M blocks.
        xm = dotw(x, m)
        parts = [dotf(s_ref[kh], xm[:, kh * npw:(kh + 1) * npw])
                 for kh in range(KSIZE)]
        return (parts[0] + parts[1]) + (parts[2] + parts[3]) + parts[4] + bias

    def bn2d(y, r_ref, rt_ref, g, be, count):
        # Training-mode BatchNorm2d (batch statistics, biased variance), fused
        # into two small MXU ops: [colsum;colsq]@R and [scale;shift]@R^T.
        sums = jnp.concatenate(
            [jnp.sum(y, axis=0, keepdims=True),
             jnp.sum(y * y, axis=0, keepdims=True)], axis=0)   # (2, NP)
        st = dotf(sums, r_ref[...]) * (1.0 / count)            # (2, 128)
        mean = st[0:1, :]
        var_c = st[1:2, :] - mean * mean
        scale = g * jax.lax.rsqrt(var_c + EPS)
        shift = be - mean * scale
        aff = dotf(jnp.concatenate([scale, shift], axis=0), rt_ref[...])  # (2, NP)
        return y * aff[0:1, :] + aff[1:2, :]

    a1 = aux1_ref[...]
    y = jnp.maximum(deconv(h, m1_ref[...], s1_ref, a1[0:1, :], np_widths[0]), 0.0)
    y = bn2d(y, r1_ref, rt1_ref, a1[1:2, :128], a1[2:3, :128], bn_counts[0])

    cp2.wait()
    a2 = aux2_ref[...]
    y = jnp.maximum(deconv(y, m2_buf[...], s2_ref, a2[0:1, :], np_widths[1]), 0.0)
    y = bn2d(y, r2_ref, rt2_ref, a2[1:2, :128], a2[2:3, :128], bn_counts[1])

    cp3.wait()
    a3 = aux3_ref[...]
    y = jnp.maximum(deconv(y, m3_buf[...], s3_ref, a3[0:1, :], np_widths[2]), 0.0)
    y = bn2d(y, r3_ref, rt3_ref, a3[1:2, :128], a3[2:3, :128], bn_counts[2])

    cp4.wait()
    y = deconv(y, m4_buf[...], s4_ref, aux4_ref[...], np_widths[3])
    # Sigmoid via EUP exp + approximate reciprocal (off the VPU), clamped so the
    # approximation can never leave [0, 1].
    out_ref[...] = jnp.clip(pl.reciprocal(1.0 + jnp.exp(-y), approx=True), 0.0, 1.0)


# ------------------------------- one-time packing ----------------------------------


def prepare_params(p, batch=BATCH):
    """One-time packing of PyTorch-layout parameters into kernel-ready constants.

    All expensive constant construction (deconv weight expansion, scatter
    matrices, BN selectors, bias tiling, bf16 casts) happens here exactly once;
    the jitted forward only streams the resulting arrays into the Pallas kernel.
    """
    k, stride = KSIZE, STRIDE
    ohs, np_widths, _ = _geometry(batch)
    packed = {
        "w1": jnp.asarray(p["w1"], jnp.bfloat16),
        "dense_aux": jnp.stack([p["b1"], p["bn1_g"], p["bn1_b"]]).astype(jnp.float32),
        "w2": jnp.asarray(p["w2"], jnp.bfloat16),
        "b2": jnp.asarray(p["b2"], jnp.float32).reshape(1, -1),
    }
    h = 1
    kin = N_FILTERS[0]                     # deconv-1 input is (B*1, 1*72)
    for i in range(4):
        cin, cout = N_FILTERS[i], N_FILTERS[i + 1]
        oh = ohs[i]
        npw = np_widths[i]

        # Column-scatter tensor: t[ix, kw, ox] = [ox == stride*ix + kw].
        t = np.zeros((h, k, oh), np.float32)
        for ix in range(h):
            for kw in range(k):
                t[ix, kw, stride * ix + kw] = 1.0
        wpt = np.asarray(p[f"dw{i + 1}"], np.float32)          # (cin, cout, kh, kw)
        # blk[kh, ix*cin+ci, ox*cout+co] = wpt[ci, co, kh, ox - stride*ix]
        blk = np.einsum("ako,ijhk->haioj", t, wpt).reshape(k, h * cin, oh * cout)
        # Concatenate the kh-blocks along N (each padded to a 128 multiple) and
        # pad K up to the previous layer's padded lane width (zero rows).
        m = np.zeros((kin, k * npw), np.float32)
        for kh in range(k):
            m[:h * cin, kh * npw:kh * npw + oh * cout] = blk[kh]
        packed[f"m{i + 1}"] = jnp.asarray(m, jnp.bfloat16)

        # Row-scatter matrices (block-diagonal over batch): oy = stride*iy + kh.
        s = np.zeros((k, batch * oh, batch * h), np.float32)
        for kh in range(k):
            for b in range(batch):
                for iy in range(h):
                    s[kh, b * oh + stride * iy + kh, b * h + iy] = 1.0
        packed[f"s{i + 1}"] = jnp.asarray(s)

        bias = np.zeros((npw,), np.float32)
        bias[:oh * cout] = np.tile(np.asarray(p[f"db{i + 1}"], np.float32), oh)
        if i < 3:
            g = np.zeros((npw,), np.float32)
            be = np.zeros((npw,), np.float32)
            g[:cout] = np.asarray(p[f"bn2d{i + 1}_g"], np.float32)
            be[:cout] = np.asarray(p[f"bn2d{i + 1}_b"], np.float32)
            packed[f"aux{i + 1}"] = jnp.asarray(np.stack([bias, g, be]))
            # Per-channel reduce / broadcast selectors for the padded (w*c) layout.
            r = np.zeros((npw, 128), np.float32)
            for ox in range(oh):
                for co in range(cout):
                    r[ox * cout + co, co] = 1.0
            packed[f"r{i + 1}"] = jnp.asarray(r)
            packed[f"rt{i + 1}"] = jnp.asarray(np.ascontiguousarray(r.T))
        else:
            packed[f"aux{i + 1}"] = jnp.asarray(bias.reshape(1, -1))

        h = oh
        kin = npw
    return packed


# ------------------------------- forward wrapper -----------------------------------


@jax.jit
def decoder_forward(input_data, packed):
    """Fused Pallas implementation of Decoder.forward (output NCHW, like PyTorch)."""
    b = input_data.shape[0]
    ohs, np_widths, bn_counts = _geometry(b)

    vm = pl.BlockSpec(memory_space=pltpu.MemorySpace.VMEM)
    hbm = pl.BlockSpec(memory_space=pl.ANY)

    inputs = [
        input_data, packed["w1"], packed["dense_aux"], packed["w2"], packed["b2"],
        packed["m1"], packed["s1"], packed["aux1"], packed["r1"], packed["rt1"],
        packed["m2"], packed["s2"], packed["aux2"], packed["r2"], packed["rt2"],
        packed["m3"], packed["s3"], packed["aux3"], packed["r3"], packed["rt3"],
        packed["m4"], packed["s4"], packed["aux4"],
    ]
    in_specs = [vm] * len(inputs)
    in_specs[10] = hbm    # m2 stays in HBM, streamed inside the kernel
    in_specs[15] = hbm    # m3
    in_specs[20] = hbm    # m4

    h = ohs[-1]
    out_shape = jax.ShapeDtypeStruct((b * h, np_widths[-1]), jnp.float32)
    y = pl.pallas_call(
        functools.partial(decoder_kernel, bn_counts=tuple(bn_counts),
                          np_widths=tuple(np_widths), batch=b),
        out_shape=out_shape,
        in_specs=in_specs,
        out_specs=vm,
        scratch_shapes=[
            pltpu.VMEM(packed["m2"].shape, jnp.bfloat16),
            pltpu.VMEM(packed["m3"].shape, jnp.bfloat16),
            pltpu.VMEM(packed["m4"].shape, jnp.bfloat16),
            pltpu.SemaphoreType.DMA((3,)),
        ],
        compiler_params=_CP,
    )(*inputs)

    cfin = N_FILTERS[-1]
    recon = jnp.transpose(y[:, :h * cfin].reshape(b, h, h, cfin), (0, 3, 1, 2))
    assert recon.shape[1] == OUTPUT_DIM[0]
    if recon.shape[2:] != tuple(OUTPUT_DIM[1:]):
        # TODO(synk): bilinear-resize fallback stays in plain-JAX glue (never hit at 61x61).
        recon = jax.image.resize(
            recon, (recon.shape[0], recon.shape[1]) + tuple(OUTPUT_DIM[1:]),
            method="linear")
    return recon


# ------------------------------- pure-JAX reference -------------------------------


def reference_forward(input_data, p):
    def bn(x, g, b, axes):
        m = x.mean(axis=axes, keepdims=True)
        v = jnp.square(x - m).mean(axis=axes, keepdims=True)
        shp = (1,) * (x.ndim - 1) + (x.shape[-1],)
        return (x - m) / jnp.sqrt(v + EPS) * g.reshape(shp) + b.reshape(shp)

    def deconv_ref(x, w_pt, b, act):
        k = w_pt.shape[-1]
        wf = jnp.transpose(w_pt[:, :, ::-1, ::-1], (2, 3, 0, 1))   # flipped, HWIO
        y = jax.lax.conv_general_dilated(
            x, wf, window_strides=(1, 1),
            padding=[(k - 1, k - 1), (k - 1, k - 1)],
            lhs_dilation=(STRIDE, STRIDE),
            dimension_numbers=("NHWC", "HWIO", "NHWC"))
        y = y + b.reshape(1, 1, 1, -1)
        return jnp.maximum(y, 0.0) if act == "relu" else jax.nn.sigmoid(y)

    h = jnp.maximum(input_data @ p["w1"] + p["b1"], 0.0)
    h = bn(h, p["bn1_g"], p["bn1_b"], (0,))
    h = jnp.maximum(h @ p["w2"] + p["b2"], 0.0)
    bsz = input_data.shape[0]
    c0, h0, w0 = PRE_FLATTEN[1:]
    x = jnp.transpose(h.reshape(bsz, c0, h0, w0), (0, 2, 3, 1))
    x = deconv_ref(x, p["dw1"], p["db1"], "relu")
    x = bn(x, p["bn2d1_g"], p["bn2d1_b"], (0, 1, 2))
    x = deconv_ref(x, p["dw2"], p["db2"], "relu")
    x = bn(x, p["bn2d2_g"], p["bn2d2_b"], (0, 1, 2))
    x = deconv_ref(x, p["dw3"], p["db3"], "relu")
    x = bn(x, p["bn2d3_g"], p["bn2d3_b"], (0, 1, 2))
    x = deconv_ref(x, p["dw4"], p["db4"], "sigmoid")
    return jnp.transpose(x, (0, 3, 1, 2))


# ------------------------------- parameter init ------------------------------------


def init_params(key):
    flat = int(np.prod(PRE_FLATTEN[1:]))
    ks = jax.random.split(key, 32)
    k = iter(range(32))

    def nrm(shape, scale):
        return scale * jax.random.normal(ks[next(k)], shape, jnp.float32)

    p = {
        "w1": nrm((LATENT_DIM, HIDDEN_1), 0.1),
        "b1": nrm((HIDDEN_1,), 0.05),
        "bn1_g": 1.0 + nrm((HIDDEN_1,), 0.05),
        "bn1_b": nrm((HIDDEN_1,), 0.05),
        "w2": nrm((HIDDEN_1, flat), 0.05),
        "b2": nrm((flat,), 0.05),
    }
    for i in range(4):
        cin, cout = N_FILTERS[i], N_FILTERS[i + 1]
        p[f"dw{i + 1}"] = nrm((cin, cout, KSIZE, KSIZE), 0.05)   # PyTorch ConvT layout
        p[f"db{i + 1}"] = nrm((cout,), 0.05)
        if i < 3:
            p[f"bn2d{i + 1}_g"] = 1.0 + nrm((cout,), 0.05)
            p[f"bn2d{i + 1}_b"] = nrm((cout,), 0.05)
    return p


# ------------------------------- main ----------------------------------------------

if __name__ == "__main__":
    key = jax.random.PRNGKey(0)
    pkey, zkey = jax.random.split(key)
    params = init_params(pkey)
    input_data = jax.random.normal(zkey, (BATCH, LATENT_DIM), jnp.float32)

    packed = prepare_params(params, BATCH)   # one-time constant packing (not per call)

    out = jax.block_until_ready(decoder_forward(input_data, packed))
    ref = jax.block_until_ready(reference_forward(input_data, params))

    assert out.shape == (BATCH,) + OUTPUT_DIM, out.shape
    assert bool(jnp.all(jnp.isfinite(out)))
    # Tolerance covers bf16-stored weights / bf16 MXU passes (the reference's own
    # f32 matmuls also run at default TPU matmul precision) and the clamped
    # approximate-reciprocal sigmoid.
    max_err = float(jnp.max(jnp.abs(out - ref)))
    assert max_err < 3e-2, f"max abs error vs reference: {max_err}"
    print("KERNEL_OK")
</pallas_src>

<mosaic_0001>
module attributes {stable_mosaic.version = 11 : i64} {
  func.func @decoder_kernel(%arg0: memref<2x8xf32, #tpu.memory_space<vmem>>, %arg1: memref<8x1000xbf16, #tpu.memory_space<vmem>>, %arg2: memref<3x1000xf32, #tpu.memory_space<vmem>>, %arg3: memref<1000x72xbf16, #tpu.memory_space<vmem>>, %arg4: memref<1x72xf32, #tpu.memory_space<vmem>>, %arg5: memref<72x1280xbf16, #tpu.memory_space<vmem>>, %arg6: memref<5x10x2xf32, #tpu.memory_space<vmem>>, %arg7: memref<3x256xf32, #tpu.memory_space<vmem>>, %arg8: memref<256x128xf32, #tpu.memory_space<vmem>>, %arg9: memref<128x256xf32, #tpu.memory_space<vmem>>, %arg10: memref<256x1920xbf16, #tpu.memory_space<any>>, %arg11: memref<5x26x10xf32, #tpu.memory_space<vmem>>, %arg12: memref<3x384xf32, #tpu.memory_space<vmem>>, %arg13: memref<384x128xf32, #tpu.memory_space<vmem>>, %arg14: memref<128x384xf32, #tpu.memory_space<vmem>>, %arg15: memref<384x1920xbf16, #tpu.memory_space<any>>, %arg16: memref<5x58x26xf32, #tpu.memory_space<vmem>>, %arg17: memref<3x384xf32, #tpu.memory_space<vmem>>, %arg18: memref<384x128xf32, #tpu.memory_space<vmem>>, %arg19: memref<128x384xf32, #tpu.memory_space<vmem>>, %arg20: memref<384x1280xbf16, #tpu.memory_space<any>>, %arg21: memref<5x122x58xf32, #tpu.memory_space<vmem>>, %arg22: memref<1x256xf32, #tpu.memory_space<vmem>>, %arg23: memref<122x256xf32, #tpu.memory_space<vmem>>, %arg24: memref<256x1920xbf16, #tpu.memory_space<vmem>>, %arg25: memref<384x1920xbf16, #tpu.memory_space<vmem>>, %arg26: memref<384x1280xbf16, #tpu.memory_space<vmem>>, %arg27: memref<3x!tpu.dma_semaphore, #tpu.memory_space<semaphore_mem>>) attributes {dimension_semantics = [], scalar_prefetch = 0 : i64, scratch_operands = 4 : i64, tpu.core_type = #tpu.core_type<tc>} {
    %c0_i32 = arith.constant 0 : i32
    %0 = tpu.memref_slice %arg27[%c0_i32] : memref<3x!tpu.dma_semaphore, #tpu.memory_space<semaphore_mem>> -> memref<1x!tpu.dma_semaphore, #tpu.memory_space<semaphore_mem>>
    %1 = tpu.memref_squeeze %0 : memref<1x!tpu.dma_semaphore, #tpu.memory_space<semaphore_mem>> -> memref<!tpu.dma_semaphore, #tpu.memory_space<semaphore_mem>>
    tpu.enqueue_dma source(%arg10 : memref<256x1920xbf16, #tpu.memory_space<any>>) target(%arg24 : memref<256x1920xbf16, #tpu.memory_space<vmem>>) target_semaphore(%1 : memref<!tpu.dma_semaphore, #tpu.memory_space<semaphore_mem>>)
    %c1_i32 = arith.constant 1 : i32
    %2 = tpu.memref_slice %arg27[%c1_i32] : memref<3x!tpu.dma_semaphore, #tpu.memory_space<semaphore_mem>> -> memref<1x!tpu.dma_semaphore, #tpu.memory_space<semaphore_mem>>
    %3 = tpu.memref_squeeze %2 : memref<1x!tpu.dma_semaphore, #tpu.memory_space<semaphore_mem>> -> memref<!tpu.dma_semaphore, #tpu.memory_space<semaphore_mem>>
    tpu.enqueue_dma source(%arg15 : memref<384x1920xbf16, #tpu.memory_space<any>>) target(%arg25 : memref<384x1920xbf16, #tpu.memory_space<vmem>>) target_semaphore(%3 : memref<!tpu.dma_semaphore, #tpu.memory_space<semaphore_mem>>)
    %c2_i32 = arith.constant 2 : i32
    %4 = tpu.memref_slice %arg27[%c2_i32] : memref<3x!tpu.dma_semaphore, #tpu.memory_space<semaphore_mem>> -> memref<1x!tpu.dma_semaphore, #tpu.memory_space<semaphore_mem>>
    %5 = tpu.memref_squeeze %4 : memref<1x!tpu.dma_semaphore, #tpu.memory_space<semaphore_mem>> -> memref<!tpu.dma_semaphore, #tpu.memory_space<semaphore_mem>>
    tpu.enqueue_dma source(%arg20 : memref<384x1280xbf16, #tpu.memory_space<any>>) target(%arg26 : memref<384x1280xbf16, #tpu.memory_space<vmem>>) target_semaphore(%5 : memref<!tpu.dma_semaphore, #tpu.memory_space<semaphore_mem>>)
    %c0 = arith.constant 0 : index
    %c0_0 = arith.constant 0 : index
    %6 = vector.load %arg2[%c0, %c0_0] : memref<3x1000xf32, #tpu.memory_space<vmem>>, vector<3x1000xf32>
    %c0_1 = arith.constant 0 : index
    %c0_2 = arith.constant 0 : index
    %7 = vector.load %arg0[%c0_1, %c0_2] : memref<2x8xf32, #tpu.memory_space<vmem>>, vector<2x8xf32>
    %c0_3 = arith.constant 0 : index
    %c0_4 = arith.constant 0 : index
    %8 = vector.load %arg1[%c0_3, %c0_4] : memref<8x1000xbf16, #tpu.memory_space<vmem>>, vector<8x1000xbf16>
    %9 = arith.truncf %7 : vector<2x8xf32> to vector<2x8xbf16>
    %cst = arith.constant dense<0.000000e+00> : vector<2x1000xf32>
    %10 = tpu.matmul %9, %8, %cst {dimension_numbers = #tpu.dot_dimension_numbers<[1], [0], [0], [1], [0, 0, 1, 1], [], []>} : vector<2x8xbf16>, vector<8x1000xbf16>, vector<2x1000xf32> -> vector<2x1000xf32>
    %11 = vector.extract_strided_slice %6 {offsets = [0, 0], sizes = [1, 1000], strides = [1, 1]} : vector<3x1000xf32> to vector<1x1000xf32>
    %12 = vector.broadcast %11 : vector<1x1000xf32> to vector<2x1000xf32>
    %13 = arith.addf %10, %12 : vector<2x1000xf32>
    %cst_5 = arith.constant 0.000000e+00 : f32
    %14 = vector.broadcast %cst_5 : f32 to vector<2x1000xf32>
    %15 = arith.maximumf %13, %14 : vector<2x1000xf32>
    %cst_6 = arith.constant dense<0.000000e+00> : vector<1000xf32>
    %16 = vector.multi_reduction <add>, %15, %cst_6 [0] : vector<2x1000xf32> to vector<1000xf32>
    %17 = vector.shape_cast %16 : vector<1000xf32> to vector<1x1000xf32>
    %cst_7 = arith.constant 5.000000e-01 : f32
    %18 = vector.broadcast %cst_7 : f32 to vector<1x1000xf32>
    %19 = arith.mulf %17, %18 : vector<1x1000xf32>
    %20 = vector.broadcast %19 : vector<1x1000xf32> to vector<2x1000xf32>
    %21 = arith.subf %15, %20 : vector<2x1000xf32>
    %22 = arith.mulf %21, %21 : vector<2x1000xf32>
    %cst_8 = arith.constant dense<0.000000e+00> : vector<1000xf32>
    %23 = vector.multi_reduction <add>, %22, %cst_8 [0] : vector<2x1000xf32> to vector<1000xf32>
    %24 = vector.shape_cast %23 : vector<1000xf32> to vector<1x1000xf32>
    %cst_9 = arith.constant 5.000000e-01 : f32
    %25 = vector.broadcast %cst_9 : f32 to vector<1x1000xf32>
    %26 = arith.mulf %24, %25 : vector<1x1000xf32>
    %27 = vector.broadcast %19 : vector<1x1000xf32> to vector<2x1000xf32>
    %28 = arith.subf %15, %27 : vector<2x1000xf32>
    %cst_10 = arith.constant 9.99999974E-6 : f32
    %29 = vector.broadcast %cst_10 : f32 to vector<1x1000xf32>
    %30 = arith.addf %26, %29 : vector<1x1000xf32>
    %31 = math.rsqrt %30 : vector<1x1000xf32>
    %32 = vector.broadcast %31 : vector<1x1000xf32> to vector<2x1000xf32>
    %33 = arith.mulf %28, %32 : vector<2x1000xf32>
    %34 = vector.extract_strided_slice %6 {offsets = [1, 0], sizes = [1, 1000], strides = [1, 1]} : vector<3x1000xf32> to vector<1x1000xf32>
    %35 = vector.broadcast %34 : vector<1x1000xf32> to vector<2x1000xf32>
    %36 = arith.mulf %33, %35 : vector<2x1000xf32>
    %37 = vector.extract_strided_slice %6 {offsets = [2, 0], sizes = [1, 1000], strides = [1, 1]} : vector<3x1000xf32> to vector<1x1000xf32>
    %38 = vector.broadcast %37 : vector<1x1000xf32> to vector<2x1000xf32>
    %39 = arith.addf %36, %38 : vector<2x1000xf32>
    %c0_11 = arith.constant 0 : index
    %c0_12 = arith.constant 0 : index
    %40 = vector.load %arg3[%c0_11, %c0_12] : memref<1000x72xbf16, #tpu.memory_space<vmem>>, vector<1000x72xbf16>
    %41 = arith.truncf %39 : vector<2x1000xf32> to vector<2x1000xbf16>
    %cst_13 = arith.constant dense<0.000000e+00> : vector<2x72xf32>
    %42 = tpu.matmul %41, %40, %cst_13 {dimension_numbers = #tpu.dot_dimension_numbers<[1], [0], [0], [1], [0, 0, 1, 1], [], []>} : vector<2x1000xbf16>, vector<1000x72xbf16>, vector<2x72xf32> -> vector<2x72xf32>
    %c0_14 = arith.constant 0 : index
    %c0_15 = arith.constant 0 : index
    %43 = vector.load %arg4[%c0_14, %c0_15] : memref<1x72xf32, #tpu.memory_space<vmem>>, vector<1x72xf32>
    %44 = vector.broadcast %43 : vector<1x72xf32> to vector<2x72xf32>
    %45 = arith.addf %42, %44 : vector<2x72xf32>
    %cst_16 = arith.constant 0.000000e+00 : f32
    %46 = vector.broadcast %cst_16 : f32 to vector<2x72xf32>
    %47 = arith.maximumf %45, %46 : vector<2x72xf32>
    %c0_17 = arith.constant 0 : index
    %c0_18 = arith.constant 0 : index
    %48 = vector.load %arg7[%c0_17, %c0_18] : memref<3x256xf32, #tpu.memory_space<vmem>>, vector<3x256xf32>
    %c0_19 = arith.constant 0 : index
    %c0_20 = arith.constant 0 : index
    %49 = vector.load %arg5[%c0_19, %c0_20] : memref<72x1280xbf16, #tpu.memory_space<vmem>>, vector<72x1280xbf16>
    %50 = vector.extract_strided_slice %48 {offsets = [0, 0], sizes = [1, 256], strides = [1, 1]} : vector<3x256xf32> to vector<1x256xf32>
    %51 = arith.truncf %47 : vector<2x72xf32> to vector<2x72xbf16>
    %cst_21 = arith.constant dense<0.000000e+00> : vector<2x1280xf32>
    %52 = tpu.matmul %51, %49, %cst_21 {dimension_numbers = #tpu.dot_dimension_numbers<[1], [0], [0], [1], [0, 0, 1, 1], [], []>} : vector<2x72xbf16>, vector<72x1280xbf16>, vector<2x1280xf32> -> vector<2x1280xf32>
    %c0_22 = arith.constant 0 : index
    %c0_23 = arith.constant 0 : index
    %c0_24 = arith.constant 0 : index
    %53 = vector.load %arg6[%c0_22, %c0_23, %c0_24] : memref<5x10x2xf32, #tpu.memory_space<vmem>>, vector<1x10x2xf32>
    %54 = vector.shape_cast %53 : vector<1x10x2xf32> to vector<10x2xf32>
    %55 = vector.extract_strided_slice %52 {offsets = [0, 0], sizes = [2, 256], strides = [1, 1]} : vector<2x1280xf32> to vector<2x256xf32>
    %cst_25 = arith.constant dense<0.000000e+00> : vector<10x256xf32>
    %56 = tpu.matmul %54, %55, %cst_25 {dimension_numbers = #tpu.dot_dimension_numbers<[1], [0], [0], [1], [0, 0, 1, 1], [], []>} : vector<10x2xf32>, vector<2x256xf32>, vector<10x256xf32> -> vector<10x256xf32>
    %c1 = arith.constant 1 : index
    %c0_26 = arith.constant 0 : index
    %c0_27 = arith.constant 0 : index
    %57 = vector.load %arg6[%c1, %c0_26, %c0_27] : memref<5x10x2xf32, #tpu.memory_space<vmem>>, vector<1x10x2xf32>
    %58 = vector.shape_cast %57 : vector<1x10x2xf32> to vector<10x2xf32>
    %59 = vector.extract_strided_slice %52 {offsets = [0, 256], sizes = [2, 256], strides = [1, 1]} : vector<2x1280xf32> to vector<2x256xf32>
    %cst_28 = arith.constant dense<0.000000e+00> : vector<10x256xf32>
    %60 = tpu.matmul %58, %59, %cst_28 {dimension_numbers = #tpu.dot_dimension_numbers<[1], [0], [0], [1], [0, 0, 1, 1], [], []>} : vector<10x2xf32>, vector<2x256xf32>, vector<10x256xf32> -> vector<10x256xf32>
    %c2 = arith.constant 2 : index
    %c0_29 = arith.constant 0 : index
    %c0_30 = arith.constant 0 : index
    %61 = vector.load %arg6[%c2, %c0_29, %c0_30] : memref<5x10x2xf32, #tpu.memory_space<vmem>>, vector<1x10x2xf32>
    %62 = vector.shape_cast %61 : vector<1x10x2xf32> to vector<10x2xf32>
    %63 = vector.extract_strided_slice %52 {offsets = [0, 512], sizes = [2, 256], strides = [1, 1]} : vector<2x1280xf32> to vector<2x256xf32>
    %cst_31 = arith.constant dense<0.000000e+00> : vector<10x256xf32>
    %64 = tpu.matmul %62, %63, %cst_31 {dimension_numbers = #tpu.dot_dimension_numbers<[1], [0], [0], [1], [0, 0, 1, 1], [], []>} : vector<10x2xf32>, vector<2x256xf32>, vector<10x256xf32> -> vector<10x256xf32>
    %c3 = arith.constant 3 : index
    %c0_32 = arith.constant 0 : index
    %c0_33 = arith.constant 0 : index
    %65 = vector.load %arg6[%c3, %c0_32, %c0_33] : memref<5x10x2xf32, #tpu.memory_space<vmem>>, vector<1x10x2xf32>
    %66 = vector.shape_cast %65 : vector<1x10x2xf32> to vector<10x2xf32>
    %67 = vector.extract_strided_slice %52 {offsets = [0, 768], sizes = [2, 256], strides = [1, 1]} : vector<2x1280xf32> to vector<2x256xf32>
    %cst_34 = arith.constant dense<0.000000e+00> : vector<10x256xf32>
    %68 = tpu.matmul %66, %67, %cst_34 {dimension_numbers = #tpu.dot_dimension_numbers<[1], [0], [0], [1], [0, 0, 1, 1], [], []>} : vector<10x2xf32>, vector<2x256xf32>, vector<10x256xf32> -> vector<10x256xf32>
    %c4 = arith.constant 4 : index
    %c0_35 = arith.constant 0 : index
    %c0_36 = arith.constant 0 : index
    %69 = vector.load %arg6[%c4, %c0_35, %c0_36] : memref<5x10x2xf32, #tpu.memory_space<vmem>>, vector<1x10x2xf32>
    %70 = vector.shape_cast %69 : vector<1x10x2xf32> to vector<10x2xf32>
    %71 = vector.extract_strided_slice %52 {offsets = [0, 1024], sizes = [2, 256], strides = [1, 1]} : vector<2x1280xf32> to vector<2x256xf32>
    %cst_37 = arith.constant dense<0.000000e+00> : vector<10x256xf32>
    %72 = tpu.matmul %70, %71, %cst_37 {dimension_numbers = #tpu.dot_dimension_numbers<[1], [0], [0], [1], [0, 0, 1, 1], [], []>} : vector<10x2xf32>, vector<2x256xf32>, vector<10x256xf32> -> vector<10x256xf32>
    %73 = arith.addf %56, %60 : vector<10x256xf32>
    %74 = arith.addf %64, %68 : vector<10x256xf32>
    %75 = arith.addf %73, %74 : vector<10x256xf32>
    %76 = arith.addf %75, %72 : vector<10x256xf32>
    %77 = vector.broadcast %50 : vector<1x256xf32> to vector<10x256xf32>
    %78 = arith.addf %76, %77 : vector<10x256xf32>
    %cst_38 = arith.constant 0.000000e+00 : f32
    %79 = vector.broadcast %cst_38 : f32 to vector<10x256xf32>
    %80 = arith.maximumf %78, %79 : vector<10x256xf32>
    %81 = vector.extract_strided_slice %48 {offsets = [1, 0], sizes = [1, 128], strides = [1, 1]} : vector<3x256xf32> to vector<1x128xf32>
    %82 = vector.extract_strided_slice %48 {offsets = [2, 0], sizes = [1, 128], strides = [1, 1]} : vector<3x256xf32> to vector<1x128xf32>
    %cst_39 = arith.constant dense<0.000000e+00> : vector<256xf32>
    %83 = vector.multi_reduction <add>, %80, %cst_39 [0] : vector<10x256xf32> to vector<256xf32>
    %84 = vector.shape_cast %83 : vector<256xf32> to vector<1x256xf32>
    %85 = arith.mulf %80, %80 : vector<10x256xf32>
    %cst_40 = arith.constant dense<0.000000e+00> : vector<256xf32>
    %86 = vector.multi_reduction <add>, %85, %cst_40 [0] : vector<10x256xf32> to vector<256xf32>
    %87 = vector.shape_cast %86 : vector<256xf32> to vector<1x256xf32>
    %88 = tpu.concatenate %84, %87 in 0 : vector<1x256xf32>, vector<1x256xf32> -> vector<2x256xf32>
    %c0_41 = arith.constant 0 : index
    %c0_42 = arith.constant 0 : index
    %89 = vector.load %arg8[%c0_41, %c0_42] : memref<256x128xf32, #tpu.memory_space<vmem>>, vector<256x128xf32>
    %cst_43 = arith.constant dense<0.000000e+00> : vector<2x128xf32>
    %90 = tpu.matmul %88, %89, %cst_43 {dimension_numbers = #tpu.dot_dimension_numbers<[1], [0], [0], [1], [0, 0, 1, 1], [], []>} : vector<2x256xf32>, vector<256x128xf32>, vector<2x128xf32> -> vector<2x128xf32>
    %cst_44 = arith.constant 2.000000e-02 : f32
    %91 = vector.broadcast %cst_44 : f32 to vector<2x128xf32>
    %92 = arith.mulf %90, %91 : vector<2x128xf32>
    %93 = vector.extract_strided_slice %92 {offsets = [0, 0], sizes = [1, 128], strides = [1, 1]} : vector<2x128xf32> to vector<1x128xf32>
    %94 = vector.extract_strided_slice %92 {offsets = [1, 0], sizes = [1, 128], strides = [1, 1]} : vector<2x128xf32> to vector<1x128xf32>
    %95 = arith.mulf %93, %93 : vector<1x128xf32>
    %96 = arith.subf %94, %95 : vector<1x128xf32>
    %cst_45 = arith.constant 9.99999974E-6 : f32
    %97 = vector.broadcast %cst_45 : f32 to vector<1x128xf32>
    %98 = arith.addf %96, %97 : vector<1x128xf32>
    %99 = math.rsqrt %98 : vector<1x128xf32>
    %100 = arith.mulf %81, %99 : vector<1x128xf32>
    %101 = arith.mulf %93, %100 : vector<1x128xf32>
    %102 = arith.subf %82, %101 : vector<1x128xf32>
    %103 = tpu.concatenate %100, %102 in 0 : vector<1x128xf32>, vector<1x128xf32> -> vector<2x128xf32>
    %c0_46 = arith.constant 0 : index
    %c0_47 = arith.constant 0 : index
    %104 = vector.load %arg9[%c0_46, %c0_47] : memref<128x256xf32, #tpu.memory_space<vmem>>, vector<128x256xf32>
    %cst_48 = arith.constant dense<0.000000e+00> : vector<2x256xf32>
    %105 = tpu.matmul %103, %104, %cst_48 {dimension_numbers = #tpu.dot_dimension_numbers<[1], [0], [0], [1], [0, 0, 1, 1], [], []>} : vector<2x128xf32>, vector<128x256xf32>, vector<2x256xf32> -> vector<2x256xf32>
    %106 = vector.extract_strided_slice %105 {offsets = [0, 0], sizes = [1, 256], strides = [1, 1]} : vector<2x256xf32> to vector<1x256xf32>
    %107 = vector.broadcast %106 : vector<1x256xf32> to vector<10x256xf32>
    %108 = arith.mulf %80, %107 : vector<10x256xf32>
    %109 = vector.extract_strided_slice %105 {offsets = [1, 0], sizes = [1, 256], strides = [1, 1]} : vector<2x256xf32> to vector<1x256xf32>
    %110 = vector.broadcast %109 : vector<1x256xf32> to vector<10x256xf32>
    %111 = arith.addf %108, %110 : vector<10x256xf32>
    %c0_i32_49 = arith.constant 0 : i32
    %112 = tpu.memref_slice %arg27[%c0_i32_49] : memref<3x!tpu.dma_semaphore, #tpu.memory_space<semaphore_mem>> -> memref<1x!tpu.dma_semaphore, #tpu.memory_space<semaphore_mem>>
    %113 = tpu.memref_squeeze %112 : memref<1x!tpu.dma_semaphore, #tpu.memory_space<semaphore_mem>> -> memref<!tpu.dma_semaphore, #tpu.memory_space<semaphore_mem>>
    tpu.wait_dma2 semaphore(%113 : memref<!tpu.dma_semaphore, #tpu.memory_space<semaphore_mem>>) src(%arg10 : memref<256x1920xbf16, #tpu.memory_space<any>>) dst(%arg24 : memref<256x1920xbf16, #tpu.memory_space<vmem>>)
    %c0_50 = arith.constant 0 : index
    %c0_51 = arith.constant 0 : index
    %114 = vector.load %arg12[%c0_50, %c0_51] : memref<3x384xf32, #tpu.memory_space<vmem>>, vector<3x384xf32>
    %c0_52 = arith.constant 0 : index
    %c0_53 = arith.constant 0 : index
    %115 = vector.load %arg24[%c0_52, %c0_53] : memref<256x1920xbf16, #tpu.memory_space<vmem>>, vector<256x1920xbf16>
    %116 = vector.extract_strided_slice %114 {offsets = [0, 0], sizes = [1, 384], strides = [1, 1]} : vector<3x384xf32> to vector<1x384xf32>
    %117 = arith.truncf %111 : vector<10x256xf32> to vector<10x256xbf16>
    %cst_54 = arith.constant dense<0.000000e+00> : vector<10x1920xf32>
    %118 = tpu.matmul %117, %115, %cst_54 {dimension_numbers = #tpu.dot_dimension_numbers<[1], [0], [0], [1], [0, 0, 1, 1], [], []>} : vector<10x256xbf16>, vector<256x1920xbf16>, vector<10x1920xf32> -> vector<10x1920xf32>
    %c0_55 = arith.constant 0 : index
    %c0_56 = arith.constant 0 : index
    %c0_57 = arith.constant 0 : index
    %119 = vector.load %arg11[%c0_55, %c0_56, %c0_57] : memref<5x26x10xf32, #tpu.memory_space<vmem>>, vector<1x26x10xf32>
    %120 = vector.shape_cast %119 : vector<1x26x10xf32> to vector<26x10xf32>
    %121 = vector.extract_strided_slice %118 {offsets = [0, 0], sizes = [10, 384], strides = [1, 1]} : vector<10x1920xf32> to vector<10x384xf32>
    %cst_58 = arith.constant dense<0.000000e+00> : vector<26x384xf32>
    %122 = tpu.matmul %120, %121, %cst_58 {dimension_numbers = #tpu.dot_dimension_numbers<[1], [0], [0], [1], [0, 0, 1, 1], [], []>} : vector<26x10xf32>, vector<10x384xf32>, vector<26x384xf32> -> vector<26x384xf32>
    %c1_59 = arith.constant 1 : index
    %c0_60 = arith.constant 0 : index
    %c0_61 = arith.constant 0 : index
    %123 = vector.load %arg11[%c1_59, %c0_60, %c0_61] : memref<5x26x10xf32, #tpu.memory_space<vmem>>, vector<1x26x10xf32>
    %124 = vector.shape_cast %123 : vector<1x26x10xf32> to vector<26x10xf32>
    %125 = vector.extract_strided_slice %118 {offsets = [0, 384], sizes = [10, 384], strides = [1, 1]} : vector<10x1920xf32> to vector<10x384xf32>
    %cst_62 = arith.constant dense<0.000000e+00> : vector<26x384xf32>
    %126 = tpu.matmul %124, %125, %cst_62 {dimension_numbers = #tpu.dot_dimension_numbers<[1], [0], [0], [1], [0, 0, 1, 1], [], []>} : vector<26x10xf32>, vector<10x384xf32>, vector<26x384xf32> -> vector<26x384xf32>
    %c2_63 = arith.constant 2 : index
    %c0_64 = arith.constant 0 : index
    %c0_65 = arith.constant 0 : index
    %127 = vector.load %arg11[%c2_63, %c0_64, %c0_65] : memref<5x26x10xf32, #tpu.memory_space<vmem>>, vector<1x26x10xf32>
    %128 = vector.shape_cast %127 : vector<1x26x10xf32> to vector<26x10xf32>
    %129 = vector.extract_strided_slice %118 {offsets = [0, 768], sizes = [10, 384], strides = [1, 1]} : vector<10x1920xf32> to vector<10x384xf32>
    %cst_66 = arith.constant dense<0.000000e+00> : vector<26x384xf32>
    %130 = tpu.matmul %128, %129, %cst_66 {dimension_numbers = #tpu.dot_dimension_numbers<[1], [0], [0], [1], [0, 0, 1, 1], [], []>} : vector<26x10xf32>, vector<10x384xf32>, vector<26x384xf32> -> vector<26x384xf32>
    %c3_67 = arith.constant 3 : index
    %c0_68 = arith.constant 0 : index
    %c0_69 = arith.constant 0 : index
    %131 = vector.load %arg11[%c3_67, %c0_68, %c0_69] : memref<5x26x10xf32, #tpu.memory_space<vmem>>, vector<1x26x10xf32>
    %132 = vector.shape_cast %131 : vector<1x26x10xf32> to vector<26x10xf32>
    %133 = vector.extract_strided_slice %118 {offsets = [0, 1152], sizes = [10, 384], strides = [1, 1]} : vector<10x1920xf32> to vector<10x384xf32>
    %cst_70 = arith.constant dense<0.000000e+00> : vector<26x384xf32>
    %134 = tpu.matmul %132, %133, %cst_70 {dimension_numbers = #tpu.dot_dimension_numbers<[1], [0], [0], [1], [0, 0, 1, 1], [], []>} : vector<26x10xf32>, vector<10x384xf32>, vector<26x384xf32> -> vector<26x384xf32>
    %c4_71 = arith.constant 4 : index
    %c0_72 = arith.constant 0 : index
    %c0_73 = arith.constant 0 : index
    %135 = vector.load %arg11[%c4_71, %c0_72, %c0_73] : memref<5x26x10xf32, #tpu.memory_space<vmem>>, vector<1x26x10xf32>
    %136 = vector.shape_cast %135 : vector<1x26x10xf32> to vector<26x10xf32>
    %137 = vector.extract_strided_slice %118 {offsets = [0, 1536], sizes = [10, 384], strides = [1, 1]} : vector<10x1920xf32> to vector<10x384xf32>
    %cst_74 = arith.constant dense<0.000000e+00> : vector<26x384xf32>
    %138 = tpu.matmul %136, %137, %cst_74 {dimension_numbers = #tpu.dot_dimension_numbers<[1], [0], [0], [1], [0, 0, 1, 1], [], []>} : vector<26x10xf32>, vector<10x384xf32>, vector<26x384xf32> -> vector<26x384xf32>
    %139 = arith.addf %122, %126 : vector<26x384xf32>
    %140 = arith.addf %130, %134 : vector<26x384xf32>
    %141 = arith.addf %139, %140 : vector<26x384xf32>
    %142 = arith.addf %141, %138 : vector<26x384xf32>
    %143 = vector.broadcast %116 : vector<1x384xf32> to vector<26x384xf32>
    %144 = arith.addf %142, %143 : vector<26x384xf32>
    %cst_75 = arith.constant 0.000000e+00 : f32
    %145 = vector.broadcast %cst_75 : f32 to vector<26x384xf32>
    %146 = arith.maximumf %144, %145 : vector<26x384xf32>
    %147 = vector.extract_strided_slice %114 {offsets = [1, 0], sizes = [1, 128], strides = [1, 1]} : vector<3x384xf32> to vector<1x128xf32>
    %148 = vector.extract_strided_slice %114 {offsets = [2, 0], sizes = [1, 128], strides = [1, 1]} : vector<3x384xf32> to vector<1x128xf32>
    %cst_76 = arith.constant dense<0.000000e+00> : vector<384xf32>
    %149 = vector.multi_reduction <add>, %146, %cst_76 [0] : vector<26x384xf32> to vector<384xf32>
    %150 = vector.shape_cast %149 : vector<384xf32> to vector<1x384xf32>
    %151 = arith.mulf %146, %146 : vector<26x384xf32>
    %cst_77 = arith.constant dense<0.000000e+00> : vector<384xf32>
    %152 = vector.multi_reduction <add>, %151, %cst_77 [0] : vector<26x384xf32> to vector<384xf32>
    %153 = vector.shape_cast %152 : vector<384xf32> to vector<1x384xf32>
    %154 = tpu.concatenate %150, %153 in 0 : vector<1x384xf32>, vector<1x384xf32> -> vector<2x384xf32>
    %c0_78 = arith.constant 0 : index
    %c0_79 = arith.constant 0 : index
    %155 = vector.load %arg13[%c0_78, %c0_79] : memref<384x128xf32, #tpu.memory_space<vmem>>, vector<384x128xf32>
    %cst_80 = arith.constant dense<0.000000e+00> : vector<2x128xf32>
    %156 = tpu.matmul %154, %155, %cst_80 {dimension_numbers = #tpu.dot_dimension_numbers<[1], [0], [0], [1], [0, 0, 1, 1], [], []>} : vector<2x384xf32>, vector<384x128xf32>, vector<2x128xf32> -> vector<2x128xf32>
    %cst_81 = arith.constant 2.958580e-03 : f32
    %157 = vector.broadcast %cst_81 : f32 to vector<2x128xf32>
    %158 = arith.mulf %156, %157 : vector<2x128xf32>
    %159 = vector.extract_strided_slice %158 {offsets = [0, 0], sizes = [1, 128], strides = [1, 1]} : vector<2x128xf32> to vector<1x128xf32>
    %160 = vector.extract_strided_slice %158 {offsets = [1, 0], sizes = [1, 128], strides = [1, 1]} : vector<2x128xf32> to vector<1x128xf32>
    %161 = arith.mulf %159, %159 : vector<1x128xf32>
    %162 = arith.subf %160, %161 : vector<1x128xf32>
    %cst_82 = arith.constant 9.99999974E-6 : f32
    %163 = vector.broadcast %cst_82 : f32 to vector<1x128xf32>
    %164 = arith.addf %162, %163 : vector<1x128xf32>
    %165 = math.rsqrt %164 : vector<1x128xf32>
    %166 = arith.mulf %147, %165 : vector<1x128xf32>
    %167 = arith.mulf %159, %166 : vector<1x128xf32>
    %168 = arith.subf %148, %167 : vector<1x128xf32>
    %169 = tpu.concatenate %166, %168 in 0 : vector<1x128xf32>, vector<1x128xf32> -> vector<2x128xf32>
    %c0_83 = arith.constant 0 : index
    %c0_84 = arith.constant 0 : index
    %170 = vector.load %arg14[%c0_83, %c0_84] : memref<128x384xf32, #tpu.memory_space<vmem>>, vector<128x384xf32>
    %cst_85 = arith.constant dense<0.000000e+00> : vector<2x384xf32>
    %171 = tpu.matmul %169, %170, %cst_85 {dimension_numbers = #tpu.dot_dimension_numbers<[1], [0], [0], [1], [0, 0, 1, 1], [], []>} : vector<2x128xf32>, vector<128x384xf32>, vector<2x384xf32> -> vector<2x384xf32>
    %172 = vector.extract_strided_slice %171 {offsets = [0, 0], sizes = [1, 384], strides = [1, 1]} : vector<2x384xf32> to vector<1x384xf32>
    %173 = vector.broadcast %172 : vector<1x384xf32> to vector<26x384xf32>
    %174 = arith.mulf %146, %173 : vector<26x384xf32>
    %175 = vector.extract_strided_slice %171 {offsets = [1, 0], sizes = [1, 384], strides = [1, 1]} : vector<2x384xf32> to vector<1x384xf32>
    %176 = vector.broadcast %175 : vector<1x384xf32> to vector<26x384xf32>
    %177 = arith.addf %174, %176 : vector<26x384xf32>
    %c1_i32_86 = arith.constant 1 : i32
    %178 = tpu.memref_slice %arg27[%c1_i32_86] : memref<3x!tpu.dma_semaphore, #tpu.memory_space<semaphore_mem>> -> memref<1x!tpu.dma_semaphore, #tpu.memory_space<semaphore_mem>>
    %179 = tpu.memref_squeeze %178 : memref<1x!tpu.dma_semaphore, #tpu.memory_space<semaphore_mem>> -> memref<!tpu.dma_semaphore, #tpu.memory_space<semaphore_mem>>
    tpu.wait_dma2 semaphore(%179 : memref<!tpu.dma_semaphore, #tpu.memory_space<semaphore_mem>>) src(%arg15 : memref<384x1920xbf16, #tpu.memory_space<any>>) dst(%arg25 : memref<384x1920xbf16, #tpu.memory_space<vmem>>)
    %c0_87 = arith.constant 0 : index
    %c0_88 = arith.constant 0 : index
    %180 = vector.load %arg17[%c0_87, %c0_88] : memref<3x384xf32, #tpu.memory_space<vmem>>, vector<3x384xf32>
    %c0_89 = arith.constant 0 : index
    %c0_90 = arith.constant 0 : index
    %181 = vector.load %arg25[%c0_89, %c0_90] : memref<384x1920xbf16, #tpu.memory_space<vmem>>, vector<384x1920xbf16>
    %182 = vector.extract_strided_slice %180 {offsets = [0, 0], sizes = [1, 384], strides = [1, 1]} : vector<3x384xf32> to vector<1x384xf32>
    %183 = arith.truncf %177 : vector<26x384xf32> to vector<26x384xbf16>
    %cst_91 = arith.constant dense<0.000000e+00> : vector<26x1920xf32>
    %184 = tpu.matmul %183, %181, %cst_91 {dimension_numbers = #tpu.dot_dimension_numbers<[1], [0], [0], [1], [0, 0, 1, 1], [], []>} : vector<26x384xbf16>, vector<384x1920xbf16>, vector<26x1920xf32> -> vector<26x1920xf32>
    %c0_92 = arith.constant 0 : index
    %c0_93 = arith.constant 0 : index
    %c0_94 = arith.constant 0 : index
    %185 = vector.load %arg16[%c0_92, %c0_93, %c0_94] : memref<5x58x26xf32, #tpu.memory_space<vmem>>, vector<1x58x26xf32>
    %186 = vector.shape_cast %185 : vector<1x58x26xf32> to vector<58x26xf32>
    %187 = vector.extract_strided_slice %184 {offsets = [0, 0], sizes = [26, 384], strides = [1, 1]} : vector<26x1920xf32> to vector<26x384xf32>
    %cst_95 = arith.constant dense<0.000000e+00> : vector<58x384xf32>
    %188 = tpu.matmul %186, %187, %cst_95 {dimension_numbers = #tpu.dot_dimension_numbers<[1], [0], [0], [1], [0, 0, 1, 1], [], []>} : vector<58x26xf32>, vector<26x384xf32>, vector<58x384xf32> -> vector<58x384xf32>
    %c1_96 = arith.constant 1 : index
    %c0_97 = arith.constant 0 : index
    %c0_98 = arith.constant 0 : index
    %189 = vector.load %arg16[%c1_96, %c0_97, %c0_98] : memref<5x58x26xf32, #tpu.memory_space<vmem>>, vector<1x58x26xf32>
    %190 = vector.shape_cast %189 : vector<1x58x26xf32> to vector<58x26xf32>
    %191 = vector.extract_strided_slice %184 {offsets = [0, 384], sizes = [26, 384], strides = [1, 1]} : vector<26x1920xf32> to vector<26x384xf32>
    %cst_99 = arith.constant dense<0.000000e+00> : vector<58x384xf32>
    %192 = tpu.matmul %190, %191, %cst_99 {dimension_numbers = #tpu.dot_dimension_numbers<[1], [0], [0], [1], [0, 0, 1, 1], [], []>} : vector<58x26xf32>, vector<26x384xf32>, vector<58x384xf32> -> vector<58x384xf32>
    %c2_100 = arith.constant 2 : index
    %c0_101 = arith.constant 0 : index
    %c0_102 = arith.constant 0 : index
    %193 = vector.load %arg16[%c2_100, %c0_101, %c0_102] : memref<5x58x26xf32, #tpu.memory_space<vmem>>, vector<1x58x26xf32>
    %194 = vector.shape_cast %193 : vector<1x58x26xf32> to vector<58x26xf32>
    %195 = vector.extract_strided_slice %184 {offsets = [0, 768], sizes = [26, 384], strides = [1, 1]} : vector<26x1920xf32> to vector<26x384xf32>
    %cst_103 = arith.constant dense<0.000000e+00> : vector<58x384xf32>
    %196 = tpu.matmul %194, %195, %cst_103 {dimension_numbers = #tpu.dot_dimension_numbers<[1], [0], [0], [1], [0, 0, 1, 1], [], []>} : vector<58x26xf32>, vector<26x384xf32>, vector<58x384xf32> -> vector<58x384xf32>
    %c3_104 = arith.constant 3 : index
    %c0_105 = arith.constant 0 : index
    %c0_106 = arith.constant 0 : index
    %197 = vector.load %arg16[%c3_104, %c0_105, %c0_106] : memref<5x58x26xf32, #tpu.memory_space<vmem>>, vector<1x58x26xf32>
    %198 = vector.shape_cast %197 : vector<1x58x26xf32> to vector<58x26xf32>
    %199 = vector.extract_strided_slice %184 {offsets = [0, 1152], sizes = [26, 384], strides = [1, 1]} : vector<26x1920xf32> to vector<26x384xf32>
    %cst_107 = arith.constant dense<0.000000e+00> : vector<58x384xf32>
    %200 = tpu.matmul %198, %199, %cst_107 {dimension_numbers = #tpu.dot_dimension_numbers<[1], [0], [0], [1], [0, 0, 1, 1], [], []>} : vector<58x26xf32>, vector<26x384xf32>, vector<58x384xf32> -> vector<58x384xf32>
    %c4_108 = arith.constant 4 : index
    %c0_109 = arith.constant 0 : index
    %c0_110 = arith.constant 0 : index
    %201 = vector.load %arg16[%c4_108, %c0_109, %c0_110] : memref<5x58x26xf32, #tpu.memory_space<vmem>>, vector<1x58x26xf32>
    %202 = vector.shape_cast %201 : vector<1x58x26xf32> to vector<58x26xf32>
    %203 = vector.extract_strided_slice %184 {offsets = [0, 1536], sizes = [26, 384], strides = [1, 1]} : vector<26x1920xf32> to vector<26x384xf32>
    %cst_111 = arith.constant dense<0.000000e+00> : vector<58x384xf32>
    %204 = tpu.matmul %202, %203, %cst_111 {dimension_numbers = #tpu.dot_dimension_numbers<[1], [0], [0], [1], [0, 0, 1, 1], [], []>} : vector<58x26xf32>, vector<26x384xf32>, vector<58x384xf32> -> vector<58x384xf32>
    %205 = arith.addf %188, %192 : vector<58x384xf32>
    %206 = arith.addf %196, %200 : vector<58x384xf32>
    %207 = arith.addf %205, %206 : vector<58x384xf32>
    %208 = arith.addf %207, %204 : vector<58x384xf32>
    %209 = vector.broadcast %182 : vector<1x384xf32> to vector<58x384xf32>
    %210 = arith.addf %208, %209 : vector<58x384xf32>
    %cst_112 = arith.constant 0.000000e+00 : f32
    %211 = vector.broadcast %cst_112 : f32 to vector<58x384xf32>
    %212 = arith.maximumf %210, %211 : vector<58x384xf32>
    %213 = vector.extract_strided_slice %180 {offsets = [1, 0], sizes = [1, 128], strides = [1, 1]} : vector<3x384xf32> to vector<1x128xf32>
    %214 = vector.extract_strided_slice %180 {offsets = [2, 0], sizes = [1, 128], strides = [1, 1]} : vector<3x384xf32> to vector<1x128xf32>
    %cst_113 = arith.constant dense<0.000000e+00> : vector<384xf32>
    %215 = vector.multi_reduction <add>, %212, %cst_113 [0] : vector<58x384xf32> to vector<384xf32>
    %216 = vector.shape_cast %215 : vector<384xf32> to vector<1x384xf32>
    %217 = arith.mulf %212, %212 : vector<58x384xf32>
    %cst_114 = arith.constant dense<0.000000e+00> : vector<384xf32>
    %218 = vector.multi_reduction <add>, %217, %cst_114 [0] : vector<58x384xf32> to vector<384xf32>
    %219 = vector.shape_cast %218 : vector<384xf32> to vector<1x384xf32>
    %220 = tpu.concatenate %216, %219 in 0 : vector<1x384xf32>, vector<1x384xf32> -> vector<2x384xf32>
    %c0_115 = arith.constant 0 : index
    %c0_116 = arith.constant 0 : index
    %221 = vector.load %arg18[%c0_115, %c0_116] : memref<384x128xf32, #tpu.memory_space<vmem>>, vector<384x128xf32>
    %cst_117 = arith.constant dense<0.000000e+00> : vector<2x128xf32>
    %222 = tpu.matmul %220, %221, %cst_117 {dimension_numbers = #tpu.dot_dimension_numbers<[1], [0], [0], [1], [0, 0, 1, 1], [], []>} : vector<2x384xf32>, vector<384x128xf32>, vector<2x128xf32> -> vector<2x128xf32>
    %cst_118 = arith.constant 5.94530313E-4 : f32
    %223 = vector.broadcast %cst_118 : f32 to vector<2x128xf32>
    %224 = arith.mulf %222, %223 : vector<2x128xf32>
    %225 = vector.extract_strided_slice %224 {offsets = [0, 0], sizes = [1, 128], strides = [1, 1]} : vector<2x128xf32> to vector<1x128xf32>
    %226 = vector.extract_strided_slice %224 {offsets = [1, 0], sizes = [1, 128], strides = [1, 1]} : vector<2x128xf32> to vector<1x128xf32>
    %227 = arith.mulf %225, %225 : vector<1x128xf32>
    %228 = arith.subf %226, %227 : vector<1x128xf32>
    %cst_119 = arith.constant 9.99999974E-6 : f32
    %229 = vector.broadcast %cst_119 : f32 to vector<1x128xf32>
    %230 = arith.addf %228, %229 : vector<1x128xf32>
    %231 = math.rsqrt %230 : vector<1x128xf32>
    %232 = arith.mulf %213, %231 : vector<1x128xf32>
    %233 = arith.mulf %225, %232 : vector<1x128xf32>
    %234 = arith.subf %214, %233 : vector<1x128xf32>
    %235 = tpu.concatenate %232, %234 in 0 : vector<1x128xf32>, vector<1x128xf32> -> vector<2x128xf32>
    %c0_120 = arith.constant 0 : index
    %c0_121 = arith.constant 0 : index
    %236 = vector.load %arg19[%c0_120, %c0_121] : memref<128x384xf32, #tpu.memory_space<vmem>>, vector<128x384xf32>
    %cst_122 = arith.constant dense<0.000000e+00> : vector<2x384xf32>
    %237 = tpu.matmul %235, %236, %cst_122 {dimension_numbers = #tpu.dot_dimension_numbers<[1], [0], [0], [1], [0, 0, 1, 1], [], []>} : vector<2x128xf32>, vector<128x384xf32>, vector<2x384xf32> -> vector<2x384xf32>
    %238 = vector.extract_strided_slice %237 {offsets = [0, 0], sizes = [1, 384], strides = [1, 1]} : vector<2x384xf32> to vector<1x384xf32>
    %239 = vector.broadcast %238 : vector<1x384xf32> to vector<58x384xf32>
    %240 = arith.mulf %212, %239 : vector<58x384xf32>
    %241 = vector.extract_strided_slice %237 {offsets = [1, 0], sizes = [1, 384], strides = [1, 1]} : vector<2x384xf32> to vector<1x384xf32>
    %242 = vector.broadcast %241 : vector<1x384xf32> to vector<58x384xf32>
    %243 = arith.addf %240, %242 : vector<58x384xf32>
    %c2_i32_123 = arith.constant 2 : i32
    %244 = tpu.memref_slice %arg27[%c2_i32_123] : memref<3x!tpu.dma_semaphore, #tpu.memory_space<semaphore_mem>> -> memref<1x!tpu.dma_semaphore, #tpu.memory_space<semaphore_mem>>
    %245 = tpu.memref_squeeze %244 : memref<1x!tpu.dma_semaphore, #tpu.memory_space<semaphore_mem>> -> memref<!tpu.dma_semaphore, #tpu.memory_space<semaphore_mem>>
    tpu.wait_dma2 semaphore(%245 : memref<!tpu.dma_semaphore, #tpu.memory_space<semaphore_mem>>) src(%arg20 : memref<384x1280xbf16, #tpu.memory_space<any>>) dst(%arg26 : memref<384x1280xbf16, #tpu.memory_space<vmem>>)
    %c0_124 = arith.constant 0 : index
    %c0_125 = arith.constant 0 : index
    %246 = vector.load %arg26[%c0_124, %c0_125] : memref<384x1280xbf16, #tpu.memory_space<vmem>>, vector<384x1280xbf16>
    %c0_126 = arith.constant 0 : index
    %c0_127 = arith.constant 0 : index
    %247 = vector.load %arg22[%c0_126, %c0_127] : memref<1x256xf32, #tpu.memory_space<vmem>>, vector<1x256xf32>
    %248 = arith.truncf %243 : vector<58x384xf32> to vector<58x384xbf16>
    %cst_128 = arith.constant dense<0.000000e+00> : vector<58x1280xf32>
    %249 = tpu.matmul %248, %246, %cst_128 {dimension_numbers = #tpu.dot_dimension_numbers<[1], [0], [0], [1], [0, 0, 1, 1], [], []>} : vector<58x384xbf16>, vector<384x1280xbf16>, vector<58x1280xf32> -> vector<58x1280xf32>
    %c0_129 = arith.constant 0 : index
    %c0_130 = arith.constant 0 : index
    %c0_131 = arith.constant 0 : index
    %250 = vector.load %arg21[%c0_129, %c0_130, %c0_131] : memref<5x122x58xf32, #tpu.memory_space<vmem>>, vector<1x122x58xf32>
    %251 = vector.shape_cast %250 : vector<1x122x58xf32> to vector<122x58xf32>
    %252 = vector.extract_strided_slice %249 {offsets = [0, 0], sizes = [58, 256], strides = [1, 1]} : vector<58x1280xf32> to vector<58x256xf32>
    %cst_132 = arith.constant dense<0.000000e+00> : vector<122x256xf32>
    %253 = tpu.matmul %251, %252, %cst_132 {dimension_numbers = #tpu.dot_dimension_numbers<[1], [0], [0], [1], [0, 0, 1, 1], [], []>} : vector<122x58xf32>, vector<58x256xf32>, vector<122x256xf32> -> vector<122x256xf32>
    %c1_133 = arith.constant 1 : index
    %c0_134 = arith.constant 0 : index
    %c0_135 = arith.constant 0 : index
    %254 = vector.load %arg21[%c1_133, %c0_134, %c0_135] : memref<5x122x58xf32, #tpu.memory_space<vmem>>, vector<1x122x58xf32>
    %255 = vector.shape_cast %254 : vector<1x122x58xf32> to vector<122x58xf32>
    %256 = vector.extract_strided_slice %249 {offsets = [0, 256], sizes = [58, 256], strides = [1, 1]} : vector<58x1280xf32> to vector<58x256xf32>
    %cst_136 = arith.constant dense<0.000000e+00> : vector<122x256xf32>
    %257 = tpu.matmul %255, %256, %cst_136 {dimension_numbers = #tpu.dot_dimension_numbers<[1], [0], [0], [1], [0, 0, 1, 1], [], []>} : vector<122x58xf32>, vector<58x256xf32>, vector<122x256xf32> -> vector<122x256xf32>
    %c2_137 = arith.constant 2 : index
    %c0_138 = arith.constant 0 : index
    %c0_139 = arith.constant 0 : index
    %258 = vector.load %arg21[%c2_137, %c0_138, %c0_139] : memref<5x122x58xf32, #tpu.memory_space<vmem>>, vector<1x122x58xf32>
    %259 = vector.shape_cast %258 : vector<1x122x58xf32> to vector<122x58xf32>
    %260 = vector.extract_strided_slice %249 {offsets = [0, 512], sizes = [58, 256], strides = [1, 1]} : vector<58x1280xf32> to vector<58x256xf32>
    %cst_140 = arith.constant dense<0.000000e+00> : vector<122x256xf32>
    %261 = tpu.matmul %259, %260, %cst_140 {dimension_numbers = #tpu.dot_dimension_numbers<[1], [0], [0], [1], [0, 0, 1, 1], [], []>} : vector<122x58xf32>, vector<58x256xf32>, vector<122x256xf32> -> vector<122x256xf32>
    %c3_141 = arith.constant 3 : index
    %c0_142 = arith.constant 0 : index
    %c0_143 = arith.constant 0 : index
    %262 = vector.load %arg21[%c3_141, %c0_142, %c0_143] : memref<5x122x58xf32, #tpu.memory_space<vmem>>, vector<1x122x58xf32>
    %263 = vector.shape_cast %262 : vector<1x122x58xf32> to vector<122x58xf32>
    %264 = vector.extract_strided_slice %249 {offsets = [0, 768], sizes = [58, 256], strides = [1, 1]} : vector<58x1280xf32> to vector<58x256xf32>
    %cst_144 = arith.constant dense<0.000000e+00> : vector<122x256xf32>
    %265 = tpu.matmul %263, %264, %cst_144 {dimension_numbers = #tpu.dot_dimension_numbers<[1], [0], [0], [1], [0, 0, 1, 1], [], []>} : vector<122x58xf32>, vector<58x256xf32>, vector<122x256xf32> -> vector<122x256xf32>
    %c4_145 = arith.constant 4 : index
    %c0_146 = arith.constant 0 : index
    %c0_147 = arith.constant 0 : index
    %266 = vector.load %arg21[%c4_145, %c0_146, %c0_147] : memref<5x122x58xf32, #tpu.memory_space<vmem>>, vector<1x122x58xf32>
    %267 = vector.shape_cast %266 : vector<1x122x58xf32> to vector<122x58xf32>
    %268 = vector.extract_strided_slice %249 {offsets = [0, 1024], sizes = [58, 256], strides = [1, 1]} : vector<58x1280xf32> to vector<58x256xf32>
    %cst_148 = arith.constant dense<0.000000e+00> : vector<122x256xf32>
    %269 = tpu.matmul %267, %268, %cst_148 {dimension_numbers = #tpu.dot_dimension_numbers<[1], [0], [0], [1], [0, 0, 1, 1], [], []>} : vector<122x58xf32>, vector<58x256xf32>, vector<122x256xf32> -> vector<122x256xf32>
    %270 = arith.addf %253, %257 : vector<122x256xf32>
    %271 = arith.addf %261, %265 : vector<122x256xf32>
    %272 = arith.addf %270, %271 : vector<122x256xf32>
    %273 = arith.addf %272, %269 : vector<122x256xf32>
    %274 = vector.broadcast %247 : vector<1x256xf32> to vector<122x256xf32>
    %275 = arith.addf %273, %274 : vector<122x256xf32>
    %cst_149 = arith.constant 0.000000e+00 : f32
    %276 = vector.broadcast %cst_149 : f32 to vector<122x256xf32>
    %277 = arith.subf %276, %275 : vector<122x256xf32>
    %278 = math.exp %277 : vector<122x256xf32>
    %cst_150 = arith.constant 1.000000e+00 : f32
    %279 = vector.broadcast %cst_150 : f32 to vector<122x256xf32>
    %280 = arith.addf %279, %278 : vector<122x256xf32>
    %281 = tpu.reciprocal %280 {approx = true} : vector<122x256xf32> -> vector<122x256xf32>
    %cst_151 = arith.constant 0.000000e+00 : f32
    %cst_152 = arith.constant 1.000000e+00 : f32
    %282 = vector.broadcast %cst_151 : f32 to vector<122x256xf32>
    %283 = arith.maximumf %282, %281 : vector<122x256xf32>
    %284 = vector.broadcast %cst_152 : f32 to vector<122x256xf32>
    %285 = arith.minimumf %284, %283 : vector<122x256xf32>
    %c0_153 = arith.constant 0 : index
    %c0_154 = arith.constant 0 : index
    %286 = vector.load %arg23[%c0_153, %c0_154] : memref<122x256xf32, #tpu.memory_space<vmem>>, vector<122x256xf32>
    tpu.vector_store %arg23[%c0_153, %c0_154], %285 {strides = array<i32>} : memref<122x256xf32, #tpu.memory_space<vmem>>, vector<122x256xf32>,
    return
  }
}

</mosaic_0001>

<bundles_post_ra>
// kernel: decoder_forward.1
= control target key start
LH: loop header
LB: loop body
LE: loop exit
PB: predicated region body
PF: predicated region fallthrough
CT: control target
= control target key end

     0   :  { %s20238_s0 = inlined_call_operand.hbm [shape: f32[2,8], index: 0, kind: input, shape index: {}]   ;;  %s20239_s1 = inlined_call_operand.hbm [shape: bf16[8,1000], index: 1, kind: input, shape index: {}]   ;;  %s20240_s2 = inlined_call_operand.hbm [shape: f32[3,1000], index: 2, kind: input, shape index: {}]   ;;  %s20241_s3 = inlined_call_operand.vmem [shape: bf16[1000,72], index: 3, kind: input, shape index: {}]   ;;  %s20242_s4 = inlined_call_operand.hbm [shape: f32[1,72], index: 4, kind: input, shape index: {}]   ;;  %s20243_s5 = inlined_call_operand.hbm [shape: bf16[72,1280], index: 5, kind: input, shape index: {}]   ;;  %s20244_s6 = inlined_call_operand.vmem [shape: f32[5,10,2], index: 6, kind: input, shape index: {}]   ;;  %s20245_s7 = inlined_call_operand.hbm [shape: f32[3,256], index: 7, kind: input, shape index: {}]   ;;  %s20246_s8 = inlined_call_operand.hbm [shape: f32[256,128], index: 8, kind: input, shape index: {}]   ;;  %s20247_s9 = inlined_call_operand.hbm [shape: f32[128,256], index: 9, kind: input, shape index: {}]   ;;  %s20248_s10 = inlined_call_operand.vmem [shape: bf16[256,1920], index: 10, kind: input, shape index: {}]   ;;  %s20249_s11 = inlined_call_operand.vmem [shape: f32[5,26,10], index: 11, kind: input, shape index: {}]   ;;  %s20250_s12 = inlined_call_operand.hbm [shape: f32[3,384], index: 12, kind: input, shape index: {}]   ;;  %s20251_s13 = inlined_call_operand.hbm [shape: f32[384,128], index: 13, kind: input, shape index: {}]   ;;  %s20252_s14 = inlined_call_operand.hbm [shape: f32[128,384], index: 14, kind: input, shape index: {}]   ;;  %s20253_s15 = inlined_call_operand.hbm [shape: bf16[384,1920], index: 15, kind: input, shape index: {}]   ;;  %s20254_s16 = inlined_call_operand.vmem [shape: f32[5,58,26], index: 16, kind: input, shape index: {}]   ;;  %s20255_s17 = inlined_call_operand.hbm [shape: f32[3,384], index: 17, kind: input, shape index: {}]   ;;  %s20256_s18 = inlined_call_operand.hbm [shape: f32[384,128], index: 18, kind: input, shape index: {}]   ;;  %s20257_s19 = inlined_call_operand.vmem [shape: f32[128,384], index: 19, kind: input, shape index: {}]   ;;  %s20258_s20 = inlined_call_operand.hbm [shape: bf16[384,1280], index: 20, kind: input, shape index: {}]   ;;  %s20259_s21 = inlined_call_operand.vmem [shape: f32[5,122,58], index: 21, kind: input, shape index: {}]   ;;  %s20260_s22 = inlined_call_operand.hbm [shape: f32[1,256], index: 22, kind: input, shape index: {}]   ;;  %s20261_s23 = inlined_call_operand.vmem [shape: f32[122,256], index: 23, kind: output, shape index: {}]  }
   0x1   :  { %20271 = sst [smem:[#allocation44_spill]] %s20238_s0 }
   0x2   :  { %20272 = sst [smem:[#allocation45_spill]] %s20239_s1 }
   0x3   :  { %20273 = sst [smem:[#allocation46_spill]] %s20240_s2 }
   0x4   :  { %20274 = sst [smem:[#allocation47_spill]] %s20241_s3 }
   0x5   :  { %20275 = sst [smem:[#allocation48_spill]] %s20242_s4 }
   0x6   :  { %20276 = sst [smem:[#allocation49_spill]] %s20243_s5 }
   0x7   :  { %20277 = sst [smem:[#allocation50_spill]] %s20244_s6 }
   0x8   :  { %20278 = sst [smem:[#allocation51_spill]] %s20245_s7 }
   0x9   :  { %20279 = sst [smem:[#allocation52_spill]] %s20261_s23 }
   0xa   :  { %28 = vsyncpa [#allocation7], 0 }
   0xb   :  { %29 = vsyncpa [#allocation9], 0 }
   0xc   :  { %30 = vsyncpa [#allocation12], 0 }
   0xd   :  { %31 = vsyncpa [#allocation15], 0 }
   0xe   :  { %32 = vsyncpa [#allocation18], 0 }
   0xf   :  { %33 = vsyncpa [#allocation21], 0 }
  0x10   :  { %34 = vsyncpa [#allocation24], 0 }
  0x11   :  { %35 = vsyncpa [#allocation27], 0  ;;  %s15735_s4 = smov [#allocation8]   ;;  %s15736_s24 = smov [#allocation11]  }
  0x12   :  { %s52_s30 = sshll.u32 %s15735_s4, 4  ;;  %s74_s25 = sshll.u32 %s15736_s24, 4  ;;  %s53_s30 = int_to_ptr.vmem [resolvable:$true] %s52_s30  ;;  %s75_s25 = int_to_ptr.vmem [resolvable:$true] %s74_s25 }
  0x13   :  { %s20280_s26 = sld [smem:[#allocation45_spill]] }
  0x19   :  { %s15405_s2 = scalar_lea.hbm %s20280_s26, 512 }
  0x1a   :  { %p15406_p0 = scmp.ne.s32.totalorder %s20280_s26, %s15405_s2  ;;  %p15409_p1 = scmp.lt.u32.totalorder %s15405_s2, %s20280_s26 }
  0x1c   :  { %p15411_p2 = pnand %p15409_p1, %p15406_p0 }
  0x1e   :  { %15414 = shalt.err (!%p15411_p2)
}
  0x1f   :  { %s15415_s29 = scalar_lea.vmem %s53_s30, 512  ;;  %p15420_p4 = scmp.lt.s32.totalorder %s53_s30, %s53_s30 }
  0x20   :  { %p15416_p3 = scmp.ne.s32.totalorder %s53_s30, %s15415_s29  ;;  %p15421_p5 = scmp.lt.s32.totalorder %s15415_s29, %s15415_s29 }
  0x22   :  { %p15422_p6 = por %p15421_p5, %p15420_p4 }
  0x24   :  { %p15423_p7 = pnand %p15422_p6, %p15416_p3 }
  0x26   :  { %15426 = shalt.err (!%p15423_p7)
}
  0x27   :  { %55 = dma.hbm_to_vmem [thread:$0]  %s20280_s26, 512, %s53_s30, [#allocation9]  }
  0x28   :  { %s20281_s5 = sld [smem:[#allocation48_spill]] }
  0x2e   :  { %s15427_s1 = scalar_lea.hbm %s20281_s5, 16 }
  0x2f   :  { %p15428_p8 = scmp.ne.s32.totalorder %s20281_s5, %s15427_s1  ;;  %p15431_p9 = scmp.lt.u32.totalorder %s15427_s1, %s20281_s5 }
  0x31   :  { %p15433_p10 = pnand %p15431_p9, %p15428_p8 }
  0x33   :  { %15436 = shalt.err (!%p15433_p10)
}
  0x34   :  { %s15437_s28 = scalar_lea.vmem %s75_s25, 16  ;;  %s15441_s29 = scalar_lea.vmem %s75_s25, 32 }
  0x35   :  { %p15438_p11 = scmp.ne.s32.totalorder %s75_s25, %s15437_s28  ;;  %p15442_p12 = scmp.lt.s32.totalorder %s75_s25, %s75_s25 }
  0x36   :  { %p15443_p13 = scmp.lt.s32.totalorder %s15441_s29, %s15437_s28 }
  0x38   :  { %p15444_p0 = por %p15443_p13, %p15442_p12 }
  0x3a   :  { %p15445_p1 = pnand %p15444_p0, %p15438_p11 }
  0x3c   :  { %15448 = shalt.err (!%p15445_p1)
}
  0x3d   :  { %77 = dma.hbm_to_vmem [thread:$0]  %s20281_s5, 16, %s75_s25, [#allocation12]  }
  0x3e   :  { %s15737_s3 = smov [#allocation14]   ;;  %s15738_s4 = smov [#allocation17]  }
  0x3f   :  { %s98_s0 = sshll.u32 %s15737_s3, 4  ;;  %s119_s24 = sshll.u32 %s15738_s4, 4  ;;  %s99_s0 = int_to_ptr.vmem [resolvable:$true] %s98_s0  ;;  %s15920_s24 = int_to_ptr.vmem [resolvable:$true] %s119_s24 }
  0x40   :  { %s20282_s27 = sld [smem:[#allocation51_spill]] }
  0x46   :  { %s15449_s2 = scalar_lea.hbm %s20282_s27, 128 }
  0x47   :  { %p15450_p2 = scmp.ne.s32.totalorder %s20282_s27, %s15449_s2  ;;  %p15453_p3 = scmp.lt.u32.totalorder %s15449_s2, %s20282_s27 }
  0x49   :  { %p15455_p4 = pnand %p15453_p3, %p15450_p2 }
  0x4b   :  { %15458 = shalt.err (!%p15455_p4)
}
  0x4c   :  { %s15459_s25 = scalar_lea.vmem %s99_s0, 128  ;;  %p15464_p6 = scmp.lt.s32.totalorder %s99_s0, %s99_s0 }
  0x4d   :  { %p15460_p5 = scmp.ne.s32.totalorder %s99_s0, %s15459_s25  ;;  %p15465_p7 = scmp.lt.s32.totalorder %s15459_s25, %s15459_s25 }
  0x4f   :  { %p15466_p8 = por %p15465_p7, %p15464_p6 }
  0x51   :  { %p15467_p9 = pnand %p15466_p8, %p15460_p5 }
  0x53   :  { %15470 = shalt.err (!%p15467_p9)
}
  0x54   :  { %101 = dma.hbm_to_vmem [thread:$0]  %s20282_s27, 128, %s99_s0, [#allocation15]  }
  0x55   :  { %s15471_s4 = scalar_lea.hbm %s20247_s9, 4096 }
  0x56   :  { %p15472_p10 = scmp.ne.s32.totalorder %s20247_s9, %s15471_s4  ;;  %p15475_p11 = scmp.lt.u32.totalorder %s15471_s4, %s20247_s9 }
  0x58   :  { %p15477_p12 = pnand %p15475_p11, %p15472_p10 }
  0x5a   :  { %15480 = shalt.err (!%p15477_p12)
}
  0x5b   :  { %s15481_s7 = scalar_lea.vmem %s15920_s24, 4096  ;;  %p15486_p0 = scmp.lt.s32.totalorder %s15920_s24, %s15920_s24 }
  0x5c   :  { %p15482_p13 = scmp.ne.s32.totalorder %s15920_s24, %s15481_s7  ;;  %p15487_p1 = scmp.lt.s32.totalorder %s15481_s7, %s15481_s7 }
  0x5e   :  { %p15488_p2 = por %p15487_p1, %p15486_p0 }
  0x60   :  { %p15489_p3 = pnand %p15488_p2, %p15482_p13 }
  0x62   :  { %15492 = shalt.err (!%p15489_p3)
}
  0x63   :  { %s15739_s0 = smov 256   ;;  %s15740_s27 = smov 16  }
  0x64   :  { %125 = dma.hbm_to_vmem [thread:$0]  %s20247_s9, 4096, %s15920_s24, [#allocation18], %s15739_s0, %s15739_s0, %s15740_s27  }
  0x65   :  { %s15741_s25 = smov [#allocation20]   ;;  %s15742_s30 = smov [#allocation23]  }
  0x66   :  { %s143_s5 = sshll.u32 %s15741_s25, 4  ;;  %s170_s26 = sshll.u32 %s15742_s30, 4  ;;  %s144_s5 = int_to_ptr.vmem [resolvable:$true] %s143_s5  ;;  %s171_s26 = int_to_ptr.vmem [resolvable:$true] %s170_s26 }
  0x67   :  { %s15493_s1 = scalar_lea.hbm %s20251_s13, 6144 }
  0x68   :  { %p15494_p4 = scmp.ne.s32.totalorder %s20251_s13, %s15493_s1  ;;  %p15497_p5 = scmp.lt.u32.totalorder %s15493_s1, %s20251_s13 }
  0x6a   :  { %p15499_p6 = pnand %p15497_p5, %p15494_p4 }
  0x6c   :  { %15502 = shalt.err (!%p15499_p6)
}
  0x6d   :  { %s15503_s9 = scalar_lea.vmem %s144_s5, 6144  ;;  %p15508_p8 = scmp.lt.s32.totalorder %s144_s5, %s144_s5 }
  0x6e   :  { %p15504_p7 = scmp.ne.s32.totalorder %s144_s5, %s15503_s9  ;;  %p15509_p9 = scmp.lt.s32.totalorder %s15503_s9, %s15503_s9 }
  0x70   :  { %p15510_p10 = por %p15509_p9, %p15508_p8 }
  0x72   :  { %p15511_p11 = pnand %p15510_p10, %p15504_p7 }
  0x74   :  { %15514 = shalt.err (!%p15511_p11)
}
  0x75   :  { %s15743_s24 = smov 128   ;;  %s15744_s0 = smov 8  }
  0x76   :  { %149 = dma.hbm_to_vmem [thread:$0]  %s20251_s13, 6144, %s144_s5, [#allocation21], %s15743_s24, %s15743_s24, %s15744_s0  }
  0x77   :  { %s15515_s30 = scalar_lea.hbm %s20255_s17, 192 }
  0x78   :  { %p15516_p12 = scmp.ne.s32.totalorder %s20255_s17, %s15515_s30  ;;  %p15519_p13 = scmp.lt.u32.totalorder %s15515_s30, %s20255_s17 }
  0x7a   :  { %p15521_p0 = pnand %p15519_p13, %p15516_p12 }
  0x7c   :  { %15524 = shalt.err (!%p15521_p0)
}
  0x7d   :  { %s15525_s6 = scalar_lea.vmem %s171_s26, 192  ;;  %p15530_p2 = scmp.lt.s32.totalorder %s171_s26, %s171_s26 }
  0x7e   :  { %p15526_p1 = scmp.ne.s32.totalorder %s171_s26, %s15525_s6  ;;  %p15531_p3 = scmp.lt.s32.totalorder %s15525_s6, %s15525_s6 }
  0x80   :  { %p15532_p4 = por %p15531_p3, %p15530_p2 }
  0x82   :  { %p15533_p5 = pnand %p15532_p4, %p15526_p1 }
  0x84   :  { %15536 = shalt.err (!%p15533_p5)
}
  0x85   :  { %173 = dma.hbm_to_vmem [thread:$0]  %s20255_s17, 192, %s171_s26, [#allocation24]  }
  0x86   :  { %s15745_s2 = smov [#allocation6]   ;;  %s15746_s9 = smov [#allocation10]  }
  0x87   :  { %s42_s7 = sshll.u32 %s15745_s2, 4  ;;  %s62_s27 = sshll.u32 %s15746_s9, 4  ;;  %s43_s7 = int_to_ptr.vmem [resolvable:$true] %s42_s7  ;;  %s63_s27 = int_to_ptr.vmem [resolvable:$true] %s62_s27 }
  0x88   :  { %s20283_s25 = sld [smem:[#allocation44_spill]] }
  0x8e   :  { %s15537_s30 = scalar_lea.hbm %s20283_s25, 32 }
  0x8f   :  { %p15538_p6 = scmp.ne.s32.totalorder %s20283_s25, %s15537_s30  ;;  %p15541_p7 = scmp.lt.u32.totalorder %s15537_s30, %s20283_s25 }
  0x91   :  { %p15543_p8 = pnand %p15541_p7, %p15538_p6 }
  0x93   :  { %15546 = shalt.err (!%p15543_p8)
}
  0x94   :  { %s15547_s17 = scalar_lea.vmem %s43_s7, 32  ;;  %p15552_p10 = scmp.lt.s32.totalorder %s43_s7, %s43_s7 }
  0x95   :  { %p15548_p9 = scmp.ne.s32.totalorder %s43_s7, %s15547_s17  ;;  %p15553_p11 = scmp.lt.s32.totalorder %s15547_s17, %s15547_s17 }
  0x97   :  { %p15554_p12 = por %p15553_p11, %p15552_p10 }
  0x99   :  { %p15555_p13 = pnand %p15554_p12, %p15548_p9 }
  0x9b   :  { %15558 = shalt.err (!%p15555_p13)
}
  0x9c   :  { %45 = dma.hbm_to_vmem [thread:$0]  %s20283_s25, 32, %s43_s7, [#allocation7]  }
  0x9d   :  { %s20284_s2 = sld [smem:[#allocation46_spill]] }
  0xa3   :  { %s15559_s9 = scalar_lea.hbm %s20284_s2, 512 }
  0xa4   :  { %p15560_p0 = scmp.ne.s32.totalorder %s20284_s2, %s15559_s9  ;;  %p15563_p1 = scmp.lt.u32.totalorder %s15559_s9, %s20284_s2 }
  0xa6   :  { %p15565_p2 = pnand %p15563_p1, %p15560_p0 }
  0xa8   :  { %15568 = shalt.err (!%p15565_p2)
}
  0xa9   :  { %s15569_s4 = scalar_lea.vmem %s63_s27, 512  ;;  %p15574_p4 = scmp.lt.s32.totalorder %s63_s27, %s63_s27 }
  0xaa   :  { %p15570_p3 = scmp.ne.s32.totalorder %s63_s27, %s15569_s4  ;;  %p15575_p5 = scmp.lt.s32.totalorder %s15569_s4, %s15569_s4 }
  0xac   :  { %p15576_p6 = por %p15575_p5, %p15574_p4 }
  0xae   :  { %p15577_p7 = pnand %p15576_p6, %p15570_p3 }
  0xb0   :  { %15580 = shalt.err (!%p15577_p7)
}
  0xb1   :  { %65 = dma.hbm_to_vmem [thread:$0]  %s20284_s2, 512, %s63_s27, [#allocation9]  }
  0xb2   :  { %s15747_s1 = smov [#allocation13]   ;;  %s20285_s6 = sld [smem:[#allocation49_spill]] }
  0xb3   :  { %s83_s23 = sshll.u32 %s15747_s1, 4  ;;  %s84_s23 = int_to_ptr.vmem [resolvable:$true] %s83_s23 }
  0xb8   :  { %s15581_s13 = scalar_lea.hbm %s20285_s6, 5760 }
  0xb9   :  { %p15582_p8 = scmp.ne.s32.totalorder %s20285_s6, %s15581_s13  ;;  %p15585_p9 = scmp.lt.u32.totalorder %s15581_s13, %s20285_s6 }
  0xbb   :  { %p15587_p10 = pnand %p15585_p9, %p15582_p8 }
  0xbd   :  { %15590 = shalt.err (!%p15587_p10)
}
  0xbe   :  { %s15591_s30 = scalar_lea.vmem %s84_s23, 5760  ;;  %p15596_p12 = scmp.lt.s32.totalorder %s84_s23, %s84_s23 }
  0xbf   :  { %p15592_p11 = scmp.ne.s32.totalorder %s84_s23, %s15591_s30  ;;  %p15597_p13 = scmp.lt.s32.totalorder %s15591_s30, %s15591_s30 }
  0xc1   :  { %p15598_p0 = por %p15597_p13, %p15596_p12 }
  0xc3   :  { %p15599_p1 = pnand %p15598_p0, %p15592_p11 }
  0xc5   :  { %15602 = shalt.err (!%p15599_p1)
}
  0xc6   :  { %s15748_s27 = smov 640   ;;  %s15749_s2 = smov 40  }
  0xc7   :  { %89 = dma.hbm_to_vmem [thread:$0]  %s20285_s6, 5760, %s84_s23, [#allocation12], %s15748_s27, %s15748_s27, %s15749_s2  }
  0xc8   :  { %s15750_s7 = smov [#allocation16]   ;;  %s15751_s1 = smov [#allocation19]  }
  0xc9   :  { %s107_s25 = sshll.u32 %s15750_s7, 4  ;;  %s134_s17 = sshll.u32 %s15751_s1, 4  ;;  %s108_s25 = int_to_ptr.vmem [resolvable:$true] %s107_s25  ;;  %s135_s17 = int_to_ptr.vmem [resolvable:$true] %s134_s17 }
  0xca   :  { %s15603_s5 = scalar_lea.hbm %s20246_s8, 4096 }
  0xcb   :  { %p15604_p2 = scmp.ne.s32.totalorder %s20246_s8, %s15603_s5  ;;  %p15607_p3 = scmp.lt.u32.totalorder %s15603_s5, %s20246_s8 }
  0xcd   :  { %p15609_p4 = pnand %p15607_p3, %p15604_p2 }
  0xcf   :  { %15612 = shalt.err (!%p15609_p4)
}
  0xd0   :  { %s15613_s23 = scalar_lea.vmem %s108_s25, 4096  ;;  %p15618_p6 = scmp.lt.s32.totalorder %s108_s25, %s108_s25 }
  0xd1   :  { %p15614_p5 = scmp.ne.s32.totalorder %s108_s25, %s15613_s23  ;;  %p15619_p7 = scmp.lt.s32.totalorder %s15613_s23, %s15613_s23 }
  0xd3   :  { %p15620_p8 = por %p15619_p7, %p15618_p6 }
  0xd5   :  { %p15621_p9 = pnand %p15620_p8, %p15614_p5 }
  0xd7   :  { %15624 = shalt.err (!%p15621_p9)
}
  0xd8   :  { %113 = dma.hbm_to_vmem [thread:$0]  %s20246_s8, 4096, %s108_s25, [#allocation15], %s15743_s24, %s15743_s24, %s15744_s0  }
  0xd9   :  { %s15625_s7 = scalar_lea.hbm %s20250_s12, 192 }
  0xda   :  { %p15626_p10 = scmp.ne.s32.totalorder %s20250_s12, %s15625_s7  ;;  %p15629_p11 = scmp.lt.u32.totalorder %s15625_s7, %s20250_s12 }
  0xdc   :  { %p15631_p12 = pnand %p15629_p11, %p15626_p10 }
  0xde   :  { %15634 = shalt.err (!%p15631_p12)
}
  0xdf   :  { %s15635_s9 = scalar_lea.vmem %s135_s17, 192  ;;  %p15640_p0 = scmp.lt.s32.totalorder %s135_s17, %s135_s17 }
  0xe0   :  { %p15636_p13 = scmp.ne.s32.totalorder %s135_s17, %s15635_s9  ;;  %p15641_p1 = scmp.lt.s32.totalorder %s15635_s9, %s15635_s9 }
  0xe2   :  { %p15642_p2 = por %p15641_p1, %p15640_p0 }
  0xe4   :  { %p15643_p3 = pnand %p15642_p2, %p15636_p13 }
  0xe6   :  { %15646 = shalt.err (!%p15643_p3)
}
  0xe7   :  { %137 = dma.hbm_to_vmem [thread:$0]  %s20250_s12, 192, %s135_s17, [#allocation18]  }
  0xe8   :  { %s15752_s28 = smov [#allocation22]   ;;  %s15647_s6 = scalar_lea.hbm %s20252_s14, 6144 }
  0xe9   :  { %s155_s29 = sshll.u32 %s15752_s28, 4  ;;  %p15648_p4 = scmp.ne.s32.totalorder %s20252_s14, %s15647_s6  ;;  %s156_s29 = int_to_ptr.vmem [resolvable:$true] %s155_s29 }
  0xea   :  { %p15651_p5 = scmp.lt.u32.totalorder %s15647_s6, %s20252_s14 }
  0xec   :  { %p15653_p6 = pnand %p15651_p5, %p15648_p4 }
  0xee   :  { %15656 = shalt.err (!%p15653_p6)
}
  0xef   :  { %s15657_s1 = scalar_lea.vmem %s156_s29, 6144  ;;  %p15662_p8 = scmp.lt.s32.totalorder %s156_s29, %s156_s29 }
  0xf0   :  { %p15658_p7 = scmp.ne.s32.totalorder %s156_s29, %s15657_s1  ;;  %p15663_p9 = scmp.lt.s32.totalorder %s15657_s1, %s15657_s1 }
  0xf2   :  { %p15664_p10 = por %p15663_p9, %p15662_p8 }
  0xf4   :  { %p15665_p11 = pnand %p15664_p10, %p15658_p7 }
  0xf6   :  { %15668 = shalt.err (!%p15665_p11)
}
  0xf7   :  { %s15753_s12 = smov 384   ;;  %s15754_s17 = smov 24  }
  0xf8   :  { %161 = dma.hbm_to_vmem [thread:$0]  %s20252_s14, 6144, %s156_s29, [#allocation21], %s15753_s12, %s15753_s12, %s15754_s17  }
  0xf9   :  { %s15755_s5 = smov [#allocation25]   ;;  %s15756_s8 = smov [#allocation26]  }
  0xfa   :  { %s179_s9 = sshll.u32 %s15755_s5, 4  ;;  %s196_s25 = sshll.u32 %s15756_s8, 4  ;;  %s180_s9 = int_to_ptr.vmem [resolvable:$true] %s179_s9  ;;  %s197_s25 = int_to_ptr.vmem [resolvable:$true] %s196_s25 }
  0xfb   :  { %s15669_s23 = scalar_lea.hbm %s20256_s18, 6144 }
  0xfc   :  { %p15670_p12 = scmp.ne.s32.totalorder %s20256_s18, %s15669_s23  ;;  %p15673_p13 = scmp.lt.u32.totalorder %s15669_s23, %s20256_s18 }
  0xfe   :  { %p15675_p0 = pnand %p15673_p13, %p15670_p12 }
 0x100   :  { %15678 = shalt.err (!%p15675_p0)
}
 0x101   :  { %s15679_s14 = scalar_lea.vmem %s180_s9, 6144  ;;  %p15684_p2 = scmp.lt.s32.totalorder %s180_s9, %s180_s9 }
 0x102   :  { %p15680_p1 = scmp.ne.s32.totalorder %s180_s9, %s15679_s14  ;;  %p15685_p3 = scmp.lt.s32.totalorder %s15679_s14, %s15679_s14 }
 0x104   :  { %p15686_p4 = por %p15685_p3, %p15684_p2 }
 0x106   :  { %p15687_p5 = pnand %p15686_p4, %p15680_p1 }
 0x108   :  { %15690 = shalt.err (!%p15687_p5)
}
 0x109   :  { %185 = dma.hbm_to_vmem [thread:$0]  %s20256_s18, 6144, %s180_s9, [#allocation24], %s15743_s24, %s15743_s24, %s15744_s0  }
 0x10a   :  { %s15691_s17 = scalar_lea.hbm %s20260_s22, 32 }
 0x10b   :  { %p15692_p6 = scmp.ne.s32.totalorder %s20260_s22, %s15691_s17  ;;  %p15695_p7 = scmp.lt.u32.totalorder %s15691_s17, %s20260_s22 }
 0x10d   :  { %p15697_p8 = pnand %p15695_p7, %p15692_p6 }
 0x10f   :  { %15700 = shalt.err (!%p15697_p8)
}
 0x110   :  { %s15701_s28 = scalar_lea.vmem %s197_s25, 32  ;;  %p15706_p10 = scmp.lt.s32.totalorder %s197_s25, %s197_s25 }
 0x111   :  { %p15702_p9 = scmp.ne.s32.totalorder %s197_s25, %s15701_s28  ;;  %p15707_p11 = scmp.lt.s32.totalorder %s15701_s28, %s15701_s28 }
 0x113   :  { %p15708_p12 = por %p15707_p11, %p15706_p10 }
 0x115   :  { %p15709_p13 = pnand %p15708_p12, %p15702_p9 }
 0x117   :  { %15712 = shalt.err (!%p15709_p13)
}
 0x118   :  { %199 = dma.hbm_to_vmem [thread:$0]  %s20260_s22, 32, %s197_s25, [#allocation27]  }
 0x119   :  { %15713 = dma.done.wait [#allocation7], 32  }
 0x11a   :  { %15714 = vsyncadd [#allocation7], 4294967264 }
 0x11b   :  { %15715 = dma.done.wait [#allocation9], 1024  }
 0x11c   :  { %15716 = vsyncadd [#allocation9], 4294966272 }
 0x11d   :  { %15717 = dma.done.wait [#allocation12], 5776  }
 0x11e   :  { %15718 = vsyncadd [#allocation12], 4294961520 }
 0x11f   :  { %15719 = dma.done.wait [#allocation15], 4224  }
 0x120   :  { %15720 = vsyncadd [#allocation15], 4294963072 }
 0x121   :  { %15721 = dma.done.wait [#allocation18], 4288  }
 0x122   :  { %15722 = vsyncadd [#allocation18], 4294963008 }
 0x123   :  { %15723 = dma.done.wait [#allocation21], 12288  }
 0x124   :  { %15724 = vsyncadd [#allocation21], 4294955008 }
 0x125   :  { %15725 = dma.done.wait [#allocation24], 6336  }
 0x126   :  { %15726 = vsyncadd [#allocation24], 4294960960 }
 0x127   :  { %15727 = dma.done.wait [#allocation27], 32  }
 0x128   :  { %15728 = vsyncadd [#allocation27], 4294967264  ;;  %v260_v0 = vld [vmem:[%s20248_s10] sm:$0xf]  ;;  %v262_v1 = vld [vmem:[%s20248_s10 + $0x3c] sm:$0xf] }
 0x129   :  { %v264_v2 = vld [vmem:[%s20248_s10 + $0x4] sm:$0xf]  ;;  %261 = vst [vmem:[#allocation2] sm:$0xf] %v260_v0  ;;  %263 = vst [vmem:[#allocation2 + $0x4] sm:$0xf] %v262_v1 }
 0x12a   :  { %265 = vst [vmem:[#allocation2 + $0x8] sm:$0xf] %v264_v2  ;;  %v266_v3 = vld [vmem:[%s20248_s10 + $0x40] sm:$0xf]  ;;  %v268_v4 = vld [vmem:[%s20248_s10 + $0x8] sm:$0xf] }
 0x12b   :  { %v270_v5 = vld [vmem:[%s20248_s10 + $0x44] sm:$0xf]  ;;  %267 = vst [vmem:[#allocation2 + $0xc] sm:$0xf] %v266_v3  ;;  %269 = vst [vmem:[#allocation2 + $0x10] sm:$0xf] %v268_v4 }
 0x12c   :  { %271 = vst [vmem:[#allocation2 + $0x14] sm:$0xf] %v270_v5  ;;  %v272_v6 = vld [vmem:[%s20248_s10 + $0xc] sm:$0xf]  ;;  %v274_v7 = vld [vmem:[%s20248_s10 + $0x48] sm:$0xf] }
 0x12d   :  { %v276_v8 = vld [vmem:[%s20248_s10 + $0x10] sm:$0xf]  ;;  %273 = vst [vmem:[#allocation2 + $0x18] sm:$0xf] %v272_v6  ;;  %275 = vst [vmem:[#allocation2 + $0x1c] sm:$0xf] %v274_v7 }
 0x12e   :  { %277 = vst [vmem:[#allocation2 + $0x20] sm:$0xf] %v276_v8  ;;  %v278_v9 = vld [vmem:[%s20248_s10 + $0x4c] sm:$0xf]  ;;  %v280_v10 = vld [vmem:[%s20248_s10 + $0x14] sm:$0xf] }
 0x12f   :  { %v282_v11 = vld [vmem:[%s20248_s10 + $0x50] sm:$0xf]  ;;  %279 = vst [vmem:[#allocation2 + $0x24] sm:$0xf] %v278_v9  ;;  %281 = vst [vmem:[#allocation2 + $0x28] sm:$0xf] %v280_v10 }
 0x130   :  { %283 = vst [vmem:[#allocation2 + $0x2c] sm:$0xf] %v282_v11  ;;  %v284_v12 = vld [vmem:[%s20248_s10 + $0x18] sm:$0xf]  ;;  %v286_v13 = vld [vmem:[%s20248_s10 + $0x54] sm:$0xf] }
 0x131   :  { %v288_v14 = vld [vmem:[%s20248_s10 + $0x1c] sm:$0xf]  ;;  %285 = vst [vmem:[#allocation2 + $0x30] sm:$0xf] %v284_v12  ;;  %287 = vst [vmem:[#allocation2 + $0x34] sm:$0xf] %v286_v13 }
 0x132   :  { %289 = vst [vmem:[#allocation2 + $0x38] sm:$0xf] %v288_v14  ;;  %v290_v15 = vld [vmem:[%s20248_s10 + $0x58] sm:$0xf]  ;;  %v292_v16 = vld [vmem:[%s20248_s10 + $0x20] sm:$0xf] }
 0x133   :  { %v294_v17 = vld [vmem:[%s20248_s10 + $0x5c] sm:$0xf]  ;;  %291 = vst [vmem:[#allocation2 + $0x3c] sm:$0xf] %v290_v15  ;;  %293 = vst [vmem:[#allocation2 + $0x40] sm:$0xf] %v292_v16 }
 0x134   :  { %295 = vst [vmem:[#allocation2 + $0x44] sm:$0xf] %v294_v17  ;;  %v296_v18 = vld [vmem:[%s20248_s10 + $0x24] sm:$0xf]  ;;  %v298_v19 = vld [vmem:[%s20248_s10 + $0x60] sm:$0xf] }
 0x135   :  { %v300_v20 = vld [vmem:[%s20248_s10 + $0x28] sm:$0xf]  ;;  %297 = vst [vmem:[#allocation2 + $0x48] sm:$0xf] %v296_v18  ;;  %299 = vst [vmem:[#allocation2 + $0x4c] sm:$0xf] %v298_v19 }
 0x136   :  { %301 = vst [vmem:[#allocation2 + $0x50] sm:$0xf] %v300_v20  ;;  %v302_v21 = vld [vmem:[%s20248_s10 + $0x64] sm:$0xf]  ;;  %v304_v22 = vld [vmem:[%s20248_s10 + $0x2c] sm:$0xf] }
 0x137   :  { %v306_v23 = vld [vmem:[%s20248_s10 + $0x68] sm:$0xf]  ;;  %303 = vst [vmem:[#allocation2 + $0x54] sm:$0xf] %v302_v21  ;;  %305 = vst [vmem:[#allocation2 + $0x58] sm:$0xf] %v304_v22 }
 0x138   :  { %307 = vst [vmem:[#allocation2 + $0x5c] sm:$0xf] %v306_v23  ;;  %v308_v24 = vld [vmem:[%s20248_s10 + $0x30] sm:$0xf]  ;;  %v310_v25 = vld [vmem:[%s20248_s10 + $0x6c] sm:$0xf] }
 0x139   :  { %v312_v26 = vld [vmem:[%s20248_s10 + $0x34] sm:$0xf]  ;;  %309 = vst [vmem:[#allocation2 + $0x60] sm:$0xf] %v308_v24  ;;  %311 = vst [vmem:[#allocation2 + $0x64] sm:$0xf] %v310_v25 }
 0x13a   :  { %313 = vst [vmem:[#allocation2 + $0x68] sm:$0xf] %v312_v26  ;;  %v314_v27 = vld [vmem:[%s20248_s10 + $0x70] sm:$0xf]  ;;  %v316_v28 = vld [vmem:[%s20248_s10 + $0x38] sm:$0xf] }
 0x13b   :  { %v318_v29 = vld [vmem:[%s20248_s10 + $0x74] sm:$0xff]   ;;  %315 = vst [vmem:[#allocation2 + $0x6c] sm:$0xf] %v314_v27  ;;  %317 = vst [vmem:[#allocation2 + $0x70] sm:$0xf] %v316_v28  ;;  %v378_v58 = vld [vmem:[%s20248_s10 + $0xec] sm:$0xff]  }
 0x13c   :  { %319 = vst [vmem:[#allocation2 + $0x74] sm:$0xff] %v318_v29   ;;  %v322_v30 = vld [vmem:[%s20248_s10 + $0xb4] sm:$0xf]  ;;  %v324_v31 = vld [vmem:[%s20248_s10 + $0x7c] sm:$0xf]  ;;  %379 = vst [vmem:[#allocation2 + $0xec] sm:$0xff] %v378_v58  }
 0x13d   :  { %v326_v32 = vld [vmem:[%s20248_s10 + $0xb8] sm:$0xf]  ;;  %323 = vst [vmem:[#allocation2 + $0x7c] sm:$0xf] %v322_v30  ;;  %325 = vst [vmem:[#allocation2 + $0x80] sm:$0xf] %v324_v31 }
 0x13e   :  { %327 = vst [vmem:[#allocation2 + $0x84] sm:$0xf] %v326_v32  ;;  %v328_v33 = vld [vmem:[%s20248_s10 + $0x80] sm:$0xf]  ;;  %v330_v34 = vld [vmem:[%s20248_s10 + $0xbc] sm:$0xf] }
 0x13f   :  { %v332_v35 = vld [vmem:[%s20248_s10 + $0x84] sm:$0xf]  ;;  %329 = vst [vmem:[#allocation2 + $0x88] sm:$0xf] %v328_v33  ;;  %331 = vst [vmem:[#allocation2 + $0x8c] sm:$0xf] %v330_v34 }
 0x140   :  { %333 = vst [vmem:[#allocation2 + $0x90] sm:$0xf] %v332_v35  ;;  %v334_v36 = vld [vmem:[%s20248_s10 + $0xc0] sm:$0xf]  ;;  %v336_v37 = vld [vmem:[%s20248_s10 + $0x88] sm:$0xf] }
 0x141   :  { %v338_v38 = vld [vmem:[%s20248_s10 + $0xc4] sm:$0xf]  ;;  %335 = vst [vmem:[#allocation2 + $0x94] sm:$0xf] %v334_v36  ;;  %337 = vst [vmem:[#allocation2 + $0x98] sm:$0xf] %v336_v37 }
 0x142   :  { %339 = vst [vmem:[#allocation2 + $0x9c] sm:$0xf] %v338_v38  ;;  %v340_v39 = vld [vmem:[%s20248_s10 + $0x8c] sm:$0xf]  ;;  %v342_v40 = vld [vmem:[%s20248_s10 + $0xc8] sm:$0xf] }
 0x143   :  { %v344_v41 = vld [vmem:[%s20248_s10 + $0x90] sm:$0xf]  ;;  %341 = vst [vmem:[#allocation2 + $0xa0] sm:$0xf] %v340_v39  ;;  %343 = vst [vmem:[#allocation2 + $0xa4] sm:$0xf] %v342_v40 }
 0x144   :  { %345 = vst [vmem:[#allocation2 + $0xa8] sm:$0xf] %v344_v41  ;;  %v346_v42 = vld [vmem:[%s20248_s10 + $0xcc] sm:$0xf]  ;;  %v348_v43 = vld [vmem:[%s20248_s10 + $0x94] sm:$0xf] }
 0x145   :  { %v350_v44 = vld [vmem:[%s20248_s10 + $0xd0] sm:$0xf]  ;;  %347 = vst [vmem:[#allocation2 + $0xac] sm:$0xf] %v346_v42  ;;  %349 = vst [vmem:[#allocation2 + $0xb0] sm:$0xf] %v348_v43 }
 0x146   :  { %351 = vst [vmem:[#allocation2 + $0xb4] sm:$0xf] %v350_v44  ;;  %v352_v45 = vld [vmem:[%s20248_s10 + $0x98] sm:$0xf]  ;;  %v354_v46 = vld [vmem:[%s20248_s10 + $0xd4] sm:$0xf] }
 0x147   :  { %v356_v47 = vld [vmem:[%s20248_s10 + $0x9c] sm:$0xf]  ;;  %353 = vst [vmem:[#allocation2 + $0xb8] sm:$0xf] %v352_v45  ;;  %355 = vst [vmem:[#allocation2 + $0xbc] sm:$0xf] %v354_v46 }
 0x148   :  { %357 = vst [vmem:[#allocation2 + $0xc0] sm:$0xf] %v356_v47  ;;  %v358_v48 = vld [vmem:[%s20248_s10 + $0xd8] sm:$0xf]  ;;  %v360_v49 = vld [vmem:[%s20248_s10 + $0xa0] sm:$0xf] }
 0x149   :  { %v362_v50 = vld [vmem:[%s20248_s10 + $0xdc] sm:$0xf]  ;;  %359 = vst [vmem:[#allocation2 + $0xc4] sm:$0xf] %v358_v48  ;;  %361 = vst [vmem:[#allocation2 + $0xc8] sm:$0xf] %v360_v49 }
 0x14a   :  { %363 = vst [vmem:[#allocation2 + $0xcc] sm:$0xf] %v362_v50  ;;  %v364_v51 = vld [vmem:[%s20248_s10 + $0xa4] sm:$0xf]  ;;  %v366_v52 = vld [vmem:[%s20248_s10 + $0xe0] sm:$0xf] }
 0x14b   :  { %v368_v53 = vld [vmem:[%s20248_s10 + $0xa8] sm:$0xf]  ;;  %365 = vst [vmem:[#allocation2 + $0xd0] sm:$0xf] %v364_v51  ;;  %367 = vst [vmem:[#allocation2 + $0xd4] sm:$0xf] %v366_v52 }
 0x14c   :  { %369 = vst [vmem:[#allocation2 + $0xd8] sm:$0xf] %v368_v53  ;;  %v370_v54 = vld [vmem:[%s20248_s10 + $0xe4] sm:$0xf]  ;;  %v372_v55 = vld [vmem:[%s20248_s10 + $0xac] sm:$0xf] }
 0x14d   :  { %v374_v56 = vld [vmem:[%s20248_s10 + $0xe8] sm:$0xf]  ;;  %371 = vst [vmem:[#allocation2 + $0xdc] sm:$0xf] %v370_v54  ;;  %373 = vst [vmem:[#allocation2 + $0xe0] sm:$0xf] %v372_v55 }
 0x14e   :  { %375 = vst [vmem:[#allocation2 + $0xe4] sm:$0xf] %v374_v56  ;;  %v376_v57 = vld [vmem:[%s20248_s10 + $0xb0] sm:$0xf]  ;;  %v382_v59 = vld [vmem:[%s20248_s10 + $0x12c] sm:$0xf] }
 0x14f   :  { %377 = vst [vmem:[#allocation2 + $0xe8] sm:$0xf] %v376_v57  ;;  %383 = vst [vmem:[#allocation2 + $0xf4] sm:$0xf] %v382_v59  ;;  %v384_v60 = vld [vmem:[%s20248_s10 + $0xf4] sm:$0xf] }
 0x150   :  { %v386_v61 = vld [vmem:[%s20248_s10 + $0x130] sm:$0xf]  ;;  %v388_v62 = vld [vmem:[%s20248_s10 + $0xf8] sm:$0xf]  ;;  %385 = vst [vmem:[#allocation2 + $0xf8] sm:$0xf] %v384_v60 }
 0x151   :  { %387 = vst [vmem:[#allocation2 + $0xfc] sm:$0xf] %v386_v61  ;;  %389 = vst [vmem:[#allocation2 + $0x100] sm:$0xf] %v388_v62  ;;  %v390_v63 = vld [vmem:[%s20248_s10 + $0x134] sm:$0xf] }
 0x152   :  { %v392_v0 = vld [vmem:[%s20248_s10 + $0xfc] sm:$0xf]  ;;  %v394_v1 = vld [vmem:[%s20248_s10 + $0x138] sm:$0xf]  ;;  %391 = vst [vmem:[#allocation2 + $0x104] sm:$0xf] %v390_v63 }
 0x153   :  { %393 = vst [vmem:[#allocation2 + $0x108] sm:$0xf] %v392_v0  ;;  %395 = vst [vmem:[#allocation2 + $0x10c] sm:$0xf] %v394_v1  ;;  %v396_v2 = vld [vmem:[%s20248_s10 + $0x100] sm:$0xf] }
 0x154   :  { %v398_v3 = vld [vmem:[%s20248_s10 + $0x13c] sm:$0xf]  ;;  %v400_v4 = vld [vmem:[%s20248_s10 + $0x104] sm:$0xf]  ;;  %397 = vst [vmem:[#allocation2 + $0x110] sm:$0xf] %v396_v2 }
 0x155   :  { %399 = vst [vmem:[#allocation2 + $0x114] sm:$0xf] %v398_v3  ;;  %401 = vst [vmem:[#allocation2 + $0x118] sm:$0xf] %v400_v4  ;;  %v402_v5 = vld [vmem:[%s20248_s10 + $0x140] sm:$0xf] }
 0x156   :  { %v404_v6 = vld [vmem:[%s20248_s10 + $0x108] sm:$0xf]  ;;  %v406_v7 = vld [vmem:[%s20248_s10 + $0x144] sm:$0xf]  ;;  %403 = vst [vmem:[#allocation2 + $0x11c] sm:$0xf] %v402_v5 }
 0x157   :  { %405 = vst [vmem:[#allocation2 + $0x120] sm:$0xf] %v404_v6  ;;  %407 = vst [vmem:[#allocation2 + $0x124] sm:$0xf] %v406_v7  ;;  %v408_v8 = vld [vmem:[%s20248_s10 + $0x10c] sm:$0xf] }
 0x158   :  { %v410_v9 = vld [vmem:[%s20248_s10 + $0x148] sm:$0xf]  ;;  %v412_v10 = vld [vmem:[%s20248_s10 + $0x110] sm:$0xf]  ;;  %409 = vst [vmem:[#allocation2 + $0x128] sm:$0xf] %v408_v8 }
 0x159   :  { %411 = vst [vmem:[#allocation2 + $0x12c] sm:$0xf] %v410_v9  ;;  %413 = vst [vmem:[#allocation2 + $0x130] sm:$0xf] %v412_v10  ;;  %v414_v11 = vld [vmem:[%s20248_s10 + $0x14c] sm:$0xf] }
 0x15a   :  { %v416_v12 = vld [vmem:[%s20248_s10 + $0x114] sm:$0xf]  ;;  %v418_v13 = vld [vmem:[%s20248_s10 + $0x150] sm:$0xf]  ;;  %415 = vst [vmem:[#allocation2 + $0x134] sm:$0xf] %v414_v11 }
 0x15b   :  { %417 = vst [vmem:[#allocation2 + $0x138] sm:$0xf] %v416_v12  ;;  %419 = vst [vmem:[#allocation2 + $0x13c] sm:$0xf] %v418_v13  ;;  %v420_v14 = vld [vmem:[%s20248_s10 + $0x118] sm:$0xf] }
 0x15c   :  { %v422_v15 = vld [vmem:[%s20248_s10 + $0x154] sm:$0xf]  ;;  %v424_v16 = vld [vmem:[%s20248_s10 + $0x11c] sm:$0xf]  ;;  %421 = vst [vmem:[#allocation2 + $0x140] sm:$0xf] %v420_v14 }
 0x15d   :  { %423 = vst [vmem:[#allocation2 + $0x144] sm:$0xf] %v422_v15  ;;  %425 = vst [vmem:[#allocation2 + $0x148] sm:$0xf] %v424_v16  ;;  %v426_v17 = vld [vmem:[%s20248_s10 + $0x158] sm:$0xf] }
 0x15e   :  { %v428_v18 = vld [vmem:[%s20248_s10 + $0x120] sm:$0xf]  ;;  %v430_v19 = vld [vmem:[%s20248_s10 + $0x15c] sm:$0xf]  ;;  %427 = vst [vmem:[#allocation2 + $0x14c] sm:$0xf] %v426_v17 }
 0x15f   :  { %429 = vst [vmem:[#allocation2 + $0x150] sm:$0xf] %v428_v18  ;;  %431 = vst [vmem:[#allocation2 + $0x154] sm:$0xf] %v430_v19  ;;  %v432_v20 = vld [vmem:[%s20248_s10 + $0x124] sm:$0xf] }
 0x160   :  { %v434_v21 = vld [vmem:[%s20248_s10 + $0x160] sm:$0xf]  ;;  %v436_v22 = vld [vmem:[%s20248_s10 + $0x128] sm:$0xf]  ;;  %433 = vst [vmem:[#allocation2 + $0x158] sm:$0xf] %v432_v20 }
 0x161   :  { %435 = vst [vmem:[#allocation2 + $0x15c] sm:$0xf] %v434_v21  ;;  %437 = vst [vmem:[#allocation2 + $0x160] sm:$0xf] %v436_v22  ;;  %v438_v23 = vld [vmem:[%s20248_s10 + $0x164] sm:$0xff]   ;;  %v498_v52 = vld [vmem:[%s20248_s10 + $0x1dc] sm:$0xff]  }
 0x162   :  { %v442_v24 = vld [vmem:[%s20248_s10 + $0x1a4] sm:$0xf]  ;;  %v444_v25 = vld [vmem:[%s20248_s10 + $0x16c] sm:$0xf]  ;;  %439 = vst [vmem:[#allocation2 + $0x164] sm:$0xff] %v438_v23   ;;  %499 = vst [vmem:[#allocation2 + $0x1dc] sm:$0xff] %v498_v52  }
 0x163   :  { %443 = vst [vmem:[#allocation2 + $0x16c] sm:$0xf] %v442_v24  ;;  %445 = vst [vmem:[#allocation2 + $0x170] sm:$0xf] %v444_v25  ;;  %v446_v26 = vld [vmem:[%s20248_s10 + $0x1a8] sm:$0xf] }
 0x164   :  { %v448_v27 = vld [vmem:[%s20248_s10 + $0x170] sm:$0xf]  ;;  %v450_v28 = vld [vmem:[%s20248_s10 + $0x1ac] sm:$0xf]  ;;  %447 = vst [vmem:[#allocation2 + $0x174] sm:$0xf] %v446_v26 }
 0x165   :  { %449 = vst [vmem:[#allocation2 + $0x178] sm:$0xf] %v448_v27  ;;  %451 = vst [vmem:[#allocation2 + $0x17c] sm:$0xf] %v450_v28  ;;  %v452_v29 = vld [vmem:[%s20248_s10 + $0x174] sm:$0xf] }
 0x166   :  { %v454_v30 = vld [vmem:[%s20248_s10 + $0x1b0] sm:$0xf]  ;;  %v456_v31 = vld [vmem:[%s20248_s10 + $0x178] sm:$0xf]  ;;  %453 = vst [vmem:[#allocation2 + $0x180] sm:$0xf] %v452_v29 }
 0x167   :  { %455 = vst [vmem:[#allocation2 + $0x184] sm:$0xf] %v454_v30  ;;  %457 = vst [vmem:[#allocation2 + $0x188] sm:$0xf] %v456_v31  ;;  %v458_v32 = vld [vmem:[%s20248_s10 + $0x1b4] sm:$0xf] }
 0x168   :  { %v460_v33 = vld [vmem:[%s20248_s10 + $0x17c] sm:$0xf]  ;;  %v462_v34 = vld [vmem:[%s20248_s10 + $0x1b8] sm:$0xf]  ;;  %459 = vst [vmem:[#allocation2 + $0x18c] sm:$0xf] %v458_v32 }
 0x169   :  { %461 = vst [vmem:[#allocation2 + $0x190] sm:$0xf] %v460_v33  ;;  %463 = vst [vmem:[#allocation2 + $0x194] sm:$0xf] %v462_v34  ;;  %v464_v35 = vld [vmem:[%s20248_s10 + $0x180] sm:$0xf] }
 0x16a   :  { %v466_v36 = vld [vmem:[%s20248_s10 + $0x1bc] sm:$0xf]  ;;  %v468_v37 = vld [vmem:[%s20248_s10 + $0x184] sm:$0xf]  ;;  %465 = vst [vmem:[#allocation2 + $0x198] sm:$0xf] %v464_v35 }
 0x16b   :  { %467 = vst [vmem:[#allocation2 + $0x19c] sm:$0xf] %v466_v36  ;;  %469 = vst [vmem:[#allocation2 + $0x1a0] sm:$0xf] %v468_v37  ;;  %v470_v38 = vld [vmem:[%s20248_s10 + $0x1c0] sm:$0xf] }
 0x16c   :  { %v472_v39 = vld [vmem:[%s20248_s10 + $0x188] sm:$0xf]  ;;  %v474_v40 = vld [vmem:[%s20248_s10 + $0x1c4] sm:$0xf]  ;;  %471 = vst [vmem:[#allocation2 + $0x1a4] sm:$0xf] %v470_v38 }
 0x16d   :  { %473 = vst [vmem:[#allocation2 + $0x1a8] sm:$0xf] %v472_v39  ;;  %475 = vst [vmem:[#allocation2 + $0x1ac] sm:$0xf] %v474_v40  ;;  %v476_v41 = vld [vmem:[%s20248_s10 + $0x18c] sm:$0xf] }
 0x16e   :  { %v478_v42 = vld [vmem:[%s20248_s10 + $0x1c8] sm:$0xf]  ;;  %v480_v43 = vld [vmem:[%s20248_s10 + $0x190] sm:$0xf]  ;;  %477 = vst [vmem:[#allocation2 + $0x1b0] sm:$0xf] %v476_v41 }
 0x16f   :  { %479 = vst [vmem:[#allocation2 + $0x1b4] sm:$0xf] %v478_v42  ;;  %481 = vst [vmem:[#allocation2 + $0x1b8] sm:$0xf] %v480_v43  ;;  %v482_v44 = vld [vmem:[%s20248_s10 + $0x1cc] sm:$0xf] }
 0x170   :  { %v484_v45 = vld [vmem:[%s20248_s10 + $0x194] sm:$0xf]  ;;  %v486_v46 = vld [vmem:[%s20248_s10 + $0x1d0] sm:$0xf]  ;;  %483 = vst [vmem:[#allocation2 + $0x1bc] sm:$0xf] %v482_v44 }
 0x171   :  { %485 = vst [vmem:[#allocation2 + $0x1c0] sm:$0xf] %v484_v45  ;;  %487 = vst [vmem:[#allocation2 + $0x1c4] sm:$0xf] %v486_v46  ;;  %v488_v47 = vld [vmem:[%s20248_s10 + $0x198] sm:$0xf] }
 0x172   :  { %v490_v48 = vld [vmem:[%s20248_s10 + $0x1d4] sm:$0xf]  ;;  %v492_v49 = vld [vmem:[%s20248_s10 + $0x19c] sm:$0xf]  ;;  %489 = vst [vmem:[#allocation2 + $0x1c8] sm:$0xf] %v488_v47 }
 0x173   :  { %491 = vst [vmem:[#allocation2 + $0x1cc] sm:$0xf] %v490_v48  ;;  %493 = vst [vmem:[#allocation2 + $0x1d0] sm:$0xf] %v492_v49  ;;  %v494_v50 = vld [vmem:[%s20248_s10 + $0x1d8] sm:$0xf] }
 0x174   :  { %v496_v51 = vld [vmem:[%s20248_s10 + $0x1a0] sm:$0xf]  ;;  %495 = vst [vmem:[#allocation2 + $0x1d4] sm:$0xf] %v494_v50  ;;  %v502_v53 = vld [vmem:[%s20248_s10 + $0x21c] sm:$0xf] }
 0x175   :  { %497 = vst [vmem:[#allocation2 + $0x1d8] sm:$0xf] %v496_v51  ;;  %v504_v54 = vld [vmem:[%s20248_s10 + $0x1e4] sm:$0xf]  ;;  %v506_v55 = vld [vmem:[%s20248_s10 + $0x220] sm:$0xf] }
 0x176   :  { %503 = vst [vmem:[#allocation2 + $0x1e4] sm:$0xf] %v502_v53  ;;  %505 = vst [vmem:[#allocation2 + $0x1e8] sm:$0xf] %v504_v54  ;;  %v508_v56 = vld [vmem:[%s20248_s10 + $0x1e8] sm:$0xf] }
 0x177   :  { %507 = vst [vmem:[#allocation2 + $0x1ec] sm:$0xf] %v506_v55  ;;  %v510_v57 = vld [vmem:[%s20248_s10 + $0x224] sm:$0xf]  ;;  %v512_v58 = vld [vmem:[%s20248_s10 + $0x1ec] sm:$0xf] }
 0x178   :  { %509 = vst [vmem:[#allocation2 + $0x1f0] sm:$0xf] %v508_v56  ;;  %511 = vst [vmem:[#allocation2 + $0x1f4] sm:$0xf] %v510_v57  ;;  %v514_v59 = vld [vmem:[%s20248_s10 + $0x228] sm:$0xf] }
 0x179   :  { %513 = vst [vmem:[#allocation2 + $0x1f8] sm:$0xf] %v512_v58  ;;  %v516_v60 = vld [vmem:[%s20248_s10 + $0x1f0] sm:$0xf]  ;;  %v518_v61 = vld [vmem:[%s20248_s10 + $0x22c] sm:$0xf] }
 0x17a   :  { %515 = vst [vmem:[#allocation2 + $0x1fc] sm:$0xf] %v514_v59  ;;  %517 = vst [vmem:[#allocation2 + $0x200] sm:$0xf] %v516_v60  ;;  %v520_v62 = vld [vmem:[%s20248_s10 + $0x1f4] sm:$0xf] }
 0x17b   :  { %519 = vst [vmem:[#allocation2 + $0x204] sm:$0xf] %v518_v61  ;;  %v522_v63 = vld [vmem:[%s20248_s10 + $0x230] sm:$0xf]  ;;  %v524_v0 = vld [vmem:[%s20248_s10 + $0x1f8] sm:$0xf] }
 0x17c   :  { %521 = vst [vmem:[#allocation2 + $0x208] sm:$0xf] %v520_v62  ;;  %523 = vst [vmem:[#allocation2 + $0x20c] sm:$0xf] %v522_v63  ;;  %v526_v1 = vld [vmem:[%s20248_s10 + $0x234] sm:$0xf] }
 0x17d   :  { %525 = vst [vmem:[#allocation2 + $0x210] sm:$0xf] %v524_v0  ;;  %v528_v2 = vld [vmem:[%s20248_s10 + $0x1fc] sm:$0xf]  ;;  %v530_v3 = vld [vmem:[%s20248_s10 + $0x238] sm:$0xf] }
 0x17e   :  { %527 = vst [vmem:[#allocation2 + $0x214] sm:$0xf] %v526_v1  ;;  %529 = vst [vmem:[#allocation2 + $0x218] sm:$0xf] %v528_v2  ;;  %v532_v4 = vld [vmem:[%s20248_s10 + $0x200] sm:$0xf] }
 0x17f   :  { %531 = vst [vmem:[#allocation2 + $0x21c] sm:$0xf] %v530_v3  ;;  %v534_v5 = vld [vmem:[%s20248_s10 + $0x23c] sm:$0xf]  ;;  %v536_v6 = vld [vmem:[%s20248_s10 + $0x204] sm:$0xf] }
 0x180   :  { %533 = vst [vmem:[#allocation2 + $0x220] sm:$0xf] %v532_v4  ;;  %535 = vst [vmem:[#allocation2 + $0x224] sm:$0xf] %v534_v5  ;;  %v538_v7 = vld [vmem:[%s20248_s10 + $0x240] sm:$0xf] }
 0x181   :  { %537 = vst [vmem:[#allocation2 + $0x228] sm:$0xf] %v536_v6  ;;  %v540_v8 = vld [vmem:[%s20248_s10 + $0x208] sm:$0xf]  ;;  %v542_v9 = vld [vmem:[%s20248_s10 + $0x244] sm:$0xf] }
 0x182   :  { %539 = vst [vmem:[#allocation2 + $0x22c] sm:$0xf] %v538_v7  ;;  %541 = vst [vmem:[#allocation2 + $0x230] sm:$0xf] %v540_v8  ;;  %v544_v10 = vld [vmem:[%s20248_s10 + $0x20c] sm:$0xf] }
 0x183   :  { %543 = vst [vmem:[#allocation2 + $0x234] sm:$0xf] %v542_v9  ;;  %v546_v11 = vld [vmem:[%s20248_s10 + $0x248] sm:$0xf]  ;;  %v548_v12 = vld [vmem:[%s20248_s10 + $0x210] sm:$0xf] }
 0x184   :  { %545 = vst [vmem:[#allocation2 + $0x238] sm:$0xf] %v544_v10  ;;  %547 = vst [vmem:[#allocation2 + $0x23c] sm:$0xf] %v546_v11  ;;  %v550_v13 = vld [vmem:[%s20248_s10 + $0x24c] sm:$0xf] }
 0x185   :  { %549 = vst [vmem:[#allocation2 + $0x240] sm:$0xf] %v548_v12  ;;  %v552_v14 = vld [vmem:[%s20248_s10 + $0x214] sm:$0xf]  ;;  %v554_v15 = vld [vmem:[%s20248_s10 + $0x250] sm:$0xf] }
 0x186   :  { %551 = vst [vmem:[#allocation2 + $0x244] sm:$0xf] %v550_v13  ;;  %553 = vst [vmem:[#allocation2 + $0x248] sm:$0xf] %v552_v14  ;;  %v556_v16 = vld [vmem:[%s20248_s10 + $0x218] sm:$0xf] }
 0x187   :  { %555 = vst [vmem:[#allocation2 + $0x24c] sm:$0xf] %v554_v15  ;;  %v558_v17 = vld [vmem:[%s20248_s10 + $0x254] sm:$0xff]   ;;  %557 = vst [vmem:[#allocation2 + $0x250] sm:$0xf] %v556_v16  ;;  %v618_v46 = vld [vmem:[%s20248_s10 + $0x2cc] sm:$0xff]  }
 0x188   :  { %v562_v18 = vld [vmem:[%s20248_s10 + $0x294] sm:$0xf]  ;;  %559 = vst [vmem:[#allocation2 + $0x254] sm:$0xff] %v558_v17   ;;  %v564_v19 = vld [vmem:[%s20248_s10 + $0x25c] sm:$0xf]  ;;  %619 = vst [vmem:[#allocation2 + $0x2cc] sm:$0xff] %v618_v46  }
 0x189   :  { %563 = vst [vmem:[#allocation2 + $0x25c] sm:$0xf] %v562_v18  ;;  %v566_v20 = vld [vmem:[%s20248_s10 + $0x298] sm:$0xf]  ;;  %v568_v21 = vld [vmem:[%s20248_s10 + $0x260] sm:$0xf] }
 0x18a   :  { %565 = vst [vmem:[#allocation2 + $0x260] sm:$0xf] %v564_v19  ;;  %567 = vst [vmem:[#allocation2 + $0x264] sm:$0xf] %v566_v20  ;;  %v570_v22 = vld [vmem:[%s20248_s10 + $0x29c] sm:$0xf] }
 0x18b   :  { %569 = vst [vmem:[#allocation2 + $0x268] sm:$0xf] %v568_v21  ;;  %v572_v23 = vld [vmem:[%s20248_s10 + $0x264] sm:$0xf]  ;;  %v574_v24 = vld [vmem:[%s20248_s10 + $0x2a0] sm:$0xf] }
 0x18c   :  { %571 = vst [vmem:[#allocation2 + $0x26c] sm:$0xf] %v570_v22  ;;  %573 = vst [vmem:[#allocation2 + $0x270] sm:$0xf] %v572_v23  ;;  %v576_v25 = vld [vmem:[%s20248_s10 + $0x268] sm:$0xf] }
 0x18d   :  { %575 = vst [vmem:[#allocation2 + $0x274] sm:$0xf] %v574_v24  ;;  %v578_v26 = vld [vmem:[%s20248_s10 + $0x2a4] sm:$0xf]  ;;  %v580_v27 = vld [vmem:[%s20248_s10 + $0x26c] sm:$0xf] }
 0x18e   :  { %577 = vst [vmem:[#allocation2 + $0x278] sm:$0xf] %v576_v25  ;;  %579 = vst [vmem:[#allocation2 + $0x27c] sm:$0xf] %v578_v26  ;;  %v582_v28 = vld [vmem:[%s20248_s10 + $0x2a8] sm:$0xf] }
 0x18f   :  { %581 = vst [vmem:[#allocation2 + $0x280] sm:$0xf] %v580_v27  ;;  %v584_v29 = vld [vmem:[%s20248_s10 + $0x270] sm:$0xf]  ;;  %v586_v30 = vld [vmem:[%s20248_s10 + $0x2ac] sm:$0xf] }
 0x190   :  { %583 = vst [vmem:[#allocation2 + $0x284] sm:$0xf] %v582_v28  ;;  %585 = vst [vmem:[#allocation2 + $0x288] sm:$0xf] %v584_v29  ;;  %v588_v31 = vld [vmem:[%s20248_s10 + $0x274] sm:$0xf] }
 0x191   :  { %587 = vst [vmem:[#allocation2 + $0x28c] sm:$0xf] %v586_v30  ;;  %v590_v32 = vld [vmem:[%s20248_s10 + $0x2b0] sm:$0xf]  ;;  %v592_v33 = vld [vmem:[%s20248_s10 + $0x278] sm:$0xf] }
 0x192   :  { %589 = vst [vmem:[#allocation2 + $0x290] sm:$0xf] %v588_v31  ;;  %591 = vst [vmem:[#allocation2 + $0x294] sm:$0xf] %v590_v32  ;;  %v594_v34 = vld [vmem:[%s20248_s10 + $0x2b4] sm:$0xf] }
 0x193   :  { %593 = vst [vmem:[#allocation2 + $0x298] sm:$0xf] %v592_v33  ;;  %v596_v35 = vld [vmem:[%s20248_s10 + $0x27c] sm:$0xf]  ;;  %v598_v36 = vld [vmem:[%s20248_s10 + $0x2b8] sm:$0xf] }
 0x194   :  { %595 = vst [vmem:[#allocation2 + $0x29c] sm:$0xf] %v594_v34  ;;  %597 = vst [vmem:[#allocation2 + $0x2a0] sm:$0xf] %v596_v35  ;;  %v600_v37 = vld [vmem:[%s20248_s10 + $0x280] sm:$0xf] }
 0x195   :  { %599 = vst [vmem:[#allocation2 + $0x2a4] sm:$0xf] %v598_v36  ;;  %v602_v38 = vld [vmem:[%s20248_s10 + $0x2bc] sm:$0xf]  ;;  %v604_v39 = vld [vmem:[%s20248_s10 + $0x284] sm:$0xf] }
 0x196   :  { %601 = vst [vmem:[#allocation2 + $0x2a8] sm:$0xf] %v600_v37  ;;  %603 = vst [vmem:[#allocation2 + $0x2ac] sm:$0xf] %v602_v38  ;;  %v606_v40 = vld [vmem:[%s20248_s10 + $0x2c0] sm:$0xf] }
 0x197   :  { %605 = vst [vmem:[#allocation2 + $0x2b0] sm:$0xf] %v604_v39  ;;  %v608_v41 = vld [vmem:[%s20248_s10 + $0x288] sm:$0xf]  ;;  %v610_v42 = vld [vmem:[%s20248_s10 + $0x2c4] sm:$0xf] }
 0x198   :  { %607 = vst [vmem:[#allocation2 + $0x2b4] sm:$0xf] %v606_v40  ;;  %609 = vst [vmem:[#allocation2 + $0x2b8] sm:$0xf] %v608_v41  ;;  %v612_v43 = vld [vmem:[%s20248_s10 + $0x28c] sm:$0xf] }
 0x199   :  { %611 = vst [vmem:[#allocation2 + $0x2bc] sm:$0xf] %v610_v42  ;;  %v614_v44 = vld [vmem:[%s20248_s10 + $0x2c8] sm:$0xf]  ;;  %v616_v45 = vld [vmem:[%s20248_s10 + $0x290] sm:$0xf] }
 0x19a   :  { %613 = vst [vmem:[#allocation2 + $0x2c0] sm:$0xf] %v612_v43  ;;  %615 = vst [vmem:[#allocation2 + $0x2c4] sm:$0xf] %v614_v44  ;;  %v622_v47 = vld [vmem:[%s20248_s10 + $0x30c] sm:$0xf] }
 0x19b   :  { %617 = vst [vmem:[#allocation2 + $0x2c8] sm:$0xf] %v616_v45  ;;  %v624_v48 = vld [vmem:[%s20248_s10 + $0x2d4] sm:$0xf]  ;;  %623 = vst [vmem:[#allocation2 + $0x2d4] sm:$0xf] %v622_v47 }
 0x19c   :  { %625 = vst [vmem:[#allocation2 + $0x2d8] sm:$0xf] %v624_v48  ;;  %v626_v49 = vld [vmem:[%s20248_s10 + $0x310] sm:$0xf]  ;;  %v628_v50 = vld [vmem:[%s20248_s10 + $0x2d8] sm:$0xf] }
 0x19d   :  { %v630_v51 = vld [vmem:[%s20248_s10 + $0x314] sm:$0xf]  ;;  %627 = vst [vmem:[#allocation2 + $0x2dc] sm:$0xf] %v626_v49  ;;  %629 = vst [vmem:[#allocation2 + $0x2e0] sm:$0xf] %v628_v50 }
 0x19e   :  { %631 = vst [vmem:[#allocation2 + $0x2e4] sm:$0xf] %v630_v51  ;;  %v632_v52 = vld [vmem:[%s20248_s10 + $0x2dc] sm:$0xf]  ;;  %v634_v53 = vld [vmem:[%s20248_s10 + $0x318] sm:$0xf] }
 0x19f   :  { %v636_v54 = vld [vmem:[%s20248_s10 + $0x2e0] sm:$0xf]  ;;  %633 = vst [vmem:[#allocation2 + $0x2e8] sm:$0xf] %v632_v52  ;;  %635 = vst [vmem:[#allocation2 + $0x2ec] sm:$0xf] %v634_v53 }
 0x1a0   :  { %637 = vst [vmem:[#allocation2 + $0x2f0] sm:$0xf] %v636_v54  ;;  %v638_v55 = vld [vmem:[%s20248_s10 + $0x31c] sm:$0xf]  ;;  %v640_v56 = vld [vmem:[%s20248_s10 + $0x2e4] sm:$0xf] }
 0x1a1   :  { %v642_v57 = vld [vmem:[%s20248_s10 + $0x320] sm:$0xf]  ;;  %639 = vst [vmem:[#allocation2 + $0x2f4] sm:$0xf] %v638_v55  ;;  %641 = vst [vmem:[#allocation2 + $0x2f8] sm:$0xf] %v640_v56 }
 0x1a2   :  { %643 = vst [vmem:[#allocation2 + $0x2fc] sm:$0xf] %v642_v57  ;;  %v644_v58 = vld [vmem:[%s20248_s10 + $0x2e8] sm:$0xf]  ;;  %v646_v59 = vld [vmem:[%s20248_s10 + $0x324] sm:$0xf] }
 0x1a3   :  { %v648_v60 = vld [vmem:[%s20248_s10 + $0x2ec] sm:$0xf]  ;;  %645 = vst [vmem:[#allocation2 + $0x300] sm:$0xf] %v644_v58  ;;  %647 = vst [vmem:[#allocation2 + $0x304] sm:$0xf] %v646_v59 }
 0x1a4   :  { %649 = vst [vmem:[#allocation2 + $0x308] sm:$0xf] %v648_v60  ;;  %v650_v61 = vld [vmem:[%s20248_s10 + $0x328] sm:$0xf]  ;;  %v652_v62 = vld [vmem:[%s20248_s10 + $0x2f0] sm:$0xf] }
 0x1a5   :  { %v654_v63 = vld [vmem:[%s20248_s10 + $0x32c] sm:$0xf]  ;;  %651 = vst [vmem:[#allocation2 + $0x30c] sm:$0xf] %v650_v61  ;;  %653 = vst [vmem:[#allocation2 + $0x310] sm:$0xf] %v652_v62 }
 0x1a6   :  { %655 = vst [vmem:[#allocation2 + $0x314] sm:$0xf] %v654_v63  ;;  %v656_v0 = vld [vmem:[%s20248_s10 + $0x2f4] sm:$0xf]  ;;  %v658_v1 = vld [vmem:[%s20248_s10 + $0x330] sm:$0xf] }
 0x1a7   :  { %v660_v2 = vld [vmem:[%s20248_s10 + $0x2f8] sm:$0xf]  ;;  %657 = vst [vmem:[#allocation2 + $0x318] sm:$0xf] %v656_v0  ;;  %659 = vst [vmem:[#allocation2 + $0x31c] sm:$0xf] %v658_v1 }
 0x1a8   :  { %661 = vst [vmem:[#allocation2 + $0x320] sm:$0xf] %v660_v2  ;;  %v662_v3 = vld [vmem:[%s20248_s10 + $0x334] sm:$0xf]  ;;  %v664_v4 = vld [vmem:[%s20248_s10 + $0x2fc] sm:$0xf] }
 0x1a9   :  { %v666_v5 = vld [vmem:[%s20248_s10 + $0x338] sm:$0xf]  ;;  %663 = vst [vmem:[#allocation2 + $0x324] sm:$0xf] %v662_v3  ;;  %665 = vst [vmem:[#allocation2 + $0x328] sm:$0xf] %v664_v4 }
 0x1aa   :  { %667 = vst [vmem:[#allocation2 + $0x32c] sm:$0xf] %v666_v5  ;;  %v668_v6 = vld [vmem:[%s20248_s10 + $0x300] sm:$0xf]  ;;  %v670_v7 = vld [vmem:[%s20248_s10 + $0x33c] sm:$0xf] }
 0x1ab   :  { %v672_v8 = vld [vmem:[%s20248_s10 + $0x304] sm:$0xf]  ;;  %669 = vst [vmem:[#allocation2 + $0x330] sm:$0xf] %v668_v6  ;;  %671 = vst [vmem:[#allocation2 + $0x334] sm:$0xf] %v670_v7 }
 0x1ac   :  { %673 = vst [vmem:[#allocation2 + $0x338] sm:$0xf] %v672_v8  ;;  %v674_v9 = vld [vmem:[%s20248_s10 + $0x340] sm:$0xf]  ;;  %v676_v10 = vld [vmem:[%s20248_s10 + $0x308] sm:$0xf] }
 0x1ad   :  { %v678_v11 = vld [vmem:[%s20248_s10 + $0x344] sm:$0xff]   ;;  %675 = vst [vmem:[#allocation2 + $0x33c] sm:$0xf] %v674_v9  ;;  %677 = vst [vmem:[#allocation2 + $0x340] sm:$0xf] %v676_v10  ;;  %v738_v40 = vld [vmem:[%s20248_s10 + $0x3bc] sm:$0xff]  }
 0x1ae   :  { %679 = vst [vmem:[#allocation2 + $0x344] sm:$0xff] %v678_v11   ;;  %v682_v12 = vld [vmem:[%s20248_s10 + $0x384] sm:$0xf]  ;;  %v684_v13 = vld [vmem:[%s20248_s10 + $0x34c] sm:$0xf]  ;;  %739 = vst [vmem:[#allocation2 + $0x3bc] sm:$0xff] %v738_v40  }
 0x1af   :  { %v686_v14 = vld [vmem:[%s20248_s10 + $0x388] sm:$0xf]  ;;  %683 = vst [vmem:[#allocation2 + $0x34c] sm:$0xf] %v682_v12  ;;  %685 = vst [vmem:[#allocation2 + $0x350] sm:$0xf] %v684_v13 }
 0x1b0   :  { %687 = vst [vmem:[#allocation2 + $0x354] sm:$0xf] %v686_v14  ;;  %v688_v15 = vld [vmem:[%s20248_s10 + $0x350] sm:$0xf]  ;;  %v690_v16 = vld [vmem:[%s20248_s10 + $0x38c] sm:$0xf] }
 0x1b1   :  { %v692_v17 = vld [vmem:[%s20248_s10 + $0x354] sm:$0xf]  ;;  %689 = vst [vmem:[#allocation2 + $0x358] sm:$0xf] %v688_v15  ;;  %691 = vst [vmem:[#allocation2 + $0x35c] sm:$0xf] %v690_v16 }
 0x1b2   :  { %693 = vst [vmem:[#allocation2 + $0x360] sm:$0xf] %v692_v17  ;;  %v694_v18 = vld [vmem:[%s20248_s10 + $0x390] sm:$0xf]  ;;  %v696_v19 = vld [vmem:[%s20248_s10 + $0x358] sm:$0xf] }
 0x1b3   :  { %v698_v20 = vld [vmem:[%s20248_s10 + $0x394] sm:$0xf]  ;;  %695 = vst [vmem:[#allocation2 + $0x364] sm:$0xf] %v694_v18  ;;  %697 = vst [vmem:[#allocation2 + $0x368] sm:$0xf] %v696_v19 }
 0x1b4   :  { %699 = vst [vmem:[#allocation2 + $0x36c] sm:$0xf] %v698_v20  ;;  %v700_v21 = vld [vmem:[%s20248_s10 + $0x35c] sm:$0xf]  ;;  %v702_v22 = vld [vmem:[%s20248_s10 + $0x398] sm:$0xf] }
 0x1b5   :  { %v704_v23 = vld [vmem:[%s20248_s10 + $0x360] sm:$0xf]  ;;  %701 = vst [vmem:[#allocation2 + $0x370] sm:$0xf] %v700_v21  ;;  %703 = vst [vmem:[#allocation2 + $0x374] sm:$0xf] %v702_v22 }
 0x1b6   :  { %705 = vst [vmem:[#allocation2 + $0x378] sm:$0xf] %v704_v23  ;;  %v706_v24 = vld [vmem:[%s20248_s10 + $0x39c] sm:$0xf]  ;;  %v708_v25 = vld [vmem:[%s20248_s10 + $0x364] sm:$0xf] }
 0x1b7   :  { %v710_v26 = vld [vmem:[%s20248_s10 + $0x3a0] sm:$0xf]  ;;  %707 = vst [vmem:[#allocation2 + $0x37c] sm:$0xf] %v706_v24  ;;  %709 = vst [vmem:[#allocation2 + $0x380] sm:$0xf] %v708_v25 }
 0x1b8   :  { %711 = vst [vmem:[#allocation2 + $0x384] sm:$0xf] %v710_v26  ;;  %v712_v27 = vld [vmem:[%s20248_s10 + $0x368] sm:$0xf]  ;;  %v714_v28 = vld [vmem:[%s20248_s10 + $0x3a4] sm:$0xf] }
 0x1b9   :  { %v716_v29 = vld [vmem:[%s20248_s10 + $0x36c] sm:$0xf]  ;;  %713 = vst [vmem:[#allocation2 + $0x388] sm:$0xf] %v712_v27  ;;  %715 = vst [vmem:[#allocation2 + $0x38c] sm:$0xf] %v714_v28 }
 0x1ba   :  { %717 = vst [vmem:[#allocation2 + $0x390] sm:$0xf] %v716_v29  ;;  %v718_v30 = vld [vmem:[%s20248_s10 + $0x3a8] sm:$0xf]  ;;  %v720_v31 = vld [vmem:[%s20248_s10 + $0x370] sm:$0xf] }
 0x1bb   :  { %v722_v32 = vld [vmem:[%s20248_s10 + $0x3ac] sm:$0xf]  ;;  %719 = vst [vmem:[#allocation2 + $0x394] sm:$0xf] %v718_v30  ;;  %721 = vst [vmem:[#allocation2 + $0x398] sm:$0xf] %v720_v31 }
 0x1bc   :  { %723 = vst [vmem:[#allocation2 + $0x39c] sm:$0xf] %v722_v32  ;;  %v724_v33 = vld [vmem:[%s20248_s10 + $0x374] sm:$0xf]  ;;  %v726_v34 = vld [vmem:[%s20248_s10 + $0x3b0] sm:$0xf] }
 0x1bd   :  { %v728_v35 = vld [vmem:[%s20248_s10 + $0x378] sm:$0xf]  ;;  %725 = vst [vmem:[#allocation2 + $0x3a0] sm:$0xf] %v724_v33  ;;  %727 = vst [vmem:[#allocation2 + $0x3a4] sm:$0xf] %v726_v34 }
 0x1be   :  { %729 = vst [vmem:[#allocation2 + $0x3a8] sm:$0xf] %v728_v35  ;;  %v730_v36 = vld [vmem:[%s20248_s10 + $0x3b4] sm:$0xf]  ;;  %v732_v37 = vld [vmem:[%s20248_s10 + $0x37c] sm:$0xf] }
 0x1bf   :  { %v734_v38 = vld [vmem:[%s20248_s10 + $0x3b8] sm:$0xf]  ;;  %731 = vst [vmem:[#allocation2 + $0x3ac] sm:$0xf] %v730_v36  ;;  %733 = vst [vmem:[#allocation2 + $0x3b0] sm:$0xf] %v732_v37 }
 0x1c0   :  { %735 = vst [vmem:[#allocation2 + $0x3b4] sm:$0xf] %v734_v38  ;;  %v736_v39 = vld [vmem:[%s20248_s10 + $0x380] sm:$0xf]  ;;  %v742_v41 = vld [vmem:[%s20248_s10 + $0x3fc] sm:$0xf] }
 0x1c1   :  { %737 = vst [vmem:[#allocation2 + $0x3b8] sm:$0xf] %v736_v39  ;;  %743 = vst [vmem:[#allocation2 + $0x3c4] sm:$0xf] %v742_v41  ;;  %v744_v42 = vld [vmem:[%s20248_s10 + $0x3c4] sm:$0xf] }
 0x1c2   :  { %v746_v43 = vld [vmem:[%s20248_s10 + $0x400] sm:$0xf]  ;;  %v748_v44 = vld [vmem:[%s20248_s10 + $0x3c8] sm:$0xf]  ;;  %745 = vst [vmem:[#allocation2 + $0x3c8] sm:$0xf] %v744_v42 }
 0x1c3   :  { %747 = vst [vmem:[#allocation2 + $0x3cc] sm:$0xf] %v746_v43  ;;  %749 = vst [vmem:[#allocation2 + $0x3d0] sm:$0xf] %v748_v44  ;;  %v750_v45 = vld [vmem:[%s20248_s10 + $0x404] sm:$0xf] }
 0x1c4   :  { %v752_v46 = vld [vmem:[%s20248_s10 + $0x3cc] sm:$0xf]  ;;  %v754_v47 = vld [vmem:[%s20248_s10 + $0x408] sm:$0xf]  ;;  %751 = vst [vmem:[#allocation2 + $0x3d4] sm:$0xf] %v750_v45 }
 0x1c5   :  { %753 = vst [vmem:[#allocation2 + $0x3d8] sm:$0xf] %v752_v46  ;;  %755 = vst [vmem:[#allocation2 + $0x3dc] sm:$0xf] %v754_v47  ;;  %v756_v48 = vld [vmem:[%s20248_s10 + $0x3d0] sm:$0xf] }
 0x1c6   :  { %v758_v49 = vld [vmem:[%s20248_s10 + $0x40c] sm:$0xf]  ;;  %v760_v50 = vld [vmem:[%s20248_s10 + $0x3d4] sm:$0xf]  ;;  %757 = vst [vmem:[#allocation2 + $0x3e0] sm:$0xf] %v756_v48 }
 0x1c7   :  { %759 = vst [vmem:[#allocation2 + $0x3e4] sm:$0xf] %v758_v49  ;;  %761 = vst [vmem:[#allocation2 + $0x3e8] sm:$0xf] %v760_v50  ;;  %v762_v51 = vld [vmem:[%s20248_s10 + $0x410] sm:$0xf] }
 0x1c8   :  { %v764_v52 = vld [vmem:[%s20248_s10 + $0x3d8] sm:$0xf]  ;;  %v766_v53 = vld [vmem:[%s20248_s10 + $0x414] sm:$0xf]  ;;  %763 = vst [vmem:[#allocation2 + $0x3ec] sm:$0xf] %v762_v51 }
 0x1c9   :  { %765 = vst [vmem:[#allocation2 + $0x3f0] sm:$0xf] %v764_v52  ;;  %767 = vst [vmem:[#allocation2 + $0x3f4] sm:$0xf] %v766_v53  ;;  %v768_v54 = vld [vmem:[%s20248_s10 + $0x3dc] sm:$0xf] }
 0x1ca   :  { %v770_v55 = vld [vmem:[%s20248_s10 + $0x418] sm:$0xf]  ;;  %v772_v56 = vld [vmem:[%s20248_s10 + $0x3e0] sm:$0xf]  ;;  %769 = vst [vmem:[#allocation2 + $0x3f8] sm:$0xf] %v768_v54 }
 0x1cb   :  { %771 = vst [vmem:[#allocation2 + $0x3fc] sm:$0xf] %v770_v55  ;;  %773 = vst [vmem:[#allocation2 + $0x400] sm:$0xf] %v772_v56  ;;  %v774_v57 = vld [vmem:[%s20248_s10 + $0x41c] sm:$0xf] }
 0x1cc   :  { %v776_v58 = vld [vmem:[%s20248_s10 + $0x3e4] sm:$0xf]  ;;  %v778_v59 = vld [vmem:[%s20248_s10 + $0x420] sm:$0xf]  ;;  %775 = vst [vmem:[#allocation2 + $0x404] sm:$0xf] %v774_v57 }
 0x1cd   :  { %777 = vst [vmem:[#allocation2 + $0x408] sm:$0xf] %v776_v58  ;;  %779 = vst [vmem:[#allocation2 + $0x40c] sm:$0xf] %v778_v59  ;;  %v780_v60 = vld [vmem:[%s20248_s10 + $0x3e8] sm:$0xf] }
 0x1ce   :  { %v782_v61 = vld [vmem:[%s20248_s10 + $0x424] sm:$0xf]  ;;  %v784_v62 = vld [vmem:[%s20248_s10 + $0x3ec] sm:$0xf]  ;;  %781 = vst [vmem:[#allocation2 + $0x410] sm:$0xf] %v780_v60 }
 0x1cf   :  { %783 = vst [vmem:[#allocation2 + $0x414] sm:$0xf] %v782_v61  ;;  %785 = vst [vmem:[#allocation2 + $0x418] sm:$0xf] %v784_v62  ;;  %v786_v63 = vld [vmem:[%s20248_s10 + $0x428] sm:$0xf] }
 0x1d0   :  { %v788_v0 = vld [vmem:[%s20248_s10 + $0x3f0] sm:$0xf]  ;;  %v790_v1 = vld [vmem:[%s20248_s10 + $0x42c] sm:$0xf]  ;;  %787 = vst [vmem:[#allocation2 + $0x41c] sm:$0xf] %v786_v63 }
 0x1d1   :  { %789 = vst [vmem:[#allocation2 + $0x420] sm:$0xf] %v788_v0  ;;  %791 = vst [vmem:[#allocation2 + $0x424] sm:$0xf] %v790_v1  ;;  %v792_v2 = vld [vmem:[%s20248_s10 + $0x3f4] sm:$0xf] }
 0x1d2   :  { %v794_v3 = vld [vmem:[%s20248_s10 + $0x430] sm:$0xf]  ;;  %v796_v4 = vld [vmem:[%s20248_s10 + $0x3f8] sm:$0xf]  ;;  %793 = vst [vmem:[#allocation2 + $0x428] sm:$0xf] %v792_v2 }
 0x1d3   :  { %795 = vst [vmem:[#allocation2 + $0x42c] sm:$0xf] %v794_v3  ;;  %797 = vst [vmem:[#allocation2 + $0x430] sm:$0xf] %v796_v4  ;;  %v798_v5 = vld [vmem:[%s20248_s10 + $0x434] sm:$0xff]   ;;  %v858_v34 = vld [vmem:[%s20248_s10 + $0x4ac] sm:$0xff]  }
 0x1d4   :  { %v802_v6 = vld [vmem:[%s20248_s10 + $0x474] sm:$0xf]  ;;  %v804_v7 = vld [vmem:[%s20248_s10 + $0x43c] sm:$0xf]  ;;  %799 = vst [vmem:[#allocation2 + $0x434] sm:$0xff] %v798_v5   ;;  %859 = vst [vmem:[#allocation2 + $0x4ac] sm:$0xff] %v858_v34  }
 0x1d5   :  { %803 = vst [vmem:[#allocation2 + $0x43c] sm:$0xf] %v802_v6  ;;  %805 = vst [vmem:[#allocation2 + $0x440] sm:$0xf] %v804_v7  ;;  %v806_v8 = vld [vmem:[%s20248_s10 + $0x478] sm:$0xf] }
 0x1d6   :  { %v808_v9 = vld [vmem:[%s20248_s10 + $0x440] sm:$0xf]  ;;  %v810_v10 = vld [vmem:[%s20248_s10 + $0x47c] sm:$0xf]  ;;  %807 = vst [vmem:[#allocation2 + $0x444] sm:$0xf] %v806_v8 }
 0x1d7   :  { %809 = vst [vmem:[#allocation2 + $0x448] sm:$0xf] %v808_v9  ;;  %811 = vst [vmem:[#allocation2 + $0x44c] sm:$0xf] %v810_v10  ;;  %v812_v11 = vld [vmem:[%s20248_s10 + $0x444] sm:$0xf] }
 0x1d8   :  { %v814_v12 = vld [vmem:[%s20248_s10 + $0x480] sm:$0xf]  ;;  %v816_v13 = vld [vmem:[%s20248_s10 + $0x448] sm:$0xf]  ;;  %813 = vst [vmem:[#allocation2 + $0x450] sm:$0xf] %v812_v11 }
 0x1d9   :  { %815 = vst [vmem:[#allocation2 + $0x454] sm:$0xf] %v814_v12  ;;  %817 = vst [vmem:[#allocation2 + $0x458] sm:$0xf] %v816_v13  ;;  %v818_v14 = vld [vmem:[%s20248_s10 + $0x484] sm:$0xf] }
 0x1da   :  { %v820_v15 = vld [vmem:[%s20248_s10 + $0x44c] sm:$0xf]  ;;  %v822_v16 = vld [vmem:[%s20248_s10 + $0x488] sm:$0xf]  ;;  %819 = vst [vmem:[#allocation2 + $0x45c] sm:$0xf] %v818_v14 }
 0x1db   :  { %821 = vst [vmem:[#allocation2 + $0x460] sm:$0xf] %v820_v15  ;;  %823 = vst [vmem:[#allocation2 + $0x464] sm:$0xf] %v822_v16  ;;  %v824_v17 = vld [vmem:[%s20248_s10 + $0x450] sm:$0xf] }
 0x1dc   :  { %v826_v18 = vld [vmem:[%s20248_s10 + $0x48c] sm:$0xf]  ;;  %v828_v19 = vld [vmem:[%s20248_s10 + $0x454] sm:$0xf]  ;;  %825 = vst [vmem:[#allocation2 + $0x468] sm:$0xf] %v824_v17 }
 0x1dd   :  { %827 = vst [vmem:[#allocation2 + $0x46c] sm:$0xf] %v826_v18  ;;  %829 = vst [vmem:[#allocation2 + $0x470] sm:$0xf] %v828_v19  ;;  %v830_v20 = vld [vmem:[%s20248_s10 + $0x490] sm:$0xf] }
 0x1de   :  { %v832_v21 = vld [vmem:[%s20248_s10 + $0x458] sm:$0xf]  ;;  %v834_v22 = vld [vmem:[%s20248_s10 + $0x494] sm:$0xf]  ;;  %831 = vst [vmem:[#allocation2 + $0x474] sm:$0xf] %v830_v20 }
 0x1df   :  { %833 = vst [vmem:[#allocation2 + $0x478] sm:$0xf] %v832_v21  ;;  %835 = vst [vmem:[#allocation2 + $0x47c] sm:$0xf] %v834_v22  ;;  %v836_v23 = vld [vmem:[%s20248_s10 + $0x45c] sm:$0xf] }
 0x1e0   :  { %v838_v24 = vld [vmem:[%s20248_s10 + $0x498] sm:$0xf]  ;;  %v840_v25 = vld [vmem:[%s20248_s10 + $0x460] sm:$0xf]  ;;  %837 = vst [vmem:[#allocation2 + $0x480] sm:$0xf] %v836_v23 }
 0x1e1   :  { %839 = vst [vmem:[#allocation2 + $0x484] sm:$0xf] %v838_v24  ;;  %841 = vst [vmem:[#allocation2 + $0x488] sm:$0xf] %v840_v25  ;;  %v842_v26 = vld [vmem:[%s20248_s10 + $0x49c] sm:$0xf] }
 0x1e2   :  { %v844_v27 = vld [vmem:[%s20248_s10 + $0x464] sm:$0xf]  ;;  %v846_v28 = vld [vmem:[%s20248_s10 + $0x4a0] sm:$0xf]  ;;  %843 = vst [vmem:[#allocation2 + $0x48c] sm:$0xf] %v842_v26 }
 0x1e3   :  { %845 = vst [vmem:[#allocation2 + $0x490] sm:$0xf] %v844_v27  ;;  %847 = vst [vmem:[#allocation2 + $0x494] sm:$0xf] %v846_v28  ;;  %v848_v29 = vld [vmem:[%s20248_s10 + $0x468] sm:$0xf] }
 0x1e4   :  { %v850_v30 = vld [vmem:[%s20248_s10 + $0x4a4] sm:$0xf]  ;;  %v852_v31 = vld [vmem:[%s20248_s10 + $0x46c] sm:$0xf]  ;;  %849 = vst [vmem:[#allocation2 + $0x498] sm:$0xf] %v848_v29 }
 0x1e5   :  { %851 = vst [vmem:[#allocation2 + $0x49c] sm:$0xf] %v850_v30  ;;  %853 = vst [vmem:[#allocation2 + $0x4a0] sm:$0xf] %v852_v31  ;;  %v854_v32 = vld [vmem:[%s20248_s10 + $0x4a8] sm:$0xf] }
 0x1e6   :  { %v856_v33 = vld [vmem:[%s20248_s10 + $0x470] sm:$0xf]  ;;  %855 = vst [vmem:[#allocation2 + $0x4a4] sm:$0xf] %v854_v32  ;;  %v862_v35 = vld [vmem:[%s20248_s10 + $0x4ec] sm:$0xf] }
 0x1e7   :  { %857 = vst [vmem:[#allocation2 + $0x4a8] sm:$0xf] %v856_v33  ;;  %v864_v36 = vld [vmem:[%s20248_s10 + $0x4b4] sm:$0xf]  ;;  %v866_v37 = vld [vmem:[%s20248_s10 + $0x4f0] sm:$0xf] }
 0x1e8   :  { %863 = vst [vmem:[#allocation2 + $0x4b4] sm:$0xf] %v862_v35  ;;  %865 = vst [vmem:[#allocation2 + $0x4b8] sm:$0xf] %v864_v36  ;;  %v868_v38 = vld [vmem:[%s20248_s10 + $0x4b8] sm:$0xf] }
 0x1e9   :  { %867 = vst [vmem:[#allocation2 + $0x4bc] sm:$0xf] %v866_v37  ;;  %v870_v39 = vld [vmem:[%s20248_s10 + $0x4f4] sm:$0xf]  ;;  %v872_v40 = vld [vmem:[%s20248_s10 + $0x4bc] sm:$0xf] }
 0x1ea   :  { %869 = vst [vmem:[#allocation2 + $0x4c0] sm:$0xf] %v868_v38  ;;  %871 = vst [vmem:[#allocation2 + $0x4c4] sm:$0xf] %v870_v39  ;;  %v874_v41 = vld [vmem:[%s20248_s10 + $0x4f8] sm:$0xf] }
 0x1eb   :  { %873 = vst [vmem:[#allocation2 + $0x4c8] sm:$0xf] %v872_v40  ;;  %v876_v42 = vld [vmem:[%s20248_s10 + $0x4c0] sm:$0xf]  ;;  %v878_v43 = vld [vmem:[%s20248_s10 + $0x4fc] sm:$0xf] }
 0x1ec   :  { %875 = vst [vmem:[#allocation2 + $0x4cc] sm:$0xf] %v874_v41  ;;  %877 = vst [vmem:[#allocation2 + $0x4d0] sm:$0xf] %v876_v42  ;;  %v880_v44 = vld [vmem:[%s20248_s10 + $0x4c4] sm:$0xf] }
 0x1ed   :  { %879 = vst [vmem:[#allocation2 + $0x4d4] sm:$0xf] %v878_v43  ;;  %v882_v45 = vld [vmem:[%s20248_s10 + $0x500] sm:$0xf]  ;;  %v884_v46 = vld [vmem:[%s20248_s10 + $0x4c8] sm:$0xf] }
 0x1ee   :  { %881 = vst [vmem:[#allocation2 + $0x4d8] sm:$0xf] %v880_v44  ;;  %883 = vst [vmem:[#allocation2 + $0x4dc] sm:$0xf] %v882_v45  ;;  %v886_v47 = vld [vmem:[%s20248_s10 + $0x504] sm:$0xf] }
 0x1ef   :  { %885 = vst [vmem:[#allocation2 + $0x4e0] sm:$0xf] %v884_v46  ;;  %v888_v48 = vld [vmem:[%s20248_s10 + $0x4cc] sm:$0xf]  ;;  %v890_v49 = vld [vmem:[%s20248_s10 + $0x508] sm:$0xf] }
 0x1f0   :  { %887 = vst [vmem:[#allocation2 + $0x4e4] sm:$0xf] %v886_v47  ;;  %889 = vst [vmem:[#allocation2 + $0x4e8] sm:$0xf] %v888_v48  ;;  %v892_v50 = vld [vmem:[%s20248_s10 + $0x4d0] sm:$0xf] }
 0x1f1   :  { %891 = vst [vmem:[#allocation2 + $0x4ec] sm:$0xf] %v890_v49  ;;  %v894_v51 = vld [vmem:[%s20248_s10 + $0x50c] sm:$0xf]  ;;  %v896_v52 = vld [vmem:[%s20248_s10 + $0x4d4] sm:$0xf] }
 0x1f2   :  { %893 = vst [vmem:[#allocation2 + $0x4f0] sm:$0xf] %v892_v50  ;;  %895 = vst [vmem:[#allocation2 + $0x4f4] sm:$0xf] %v894_v51  ;;  %v898_v53 = vld [vmem:[%s20248_s10 + $0x510] sm:$0xf] }
 0x1f3   :  { %897 = vst [vmem:[#allocation2 + $0x4f8] sm:$0xf] %v896_v52  ;;  %v900_v54 = vld [vmem:[%s20248_s10 + $0x4d8] sm:$0xf]  ;;  %v902_v55 = vld [vmem:[%s20248_s10 + $0x514] sm:$0xf] }
 0x1f4   :  { %899 = vst [vmem:[#allocation2 + $0x4fc] sm:$0xf] %v898_v53  ;;  %901 = vst [vmem:[#allocation2 + $0x500] sm:$0xf] %v900_v54  ;;  %v904_v56 = vld [vmem:[%s20248_s10 + $0x4dc] sm:$0xf] }
 0x1f5   :  { %903 = vst [vmem:[#allocation2 + $0x504] sm:$0xf] %v902_v55  ;;  %v906_v57 = vld [vmem:[%s20248_s10 + $0x518] sm:$0xf]  ;;  %v908_v58 = vld [vmem:[%s20248_s10 + $0x4e0] sm:$0xf] }
 0x1f6   :  { %905 = vst [vmem:[#allocation2 + $0x508] sm:$0xf] %v904_v56  ;;  %907 = vst [vmem:[#allocation2 + $0x50c] sm:$0xf] %v906_v57  ;;  %v910_v59 = vld [vmem:[%s20248_s10 + $0x51c] sm:$0xf] }
 0x1f7   :  { %909 = vst [vmem:[#allocation2 + $0x510] sm:$0xf] %v908_v58  ;;  %v912_v60 = vld [vmem:[%s20248_s10 + $0x4e4] sm:$0xf]  ;;  %v914_v61 = vld [vmem:[%s20248_s10 + $0x520] sm:$0xf] }
 0x1f8   :  { %911 = vst [vmem:[#allocation2 + $0x514] sm:$0xf] %v910_v59  ;;  %913 = vst [vmem:[#allocation2 + $0x518] sm:$0xf] %v912_v60  ;;  %v916_v62 = vld [vmem:[%s20248_s10 + $0x4e8] sm:$0xf] }
 0x1f9   :  { %915 = vst [vmem:[#allocation2 + $0x51c] sm:$0xf] %v914_v61  ;;  %v918_v63 = vld [vmem:[%s20248_s10 + $0x524] sm:$0xff]   ;;  %917 = vst [vmem:[#allocation2 + $0x520] sm:$0xf] %v916_v62  ;;  %v978_v28 = vld [vmem:[%s20248_s10 + $0x59c] sm:$0xff]  }
 0x1fa   :  { %v922_v0 = vld [vmem:[%s20248_s10 + $0x564] sm:$0xf]  ;;  %919 = vst [vmem:[#allocation2 + $0x524] sm:$0xff] %v918_v63   ;;  %v924_v1 = vld [vmem:[%s20248_s10 + $0x52c] sm:$0xf]  ;;  %979 = vst [vmem:[#allocation2 + $0x59c] sm:$0xff] %v978_v28  }
 0x1fb   :  { %923 = vst [vmem:[#allocation2 + $0x52c] sm:$0xf] %v922_v0  ;;  %v926_v2 = vld [vmem:[%s20248_s10 + $0x568] sm:$0xf]  ;;  %v928_v3 = vld [vmem:[%s20248_s10 + $0x530] sm:$0xf] }
 0x1fc   :  { %925 = vst [vmem:[#allocation2 + $0x530] sm:$0xf] %v924_v1  ;;  %927 = vst [vmem:[#allocation2 + $0x534] sm:$0xf] %v926_v2  ;;  %v930_v4 = vld [vmem:[%s20248_s10 + $0x56c] sm:$0xf] }
 0x1fd   :  { %929 = vst [vmem:[#allocation2 + $0x538] sm:$0xf] %v928_v3  ;;  %v932_v5 = vld [vmem:[%s20248_s10 + $0x534] sm:$0xf]  ;;  %v934_v6 = vld [vmem:[%s20248_s10 + $0x570] sm:$0xf] }
 0x1fe   :  { %931 = vst [vmem:[#allocation2 + $0x53c] sm:$0xf] %v930_v4  ;;  %933 = vst [vmem:[#allocation2 + $0x540] sm:$0xf] %v932_v5  ;;  %v936_v7 = vld [vmem:[%s20248_s10 + $0x538] sm:$0xf] }
 0x1ff   :  { %935 = vst [vmem:[#allocation2 + $0x544] sm:$0xf] %v934_v6  ;;  %v938_v8 = vld [vmem:[%s20248_s10 + $0x574] sm:$0xf]  ;;  %v940_v9 = vld [vmem:[%s20248_s10 + $0x53c] sm:$0xf] }
 0x200   :  { %937 = vst [vmem:[#allocation2 + $0x548] sm:$0xf] %v936_v7  ;;  %939 = vst [vmem:[#allocation2 + $0x54c] sm:$0xf] %v938_v8  ;;  %v942_v10 = vld [vmem:[%s20248_s10 + $0x578] sm:$0xf] }
 0x201   :  { %941 = vst [vmem:[#allocation2 + $0x550] sm:$0xf] %v940_v9  ;;  %v944_v11 = vld [vmem:[%s20248_s10 + $0x540] sm:$0xf]  ;;  %v946_v12 = vld [vmem:[%s20248_s10 + $0x57c] sm:$0xf] }
 0x202   :  { %943 = vst [vmem:[#allocation2 + $0x554] sm:$0xf] %v942_v10  ;;  %945 = vst [vmem:[#allocation2 + $0x558] sm:$0xf] %v944_v11  ;;  %v948_v13 = vld [vmem:[%s20248_s10 + $0x544] sm:$0xf] }
 0x203   :  { %947 = vst [vmem:[#allocation2 + $0x55c] sm:$0xf] %v946_v12  ;;  %v950_v14 = vld [vmem:[%s20248_s10 + $0x580] sm:$0xf]  ;;  %v952_v15 = vld [vmem:[%s20248_s10 + $0x548] sm:$0xf] }
 0x204   :  { %949 = vst [vmem:[#allocation2 + $0x560] sm:$0xf] %v948_v13  ;;  %951 = vst [vmem:[#allocation2 + $0x564] sm:$0xf] %v950_v14  ;;  %v954_v16 = vld [vmem:[%s20248_s10 + $0x584] sm:$0xf] }
 0x205   :  { %953 = vst [vmem:[#allocation2 + $0x568] sm:$0xf] %v952_v15  ;;  %v956_v17 = vld [vmem:[%s20248_s10 + $0x54c] sm:$0xf]  ;;  %v958_v18 = vld [vmem:[%s20248_s10 + $0x588] sm:$0xf] }
 0x206   :  { %955 = vst [vmem:[#allocation2 + $0x56c] sm:$0xf] %v954_v16  ;;  %957 = vst [vmem:[#allocation2 + $0x570] sm:$0xf] %v956_v17  ;;  %v960_v19 = vld [vmem:[%s20248_s10 + $0x550] sm:$0xf] }
 0x207   :  { %959 = vst [vmem:[#allocation2 + $0x574] sm:$0xf] %v958_v18  ;;  %v962_v20 = vld [vmem:[%s20248_s10 + $0x58c] sm:$0xf]  ;;  %v964_v21 = vld [vmem:[%s20248_s10 + $0x554] sm:$0xf] }
 0x208   :  { %961 = vst [vmem:[#allocation2 + $0x578] sm:$0xf] %v960_v19  ;;  %963 = vst [vmem:[#allocation2 + $0x57c] sm:$0xf] %v962_v20  ;;  %v966_v22 = vld [vmem:[%s20248_s10 + $0x590] sm:$0xf] }
 0x209   :  { %965 = vst [vmem:[#allocation2 + $0x580] sm:$0xf] %v964_v21  ;;  %v968_v23 = vld [vmem:[%s20248_s10 + $0x558] sm:$0xf]  ;;  %v970_v24 = vld [vmem:[%s20248_s10 + $0x594] sm:$0xf] }
 0x20a   :  { %967 = vst [vmem:[#allocation2 + $0x584] sm:$0xf] %v966_v22  ;;  %969 = vst [vmem:[#allocation2 + $0x588] sm:$0xf] %v968_v23  ;;  %v972_v25 = vld [vmem:[%s20248_s10 + $0x55c] sm:$0xf] }
 0x20b   :  { %971 = vst [vmem:[#allocation2 + $0x58c] sm:$0xf] %v970_v24  ;;  %v974_v26 = vld [vmem:[%s20248_s10 + $0x598] sm:$0xf]  ;;  %v976_v27 = vld [vmem:[%s20248_s10 + $0x560] sm:$0xf] }
 0x20c   :  { %973 = vst [vmem:[#allocation2 + $0x590] sm:$0xf] %v972_v25  ;;  %975 = vst [vmem:[#allocation2 + $0x594] sm:$0xf] %v974_v26  ;;  %v982_v29 = vld [vmem:[%s20248_s10 + $0x5dc] sm:$0xf] }
 0x20d   :  { %977 = vst [vmem:[#allocation2 + $0x598] sm:$0xf] %v976_v27  ;;  %v984_v30 = vld [vmem:[%s20248_s10 + $0x5a4] sm:$0xf]  ;;  %983 = vst [vmem:[#allocation2 + $0x5a4] sm:$0xf] %v982_v29 }
 0x20e   :  { %985 = vst [vmem:[#allocation2 + $0x5a8] sm:$0xf] %v984_v30  ;;  %v986_v31 = vld [vmem:[%s20248_s10 + $0x5e0] sm:$0xf]  ;;  %v988_v32 = vld [vmem:[%s20248_s10 + $0x5a8] sm:$0xf] }
 0x20f   :  { %v990_v33 = vld [vmem:[%s20248_s10 + $0x5e4] sm:$0xf]  ;;  %987 = vst [vmem:[#allocation2 + $0x5ac] sm:$0xf] %v986_v31  ;;  %989 = vst [vmem:[#allocation2 + $0x5b0] sm:$0xf] %v988_v32 }
 0x210   :  { %991 = vst [vmem:[#allocation2 + $0x5b4] sm:$0xf] %v990_v33  ;;  %v992_v34 = vld [vmem:[%s20248_s10 + $0x5ac] sm:$0xf]  ;;  %v994_v35 = vld [vmem:[%s20248_s10 + $0x5e8] sm:$0xf] }
 0x211   :  { %v996_v36 = vld [vmem:[%s20248_s10 + $0x5b0] sm:$0xf]  ;;  %993 = vst [vmem:[#allocation2 + $0x5b8] sm:$0xf] %v992_v34  ;;  %995 = vst [vmem:[#allocation2 + $0x5bc] sm:$0xf] %v994_v35 }
 0x212   :  { %997 = vst [vmem:[#allocation2 + $0x5c0] sm:$0xf] %v996_v36  ;;  %v998_v37 = vld [vmem:[%s20248_s10 + $0x5ec] sm:$0xf]  ;;  %v1000_v38 = vld [vmem:[%s20248_s10 + $0x5b4] sm:$0xf] }
 0x213   :  { %v1002_v39 = vld [vmem:[%s20248_s10 + $0x5f0] sm:$0xf]  ;;  %999 = vst [vmem:[#allocation2 + $0x5c4] sm:$0xf] %v998_v37  ;;  %1001 = vst [vmem:[#allocation2 + $0x5c8] sm:$0xf] %v1000_v38 }
 0x214   :  { %1003 = vst [vmem:[#allocation2 + $0x5cc] sm:$0xf] %v1002_v39  ;;  %v1004_v40 = vld [vmem:[%s20248_s10 + $0x5b8] sm:$0xf]  ;;  %v1006_v41 = vld [vmem:[%s20248_s10 + $0x5f4] sm:$0xf] }
 0x215   :  { %v1008_v42 = vld [vmem:[%s20248_s10 + $0x5bc] sm:$0xf]  ;;  %1005 = vst [vmem:[#allocation2 + $0x5d0] sm:$0xf] %v1004_v40  ;;  %1007 = vst [vmem:[#allocation2 + $0x5d4] sm:$0xf] %v1006_v41 }
 0x216   :  { %1009 = vst [vmem:[#allocation2 + $0x5d8] sm:$0xf] %v1008_v42  ;;  %v1010_v43 = vld [vmem:[%s20248_s10 + $0x5f8] sm:$0xf]  ;;  %v1012_v44 = vld [vmem:[%s20248_s10 + $0x5c0] sm:$0xf] }
 0x217   :  { %v1014_v45 = vld [vmem:[%s20248_s10 + $0x5fc] sm:$0xf]  ;;  %1011 = vst [vmem:[#allocation2 + $0x5dc] sm:$0xf] %v1010_v43  ;;  %1013 = vst [vmem:[#allocation2 + $0x5e0] sm:$0xf] %v1012_v44 }
 0x218   :  { %1015 = vst [vmem:[#allocation2 + $0x5e4] sm:$0xf] %v1014_v45  ;;  %v1016_v46 = vld [vmem:[%s20248_s10 + $0x5c4] sm:$0xf]  ;;  %v1018_v47 = vld [vmem:[%s20248_s10 + $0x600] sm:$0xf] }
 0x219   :  { %v1020_v48 = vld [vmem:[%s20248_s10 + $0x5c8] sm:$0xf]  ;;  %1017 = vst [vmem:[#allocation2 + $0x5e8] sm:$0xf] %v1016_v46  ;;  %1019 = vst [vmem:[#allocation2 + $0x5ec] sm:$0xf] %v1018_v47 }
 0x21a   :  { %1021 = vst [vmem:[#allocation2 + $0x5f0] sm:$0xf] %v1020_v48  ;;  %v1022_v49 = vld [vmem:[%s20248_s10 + $0x604] sm:$0xf]  ;;  %v1024_v50 = vld [vmem:[%s20248_s10 + $0x5cc] sm:$0xf] }
 0x21b   :  { %v1026_v51 = vld [vmem:[%s20248_s10 + $0x608] sm:$0xf]  ;;  %1023 = vst [vmem:[#allocation2 + $0x5f4] sm:$0xf] %v1022_v49  ;;  %1025 = vst [vmem:[#allocation2 + $0x5f8] sm:$0xf] %v1024_v50 }
 0x21c   :  { %1027 = vst [vmem:[#allocation2 + $0x5fc] sm:$0xf] %v1026_v51  ;;  %v1028_v52 = vld [vmem:[%s20248_s10 + $0x5d0] sm:$0xf]  ;;  %v1030_v53 = vld [vmem:[%s20248_s10 + $0x60c] sm:$0xf] }
 0x21d   :  { %v1032_v54 = vld [vmem:[%s20248_s10 + $0x5d4] sm:$0xf]  ;;  %1029 = vst [vmem:[#allocation2 + $0x600] sm:$0xf] %v1028_v52  ;;  %1031 = vst [vmem:[#allocation2 + $0x604] sm:$0xf] %v1030_v53 }
 0x21e   :  { %1033 = vst [vmem:[#allocation2 + $0x608] sm:$0xf] %v1032_v54  ;;  %v1034_v55 = vld [vmem:[%s20248_s10 + $0x610] sm:$0xf]  ;;  %v1036_v56 = vld [vmem:[%s20248_s10 + $0x5d8] sm:$0xf] }
 0x21f   :  { %v1038_v57 = vld [vmem:[%s20248_s10 + $0x614] sm:$0xff]   ;;  %1035 = vst [vmem:[#allocation2 + $0x60c] sm:$0xf] %v1034_v55  ;;  %1037 = vst [vmem:[#allocation2 + $0x610] sm:$0xf] %v1036_v56  ;;  %v1098_v22 = vld [vmem:[%s20248_s10 + $0x68c] sm:$0xff]  }
 0x220   :  { %1039 = vst [vmem:[#allocation2 + $0x614] sm:$0xff] %v1038_v57   ;;  %v1042_v58 = vld [vmem:[%s20248_s10 + $0x654] sm:$0xf]  ;;  %v1044_v59 = vld [vmem:[%s20248_s10 + $0x61c] sm:$0xf]  ;;  %1099 = vst [vmem:[#allocation2 + $0x68c] sm:$0xff] %v1098_v22  }
 0x221   :  { %v1046_v60 = vld [vmem:[%s20248_s10 + $0x658] sm:$0xf]  ;;  %1043 = vst [vmem:[#allocation2 + $0x61c] sm:$0xf] %v1042_v58  ;;  %1045 = vst [vmem:[#allocation2 + $0x620] sm:$0xf] %v1044_v59 }
 0x222   :  { %1047 = vst [vmem:[#allocation2 + $0x624] sm:$0xf] %v1046_v60  ;;  %v1048_v61 = vld [vmem:[%s20248_s10 + $0x620] sm:$0xf]  ;;  %v1050_v62 = vld [vmem:[%s20248_s10 + $0x65c] sm:$0xf] }
 0x223   :  { %v1052_v63 = vld [vmem:[%s20248_s10 + $0x624] sm:$0xf]  ;;  %1049 = vst [vmem:[#allocation2 + $0x628] sm:$0xf] %v1048_v61  ;;  %1051 = vst [vmem:[#allocation2 + $0x62c] sm:$0xf] %v1050_v62 }
 0x224   :  { %1053 = vst [vmem:[#allocation2 + $0x630] sm:$0xf] %v1052_v63  ;;  %v1054_v0 = vld [vmem:[%s20248_s10 + $0x660] sm:$0xf]  ;;  %v1056_v1 = vld [vmem:[%s20248_s10 + $0x628] sm:$0xf] }
 0x225   :  { %v1058_v2 = vld [vmem:[%s20248_s10 + $0x664] sm:$0xf]  ;;  %1055 = vst [vmem:[#allocation2 + $0x634] sm:$0xf] %v1054_v0  ;;  %1057 = vst [vmem:[#allocation2 + $0x638] sm:$0xf] %v1056_v1 }
 0x226   :  { %1059 = vst [vmem:[#allocation2 + $0x63c] sm:$0xf] %v1058_v2  ;;  %v1060_v3 = vld [vmem:[%s20248_s10 + $0x62c] sm:$0xf]  ;;  %v1062_v4 = vld [vmem:[%s20248_s10 + $0x668] sm:$0xf] }
 0x227   :  { %v1064_v5 = vld [vmem:[%s20248_s10 + $0x630] sm:$0xf]  ;;  %1061 = vst [vmem:[#allocation2 + $0x640] sm:$0xf] %v1060_v3  ;;  %1063 = vst [vmem:[#allocation2 + $0x644] sm:$0xf] %v1062_v4 }
 0x228   :  { %1065 = vst [vmem:[#allocation2 + $0x648] sm:$0xf] %v1064_v5  ;;  %v1066_v6 = vld [vmem:[%s20248_s10 + $0x66c] sm:$0xf]  ;;  %v1068_v7 = vld [vmem:[%s20248_s10 + $0x634] sm:$0xf] }
 0x229   :  { %v1070_v8 = vld [vmem:[%s20248_s10 + $0x670] sm:$0xf]  ;;  %1067 = vst [vmem:[#allocation2 + $0x64c] sm:$0xf] %v1066_v6  ;;  %1069 = vst [vmem:[#allocation2 + $0x650] sm:$0xf] %v1068_v7 }
 0x22a   :  { %1071 = vst [vmem:[#allocation2 + $0x654] sm:$0xf] %v1070_v8  ;;  %v1072_v9 = vld [vmem:[%s20248_s10 + $0x638] sm:$0xf]  ;;  %v1074_v10 = vld [vmem:[%s20248_s10 + $0x674] sm:$0xf] }
 0x22b   :  { %v1076_v11 = vld [vmem:[%s20248_s10 + $0x63c] sm:$0xf]  ;;  %1073 = vst [vmem:[#allocation2 + $0x658] sm:$0xf] %v1072_v9  ;;  %1075 = vst [vmem:[#allocation2 + $0x65c] sm:$0xf] %v1074_v10 }
 0x22c   :  { %1077 = vst [vmem:[#allocation2 + $0x660] sm:$0xf] %v1076_v11  ;;  %v1078_v12 = vld [vmem:[%s20248_s10 + $0x678] sm:$0xf]  ;;  %v1080_v13 = vld [vmem:[%s20248_s10 + $0x640] sm:$0xf] }
 0x22d   :  { %v1082_v14 = vld [vmem:[%s20248_s10 + $0x67c] sm:$0xf]  ;;  %1079 = vst [vmem:[#allocation2 + $0x664] sm:$0xf] %v1078_v12  ;;  %1081 = vst [vmem:[#allocation2 + $0x668] sm:$0xf] %v1080_v13 }
 0x22e   :  { %1083 = vst [vmem:[#allocation2 + $0x66c] sm:$0xf] %v1082_v14  ;;  %v1084_v15 = vld [vmem:[%s20248_s10 + $0x644] sm:$0xf]  ;;  %v1086_v16 = vld [vmem:[%s20248_s10 + $0x680] sm:$0xf] }
 0x22f   :  { %v1088_v17 = vld [vmem:[%s20248_s10 + $0x648] sm:$0xf]  ;;  %1085 = vst [vmem:[#allocation2 + $0x670] sm:$0xf] %v1084_v15  ;;  %1087 = vst [vmem:[#allocation2 + $0x674] sm:$0xf] %v1086_v16 }
 0x230   :  { %1089 = vst [vmem:[#allocation2 + $0x678] sm:$0xf] %v1088_v17  ;;  %v1090_v18 = vld [vmem:[%s20248_s10 + $0x684] sm:$0xf]  ;;  %v1092_v19 = vld [vmem:[%s20248_s10 + $0x64c] sm:$0xf] }
 0x231   :  { %v1094_v20 = vld [vmem:[%s20248_s10 + $0x688] sm:$0xf]  ;;  %1091 = vst [vmem:[#allocation2 + $0x67c] sm:$0xf] %v1090_v18  ;;  %1093 = vst [vmem:[#allocation2 + $0x680] sm:$0xf] %v1092_v19 }
 0x232   :  { %1095 = vst [vmem:[#allocation2 + $0x684] sm:$0xf] %v1094_v20  ;;  %v1096_v21 = vld [vmem:[%s20248_s10 + $0x650] sm:$0xf]  ;;  %v1102_v23 = vld [vmem:[%s20248_s10 + $0x6cc] sm:$0xf] }
 0x233   :  { %1097 = vst [vmem:[#allocation2 + $0x688] sm:$0xf] %v1096_v21  ;;  %1103 = vst [vmem:[#allocation2 + $0x694] sm:$0xf] %v1102_v23  ;;  %v1104_v24 = vld [vmem:[%s20248_s10 + $0x694] sm:$0xf] }
 0x234   :  { %v1106_v25 = vld [vmem:[%s20248_s10 + $0x6d0] sm:$0xf]  ;;  %v1108_v26 = vld [vmem:[%s20248_s10 + $0x698] sm:$0xf]  ;;  %1105 = vst [vmem:[#allocation2 + $0x698] sm:$0xf] %v1104_v24 }
 0x235   :  { %1107 = vst [vmem:[#allocation2 + $0x69c] sm:$0xf] %v1106_v25  ;;  %1109 = vst [vmem:[#allocation2 + $0x6a0] sm:$0xf] %v1108_v26  ;;  %v1110_v27 = vld [vmem:[%s20248_s10 + $0x6d4] sm:$0xf] }
 0x236   :  { %v1112_v28 = vld [vmem:[%s20248_s10 + $0x69c] sm:$0xf]  ;;  %v1114_v29 = vld [vmem:[%s20248_s10 + $0x6d8] sm:$0xf]  ;;  %1111 = vst [vmem:[#allocation2 + $0x6a4] sm:$0xf] %v1110_v27 }
 0x237   :  { %1113 = vst [vmem:[#allocation2 + $0x6a8] sm:$0xf] %v1112_v28  ;;  %1115 = vst [vmem:[#allocation2 + $0x6ac] sm:$0xf] %v1114_v29  ;;  %v1116_v30 = vld [vmem:[%s20248_s10 + $0x6a0] sm:$0xf] }
 0x238   :  { %v1118_v31 = vld [vmem:[%s20248_s10 + $0x6dc] sm:$0xf]  ;;  %v1120_v32 = vld [vmem:[%s20248_s10 + $0x6a4] sm:$0xf]  ;;  %1117 = vst [vmem:[#allocation2 + $0x6b0] sm:$0xf] %v1116_v30 }
 0x239   :  { %1119 = vst [vmem:[#allocation2 + $0x6b4] sm:$0xf] %v1118_v31  ;;  %1121 = vst [vmem:[#allocation2 + $0x6b8] sm:$0xf] %v1120_v32  ;;  %v1122_v33 = vld [vmem:[%s20248_s10 + $0x6e0] sm:$0xf] }
 0x23a   :  { %v1124_v34 = vld [vmem:[%s20248_s10 + $0x6a8] sm:$0xf]  ;;  %v1126_v35 = vld [vmem:[%s20248_s10 + $0x6e4] sm:$0xf]  ;;  %1123 = vst [vmem:[#allocation2 + $0x6bc] sm:$0xf] %v1122_v33 }
 0x23b   :  { %1125 = vst [vmem:[#allocation2 + $0x6c0] sm:$0xf] %v1124_v34  ;;  %1127 = vst [vmem:[#allocation2 + $0x6c4] sm:$0xf] %v1126_v35  ;;  %v1128_v36 = vld [vmem:[%s20248_s10 + $0x6ac] sm:$0xf] }
 0x23c   :  { %v1130_v37 = vld [vmem:[%s20248_s10 + $0x6e8] sm:$0xf]  ;;  %v1132_v38 = vld [vmem:[%s20248_s10 + $0x6b0] sm:$0xf]  ;;  %1129 = vst [vmem:[#allocation2 + $0x6c8] sm:$0xf] %v1128_v36 }
 0x23d   :  { %1131 = vst [vmem:[#allocation2 + $0x6cc] sm:$0xf] %v1130_v37  ;;  %1133 = vst [vmem:[#allocation2 + $0x6d0] sm:$0xf] %v1132_v38  ;;  %v1134_v39 = vld [vmem:[%s20248_s10 + $0x6ec] sm:$0xf] }
 0x23e   :  { %v1136_v40 = vld [vmem:[%s20248_s10 + $0x6b4] sm:$0xf]  ;;  %v1138_v41 = vld [vmem:[%s20248_s10 + $0x6f0] sm:$0xf]  ;;  %1135 = vst [vmem:[#allocation2 + $0x6d4] sm:$0xf] %v1134_v39 }
 0x23f   :  { %1137 = vst [vmem:[#allocation2 + $0x6d8] sm:$0xf] %v1136_v40  ;;  %1139 = vst [vmem:[#allocation2 + $0x6dc] sm:$0xf] %v1138_v41  ;;  %v1140_v42 = vld [vmem:[%s20248_s10 + $0x6b8] sm:$0xf] }
 0x240   :  { %v1142_v43 = vld [vmem:[%s20248_s10 + $0x6f4] sm:$0xf]  ;;  %v1144_v44 = vld [vmem:[%s20248_s10 + $0x6bc] sm:$0xf]  ;;  %1141 = vst [vmem:[#allocation2 + $0x6e0] sm:$0xf] %v1140_v42 }
 0x241   :  { %1143 = vst [vmem:[#allocation2 + $0x6e4] sm:$0xf] %v1142_v43  ;;  %1145 = vst [vmem:[#allocation2 + $0x6e8] sm:$0xf] %v1144_v44  ;;  %v1146_v45 = vld [vmem:[%s20248_s10 + $0x6f8] sm:$0xf] }
 0x242   :  { %v1148_v46 = vld [vmem:[%s20248_s10 + $0x6c0] sm:$0xf]  ;;  %v1150_v47 = vld [vmem:[%s20248_s10 + $0x6fc] sm:$0xf]  ;;  %1147 = vst [vmem:[#allocation2 + $0x6ec] sm:$0xf] %v1146_v45 }
 0x243   :  { %1149 = vst [vmem:[#allocation2 + $0x6f0] sm:$0xf] %v1148_v46  ;;  %1151 = vst [vmem:[#allocation2 + $0x6f4] sm:$0xf] %v1150_v47  ;;  %v1152_v48 = vld [vmem:[%s20248_s10 + $0x6c4] sm:$0xf] }
 0x244   :  { %v1154_v49 = vld [vmem:[%s20248_s10 + $0x700] sm:$0xf]  ;;  %v1156_v50 = vld [vmem:[%s20248_s10 + $0x6c8] sm:$0xf]  ;;  %1153 = vst [vmem:[#allocation2 + $0x6f8] sm:$0xf] %v1152_v48 }
 0x245   :  { %1155 = vst [vmem:[#allocation2 + $0x6fc] sm:$0xf] %v1154_v49  ;;  %1157 = vst [vmem:[#allocation2 + $0x700] sm:$0xf] %v1156_v50  ;;  %v1158_v51 = vld [vmem:[%s20248_s10 + $0x704] sm:$0xff]  }
 0x246   :  { %v1162_v52 = vld [vmem:[%s20248_s10 + $0x744] sm:$0xf]  ;;  %v1164_v53 = vld [vmem:[%s20248_s10 + $0x70c] sm:$0xf]  ;;  %1159 = vst [vmem:[#allocation2 + $0x704] sm:$0xff] %v1158_v51  }
 0x247   :  { %1163 = vst [vmem:[#allocation2 + $0x70c] sm:$0xf] %v1162_v52  ;;  %1165 = vst [vmem:[#allocation2 + $0x710] sm:$0xf] %v1164_v53  ;;  %v1166_v54 = vld [vmem:[%s20248_s10 + $0x748] sm:$0xf] }
 0x248   :  { %v1168_v55 = vld [vmem:[%s20248_s10 + $0x710] sm:$0xf]  ;;  %v1170_v56 = vld [vmem:[%s20248_s10 + $0x74c] sm:$0xf]  ;;  %1167 = vst [vmem:[#allocation2 + $0x714] sm:$0xf] %v1166_v54 }
 0x249   :  { %1169 = vst [vmem:[#allocation2 + $0x718] sm:$0xf] %v1168_v55  ;;  %1171 = vst [vmem:[#allocation2 + $0x71c] sm:$0xf] %v1170_v56  ;;  %v1172_v57 = vld [vmem:[%s20248_s10 + $0x714] sm:$0xf] }
 0x24a   :  { %v1174_v58 = vld [vmem:[%s20248_s10 + $0x750] sm:$0xf]  ;;  %v1176_v59 = vld [vmem:[%s20248_s10 + $0x718] sm:$0xf]  ;;  %1173 = vst [vmem:[#allocation2 + $0x720] sm:$0xf] %v1172_v57 }
 0x24b   :  { %1175 = vst [vmem:[#allocation2 + $0x724] sm:$0xf] %v1174_v58  ;;  %1177 = vst [vmem:[#allocation2 + $0x728] sm:$0xf] %v1176_v59  ;;  %v1178_v60 = vld [vmem:[%s20248_s10 + $0x754] sm:$0xf] }
 0x24c   :  { %v1180_v61 = vld [vmem:[%s20248_s10 + $0x71c] sm:$0xf]  ;;  %v1182_v62 = vld [vmem:[%s20248_s10 + $0x758] sm:$0xf]  ;;  %1179 = vst [vmem:[#allocation2 + $0x72c] sm:$0xf] %v1178_v60 }
 0x24d   :  { %1181 = vst [vmem:[#allocation2 + $0x730] sm:$0xf] %v1180_v61  ;;  %1183 = vst [vmem:[#allocation2 + $0x734] sm:$0xf] %v1182_v62  ;;  %v1184_v63 = vld [vmem:[%s20248_s10 + $0x720] sm:$0xf] }
 0x24e   :  { %v1186_v0 = vld [vmem:[%s20248_s10 + $0x75c] sm:$0xf]  ;;  %v1188_v1 = vld [vmem:[%s20248_s10 + $0x724] sm:$0xf]  ;;  %1185 = vst [vmem:[#allocation2 + $0x738] sm:$0xf] %v1184_v63 }
 0x24f   :  { %1187 = vst [vmem:[#allocation2 + $0x73c] sm:$0xf] %v1186_v0  ;;  %1189 = vst [vmem:[#allocation2 + $0x740] sm:$0xf] %v1188_v1  ;;  %v1190_v2 = vld [vmem:[%s20248_s10 + $0x760] sm:$0xf] }
 0x250   :  { %v1192_v3 = vld [vmem:[%s20248_s10 + $0x728] sm:$0xf]  ;;  %v1194_v4 = vld [vmem:[%s20248_s10 + $0x764] sm:$0xf]  ;;  %1191 = vst [vmem:[#allocation2 + $0x744] sm:$0xf] %v1190_v2 }
 0x251   :  { %1193 = vst [vmem:[#allocation2 + $0x748] sm:$0xf] %v1192_v3  ;;  %1195 = vst [vmem:[#allocation2 + $0x74c] sm:$0xf] %v1194_v4  ;;  %v1196_v5 = vld [vmem:[%s20248_s10 + $0x72c] sm:$0xf] }
 0x252   :  { %v1198_v6 = vld [vmem:[%s20248_s10 + $0x768] sm:$0xf]  ;;  %v1200_v7 = vld [vmem:[%s20248_s10 + $0x730] sm:$0xf]  ;;  %1197 = vst [vmem:[#allocation2 + $0x750] sm:$0xf] %v1196_v5 }
 0x253   :  { %1199 = vst [vmem:[#allocation2 + $0x754] sm:$0xf] %v1198_v6  ;;  %1201 = vst [vmem:[#allocation2 + $0x758] sm:$0xf] %v1200_v7  ;;  %v1202_v8 = vld [vmem:[%s20248_s10 + $0x76c] sm:$0xf] }
 0x254   :  { %v1204_v9 = vld [vmem:[%s20248_s10 + $0x734] sm:$0xf]  ;;  %v1206_v10 = vld [vmem:[%s20248_s10 + $0x770] sm:$0xf]  ;;  %1203 = vst [vmem:[#allocation2 + $0x75c] sm:$0xf] %v1202_v8 }
 0x255   :  { %1205 = vst [vmem:[#allocation2 + $0x760] sm:$0xf] %v1204_v9  ;;  %1207 = vst [vmem:[#allocation2 + $0x764] sm:$0xf] %v1206_v10  ;;  %v1208_v11 = vld [vmem:[%s20248_s10 + $0x738] sm:$0xf] }
 0x256   :  { %v1210_v12 = vld [vmem:[%s20248_s10 + $0x774] sm:$0xf]  ;;  %v1212_v13 = vld [vmem:[%s20248_s10 + $0x73c] sm:$0xf]  ;;  %1209 = vst [vmem:[#allocation2 + $0x768] sm:$0xf] %v1208_v11 }
 0x257   :  { %1211 = vst [vmem:[#allocation2 + $0x76c] sm:$0xf] %v1210_v12  ;;  %1213 = vst [vmem:[#allocation2 + $0x770] sm:$0xf] %v1212_v13  ;;  %v1214_v14 = vld [vmem:[%s20248_s10 + $0x778] sm:$0xf] }
 0x258   :  { %v1216_v15 = vld [vmem:[%s20248_s10 + $0x740] sm:$0xf]  ;;  %v1218_v16 = vld [vmem:[%s20248_s10 + $0x77c] sm:$0xf]  ;;  %1215 = vst [vmem:[#allocation2 + $0x774] sm:$0xf] %v1214_v14 }
 0x259   :  { %1217 = vst [vmem:[#allocation2 + $0x778] sm:$0xf] %v1216_v15  ;;  %1219 = vst [vmem:[#allocation2 + $0x77c] sm:$0xf] %v1218_v16 }
 0x25a   :  { %2210 = vsyncadd [#allocation5], 30720  ;;  %s2216_s2 = sld [smem:[#allocation0]]   ;;  %s15757_s3 = smov [#allocation3]   ;;  %v15759_v17 = vmov 0   ;;  %vm2392_vm0 = vcmask 1043456   ;;  %v2296_v5 = vlaneseq }
 0x25b   :  { %s2224_s4 = sshll.u32 %s15757_s3, 4  ;;  %s15758_s14 = smov 1920   ;;  %2449 = vmatprep.mubr.bf16.mxu0 %v15759_v17  ;;  %2490 = vmatprep.mubr.bf16.mxu1 %v15759_v17  ;;  %vm2388_vm1 = vcmask 64512   ;;  %vm2589_vm2 = vcmask 1041408   ;;  %vm2639_vm3 = vcmask 844800   ;;  %vm3434_vm4 = vcmask 850944   ;;  %s2225_s4 = int_to_ptr.vmem [resolvable:$true] %s2224_s4 }
 0x25c   :  { %2228 = sst [smem:[#allocation30]] %s15758_s14  ;;  %s15760_s29 = smov 15   ;;  %v17606_v6 = vshrl.u32 %v2296_v5, 7  ;;  %vm3874_vm5 = vcmask 588800   ;;  %vm4118_vm6 = vcmask 15360   ;;  %vm4644_vm7 = vcmask 1040384  }
 0x25d   :  { %2230 = sst [smem:[#allocation30 + $0x1]] %s15758_s14  ;;  %s15761_s7 = smov 64  }
 0x25e   :  { %2232 = sst [smem:[#allocation30 + $0x2]] %s15760_s29  ;;  %s15762_s12 = smov 2   ;;  %v17609_v7 = vsub.s32 0, %v17606_v6  ;;  %v17616_v10 = vsub.s32 4, %v17606_v6 }
 0x25f   :  { %2234 = sst [smem:[#allocation30 + $0x3]] %s15761_s7  ;;  %s15763_s17 = smov 960  }
 0x260   :  { %s12876_s10 = sshll.u32 %s2216_s2, 26  ;;  %2236 = sst [smem:[#allocation30 + $0x4]] %s15743_s24 }
 0x261   :  { %s17480_s1 = sadd.s32 134217728, %s12876_s10  ;;  %2238 = sst [smem:[#allocation30 + $0x5]] %s15762_s12 }
 0x262   :  { %2242 = sst [smem:[#allocation30 + $0x7]] %s15761_s7  ;;  %s15764_s26 = smov 4  }
 0x263   :  { %2240 = sst [smem:[#allocation30 + $0x6]] %s15763_s17  ;;  %s15765_s13 = smov [#allocation5 + $0x1]  }
 0x264   :  { %2244 = sst [smem:[#allocation30 + $0x8]] %s15764_s26  ;;  %s15766_s5 = smov [#allocation29]  }
 0x265   :  { %2246 = dma.general %s20253_s15, 46080, %s2225_s4, %s15765_s13, %s15766_s5, [#allocation30], %s17480_s1, 0  }
 0x266   :  { %s15767_s18 = smov 1280   ;;  %s15768_s0 = smov 10  }
 0x267   :  { %2263 = sst [smem:[#allocation32]] %s15767_s18  ;;  %s15769_s9 = smov [#allocation4]  }
 0x268   :  { %2265 = sst [smem:[#allocation32 + $0x1]] %s15767_s18  ;;  %s2259_s30 = sshll.u32 %s15769_s9, 4  ;;  %s2260_s30 = int_to_ptr.vmem [resolvable:$true] %s2259_s30 }
 0x269   :  { %2267 = sst [smem:[#allocation32 + $0x2]] %s15768_s0  ;;  %s15770_s22 = smov [#allocation5 + $0x2]  }
 0x26a   :  { %2269 = sst [smem:[#allocation32 + $0x3]] %s15761_s7  ;;  %s15771_s25 = smov [#allocation31]  }
 0x26b   :  { %2271 = sst [smem:[#allocation32 + $0x4]] %s15743_s24 }
 0x26c   :  { %2273 = sst [smem:[#allocation32 + $0x5]] %s15762_s12 }
 0x26d   :  { %2275 = sst [smem:[#allocation32 + $0x6]] %s15748_s27 }
 0x26e   :  { %2277 = sst [smem:[#allocation32 + $0x7]] %s15761_s7 }
 0x26f   :  { %2279 = sst [smem:[#allocation32 + $0x8]] %s15764_s26 }
 0x270   :  { %2281 = dma.general %s20258_s20, 30720, %s2260_s30, %s15770_s22, %s15771_s25, [#allocation32], %s17480_s1, 0  }
 0x271   :  { %v2287_v18 = vld [vmem:[#allocation8] sm:$0xff]  ;;  %v2288_v19 = vld [vmem:[#allocation8 + $0x8] sm:$0xff]  ;;  %v2286_v20 = vld [vmem:[#allocation6] sm:$0x3]  ;;  %s20286_s27 = sld [smem:[#allocation47_spill]]  ;;  %s20287_s25 = sld [smem:[#allocation50_spill]] }
 0x272   :  { %v12881_v21 = vcombine.high %v2287_v18, %v2287_v18  ;;  %v12883_v22 = vcombine.high %v2288_v19, %v2288_v19  ;;  %v12880_v23 = vcombine.low %v2287_v18, %v2287_v18  ;;  %v12882_v24 = vcombine.low %v2288_v19, %v2288_v19  ;;  %v2289_v25 = vld [vmem:[#allocation8 + $0x10] sm:$0xff]  ;;  %v2290_v26 = vld [vmem:[#allocation8 + $0x18] sm:$0xff]  ;;  %v17611_v8 = vld [vmem:[#allocation10] sm:$0x77] }
 0x273   :  { %v12885_v27 = vcombine.high %v2289_v25, %v2289_v25  ;;  %v12884_v28 = vcombine.low %v2289_v25, %v2289_v25  ;;  %v12887_v29 = vcombine.high %v2290_v26, %v2290_v26  ;;  %v2291_v32 = vpack.c.bf16 %v2286_v20, %v2286_v20  ;;  %v17613_v9 = vld [vmem:[#allocation10 + $0x8] sm:$0x77]  ;;  %v17628_v18 = vld [vmem:[#allocation10 + $0x10] sm:$0x77] }
 0x274   :  { %12888 = vmatprep.subr.msk.bf16.mxu0 %vm2392_vm0, %v12881_v21  ;;  %12890 = vmatprep.subr.msk.bf16.mxu1 %vm2392_vm0, %v12883_v22  ;;  %v2394_v30 = vsel %vm2392_vm0, %v12880_v23, 0  ;;  %v2400_v31 = vsel %vm2392_vm0, %v12882_v24, 0  ;;  %v12886_v33 = vcombine.low %v2290_v26, %v2290_v26  ;;  %v2299_v11 = vrot.slane %v17611_v8, %v17609_v7  ;;  %v17632_v21 = vld [vmem:[#allocation10 + $0x18] sm:$0x77] }
 0x275   :  { %2418 = vmatpush1.bf16.msra.mxu0 %v2394_v30  ;;  %2459 = vmatpush1.bf16.msra.mxu1 %v2400_v31  ;;  %v2406_v34 = vsel %vm2392_vm0, %v12884_v28, 0  ;;  %v2307_v12 = vrot.slane %v17613_v9, %v17609_v7  ;;  %v2303_v13 = vrot.slane %v17611_v8, %v17616_v10  ;;  %v2311_v14 = vrot.slane %v17613_v9, %v17616_v10 }
 0x276   :  { %12892 = vmatprep.subr.msk.bf16.mxu0 %vm2392_vm0, %v12885_v27  ;;  %12894 = vmatprep.subr.msk.bf16.mxu1 %vm2392_vm0, %v12887_v29  ;;  %v2412_v35 = vsel %vm2392_vm0, %v12886_v33, 0  ;;  %v2339_v15 = vrot.slane %v2299_v11, %v17609_v7  ;;  %v2315_v24 = vrot.slane %v17628_v18, %v17609_v7  ;;  %v2319_v25 = vrot.slane %v17628_v18, %v17616_v10 }
 0x277   :  { %v15122_v36 = vld [vmem:[%s20286_s27 + $0x40] sm:$0xff]   ;;  %v15126_v40 = vld [vmem:[%s20286_s27 + $0x48] sm:$0xff]   ;;  %v15130_v44 = vld [vmem:[%s20286_s27 + $0x50] sm:$0xff]   ;;  %v2347_v16 = vrot.slane %v2307_v12, %v17609_v7  ;;  %v2343_v19 = vrot.slane %v2303_v13, %v17609_v7  ;;  %v2351_v20 = vrot.slane %v2311_v14, %v17609_v7  ;;  %v2323_v30 = vrot.slane %v17632_v21, %v17609_v7 }
 0x278   :  { %12889 = vmatmul.mubr.msk.bf16.vlgmr.msra.gmra.mrb[0].mxu0 %vm2388_vm1, %v2291_v32  ;;  %12891 = vmatmul.mubr.msk.bf16.vlgmr.msra.gmra.mrb[0].mxu1 %vm2388_vm1, %v2291_v32  ;;  %v15123_v37 = vld [vmem:[%s20286_s27 + $0xc0] sm:$0xff]   ;;  %v15127_v41 = vld [vmem:[%s20286_s27 + $0xc8] sm:$0xff]   ;;  %v15131_v45 = vld [vmem:[%s20286_s27 + $0xd0] sm:$0xff]   ;;  %v2327_v31 = vrot.slane %v17632_v21, %v17616_v10 }
 0x279   :  { %2500 = vmatpush1.bf16.msra.mxu0 %v2406_v34  ;;  %2531 = vmatprep.mubr.bf16.mxu0 %v15759_v17  ;;  %v15124_v38 = vld [vmem:[%s20286_s27] sm:$0xff]   ;;  %v15128_v42 = vld [vmem:[%s20286_s27 + $0x8] sm:$0xff]   ;;  %v15132_v46 = vld [vmem:[%s20286_s27 + $0x10] sm:$0xff]  }
 0x27a   :  { %2541 = vmatpush1.bf16.msra.mxu1 %v2412_v35  ;;  %2572 = vmatprep.mubr.bf16.mxu1 %v15759_v17  ;;  %v15125_v39 = vld [vmem:[%s20286_s27 + $0x80] sm:$0xff]   ;;  %v15129_v43 = vld [vmem:[%s20286_s27 + $0x88] sm:$0xff]   ;;  %v15133_v47 = vld [vmem:[%s20286_s27 + $0x90] sm:$0xff]  }
 0x27b   :  { %13404 = vmatprep.subr.bf16.mxu0 %v15122_v36  ;;  %13426 = vmatprep.subr.bf16.mxu1 %v15123_v37  ;;  %v15134_v48 = vld [vmem:[%s20286_s27 + $0x58] sm:$0xff]   ;;  %v15138_v52 = vld [vmem:[%s20286_s27 + $0x60] sm:$0xff]   ;;  %v15142_v56 = vld [vmem:[%s20286_s27 + $0x68] sm:$0xff]  }
 0x27c   :  { %v15135_v49 = vld [vmem:[%s20286_s27 + $0xd8] sm:$0xff]   ;;  %v15139_v53 = vld [vmem:[%s20286_s27 + $0xe0] sm:$0xff]   ;;  %v15143_v57 = vld [vmem:[%s20286_s27 + $0xe8] sm:$0xff]  }
 0x27d   :  { %v15136_v50 = vld [vmem:[%s20286_s27 + $0x18] sm:$0xff]   ;;  %v15140_v54 = vld [vmem:[%s20286_s27 + $0x20] sm:$0xff]   ;;  %v15144_v58 = vld [vmem:[%s20286_s27 + $0x28] sm:$0xff]  }
 0x27e   :  { %v15137_v51 = vld [vmem:[%s20286_s27 + $0x98] sm:$0xff]   ;;  %v15141_v55 = vld [vmem:[%s20286_s27 + $0xa0] sm:$0xff]   ;;  %v15145_v59 = vld [vmem:[%s20286_s27 + $0xa8] sm:$0xff]  }
 0x27f   :  { %v15146_v60 = vld [vmem:[%s20286_s27 + $0x70] sm:$0xff]   ;;  %v15150_v0 = vld [vmem:[%s20286_s27 + $0x78] sm:$0xff]   ;;  %v15154_v4 = vld [vmem:[%s20286_s27 + $0x140] sm:$0xff]  }
 0x280   :  { %12893 = vmatmul.mubr.msk.bf16.vlgmr.msra.gmra.mrb[4].mxu0 %vm2388_vm1, %v2291_v32  ;;  %12895 = vmatmul.mubr.msk.bf16.vlgmr.msra.gmra.mrb[4].mxu1 %vm2388_vm1, %v2291_v32  ;;  %v15147_v61 = vld [vmem:[%s20286_s27 + $0xf0] sm:$0xff]   ;;  %v15151_v1 = vld [vmem:[%s20286_s27 + $0xf8] sm:$0xff]  }
 0x281   :  { %13405 = vmatpush3.bf16.msra.mxu0 %v15124_v38  ;;  %13427 = vmatpush3.bf16.msra.mxu1 %v15125_v39  ;;  %v15148_v62 = vld [vmem:[%s20286_s27 + $0x30] sm:$0xff]   ;;  %v15152_v2 = vld [vmem:[%s20286_s27 + $0x38] sm:$0xff]  }
 0x282   :  { %13406 = vmatprep.subr.bf16.mxu0 %v15126_v40  ;;  %13428 = vmatprep.subr.bf16.mxu1 %v15127_v41  ;;  %v15149_v63 = vld [vmem:[%s20286_s27 + $0xb0] sm:$0xff]   ;;  %v15153_v3 = vld [vmem:[%s20286_s27 + $0xb8] sm:$0xff]  }
 0x285   :  { %13407 = vmatpush3.bf16.msra.mxu0 %v15128_v42  ;;  %13429 = vmatpush3.bf16.msra.mxu1 %v15129_v43  ;;  %v2355_v42 = vrot.slane %v2315_v24, %v17609_v7  ;;  %v2359_v43 = vrot.slane %v2319_v25, %v17609_v7 }
 0x286   :  { %13408 = vmatprep.subr.bf16.mxu0 %v15130_v44  ;;  %13430 = vmatprep.subr.bf16.mxu1 %v15131_v45 }
 0x289   :  { %13409 = vmatpush3.bf16.msra.mxu0 %v15132_v46  ;;  %13431 = vmatpush3.bf16.msra.mxu1 %v15133_v47  ;;  %v2363_v46 = vrot.slane %v2323_v30, %v17609_v7  ;;  %v2367_v47 = vrot.slane %v2327_v31, %v17609_v7 }
 0x28a   :  { %13410 = vmatprep.subr.bf16.mxu0 %v15134_v48  ;;  %13432 = vmatprep.subr.bf16.mxu1 %v15135_v49 }
 0x28d   :  { %13411 = vmatpush3.bf16.msra.mxu0 %v15136_v50  ;;  %13433 = vmatpush3.bf16.msra.mxu1 %v15137_v51 }
 0x28e   :  { %13412 = vmatprep.subr.bf16.mxu0 %v15138_v52  ;;  %13434 = vmatprep.subr.bf16.mxu1 %v15139_v53 }
 0x291   :  { %13413 = vmatpush3.bf16.msra.mxu0 %v15140_v54  ;;  %13435 = vmatpush3.bf16.msra.mxu1 %v15141_v55 }
 0x292   :  { %13414 = vmatprep.subr.bf16.mxu0 %v15142_v56  ;;  %13436 = vmatprep.subr.bf16.mxu1 %v15143_v57 }
 0x295   :  { %13415 = vmatpush3.bf16.msra.mxu0 %v15144_v58  ;;  %13437 = vmatpush3.bf16.msra.mxu1 %v15145_v59 }
 0x296   :  { %13416 = vmatprep.subr.bf16.mxu0 %v15146_v60  ;;  %13438 = vmatprep.subr.bf16.mxu1 %v15147_v61 }
 0x299   :  { %13417 = vmatpush3.bf16.msra.mxu0 %v15148_v62  ;;  %13439 = vmatpush3.bf16.msra.mxu1 %v15149_v63 }
 0x29a   :  { %13418 = vmatprep.subr.bf16.mxu0 %v15150_v0  ;;  %13440 = vmatprep.subr.bf16.mxu1 %v15151_v1 }
 0x29d   :  { %13419 = vmatpush3.bf16.msra.mxu0 %v15152_v2  ;;  %13441 = vmatpush3.bf16.msra.mxu1 %v15153_v3 }
 0x29e   :  { %3561 = vmatprep.subr.bf16.mxu1 %v15759_v17  ;;  %13448 = vmatprep.subr.bf16.mxu0 %v15154_v4 }
 0x34b   :  { %v2451_v22 = vpop.f32.mrb[0].mxu0  ;;  %v2492_v23 = vpop.f32.mrb[0].mxu1 }
 0x34c   :  { %v17638_v26 = vadd.f32 %v2451_v22, %v2339_v15  ;;  %v17640_v27 = vadd.f32 %v2492_v23, %v2347_v16  ;;  %v2453_v28 = vpop.f32.mrb[1].mxu0  ;;  %v2494_v29 = vpop.f32.mrb[1].mxu1 }
 0x34d   :  { %v17646_v32 = vadd.f32 %v2453_v28, %v2343_v19  ;;  %v17648_v33 = vadd.f32 %v2494_v29, %v2351_v20  ;;  %v2496_v34 = vpop.f32.mrb[2].mxu1  ;;  %v2455_v35 = vpop.f32.mrb[2].mxu0 }
 0x34e   :  { %v2581_v36 = vmax.f32 %v17638_v26, 0.0  ;;  %v2583_v37 = vmax.f32 %v17640_v27, 0.0  ;;  %v2497_v38 = vpop.f32.mrb[3].mxu1  ;;  %v2456_v39 = vpop.f32.mrb[3].mxu0 }
 0x34f   :  { %v2582_v40 = vmax.f32 %v17646_v32, 0.0  ;;  %v2584_v41 = vmax.f32 %v17648_v33, 0.0 }
 0x350   :  { %v2590_v44 = vsel %vm2589_vm2, %v2581_v36, 0.0  ;;  %v2604_v45 = vsel %vm2589_vm2, %v2583_v37, 0.0 }
 0x351   :  { %v2591_v48 = vrot.slane %v2590_v44, 4  ;;  %v2605_v49 = vrot.slane %v2604_v45, 4  ;;  %v2597_v50 = vsel %vm2589_vm2, %v2582_v40, 0.0  ;;  %v2611_v51 = vsel %vm2589_vm2, %v2584_v41, 0.0 }
 0x352   :  { %v2598_v52 = vrot.slane %v2597_v50, 4  ;;  %v2612_v53 = vrot.slane %v2611_v51, 4 }
 0x353   :  { %v2592_v54 = vadd.f32 %v2591_v48, %v2590_v44  ;;  %v2606_v55 = vadd.f32 %v2605_v49, %v2604_v45  ;;  %v2533_v56 = vpop.f32.mrb[4].mxu0  ;;  %v2574_v57 = vpop.f32.mrb[4].mxu1 }
 0x354   :  { %v2599_v58 = vadd.f32 %v2598_v52, %v2597_v50  ;;  %v2613_v59 = vadd.f32 %v2612_v53, %v2611_v51  ;;  %v17670_v60 = vadd.f32 %v2533_v56, %v2355_v42  ;;  %v2535_v61 = vpop.f32.mrb[5].mxu0  ;;  %v17672_v62 = vadd.f32 %v2574_v57, %v2363_v46  ;;  %v2576_v63 = vpop.f32.mrb[5].mxu1 }
 0x355   :  { %v2593_v0 = vrot.slane %v2592_v54, 2  ;;  %v2607_v1 = vrot.slane %v2606_v55, 2  ;;  %v17674_v2 = vadd.f32 %v2535_v61, %v2359_v43  ;;  %v17676_v3 = vadd.f32 %v2576_v63, %v2367_v47  ;;  %v2537_v4 = vpop.f32.mrb[6].mxu0  ;;  %v2578_v5 = vpop.f32.mrb[6].mxu1 }
 0x356   :  { %v2600_v11 = vrot.slane %v2599_v58, 2  ;;  %v2614_v12 = vrot.slane %v2613_v59, 2  ;;  %v2585_v13 = vmax.f32 %v17670_v60, 0.0  ;;  %v2587_v14 = vmax.f32 %v17672_v62, 0.0  ;;  %v2538_v15 = vpop.f32.mrb[7].mxu0  ;;  %v2579_v16 = vpop.f32.mrb[7].mxu1 }
 0x357   :  { %v2594_v19 = vadd.f32 %v2593_v0, %v2592_v54  ;;  %v2608_v20 = vadd.f32 %v2607_v1, %v2606_v55  ;;  %v2586_v22 = vmax.f32 %v17674_v2, 0.0  ;;  %v2588_v23 = vmax.f32 %v17676_v3, 0.0 }
 0x358   :  { %v2601_v24 = vadd.f32 %v2600_v11, %v2599_v58  ;;  %v2615_v25 = vadd.f32 %v2614_v12, %v2613_v59  ;;  %v2618_v28 = vsel %vm2589_vm2, %v2585_v13, 0.0  ;;  %v2632_v29 = vsel %vm2589_vm2, %v2587_v14, 0.0 }
 0x359   :  { %v2595_v30 = vrot.slane %v2594_v19, 1  ;;  %v2609_v31 = vrot.slane %v2608_v20, 1  ;;  %v2619_v34 = vrot.slane %v2618_v28, 4  ;;  %v2625_v35 = vsel %vm2589_vm2, %v2586_v22, 0.0 }
 0x35a   :  { %v2602_v38 = vrot.slane %v2601_v24, 1  ;;  %v2616_v39 = vrot.slane %v2615_v25, 1  ;;  %v2626_v42 = vrot.slane %v2625_v35, 4  ;;  %v2633_v43 = vrot.slane %v2632_v29, 4 }
 0x35b   :  { %v2596_v44 = vadd.f32 %v2595_v30, %v2594_v19  ;;  %v2610_v45 = vadd.f32 %v2609_v31, %v2608_v20  ;;  %v2620_v46 = vadd.f32 %v2619_v34, %v2618_v28  ;;  %v2640_v47 = vsel %vm2639_vm3, %v2588_v23, 0.0 }
 0x35c   :  { %v2603_v48 = vadd.f32 %v2602_v38, %v2601_v24  ;;  %v2617_v49 = vadd.f32 %v2616_v39, %v2615_v25  ;;  %v2627_v50 = vadd.f32 %v2626_v42, %v2625_v35  ;;  %v2634_v51 = vadd.f32 %v2633_v43, %v2632_v29 }
 0x35d   :  { %v2647_v52 = vmul.f32 0.5, %v2596_v44  ;;  %v2649_v53 = vmul.f32 0.5, %v2610_v45  ;;  %v2621_v54 = vrot.slane %v2620_v46, 2  ;;  %v2641_v55 = vrot.slane %v2640_v47, 4 }
 0x35e   :  { %v2648_v56 = vmul.f32 0.5, %v2603_v48  ;;  %v2650_v57 = vmul.f32 0.5, %v2617_v49  ;;  %v2628_v58 = vrot.slane %v2627_v50, 2  ;;  %v2635_v59 = vrot.slane %v2634_v51, 2 }
 0x35f   :  { %v17696_v61 = vsub.f32 %v2581_v36, %v2647_v52  ;;  %v17700_v63 = vsub.f32 %v2583_v37, %v2649_v53  ;;  %v2622_v0 = vadd.f32 %v2621_v54, %v2620_v46  ;;  %v2642_v1 = vadd.f32 %v2641_v55, %v2640_v47 }
 0x360   :  { %v17704_v4 = vsub.f32 %v2582_v40, %v2648_v56  ;;  %v17708_v5 = vsub.f32 %v2584_v41, %v2650_v57  ;;  %v2629_v11 = vadd.f32 %v2628_v58, %v2627_v50  ;;  %v2636_v12 = vadd.f32 %v2635_v59, %v2634_v51 }
 0x361   :  { %v2663_v26 = vmul.f32 %v17696_v61, %v17696_v61  ;;  %v2665_v27 = vmul.f32 %v17700_v63, %v17700_v63  ;;  %v2623_v36 = vrot.slane %v2622_v0, 1  ;;  %v2643_v37 = vrot.slane %v2642_v1, 2 }
 0x362   :  { %v2664_v15 = vmul.f32 %v17704_v4, %v17704_v4  ;;  %v2666_v32 = vmul.f32 %v17708_v5, %v17708_v5  ;;  %v2630_v40 = vrot.slane %v2629_v11, 1  ;;  %v2637_v33 = vrot.slane %v2636_v12, 1 }
 0x363   :  { %v2671_v41 = vsel %vm2589_vm2, %v2663_v26, 0.0  ;;  %v2685_v16 = vsel %vm2589_vm2, %v2665_v27, 0.0  ;;  %v2624_v19 = vadd.f32 %v2623_v36, %v2622_v0  ;;  %v2644_v20 = vadd.f32 %v2643_v37, %v2642_v1 }
 0x364   :  { %v2672_v24 = vrot.slane %v2671_v41, 4  ;;  %v2686_v25 = vrot.slane %v2685_v16, 4  ;;  %v2678_v28 = vsel %vm2589_vm2, %v2664_v15, 0.0  ;;  %v2692_v29 = vsel %vm2589_vm2, %v2666_v32, 0.0 }
 0x365   :  { %v2679_v30 = vrot.slane %v2678_v28, 4  ;;  %v2693_v31 = vrot.slane %v2692_v29, 4  ;;  %v2651_v34 = vmul.f32 0.5, %v2624_v19  ;;  %v2631_v35 = vadd.f32 %v2630_v40, %v2629_v11 }
 0x366   :  { %v2673_v38 = vadd.f32 %v2672_v24, %v2671_v41  ;;  %v2687_v39 = vadd.f32 %v2686_v25, %v2685_v16  ;;  %v2638_v42 = vadd.f32 %v2637_v33, %v2636_v12  ;;  %v2645_v43 = vrot.slane %v2644_v20, 1 }
 0x367   :  { %v2680_v44 = vadd.f32 %v2679_v30, %v2678_v28  ;;  %v2694_v45 = vadd.f32 %v2693_v31, %v2692_v29  ;;  %v17724_v46 = vsub.f32 %v2585_v13, %v2651_v34  ;;  %v2652_v47 = vmul.f32 0.5, %v2631_v35 }
 0x368   :  { %v2674_v48 = vrot.slane %v2673_v38, 2  ;;  %v2688_v49 = vrot.slane %v2687_v39, 2  ;;  %v2653_v50 = vmul.f32 0.5, %v2638_v42  ;;  %v2646_v51 = vadd.f32 %v2645_v43, %v2644_v20 }
 0x369   :  { %v2681_v52 = vrot.slane %v2680_v44, 2  ;;  %v2695_v53 = vrot.slane %v2694_v45, 2  ;;  %v2667_v54 = vmul.f32 %v17724_v46, %v17724_v46  ;;  %v17730_v55 = vsub.f32 %v2586_v22, %v2652_v47 }
 0x36a   :  { %v2675_v56 = vadd.f32 %v2674_v48, %v2673_v38  ;;  %v2689_v57 = vadd.f32 %v2688_v49, %v2687_v39  ;;  %v17734_v60 = vsub.f32 %v2587_v14, %v2653_v50  ;;  %v2654_v13 = vmul.f32 0.5, %v2646_v51 }
 0x36b   :  { %v2682_v58 = vadd.f32 %v2681_v52, %v2680_v44  ;;  %v2696_v59 = vadd.f32 %v2695_v53, %v2694_v45  ;;  %v2699_v0 = vsel %vm2589_vm2, %v2667_v54, 0.0  ;;  %v2668_v1 = vmul.f32 %v17730_v55, %v17730_v55 }
 0x36c   :  { %v2676_v11 = vrot.slane %v2675_v56, 1  ;;  %v2690_v12 = vrot.slane %v2689_v57, 1  ;;  %v2700_v26 = vrot.slane %v2699_v0, 4  ;;  %v2669_v2 = vmul.f32 %v17734_v60, %v17734_v60 }
 0x36d   :  { %v2683_v22 = vrot.slane %v2682_v58, 1  ;;  %v2697_v27 = vrot.slane %v2696_v59, 1  ;;  %v2706_v62 = vsel %vm2589_vm2, %v2668_v1, 0.0  ;;  %v17744_v14 = vsub.f32 %v2588_v23, %v2654_v13 }
 0x36e   :  { %v2677_v36 = vadd.f32 %v2676_v11, %v2675_v56  ;;  %v2691_v37 = vadd.f32 %v2690_v12, %v2689_v57  ;;  %v2701_v15 = vadd.f32 %v2700_v26, %v2699_v0  ;;  %v2707_v32 = vrot.slane %v2706_v62, 4 }
 0x36f   :  { %v2684_v40 = vadd.f32 %v2683_v22, %v2682_v58  ;;  %v2698_v33 = vadd.f32 %v2697_v27, %v2696_v59  ;;  %v2713_v41 = vsel %vm2589_vm2, %v2669_v2, 0.0  ;;  %v2670_v16 = vmul.f32 %v17744_v14, %v17744_v14 }
 0x370   :  { %v2727_v19 = vmul.f32 0.5, %v2677_v36  ;;  %v2729_v20 = vmul.f32 0.5, %v2691_v37  ;;  %v2702_v24 = vrot.slane %v2701_v15, 2  ;;  %v2708_v25 = vadd.f32 %v2707_v32, %v2706_v62 }
 0x371   :  { %v2728_v28 = vmul.f32 0.5, %v2684_v40  ;;  %v2730_v29 = vmul.f32 0.5, %v2698_v33  ;;  %v2714_v3 = vrot.slane %v2713_v41, 4  ;;  %v2720_v23 = vsel %vm2639_vm3, %v2670_v16, 0.0 }
 0x372   :  { %v2735_v30 = vadd.f32 1e-05, %v2727_v19  ;;  %v2737_v31 = vadd.f32 1e-05, %v2729_v20  ;;  %v2703_v34 = vadd.f32 %v2702_v24, %v2701_v15  ;;  %v2709_v35 = vrot.slane %v2708_v25, 2 }
 0x373   :  { %v2736_v38 = vadd.f32 1e-05, %v2728_v28  ;;  %v2738_v39 = vadd.f32 1e-05, %v2730_v29  ;;  %v2715_v42 = vadd.f32 %v2714_v3, %v2713_v41  ;;  %v2721_v43 = vrot.slane %v2720_v23, 4 }
 0x374   :  { %15255 = vrsqrt.f32 %v2735_v30  ;;  %v2704_v44 = vrot.slane %v2703_v34, 1  ;;  %v2710_v45 = vadd.f32 %v2709_v35, %v2708_v25  ;;  %v17751_v47 = vsub.s32 1, %v17606_v6 }
 0x375   :  { %15257 = vrsqrt.f32 %v2737_v31  ;;  %v2716_v48 = vrot.slane %v2715_v42, 2  ;;  %v2722_v49 = vadd.f32 %v2721_v43, %v2720_v23  ;;  %v17754_v52 = vsub.s32 5, %v17606_v6 }
 0x376   :  { %15259 = vrsqrt.f32 %v2736_v38  ;;  %v2705_v50 = vadd.f32 %v2704_v44, %v2703_v34  ;;  %v2711_v51 = vrot.slane %v2710_v45, 1  ;;  %v17757_v56 = vsub.s32 2, %v17606_v6 }
 0x377   :  { %15261 = vrsqrt.f32 %v2738_v39  ;;  %v2717_v53 = vadd.f32 %v2716_v48, %v2715_v42  ;;  %v2723_v54 = vrot.slane %v2722_v49, 2  ;;  %v17760_v58 = vsub.s32 6, %v17606_v6 }
 0x378   :  { %v2731_v57 = vmul.f32 0.5, %v2705_v50  ;;  %v2712_v13 = vadd.f32 %v2711_v51, %v2710_v45  ;;  %v2762_v59 = vrot.slane %v17611_v8, %v17751_v47  ;;  %v2770_v0 = vrot.slane %v17613_v9, %v17751_v47 }
 0x379   :  { %v2718_v1 = vrot.slane %v2717_v53, 1  ;;  %v2724_v11 = vadd.f32 %v2723_v54, %v2722_v49  ;;  %v2766_v2 = vrot.slane %v17611_v8, %v17754_v52  ;;  %v2774_v22 = vrot.slane %v17613_v9, %v17754_v52 }
 0x37a   :  { %v2739_v12 = vadd.f32 1e-05, %v2731_v57  ;;  %v2732_v26 = vmul.f32 0.5, %v2712_v13  ;;  %v2842_v6 = vrot.slane %v17611_v8, %v17757_v56  ;;  %v2846_v37 = vrot.slane %v17611_v8, %v17760_v58 }
 0x37b   :  { %v2719_v27 = vadd.f32 %v2718_v1, %v2717_v53  ;;  %v2725_v62 = vrot.slane %v2724_v11, 1  ;;  %v2850_v15 = vrot.slane %v17613_v9, %v17757_v56  ;;  %v2802_v32 = vrot.slane %v2762_v59, %v17751_v47  ;;  %v15155_v1 = vld [vmem:[%s20286_s27 + $0x100] sm:$0xff]  }
 0x37c   :  { %15263 = vrsqrt.f32 %v2739_v12  ;;  %v2740_v36 = vadd.f32 1e-05, %v2732_v26  ;;  %v2810_v40 = vrot.slane %v2770_v0, %v17751_v47  ;;  %v2806_v19 = vrot.slane %v2766_v2, %v17751_v47 }
 0x37d   :  { %v2733_v33 = vmul.f32 0.5, %v2719_v27  ;;  %v2726_v41 = vadd.f32 %v2725_v62, %v2724_v11  ;;  %v2814_v20 = vrot.slane %v2774_v22, %v17751_v47  ;;  %v2854_v24 = vrot.slane %v17613_v9, %v17760_v58  ;;  %v15156_v27 = vld [vmem:[%s20286_s27 + $0x180] sm:$0xff]  }
 0x37e   :  { %v15256_v16 = vpop.eup %15255  ;;  %15265 = vrsqrt.f32 %v2740_v36  ;;  %v2882_v3 = vrot.slane %v2842_v6, %v17757_v56  ;;  %v2778_v31 = vrot.slane %v17628_v18, %v17751_v47  ;;  %v2886_v34 = vrot.slane %v2846_v37, %v17757_v56 }
 0x37f   :  { %v15258_v25 = vpop.eup %15257  ;;  %v2751_v8 = vmul.f32 %v15256_v16, %v17696_v61  ;;  %v2741_v28 = vadd.f32 1e-05, %v2733_v33  ;;  %v2734_v29 = vmul.f32 0.5, %v2726_v41  ;;  %v2890_v35 = vrot.slane %v2850_v15, %v17757_v56  ;;  %v15158_v33 = vld [vmem:[%s20286_s27 + $0x108] sm:$0xff]  }
 0x380   :  { %v15260_v23 = vpop.eup %15259  ;;  %v2753_v30 = vmul.f32 %v15258_v25, %v17700_v63  ;;  %v2894_v44 = vrot.slane %v2854_v24, %v17757_v56  ;;  %v2782_v45 = vrot.slane %v17628_v18, %v17754_v52  ;;  %v2858_v48 = vrot.slane %v17628_v18, %v17757_v56 }
 0x381   :  { %v15262_v38 = vpop.eup %15261  ;;  %v2831_v39 = vmul.f32 %v2802_v32, %v2751_v8  ;;  %v2752_v9 = vmul.f32 %v15260_v23, %v17704_v4  ;;  %15267 = vrsqrt.f32 %v2741_v28  ;;  %v2742_v61 = vadd.f32 1e-05, %v2734_v29 }
 0x382   :  { %v2833_v42 = vmul.f32 %v2810_v40, %v2753_v30  ;;  %v2754_v43 = vmul.f32 %v15262_v38, %v17708_v5  ;;  %v2818_v51 = vrot.slane %v2778_v31, %v17751_v47  ;;  %v2862_v54 = vrot.slane %v17628_v18, %v17760_v58  ;;  %v15162_v30 = vld [vmem:[%s20286_s27 + $0x190] sm:$0xff]   ;;  %v15163_v31 = vld [vmem:[%s20286_s27 + $0x158] sm:$0xff]  }
 0x383   :  { %15269 = vrsqrt.f32 %v2742_v61  ;;  %v2832_v63 = vmul.f32 %v2806_v19, %v2752_v9  ;;  %v2911_v50 = vadd.f32 %v2882_v3, %v2831_v39  ;;  %v2786_v57 = vrot.slane %v17632_v21, %v17751_v47  ;;  %v15161_v3 = vld [vmem:[%s20286_s27 + $0x110] sm:$0xff]   ;;  %v15165_v38 = vld [vmem:[%s20286_s27 + $0x198] sm:$0xff]   ;;  %v15166_v9 = vld [vmem:[%s20286_s27 + $0x160] sm:$0xff]  }
 0x384   :  { %v2834_v49 = vmul.f32 %v2814_v20, %v2754_v43  ;;  %v2913_v53 = vadd.f32 %v2890_v35, %v2833_v42  ;;  %v2822_v11 = vrot.slane %v2782_v45, %v17751_v47  ;;  %v2898_v12 = vrot.slane %v2858_v48, %v17757_v56  ;;  %v15164_v35 = vld [vmem:[%s20286_s27 + $0x118] sm:$0xff]   ;;  %v15167_v61 = vld [vmem:[%s20286_s27 + $0x120] sm:$0xff]   ;;  %v15169_v43 = vld [vmem:[%s20286_s27 + $0x168] sm:$0xff]  }
 0x385   :  { %v2912_v4 = vadd.f32 %v2886_v34, %v2832_v63  ;;  %v2790_v18 = vrot.slane %v17632_v21, %v17754_v52  ;;  %v3044_v22 = vpack.c.bf16 %v2911_v50, %v2911_v50  ;;  %v2866_v62 = vrot.slane %v17632_v21, %v17757_v56  ;;  %v15168_v42 = vld [vmem:[%s20286_s27 + $0x1a0] sm:$0xff]   ;;  %v15171_v63 = vld [vmem:[%s20286_s27 + $0x1a8] sm:$0xff]   ;;  %v15172_v45 = vld [vmem:[%s20286_s27 + $0x170] sm:$0xff]  }
 0x386   :  { %v15264_v5 = vpop.eup %15263  ;;  %v2914_v13 = vadd.f32 %v2894_v44, %v2834_v49  ;;  %v3046_v37 = vpack.c.bf16 %v2913_v53, %v2913_v53  ;;  %v2902_v52 = vrot.slane %v2862_v54, %v17757_v56  ;;  %v2826_v15 = vrot.slane %v2786_v57, %v17751_v47  ;;  %v15170_v44 = vld [vmem:[%s20286_s27 + $0x128] sm:$0xff]   ;;  %v15173_v48 = vld [vmem:[%s20286_s27 + $0x130] sm:$0xff]   ;;  %v15175_v50 = vld [vmem:[%s20286_s27 + $0x178] sm:$0xff]  }
 0x387   :  { %v2755_v59 = vmul.f32 %v15264_v5, %v17724_v46  ;;  %v3045_v0 = vpack.c.bf16 %v2912_v4, %v2912_v4  ;;  %v15157_v46 = vld [vmem:[%s20286_s27 + $0x148] sm:$0xff]   ;;  %v2870_v32 = vrot.slane %v17632_v21, %v17760_v58  ;;  %v2830_v19 = vrot.slane %v2790_v18, %v17751_v47  ;;  %v15160_v58 = vld [vmem:[%s20286_s27 + $0x150] sm:$0xff]   ;;  %v15177_v4 = vld [vmem:[%s20286_s27 + $0x1b8] sm:$0xff]  }
 0x388   :  { %v15266_v26 = vpop.eup %15265  ;;  %v3047_v2 = vpack.c.bf16 %v2914_v13, %v2914_v13  ;;  %v15159_v21 = vld [vmem:[%s20286_s27 + $0x188] sm:$0xff]   ;;  %v2906_v20 = vrot.slane %v2866_v62, %v17757_v56  ;;  %v15174_v49 = vld [vmem:[%s20286_s27 + $0x1b0] sm:$0xff]   ;;  %v15178_v54 = vld [vmem:[%s20286_s27 + $0x1c0] sm:$0xff]  }
 0x389   :  { %v2835_v6 = vmul.f32 %v2818_v51, %v2755_v59  ;;  %v2756_v36 = vmul.f32 %v15266_v26, %v17730_v55  ;;  %3473 = vmatprep.mubr.bf16.mxu0 %v3045_v0  ;;  %v2910_v28 = vrot.slane %v2870_v32, %v17757_v56  ;;  %v15176_v51 = vld [vmem:[%s20286_s27 + $0x138] sm:$0xff]   ;;  %v15179_v5 = vld [vmem:[%s20286_s27 + $0x1c8] sm:$0xff]   ;;  %v15180_v57 = vld [vmem:[%s20286_s27 + $0x1d0] sm:$0xff]  }
 0x38a   :  { %3513 = vmatprep.mubr.bf16.mxu1 %v3047_v2  ;;  %3474 = vmatmul.mubr.bf16.vlgmr.msra.gmra.mrb[8].mxu0 %v3044_v22  ;;  %v15181_v13 = vld [vmem:[%s20286_s27 + $0x1d8] sm:$0xff]   ;;  %v15182_v59 = vld [vmem:[%s20286_s27 + $0x1e0] sm:$0xff]   ;;  %v15183_v0 = vld [vmem:[%s20286_s27 + $0x1e8] sm:$0xff]  }
 0x38b   :  { %v15268_v40 = vpop.eup %15267  ;;  %3514 = vmatmul.mubr.bf16.vlgmr.msra.gmra.mrb[8].mxu1 %v3046_v37  ;;  %13449 = vmatpush3.bf16.msra.mxu0 %v15155_v1  ;;  %v2836_v41 = vmul.f32 %v2822_v11, %v2756_v36  ;;  %v17825_v55 = vadd.f32 %v2898_v12, %v2835_v6  ;;  %v15184_v1 = vld [vmem:[%s20286_s27 + $0x1f0] ss:$0 sps:$4 sm:$0xff]   ;;  %v15185_v26 = vld [vmem:[#allocation13] ss:$40 sps:$4 sm:$0xff]   ;;  %v15188_v2 = vld [vmem:[#allocation13 + $0x10] ss:$40 sps:$4 sm:$0xff]  }
 0x38c   :  { %v2757_v16 = vmul.f32 %v15268_v40, %v17734_v60  ;;  %3562 = vmatpush1.bf16.msra.mxu1 %v15156_v27  ;;  %13450 = vmatprep.subr.bf16.mxu0 %v15157_v46  ;;  %v3439_v11 = vsel %vm2392_vm0, %v15184_v1, 0  ;;  %v15187_v18 = vld [vmem:[#allocation13 + $0x4] ss:$40 sps:$4 sm:$0xff]   ;;  %v15190_v22 = vld [vmem:[#allocation13 + $0x14] ss:$40 sps:$4 sm:$0xff]  }
 0x38d   :  { %v15270_v24 = vpop.eup %15269  ;;  %3563 = vmatprep.subr.bf16.mxu1 %v15759_v17  ;;  %v2916_v25 = vadd.f32 %v2902_v52, %v2836_v41  ;;  %v3048_v53 = vpack.c.bf16 %v17825_v55, %v17825_v55  ;;  %v15193_v27 = vld [vmem:[#allocation13 + $0x54] ss:$40 sps:$4 sm:$0xff]   ;;  %v15196_v46 = vld [vmem:[#allocation13 + $0x64] ss:$40 sps:$4 sm:$0xff]   ;;  %v15191_v62 = vld [vmem:[#allocation13 + $0x50] ss:$40 sps:$4 sm:$0xff]  }
 0x38e   :  { %v2837_v8 = vmul.f32 %v2826_v15, %v2757_v16  ;;  %v2758_v60 = vmul.f32 %v15270_v24, %v17744_v14  ;;  %v15194_v6 = vld [vmem:[#allocation13 + $0x60] ss:$40 sps:$4 sm:$0xff]   ;;  %v15199_v36 = vld [vmem:[#allocation13 + $0xa4] ss:$40 sps:$4 sm:$0xff]   ;;  %v15202_v37 = vld [vmem:[#allocation13 + $0xb4] ss:$40 sps:$4 sm:$0xff]  }
 0x38f   :  { %13451 = vmatpush3.bf16.msra.mxu0 %v15158_v33  ;;  %v3049_v29 = vpack.c.bf16 %v2916_v25, %v2916_v25  ;;  %v15197_v52 = vld [vmem:[#allocation13 + $0xa0] ss:$40 sps:$4 sm:$0xff]   ;;  %v15200_v15 = vld [vmem:[#allocation13 + $0xb0] ss:$40 sps:$4 sm:$0xff]   ;;  %v15205_v32 = vld [vmem:[#allocation13 + $0xf4] ss:$40 sps:$4 sm:$0xff]  }
 0x390   :  { %v2838_v23 = vmul.f32 %v2830_v19, %v2758_v60  ;;  %3564 = vmatpush1.bf16.msra.mxu1 %v15159_v21  ;;  %13452 = vmatprep.subr.bf16.mxu0 %v15160_v58  ;;  %v17848_v14 = vadd.f32 %v2906_v20, %v2837_v8  ;;  %v15208_v40 = vld [vmem:[#allocation13 + $0x104] ss:$40 sps:$4 sm:$0xff]   ;;  %v15203_v33 = vld [vmem:[#allocation13 + $0xf0] ss:$40 sps:$4 sm:$0xff]   ;;  %v15206_v41 = vld [vmem:[#allocation13 + $0x100] ss:$40 sps:$4 sm:$0xff]  }
 0x391   :  { %3553 = vmatprep.mubr.bf16.mxu0 %v3049_v29  ;;  %3565 = vmatprep.subr.bf16.mxu1 %v15759_v17  ;;  %v3643_v55 = vld [vmem:[#allocation13 + $0x140] sm:$0xff]  ;;  %v3645_v16 = vld [vmem:[#allocation13 + $0x150] sm:$0xff] }
 0x392   :  { %v2918_v34 = vadd.f32 %v2910_v28, %v2838_v23  ;;  %v3050_v12 = vpack.c.bf16 %v17848_v14, %v17848_v14  ;;  %v13002_v19 = vcombine.high %v3643_v55, %v3643_v55  ;;  %v13006_v21 = vcombine.high %v3645_v16, %v3645_v16  ;;  %v15215_v8 = vld [vmem:[#allocation13 + $0xc] ss:$40 sps:$4 sm:$0xff]   ;;  %v15219_v1 = vld [vmem:[#allocation13 + $0x58] ss:$40 sps:$4 sm:$0xff]  }
 0x393   :  { %13453 = vmatpush3.bf16.msra.mxu0 %v15161_v3  ;;  %v13001_v58 = vcombine.low %v3643_v55, %v3643_v55  ;;  %v13005_v20 = vcombine.low %v3645_v16, %v3645_v16  ;;  %v15218_v60 = vld [vmem:[#allocation13 + $0x24] ss:$40 sps:$4 sm:$0xff]   ;;  %v12896_v3 = vld [vmem:[#allocation11] ss:$0 sm:$0xff]  ;;  %v15241_v55 = vld [vmem:[#allocation13 + $0x18] ss:$40 sps:$4 sm:$0xff]  }
 0x394   :  { %3566 = vmatpush1.bf16.msra.mxu1 %v15162_v30  ;;  %13454 = vmatprep.subr.bf16.mxu0 %v15163_v31  ;;  %v3051_v39 = vpack.c.bf16 %v2918_v34, %v2918_v34  ;;  %v15246_v16 = vld [vmem:[#allocation13 + $0x6c] ss:$40 sps:$4 sm:$0xff]  }
 0x395   :  { %3567 = vmatprep.subr.bf16.mxu1 %v15759_v17  ;;  %v3879_v24 = vsel %vm2392_vm0, %v13001_v58, 0  ;;  %v3891_v25 = vsel %vm2392_vm0, %v13005_v20, 0  ;;  %v15247_v58 = vld [vmem:[#allocation13 + $0xb8] ss:$40 sps:$4 sm:$0xff]   ;;  %v15252_v20 = vld [vmem:[#allocation13 + $0x10c] ss:$40 sps:$4 sm:$0xff]  }
 0x396   :  { %12960 = vmatprep.mubr.msk.bf16.mxu1 %vm3434_vm4, %v3051_v39 }
 0x397   :  { %13455 = vmatpush3.bf16.msra.mxu0 %v15164_v35 }
 0x398   :  { %3568 = vmatpush1.bf16.msra.mxu1 %v15165_v38  ;;  %13456 = vmatprep.subr.bf16.mxu0 %v15166_v9 }
 0x399   :  { %3569 = vmatprep.subr.bf16.mxu1 %v15759_v17 }
 0x39b   :  { %13457 = vmatpush3.bf16.msra.mxu0 %v15167_v61 }
 0x39c   :  { %3570 = vmatpush1.bf16.msra.mxu1 %v15168_v42  ;;  %13458 = vmatprep.subr.bf16.mxu0 %v15169_v43 }
 0x39d   :  { %3571 = vmatprep.subr.bf16.mxu1 %v15759_v17 }
 0x39f   :  { %13459 = vmatpush3.bf16.msra.mxu0 %v15170_v44 }
 0x3a0   :  { %3572 = vmatpush1.bf16.msra.mxu1 %v15171_v63  ;;  %13460 = vmatprep.subr.bf16.mxu0 %v15172_v45 }
 0x3a1   :  { %3573 = vmatprep.subr.bf16.mxu1 %v15759_v17 }
 0x3a3   :  { %13461 = vmatpush3.bf16.msra.mxu0 %v15173_v48 }
 0x3a4   :  { %3574 = vmatpush1.bf16.msra.mxu1 %v15174_v49  ;;  %13462 = vmatprep.subr.bf16.mxu0 %v15175_v50 }
 0x3a5   :  { %3575 = vmatprep.subr.bf16.mxu1 %v15759_v17 }
 0x3a7   :  { %13463 = vmatpush3.bf16.msra.mxu0 %v15176_v51 }
 0x3a8   :  { %3576 = vmatpush1.bf16.msra.mxu1 %v15177_v4  ;;  %3908 = vmatprep.subr.bf16.mxu0 %v15187_v18  ;;  %v15225_v18 = vld [vmem:[#allocation13 + $0xa8] ss:$40 sps:$4 sm:$0xff]  }
 0x3a9   :  { %3577 = vmatprep.subr.bf16.mxu1 %v15759_v17 }
 0x3aa   :  { %3554 = vmatmul.mubr.bf16.vlgmr.msra.gmra.mrb[12].mxu0 %v3048_v53 }
 0x3ab   :  { %3940 = vmatprep.mubr.bf16.mxu0 %v15759_v17  ;;  %3909 = vmatpush1.bf16.msra.mxu0 %v15185_v26  ;;  %v15230_v26 = vld [vmem:[#allocation13 + $0xc4] ss:$40 sps:$4 sm:$0xff]  }
 0x3ac   :  { %3578 = vmatpush1.bf16.msra.mxu1 %v15178_v54  ;;  %3910 = vmatprep.subr.bf16.mxu0 %v15193_v27  ;;  %v15236_v27 = vld [vmem:[#allocation13 + $0x114] ss:$40 sps:$4 sm:$0xff]  }
 0x3ad   :  { %3579 = vmatprep.subr.bf16.mxu1 %v15759_v17 }
 0x3af   :  { %3911 = vmatpush1.bf16.msra.mxu0 %v15191_v62  ;;  %v3647_v62 = vld [vmem:[#allocation13 + $0x160] sm:$0xff] }
 0x3b0   :  { %3580 = vmatpush1.bf16.msra.mxu1 %v15179_v5  ;;  %3912 = vmatprep.subr.bf16.mxu0 %v15199_v36  ;;  %v15213_v5 = vld [vmem:[#allocation13 + $0x8] ss:$40 sps:$4 sm:$0xff]  }
 0x3b1   :  { %3581 = vmatprep.subr.bf16.mxu1 %v15759_v17  ;;  %v15234_v36 = vld [vmem:[#allocation13 + $0x110] ss:$40 sps:$4 sm:$0xff]  }
 0x3b3   :  { %3913 = vmatpush1.bf16.msra.mxu0 %v15197_v52  ;;  %v13010_v52 = vcombine.high %v3647_v62, %v3647_v62 }
 0x3b4   :  { %3582 = vmatpush1.bf16.msra.mxu1 %v15180_v57  ;;  %3914 = vmatprep.subr.bf16.mxu0 %v15205_v32  ;;  %v15216_v57 = vld [vmem:[#allocation13 + $0x20] ss:$40 sps:$4 sm:$0xff]   ;;  %v13009_v32 = vcombine.low %v3647_v62, %v3647_v62 }
 0x3b5   :  { %3583 = vmatprep.subr.bf16.mxu1 %v15759_v17  ;;  %v4666_v62 = vld [vmem:[#allocation16 + $0x98] sm:$0xff] }
 0x3b7   :  { %3915 = vmatpush1.bf16.msra.mxu0 %v15203_v33  ;;  %v3903_v33 = vsel %vm2392_vm0, %v13009_v32, 0  ;;  %v4668_v32 = vld [vmem:[#allocation16 + $0xa8] sm:$0xff] }
 0x3b8   :  { %3584 = vmatpush1.bf16.msra.mxu1 %v15181_v13  ;;  %13011 = vmatprep.subr.msk.bf16.mxu0 %vm2392_vm0, %v13002_v19  ;;  %v15244_v19 = vld [vmem:[#allocation13 + $0x68] ss:$40 sps:$4 sm:$0xff]  }
 0x3b9   :  { %3585 = vmatprep.subr.bf16.mxu1 %v15759_v17 }
 0x3bb   :  { %3917 = vmatpush1.bf16.msra.mxu0 %v3879_v24  ;;  %v3646_v24 = vld [vmem:[#allocation13 + $0x158] sm:$0xff] }
 0x3bc   :  { %3586 = vmatpush1.bf16.msra.mxu1 %v15182_v59  ;;  %3949 = vmatprep.subr.bf16.mxu0 %v15215_v8  ;;  %v15221_v59 = vld [vmem:[#allocation13 + $0x5c] ss:$40 sps:$4 sm:$0xff]   ;;  %v13008_v8 = vcombine.high %v3646_v24, %v3646_v24 }
 0x3bd   :  { %3587 = vmatprep.subr.bf16.mxu1 %v15759_v17 }
 0x3c0   :  { %3588 = vmatpush1.bf16.msra.mxu1 %v15183_v0  ;;  %v15224_v0 = vld [vmem:[#allocation13 + $0x74] ss:$40 sps:$4 sm:$0xff]  }
 0x3c1   :  { %3589 = vmatprep.subr.bf16.mxu1 %v15759_v17 }
 0x3c4   :  { %3590 = vmatpush1.bf16.msra.mxu1 %v3439_v11  ;;  %v15222_v11 = vld [vmem:[#allocation13 + $0x70] ss:$40 sps:$4 sm:$0xff]  }
 0x3c5   :  { %3990 = vmatprep.subr.bf16.mxu1 %v15190_v22  ;;  %v15233_v22 = vld [vmem:[#allocation13 + $0xfc] ss:$40 sps:$4 sm:$0xff]  }
 0x3c7   :  { %3594 = vmatmul.mubr.bf16.vlgmr.msra.gmra.mrb[12].mxu1 %v3050_v12  ;;  %v15227_v12 = vld [vmem:[#allocation13 + $0xac] ss:$40 sps:$4 sm:$0xff]  }
 0x3c8   :  { %4022 = vmatprep.mubr.bf16.mxu1 %v15759_v17  ;;  %3991 = vmatpush1.bf16.msra.mxu1 %v15188_v2  ;;  %v15228_v2 = vld [vmem:[#allocation13 + $0xc0] ss:$40 sps:$4 sm:$0xff]  }
 0x3c9   :  { %3992 = vmatprep.subr.bf16.mxu1 %v15196_v46  ;;  %v3644_v46 = vld [vmem:[#allocation13 + $0x148] sm:$0xff] }
 0x3cc   :  { %3993 = vmatpush1.bf16.msra.mxu1 %v15194_v6  ;;  %v15231_v6 = vld [vmem:[#allocation13 + $0xf8] ss:$40 sps:$4 sm:$0xff]  }
 0x3cd   :  { %3994 = vmatprep.subr.bf16.mxu1 %v15202_v37  ;;  %v13004_v37 = vcombine.high %v3644_v46, %v3644_v46 }
 0x3d0   :  { %3995 = vmatpush1.bf16.msra.mxu1 %v15200_v15  ;;  %v13003_v15 = vcombine.low %v3644_v46, %v3644_v46  ;;  %v4665_v46 = vld [vmem:[#allocation16 + $0x90] sm:$0xff] }
 0x3d1   :  { %3996 = vmatprep.subr.bf16.mxu1 %v15208_v40 }
 0x3d2   :  { %v3885_v40 = vsel %vm2392_vm0, %v13003_v15, 0  ;;  %v4667_v15 = vld [vmem:[#allocation16 + $0xa0] sm:$0xff] }
 0x3d4   :  { %3997 = vmatpush1.bf16.msra.mxu1 %v15206_v41  ;;  %v15243_v41 = vld [vmem:[#allocation13 + $0x1c] ss:$40 sps:$4 sm:$0xff]  }
 0x3d5   :  { %13015 = vmatprep.subr.msk.bf16.mxu1 %vm2392_vm0, %v13006_v21  ;;  %v15249_v21 = vld [vmem:[#allocation13 + $0xbc] ss:$40 sps:$4 sm:$0xff]  }
 0x3d8   :  { %3999 = vmatpush1.bf16.msra.mxu1 %v3891_v25  ;;  %v15250_v25 = vld [vmem:[#allocation13 + $0x108] ss:$40 sps:$4 sm:$0xff]  }
 0x3d9   :  { %4072 = vmatprep.subr.bf16.mxu1 %v15218_v60  ;;  %v13007_v60 = vcombine.low %v3646_v24, %v3646_v24 }
 0x45d   :  { %v13420_v28 = vpop.f32.mrb[8].mxu0 }
 0x45e   :  { %v13442_v29 = vpop.f32.mrb[8].mxu1  ;;  %v13421_v23 = vpop.f32.mrb[9].mxu0 }
 0x45f   :  { %v13422_v30 = vadd.f32 %v13421_v23, %v13420_v28  ;;  %v13443_v31 = vpop.f32.mrb[9].mxu1  ;;  %v13423_v14 = vpop.f32.mrb[10].mxu0  ;;  %v3897_v28 = vsel %vm2392_vm0, %v13007_v60, 0  ;;  %v4664_v23 = vld [vmem:[#allocation16 + $0x88] sm:$0xff] }
 0x460   :  { %v13444_v34 = vadd.f32 %v13443_v31, %v13442_v29  ;;  %v13445_v35 = vpop.f32.mrb[10].mxu1  ;;  %v13424_v38 = vpop.f32.mrb[11].mxu0  ;;  %v15772_v29 = vmov 0.0   ;;  %v4648_v14 = vld [vmem:[#allocation16 + $0x8] sm:$0xff] }
 0x461   :  { %v3476_v39 = vadd.f32 %v13422_v30, %v12896_v3  ;;  %v13446_v9 = vpop.f32.mrb[11].mxu1  ;;  %v4663_v3 = vld [vmem:[#allocation16 + $0x80] sm:$0xff] }
 0x462   :  { %v4647_v30 = vld [vmem:[#allocation16] sm:$0xff]  ;;  %v14103_v31 = vpack.c.bf16 %v4664_v23, %v4663_v3  ;;  %v4656_v3 = vld [vmem:[#allocation16 + $0x48] sm:$0xff] }
 0x463   :  { %v3516_v61 = vadd.f32 %v13444_v34, %v3476_v39  ;;  %v14105_v34 = vpack.c.bf16 %v4648_v14, %v4647_v30  ;;  %v4673_v30 = vld [vmem:[#allocation16 + $0xd0] sm:$0xff] }
 0x47d   :  { %v13464_v42 = vpop.f32.mrb[12].mxu0 }
 0x47e   :  { %v13465_v43 = vpop.f32.mrb[13].mxu0 }
 0x47f   :  { %v13466_v44 = vadd.f32 %v13465_v43, %v13464_v42  ;;  %v13467_v63 = vpop.f32.mrb[14].mxu0 }
 0x480   :  { %v13468_v45 = vpop.f32.mrb[15].mxu0 }
 0x481   :  { %v3556_v48 = vadd.f32 %v13466_v44, %v3516_v61 }
 0x49a   :  { %v3595_v49 = vpop.f32.mrb[12].mxu1 }
 0x49b   :  { %v3596_v50 = vadd.f32 %v3595_v49, %v3556_v48  ;;  %v3597_v51 = vpop.f32.mrb[13].mxu1 }
 0x49c   :  { %v3598_v4 = vpop.f32.mrb[14].mxu1 }
 0x49d   :  { %v3601_v53 = vmax.f32 %v3596_v50, 0.0  ;;  %v3599_v54 = vpop.f32.mrb[15].mxu1  ;;  %v13021_v50 = vld [vmem:[%s20287_s25 + $0x10] sm:$0xff] }
 0x49f   :  { %v17937_v13 = vpack.c.bf16 %v3601_v53, %v3601_v53 }
 0x4a1   :  { %13012 = vmatmul.mubr.msk.bf16.vlgmr.msra.gmra.mrb[16].mxu0 %vm3874_vm5, %v17937_v13  ;;  %13016 = vmatmul.mubr.msk.bf16.vlgmr.msra.gmra.mrb[16].mxu1 %vm3874_vm5, %v17937_v13 }
 0x4a2   :  { %3950 = vmatpush1.bf16.msra.mxu0 %v15213_v5  ;;  %4073 = vmatpush1.bf16.msra.mxu1 %v15216_v57  ;;  %v13022_v5 = vld [vmem:[%s20287_s25 + $0x18] sm:$0x3] }
 0x4a3   :  { %3951 = vmatprep.subr.bf16.mxu0 %v15221_v59  ;;  %4074 = vmatprep.subr.bf16.mxu1 %v15224_v0  ;;  %v13029_v59 = vld [vmem:[%s20287_s25 + $0x30] sm:$0xff] }
 0x4a4   :  { %3981 = vmatprep.mubr.bf16.mxu0 %v15759_v17  ;;  %4104 = vmatprep.mubr.bf16.mxu1 %v15759_v17 }
 0x4a6   :  { %3952 = vmatpush1.bf16.msra.mxu0 %v15219_v1  ;;  %4075 = vmatpush1.bf16.msra.mxu1 %v15222_v11  ;;  %v13030_v11 = vld [vmem:[%s20287_s25 + $0x38] sm:$0x3] }
 0x4a7   :  { %3953 = vmatprep.subr.bf16.mxu0 %v15227_v12  ;;  %4076 = vmatprep.subr.bf16.mxu1 %v15230_v26  ;;  %v13035_v12 = vld [vmem:[%s20287_s25 + $0x40] sm:$0xff]  ;;  %v13036_v26 = vld [vmem:[%s20287_s25 + $0x48] sm:$0x3] }
 0x4aa   :  { %3954 = vmatpush1.bf16.msra.mxu0 %v15225_v18  ;;  %4077 = vmatpush1.bf16.msra.mxu1 %v15228_v2  ;;  %v4113_v18 = vld [vmem:[%s20287_s25] sm:$0xff]  ;;  %v4114_v2 = vld [vmem:[%s20287_s25 + $0x8] sm:$0x3] }
 0x4ab   :  { %3955 = vmatprep.subr.bf16.mxu0 %v15233_v22  ;;  %4078 = vmatprep.subr.bf16.mxu1 %v15236_v27  ;;  %v13027_v22 = vld [vmem:[%s20287_s25 + $0x20] sm:$0xff]  ;;  %v13028_v27 = vld [vmem:[%s20287_s25 + $0x28] sm:$0x3] }
 0x4ae   :  { %3956 = vmatpush1.bf16.msra.mxu0 %v15231_v6  ;;  %4079 = vmatpush1.bf16.msra.mxu1 %v15234_v36  ;;  %v14107_v6 = vpack.c.bf16 %v4666_v62, %v4665_v46  ;;  %v4649_v36 = vld [vmem:[#allocation16 + $0x10] sm:$0xff] }
 0x4af   :  { %13013 = vmatprep.subr.msk.bf16.mxu0 %vm2392_vm0, %v13004_v37  ;;  %13019 = vmatprep.subr.msk.bf16.mxu1 %vm2392_vm0, %v13010_v52  ;;  %v4650_v37 = vld [vmem:[#allocation16 + $0x18] sm:$0xff] }
 0x4b0   :  { %v14109_v52 = vpack.c.bf16 %v4650_v37, %v4649_v36 }
 0x4b2   :  { %3958 = vmatpush1.bf16.msra.mxu0 %v3885_v40  ;;  %4081 = vmatpush1.bf16.msra.mxu1 %v3903_v33  ;;  %v14111_v40 = vpack.c.bf16 %v4668_v32, %v4667_v15  ;;  %v4651_v33 = vld [vmem:[#allocation16 + $0x20] sm:$0xff] }
 0x4b3   :  { %4031 = vmatprep.subr.bf16.mxu0 %v15243_v41  ;;  %14104 = vmatprep.subr.bf16.mxu1 %v14103_v31  ;;  %v4652_v41 = vld [vmem:[#allocation16 + $0x28] sm:$0xff]  ;;  %v4674_v31 = vld [vmem:[#allocation16 + $0xd8] sm:$0xff] }
 0x4b4   :  { %v14123_v14 = vpack.c.bf16 %v4674_v31, %v4673_v30 }
 0x4b5   :  { %13014 = vmatmul.mubr.msk.bf16.vlgmr.msra.gmra.mrb[20].mxu0 %vm3874_vm5, %v17937_v13  ;;  %13020 = vmatmul.mubr.msk.bf16.vlgmr.msra.gmra.mrb[20].mxu1 %vm3874_vm5, %v17937_v13 }
 0x4b6   :  { %4032 = vmatpush1.bf16.msra.mxu0 %v15241_v55  ;;  %4063 = vmatprep.mubr.bf16.mxu0 %v15759_v17  ;;  %v14113_v55 = vpack.c.bf16 %v4652_v41, %v4651_v33 }
 0x4b7   :  { %4033 = vmatprep.subr.bf16.mxu0 %v15246_v16  ;;  %14106 = vmatpush3.bf16.msra.mxu1 %v14105_v34  ;;  %v4669_v16 = vld [vmem:[#allocation16 + $0xb0] sm:$0xff] }
 0x4b8   :  { %14108 = vmatprep.subr.bf16.mxu1 %v14107_v6  ;;  %v4657_v34 = vld [vmem:[#allocation16 + $0x50] sm:$0xff] }
 0x4ba   :  { %4034 = vmatpush1.bf16.msra.mxu0 %v15244_v19  ;;  %v4670_v19 = vld [vmem:[#allocation16 + $0xb8] sm:$0xff] }
 0x4bb   :  { %4035 = vmatprep.subr.bf16.mxu0 %v15249_v21  ;;  %14110 = vmatpush3.bf16.msra.mxu1 %v14109_v52  ;;  %v14115_v21 = vpack.c.bf16 %v4670_v19, %v4669_v16 }
 0x4bc   :  { %14112 = vmatprep.subr.bf16.mxu1 %v14111_v40 }
 0x4be   :  { %4036 = vmatpush1.bf16.msra.mxu0 %v15247_v58  ;;  %v4653_v58 = vld [vmem:[#allocation16 + $0x30] sm:$0xff] }
 0x4bf   :  { %4037 = vmatprep.subr.bf16.mxu0 %v15252_v20  ;;  %14114 = vmatpush3.bf16.msra.mxu1 %v14113_v55  ;;  %v4654_v20 = vld [vmem:[#allocation16 + $0x38] sm:$0xff] }
 0x4c0   :  { %v14117_v24 = vpack.c.bf16 %v4654_v20, %v4653_v58  ;;  %14116 = vmatprep.subr.bf16.mxu1 %v14115_v21 }
 0x4c2   :  { %4038 = vmatpush1.bf16.msra.mxu0 %v15250_v25  ;;  %v4671_v25 = vld [vmem:[#allocation16 + $0xc0] sm:$0xff] }
 0x4c3   :  { %13017 = vmatprep.subr.msk.bf16.mxu0 %vm2392_vm0, %v13008_v8  ;;  %14118 = vmatpush3.bf16.msra.mxu1 %v14117_v24  ;;  %v4672_v8 = vld [vmem:[#allocation16 + $0xc8] sm:$0xff] }
 0x4c4   :  { %v14119_v60 = vpack.c.bf16 %v4672_v8, %v4671_v25 }
 0x4c6   :  { %4040 = vmatpush1.bf16.msra.mxu0 %v3897_v28  ;;  %v4655_v28 = vld [vmem:[#allocation16 + $0x40] sm:$0xff]  ;;  %14120 = vmatprep.subr.bf16.mxu1 %v14119_v60 }
 0x4c7   :  { %v14121_v23 = vpack.c.bf16 %v4656_v3, %v4655_v28 }
 0x4c9   :  { %13018 = vmatmul.mubr.msk.bf16.vlgmr.msra.gmra.mrb[24].mxu0 %vm3874_vm5, %v17937_v13  ;;  %14122 = vmatpush3.bf16.msra.mxu1 %v14121_v23 }
 0x4ca   :  { %4195 = vmatprep.mubr.f32.mxu0 %v15772_v29  ;;  %14124 = vmatprep.subr.bf16.mxu1 %v14123_v14 }
 0x574   :  { %v3942_v35 = vpop.f32.mrb[16].mxu0  ;;  %v4024_v38 = vpop.f32.mrb[16].mxu1 }
 0x575   :  { %v3944_v39 = vpop.f32.mrb[17].mxu0  ;;  %v4026_v9 = vpop.f32.mrb[17].mxu1 }
 0x576   :  { %v3946_v61 = vpop.f32.mrb[18].mxu0  ;;  %v4028_v42 = vpop.f32.mrb[18].mxu1 }
 0x577   :  { %v3947_v43 = vpop.f32.mrb[19].mxu0  ;;  %v4029_v44 = vpop.f32.mrb[19].mxu1  ;;  %v4659_v61 = vld [vmem:[#allocation16 + $0x60] sm:$0xff]  ;;  %v4660_v42 = vld [vmem:[#allocation16 + $0x68] sm:$0xff] }
 0x578   :  { %v4677_v44 = vld [vmem:[#allocation16 + $0xf0] sm:$0xff] }
 0x588   :  { %v3983_v63 = vpop.f32.mrb[20].mxu0  ;;  %v4106_v45 = vpop.f32.mrb[20].mxu1 }
 0x589   :  { %v3985_v48 = vpop.f32.mrb[21].mxu0  ;;  %v4108_v49 = vpop.f32.mrb[21].mxu1 }
 0x58a   :  { %v3987_v51 = vpop.f32.mrb[22].mxu0  ;;  %v4110_v4 = vpop.f32.mrb[22].mxu1  ;;  %13023 = vmatprep.subr.msk.mxu0 %vm2589_vm2, %v3985_v48 }
 0x58b   :  { %v3988_v53 = vpop.f32.mrb[23].mxu0  ;;  %v4111_v54 = vpop.f32.mrb[23].mxu1  ;;  %13024 = vmatpush1.msk.msra.mxu0 %vm2589_vm2, %v3983_v63  ;;  %v4678_v63 = vld [vmem:[#allocation16 + $0xf8] sm:$0xff] }
 0x58c   :  { %13025 = vmatmul.mubr.msk.f32.vlgmr.msra.gmra.mrb[28].mxu0 %vm4118_vm6, %v13021_v50  ;;  %v14131_v48 = vpack.c.bf16 %v4678_v63, %v4677_v44  ;;  %v4662_v50 = vld [vmem:[#allocation16 + $0x78] sm:$0xff] }
 0x58d   :  { %4201 = vmatprep.mubr.f32.mxu0 %v15772_v29  ;;  %v18019_v4 = vld [vmem:[#allocation14] sm:$0x77] }
 0x58e   :  { %v4585_v53 = vrot.slane %v18019_v4, %v17609_v7  ;;  %v4589_v54 = vrot.slane %v18019_v4, %v17616_v10 }
 0x590   :  { %13026 = vmatmul.mubr.msk.f32.gmra.mrb[30].mxu0 %vm4118_vm6, %v13022_v5  ;;  %v4595_v5 = vrot.slane %v4585_v53, %v17609_v7  ;;  %v4776_v53 = vld [vmem:[#allocation17] sm:$0xff] }
 0x591   :  { %4290 = vmatprep.mubr.f32.mxu0 %v15772_v29 }
 0x59c   :  { %v4065_v57 = vpop.f32.mrb[24].mxu0 }
 0x59d   :  { %v4067_v13 = vpop.f32.mrb[25].mxu0 }
 0x59e   :  { %v4069_v0 = vpop.f32.mrb[26].mxu0  ;;  %13031 = vmatprep.subr.msk.mxu0 %vm2589_vm2, %v4067_v13 }
 0x59f   :  { %v4070_v1 = vpop.f32.mrb[27].mxu0  ;;  %13032 = vmatpush1.msk.msra.mxu0 %vm2589_vm2, %v4065_v57  ;;  %v4599_v57 = vrot.slane %v4589_v54, %v17609_v7  ;;  %v4778_v54 = vld [vmem:[#allocation17 + $0x10] sm:$0xff] }
 0x5a0   :  { %13033 = vmatmul.mubr.msk.f32.vlgmr.msra.gmra.mrb[28].mxu0 %vm4118_vm6, %v13029_v59  ;;  %13037 = vmatprep.subr.msk.mxu0 %vm2589_vm2, %v4108_v49  ;;  %v4661_v49 = vld [vmem:[#allocation16 + $0x70] sm:$0xff] }
 0x5a1   :  { %13038 = vmatpush1.msk.msra.mxu0 %vm2589_vm2, %v4106_v45  ;;  %4296 = vmatprep.mubr.f32.mxu0 %v15772_v29  ;;  %v14129_v45 = vpack.c.bf16 %v4660_v42, %v4659_v61  ;;  %v14133_v51 = vpack.c.bf16 %v4662_v50, %v4661_v49  ;;  %v4777_v49 = vld [vmem:[#allocation17 + $0x8] sm:$0xff]  ;;  %v4779_v50 = vld [vmem:[#allocation17 + $0x18] sm:$0xff] }
 0x5a2   :  { %13041 = vmatprep.subr.msk.mxu0 %vm2589_vm2, %v3944_v39 }
 0x5a4   :  { %13034 = vmatmul.mubr.msk.f32.gmra.mrb[30].mxu0 %vm4118_vm6, %v13030_v11 }
 0x5a5   :  { %4382 = vmatprep.mubr.f32.mxu0 %v15772_v29 }
 0x5a8   :  { %13039 = vmatmul.mubr.msk.f32.vlgmr.msra.gmra.mrb[28].mxu0 %vm4118_vm6, %v13035_v12 }
 0x5a9   :  { %13042 = vmatpush1.msk.msra.mxu0 %vm2589_vm2, %v3942_v35  ;;  %4388 = vmatprep.mubr.f32.mxu0 %v15772_v29  ;;  %v4658_v35 = vld [vmem:[#allocation16 + $0x58] sm:$0xff] }
 0x5aa   :  { %13045 = vmatprep.subr.msk.mxu0 %vm2589_vm2, %v4026_v9  ;;  %v14125_v39 = vpack.c.bf16 %v4658_v35, %v4657_v34  ;;  %v4676_v9 = vld [vmem:[#allocation16 + $0xe8] sm:$0xff] }
 0x5ac   :  { %13040 = vmatmul.mubr.msk.f32.gmra.mrb[30].mxu0 %vm4118_vm6, %v13036_v26  ;;  %14126 = vmatpush3.bf16.msra.mxu1 %v14125_v39 }
 0x5ad   :  { %4471 = vmatprep.mubr.f32.mxu0 %v15772_v29 }
 0x5b0   :  { %13043 = vmatmul.mubr.msk.f32.vlgmr.msra.gmra.mrb[28].mxu0 %vm4118_vm6, %v4113_v18 }
 0x5b1   :  { %13046 = vmatpush1.msk.msra.mxu0 %vm2589_vm2, %v4024_v38  ;;  %4477 = vmatprep.mubr.f32.mxu0 %v15772_v29  ;;  %v4675_v38 = vld [vmem:[#allocation16 + $0xe0] sm:$0xff] }
 0x5b2   :  { %v14127_v43 = vpack.c.bf16 %v4676_v9, %v4675_v38 }
 0x5b4   :  { %13044 = vmatmul.mubr.msk.f32.gmra.mrb[30].mxu0 %vm4118_vm6, %v4114_v2  ;;  %14128 = vmatprep.subr.bf16.mxu1 %v14127_v43 }
 0x5b5   :  { %4560 = vmatprep.mubr.f32.mxu0 %v15772_v29  ;;  %14130 = vmatpush3.bf16.msra.mxu1 %v14129_v45 }
 0x5b6   :  { %14132 = vmatprep.subr.bf16.mxu1 %v14131_v48 }
 0x5b8   :  { %13047 = vmatmul.mubr.msk.f32.vlgmr.msra.gmra.mrb[28].mxu0 %vm4118_vm6, %v13027_v22 }
 0x5b9   :  { %4566 = vmatprep.mubr.f32.mxu0 %v15772_v29  ;;  %14134 = vmatpush3.bf16.msra.mxu1 %v14133_v51  ;;  %v14135_v51 = vpack.c.bf16 %v4779_v50, %v4777_v49 }
 0x5bb   :  { %14136 = vmatprep.subr.bf16.mxu0 %v14135_v51 }
 0x5bc   :  { %13048 = vmatmul.mubr.msk.f32.gmra.mrb[30].mxu0 %vm4118_vm6, %v13028_v27 }
 0x5bd   :  { %4872 = vmatprep.mubr.f32.mxu0 %v15772_v29 }
 0x68b   :  { %v4562_v13 = vpop.f32.mrb[28].mxu0 }
 0x68c   :  { %v4564_v59 = vpop.f32.mrb[29].mxu0  ;;  %v4600_v0 = vadd.f32 %v4595_v5, %v4562_v13  ;;  %v4783_v13 = vld [vmem:[#allocation17 + $0x38] sm:$0xff] }
 0x68d   :  { %v4601_v1 = vadd.f32 %v4599_v57, %v4564_v59 }
 0x68e   :  { %v18027_v18 = vmax.f32 %v4600_v0, 0.0  ;;  %v4780_v0 = vld [vmem:[#allocation17 + $0x20] sm:$0xff] }
 0x68f   :  { %v4568_v11 = vpop.f32.mrb[30].mxu0  ;;  %v18029_v22 = vmax.f32 %v4601_v1, 0.0  ;;  %v4782_v1 = vld [vmem:[#allocation17 + $0x30] sm:$0xff] }
 0x690   :  { %v4602_v12 = vadd.f32 %v4595_v5, %v4568_v11  ;;  %v4570_v26 = vpop.f32.mrb[31].mxu0  ;;  %v4624_v36 = vmul.f32 %v18027_v18, %v18027_v18  ;;  %v14137_v5 = vpack.c.bf16 %v4778_v54, %v4776_v53  ;;  %v14141_v11 = vpack.c.bf16 %v4782_v1, %v4780_v0 }
 0x691   :  { %v4603_v2 = vadd.f32 %v4599_v57, %v4570_v26  ;;  %v4625_v32 = vmul.f32 %v18029_v22, %v18029_v22  ;;  %v4781_v57 = vld [vmem:[#allocation17 + $0x28] sm:$0xff]  ;;  %v4787_v26 = vld [vmem:[#allocation17 + $0x58] sm:$0xff] }
 0x692   :  { %v18031_v27 = vmax.f32 %v4602_v12, 0.0  ;;  %14138 = vmatpush1.bf16.msra.mxu0 %v14137_v5  ;;  %v14139_v59 = vpack.c.bf16 %v4783_v13, %v4781_v57  ;;  %v4785_v12 = vld [vmem:[#allocation17 + $0x48] sm:$0xff] }
 0x693   :  { %v18033_v46 = vmax.f32 %v4603_v2, 0.0  ;;  %v14143_v2 = vpack.c.bf16 %v4787_v26, %v4785_v12 }
 0x694   :  { %v4608_v62 = vsel %vm2589_vm2, %v18031_v27, 0.0  ;;  %v4626_v6 = vmul.f32 %v18031_v27, %v18031_v27  ;;  %14140 = vmatprep.subr.bf16.mxu0 %v14139_v59 }
 0x695   :  { %v4609_v37 = vadd.f32 %v4608_v62, %v18027_v18  ;;  %v4616_v52 = vsel %vm2589_vm2, %v18033_v46, 0.0  ;;  %v4627_v15 = vmul.f32 %v18033_v46, %v18033_v46  ;;  %v4784_v62 = vld [vmem:[#allocation17 + $0x40] sm:$0xff] }
 0x696   :  { %v4628_v40 = vsel %vm2589_vm2, %v4626_v6, 0.0  ;;  %v4617_v33 = vadd.f32 %v4616_v52, %v18029_v22  ;;  %14142 = vmatpush1.bf16.msra.mxu0 %v14141_v11  ;;  %v4786_v6 = vld [vmem:[#allocation17 + $0x50] sm:$0xff]  ;;  %v4791_v52 = vld [vmem:[#allocation17 + $0x78] sm:$0xff] }
 0x697   :  { %v4610_v41 = vrot.slane %v4609_v37, 4  ;;  %v4629_v55 = vadd.f32 %v4628_v40, %v4624_v36  ;;  %v4636_v16 = vsel %vm2589_vm2, %v4627_v15, 0.0  ;;  %v14145_v36 = vpack.c.bf16 %v4786_v6, %v4784_v62  ;;  %14144 = vmatprep.subr.bf16.mxu0 %v14143_v2  ;;  %v4790_v40 = vld [vmem:[#allocation17 + $0x70] sm:$0xff] }
 0x698   :  { %v4618_v19 = vrot.slane %v4617_v33, 4  ;;  %v4637_v21 = vadd.f32 %v4636_v16, %v4625_v32  ;;  %v4788_v32 = vld [vmem:[#allocation17 + $0x60] sm:$0xff] }
 0x699   :  { %v4611_v58 = vadd.f32 %v4610_v41, %v4609_v37  ;;  %v4630_v20 = vrot.slane %v4629_v55, 4  ;;  %v4789_v37 = vld [vmem:[#allocation17 + $0x68] sm:$0xff] }
 0x69a   :  { %v4619_v24 = vadd.f32 %v4618_v19, %v4617_v33  ;;  %v4638_v25 = vrot.slane %v4637_v21, 4  ;;  %14146 = vmatpush1.bf16.msra.mxu0 %v14145_v36  ;;  %v14147_v15 = vpack.c.bf16 %v4791_v52, %v4789_v37  ;;  %v14149_v33 = vpack.c.bf16 %v4790_v40, %v4788_v32  ;;  %v4793_v41 = vld [vmem:[#allocation17 + $0x88] sm:$0xff]  ;;  %v4792_v19 = vld [vmem:[#allocation17 + $0x80] sm:$0xff] }
 0x69b   :  { %v4612_v8 = vrot.slane %v4611_v58, 2  ;;  %v4631_v60 = vadd.f32 %v4630_v20, %v4629_v55  ;;  %v4795_v55 = vld [vmem:[#allocation17 + $0x98] sm:$0xff]  ;;  %v4797_v20 = vld [vmem:[#allocation17 + $0xa8] sm:$0xff] }
 0x69c   :  { %v4620_v28 = vrot.slane %v4619_v24, 2  ;;  %v4639_v3 = vadd.f32 %v4638_v25, %v4637_v21  ;;  %14148 = vmatprep.subr.bf16.mxu0 %v14147_v15  ;;  %v14151_v16 = vpack.c.bf16 %v4795_v55, %v4793_v41  ;;  %v4794_v21 = vld [vmem:[#allocation17 + $0x90] sm:$0xff] }
 0x69d   :  { %v4613_v23 = vadd.f32 %v4612_v8, %v4611_v58  ;;  %v4632_v30 = vrot.slane %v4631_v60, 2  ;;  %v14153_v58 = vpack.c.bf16 %v4794_v21, %v4792_v19  ;;  %v4796_v8 = vld [vmem:[#allocation17 + $0xa0] sm:$0xff] }
 0x69e   :  { %v4621_v31 = vadd.f32 %v4620_v28, %v4619_v24  ;;  %v4640_v14 = vrot.slane %v4639_v3, 2  ;;  %14150 = vmatpush1.bf16.msra.mxu0 %v14149_v33  ;;  %v4799_v24 = vld [vmem:[#allocation17 + $0xb8] sm:$0xff] }
 0x69f   :  { %v4633_v34 = vadd.f32 %v4632_v30, %v4631_v60  ;;  %v4614_v39 = vrot.slane %v4613_v23, 1  ;;  %14152 = vmatprep.subr.bf16.mxu0 %v14151_v16  ;;  %v14155_v25 = vpack.c.bf16 %v4799_v24, %v4797_v20  ;;  %v4798_v60 = vld [vmem:[#allocation17 + $0xb0] sm:$0xff] }
 0x6a0   :  { %v4622_v35 = vrot.slane %v4621_v31, 1  ;;  %v4641_v38 = vadd.f32 %v4640_v14, %v4639_v3  ;;  %v14157_v28 = vpack.c.bf16 %v4798_v60, %v4796_v8  ;;  %v4801_v3 = vld [vmem:[#allocation17 + $0xc8] sm:$0xff]  ;;  %v4802_v14 = vld [vmem:[#allocation17 + $0xd0] sm:$0xff] }
 0x6a1   :  { %v4634_v9 = vrot.slane %v4633_v34, 1  ;;  %v4615_v63 = vadd.f32 %v4614_v39, %v4613_v23  ;;  %v4803_v23 = vld [vmem:[#allocation17 + $0xd8] sm:$0xff] }
 0x6a2   :  { %v4642_v61 = vrot.slane %v4641_v38, 1  ;;  %v4623_v43 = vadd.f32 %v4622_v35, %v4621_v31  ;;  %14154 = vmatpush1.bf16.msra.mxu0 %v14153_v58  ;;  %v14159_v30 = vpack.c.bf16 %v4803_v23, %v4801_v3  ;;  %v4800_v31 = vld [vmem:[#allocation17 + $0xc0] sm:$0xff]  ;;  %v4805_v35 = vld [vmem:[#allocation17 + $0xe8] sm:$0xff] }
 0x6a3   :  { %v4635_v42 = vadd.f32 %v4634_v9, %v4633_v34  ;;  %14156 = vmatprep.subr.bf16.mxu0 %v14155_v25  ;;  %v14161_v34 = vpack.c.bf16 %v4802_v14, %v4800_v31  ;;  %v4804_v9 = vld [vmem:[#allocation17 + $0xe0] sm:$0xff] }
 0x6a4   :  { %v4643_v44 = vadd.f32 %v4642_v61, %v4641_v38  ;;  %v4807_v38 = vld [vmem:[#allocation17 + $0xf8] sm:$0xff]  ;;  %v4806_v61 = vld [vmem:[#allocation17 + $0xf0] sm:$0xff] }
 0x6a5   :  { %v4645_v48 = vsel %vm4644_vm7, %v4615_v63, %v4635_v42  ;;  %v14163_v39 = vpack.c.bf16 %v4807_v38, %v4805_v35  ;;  %v14165_v42 = vpack.c.bf16 %v4806_v61, %v4804_v9 }
 0x6a6   :  { %v4646_v45 = vsel %vm4644_vm7, %v4623_v43, %v4643_v44  ;;  %14158 = vmatpush1.bf16.msra.mxu0 %v14157_v28 }
 0x6a7   :  { %4743 = vmatprep.mubr.f32.mxu1 %v4646_v45  ;;  %14160 = vmatprep.subr.bf16.mxu0 %v14159_v30 }
 0x6a8   :  { %4744 = vmatmul.mubr.f32.vlgmr.msra.gmra.mrb[24].mxu1 %v4645_v48 }
 0x6aa   :  { %14162 = vmatpush1.bf16.msra.mxu0 %v14161_v34 }
 0x6ab   :  { %14164 = vmatprep.subr.bf16.mxu0 %v14163_v39 }
 0x6ae   :  { %14166 = vmatpush1.bf16.msra.mxu0 %v14165_v42 }
 0x77b   :  { %v13502_v43 = vpop.f32.mrb[24].mxu1 }
 0x77c   :  { %v13503_v44 = vpop.f32.mrb[25].mxu1 }
 0x77d   :  { %v13504_v63 = vadd.f32 %v13503_v44, %v13502_v43 }
 0x77f   :  { %v4749_v45 = vmul.f32 0.02, %v13504_v63 }
 0x781   :  { %v4750_v48 = vmul.f32 %v4749_v45, %v4749_v45 }
 0x783   :  { %v4752_v49 = vrot.slane %v4750_v48, 7 }
 0x785   :  { %v4754_v50 = vsub.f32 %v4749_v45, %v4752_v49 }
 0x787   :  { %v4755_v51 = vadd.f32 1e-05, %v4754_v50 }
 0x789   :  { %15271 = vrsqrt.f32 %v4755_v51 }
 0x793   :  { %v15272_v53 = vpop.eup %15271 }
 0x794   :  { %v4757_v54 = vmul.f32 %v15272_v53, %v18019_v4 }
 0x796   :  { %v4762_v5 = vrot.slane %v4757_v54, %v17751_v47 }
 0x798   :  { %v4764_v57 = vmul.f32 %v4762_v5, %v4749_v45 }
 0x79a   :  { %v4766_v13 = vrot.slane %v4764_v57, 6 }
 0x79c   :  { %v4768_v59 = vsub.f32 %v18019_v4, %v4766_v13 }
 0x79e   :  { %v4773_v0 = vrot.slane %v4768_v59, %v17757_v56 }
 0x7a0   :  { %v4775_v1 = vsel %vm4644_vm7, %v4762_v5, %v4773_v0 }
 0x7a1   :  { %4873 = vmatmul.mubr.f32.vlgmr.msra.gmra.mrb[32].mxu0 %v4775_v1 }
 0x874   :  { %v4874_v11 = vpop.f32.mrb[32].mxu0 }
 0x875   :  { %v4882_v12 = vrot.slane %v4874_v11, %v17609_v7  ;;  %v4876_v26 = vpop.f32.mrb[33].mxu0  ;;  %v4894_v36 = vrot.slane %v4874_v11, %v17751_v47 }
 0x876   :  { %v4886_v2 = vrot.slane %v4876_v26, %v17609_v7  ;;  %v4898_v52 = vrot.slane %v4876_v26, %v17751_v47 }
 0x877   :  { %v4887_v62 = vmul.f32 %v4882_v12, %v18027_v18  ;;  %v4889_v6 = vmul.f32 %v4882_v12, %v18031_v27 }
 0x878   :  { %v4888_v37 = vmul.f32 %v4886_v2, %v18029_v22  ;;  %v4890_v4 = vmul.f32 %v4886_v2, %v18033_v46 }
 0x879   :  { %v18066_v15 = vadd.f32 %v4894_v36, %v4887_v62  ;;  %v18068_v32 = vadd.f32 %v4894_v36, %v4889_v6 }
 0x87a   :  { %v4900_v40 = vadd.f32 %v4898_v52, %v4888_v37  ;;  %v4902_v33 = vadd.f32 %v4898_v52, %v4890_v4 }
 0x87b   :  { %15729 = dma.done.wait [#allocation5], 30720 }
 0x87c   :  { %15730 = vsyncadd [#allocation5], 4294936576  ;;  %v18070_v41 = vpack.c.bf16 %v4902_v33, %v4900_v40  ;;  %v4910_v18 = vld [vmem:[#allocation2 + $0x8] sm:$0xff]  ;;  %v4909_v22 = vld [vmem:[#allocation2] sm:$0xff]  ;;  %vm5502_vm8 = vcmask 80896   ;;  %vm15773_vm9 = vmmov 1  }
 0x87d   :  { %v4925_v27 = vld [vmem:[#allocation2 + $0x80] sm:$0xff]  ;;  %5151 = vmatprep.subr.bf16.mxu0 %v4910_v18  ;;  %v4924_v46 = vld [vmem:[#allocation2 + $0x78] sm:$0xff]  ;;  %v4939_v16 = vld [vmem:[#allocation2 + $0xf0] sm:$0xff]  ;;  %vm15775_vm11 = vmmov 0  }
 0x87e   :  { %5183 = vmatprep.mubr.bf16.mxu0 %v18070_v41  ;;  %5269 = vmatprep.mubr.bf16.mxu1 %v18070_v41  ;;  %v4940_v55 = vld [vmem:[#allocation2 + $0xf8] sm:$0xff]  ;;  %v4955_v19 = vld [vmem:[#allocation2 + $0x170] sm:$0xff]  ;;  %v4954_v21 = vld [vmem:[#allocation2 + $0x168] sm:$0xff] }
 0x87f   :  { %5152 = vmatpush1.bf16.msra.mxu0 %v4909_v22  ;;  %v4914_v58 = vld [vmem:[#allocation2 + $0x28] sm:$0xff]  ;;  %v4913_v20 = vld [vmem:[#allocation2 + $0x20] sm:$0xff]  ;;  %v4928_v8 = vld [vmem:[#allocation2 + $0x98] sm:$0xff] }
 0x880   :  { %5153 = vmatprep.subr.bf16.mxu0 %v4925_v27  ;;  %v4970_v24 = vld [vmem:[#allocation2 + $0x1e8] sm:$0xff]  ;;  %5237 = vmatprep.subr.bf16.mxu1 %v4914_v58  ;;  %v4929_v25 = vld [vmem:[#allocation2 + $0xa0] sm:$0xff]  ;;  %v4944_v28 = vld [vmem:[#allocation2 + $0x118] sm:$0xff] }
 0x881   :  { %5238 = vmatpush1.bf16.msra.mxu1 %v4913_v20  ;;  %v4969_v60 = vld [vmem:[#allocation2 + $0x1e0] sm:$0xff]  ;;  %v4943_v23 = vld [vmem:[#allocation2 + $0x110] sm:$0xff]  ;;  %v4984_v30 = vld [vmem:[#allocation2 + $0x258] sm:$0xff] }
 0x882   :  { %5239 = vmatprep.subr.bf16.mxu1 %v4929_v25  ;;  %v4985_v3 = vld [vmem:[#allocation2 + $0x260] sm:$0xff]  ;;  %v4959_v31 = vld [vmem:[#allocation2 + $0x190] sm:$0xff]  ;;  %v5000_v14 = vld [vmem:[#allocation2 + $0x2d8] sm:$0xff] }
 0x883   :  { %5154 = vmatpush1.bf16.msra.mxu0 %v4924_v46  ;;  %v4958_v34 = vld [vmem:[#allocation2 + $0x188] sm:$0xff]  ;;  %v4999_v35 = vld [vmem:[#allocation2 + $0x2d0] sm:$0xff]  ;;  %v4973_v9 = vld [vmem:[#allocation2 + $0x200] sm:$0xff] }
 0x884   :  { %5155 = vmatprep.subr.bf16.mxu0 %v4940_v55  ;;  %v4974_v38 = vld [vmem:[#allocation2 + $0x208] sm:$0xff]  ;;  %v5015_v39 = vld [vmem:[#allocation2 + $0x350] sm:$0xff]  ;;  %v4989_v42 = vld [vmem:[#allocation2 + $0x280] sm:$0xff] }
 0x885   :  { %5240 = vmatpush1.bf16.msra.mxu1 %v4928_v8  ;;  %v5014_v61 = vld [vmem:[#allocation2 + $0x348] sm:$0xff]  ;;  %v4988_v44 = vld [vmem:[#allocation2 + $0x278] sm:$0xff]  ;;  %v5029_v63 = vld [vmem:[#allocation2 + $0x3c0] sm:$0xff] }
 0x886   :  { %5241 = vmatprep.subr.bf16.mxu1 %v4944_v28  ;;  %v5030_v43 = vld [vmem:[#allocation2 + $0x3c8] sm:$0xff]  ;;  %v5004_v45 = vld [vmem:[#allocation2 + $0x2f8] sm:$0xff]  ;;  %v5045_v48 = vld [vmem:[#allocation2 + $0x440] sm:$0xff] }
 0x887   :  { %5156 = vmatpush1.bf16.msra.mxu0 %v4939_v16  ;;  %v5003_v49 = vld [vmem:[#allocation2 + $0x2f0] sm:$0xff]  ;;  %v5044_v50 = vld [vmem:[#allocation2 + $0x438] sm:$0xff]  ;;  %v5018_v54 = vld [vmem:[#allocation2 + $0x368] sm:$0xff]  ;;  %v18076_v16 = vpack.c.bf16 %v18068_v32, %v18066_v15 }
 0x888   :  { %5157 = vmatprep.subr.bf16.mxu0 %v4955_v19  ;;  %v5019_v51 = vld [vmem:[#allocation2 + $0x370] sm:$0xff]  ;;  %v5060_v53 = vld [vmem:[#allocation2 + $0x4b8] sm:$0xff]  ;;  %v5034_v57 = vld [vmem:[#allocation2 + $0x3e8] sm:$0xff] }
 0x889   :  { %5242 = vmatpush1.bf16.msra.mxu1 %v4943_v23  ;;  %v5059_v5 = vld [vmem:[#allocation2 + $0x4b0] sm:$0xff]  ;;  %v5033_v59 = vld [vmem:[#allocation2 + $0x3e0] sm:$0xff]  ;;  %v5074_v0 = vld [vmem:[#allocation2 + $0x528] sm:$0xff] }
 0x88a   :  { %5243 = vmatprep.subr.bf16.mxu1 %v4959_v31  ;;  %v5075_v13 = vld [vmem:[#allocation2 + $0x530] sm:$0xff]  ;;  %v5049_v1 = vld [vmem:[#allocation2 + $0x460] sm:$0xff]  ;;  %v5090_v11 = vld [vmem:[#allocation2 + $0x5a8] sm:$0xff] }
 0x88b   :  { %5158 = vmatpush1.bf16.msra.mxu0 %v4954_v21  ;;  %v5048_v12 = vld [vmem:[#allocation2 + $0x458] sm:$0xff]  ;;  %v5089_v26 = vld [vmem:[#allocation2 + $0x5a0] sm:$0xff]  ;;  %v5063_v6 = vld [vmem:[#allocation2 + $0x4d0] sm:$0xff] }
 0x88c   :  { %5159 = vmatprep.subr.bf16.mxu0 %v4970_v24  ;;  %v5064_v2 = vld [vmem:[#allocation2 + $0x4d8] sm:$0xff]  ;;  %v5105_v62 = vld [vmem:[#allocation2 + $0x620] sm:$0xff]  ;;  %v5079_v37 = vld [vmem:[#allocation2 + $0x550] sm:$0xff] }
 0x88d   :  { %5244 = vmatpush1.bf16.msra.mxu1 %v4958_v34  ;;  %v5104_v36 = vld [vmem:[#allocation2 + $0x618] sm:$0xff]  ;;  %v5078_v52 = vld [vmem:[#allocation2 + $0x548] sm:$0xff]  ;;  %v5119_v40 = vld [vmem:[#allocation2 + $0x690] sm:$0xff] }
 0x88e   :  { %5245 = vmatprep.subr.bf16.mxu1 %v4974_v38  ;;  %v5120_v4 = vld [vmem:[#allocation2 + $0x698] sm:$0xff]  ;;  %v5094_v33 = vld [vmem:[#allocation2 + $0x5c8] sm:$0xff]  ;;  %v5135_v18 = vld [vmem:[#allocation2 + $0x710] sm:$0xff] }
 0x88f   :  { %5160 = vmatpush1.bf16.msra.mxu0 %v4969_v60  ;;  %v5093_v22 = vld [vmem:[#allocation2 + $0x5c0] sm:$0xff]  ;;  %v5134_v27 = vld [vmem:[#allocation2 + $0x708] sm:$0xff]  ;;  %v4912_v55 = vld [vmem:[#allocation2 + $0x18] sm:$0xff] }
 0x890   :  { %5161 = vmatprep.subr.bf16.mxu0 %v4985_v3  ;;  %v5109_v46 = vld [vmem:[#allocation2 + $0x640] sm:$0xff]  ;;  %v5108_v19 = vld [vmem:[#allocation2 + $0x638] sm:$0xff]  ;;  %v4911_v21 = vld [vmem:[#allocation2 + $0x10] sm:$0xff] }
 0x891   :  { %5246 = vmatpush1.bf16.msra.mxu1 %v4973_v9  ;;  %v5124_v58 = vld [vmem:[#allocation2 + $0x6b8] sm:$0xff]  ;;  %v4927_v20 = vld [vmem:[#allocation2 + $0x90] sm:$0xff]  ;;  %v4926_v25 = vld [vmem:[#allocation2 + $0x88] sm:$0xff] }
 0x892   :  { %5247 = vmatprep.subr.bf16.mxu1 %v4989_v42  ;;  %v5123_v24 = vld [vmem:[#allocation2 + $0x6b0] sm:$0xff]  ;;  %v4942_v15 = vld [vmem:[#allocation2 + $0x108] sm:$0xff]  ;;  %v4941_v60 = vld [vmem:[#allocation2 + $0x100] sm:$0xff] }
 0x893   :  { %5162 = vmatpush1.bf16.msra.mxu0 %v4984_v30  ;;  %v5139_v8 = vld [vmem:[#allocation2 + $0x730] sm:$0xff]  ;;  %v5138_v32 = vld [vmem:[#allocation2 + $0x728] sm:$0xff]  ;;  %v4957_v3 = vld [vmem:[#allocation2 + $0x180] sm:$0xff] }
 0x894   :  { %5163 = vmatprep.subr.bf16.mxu0 %v5000_v14  ;;  %v4918_v28 = vld [vmem:[#allocation2 + $0x48] sm:$0xff]  ;;  %v4917_v23 = vld [vmem:[#allocation2 + $0x40] sm:$0xff]  ;;  %v4956_v30 = vld [vmem:[#allocation2 + $0x178] sm:$0xff] }
 0x895   :  { %5248 = vmatpush1.bf16.msra.mxu1 %v4988_v44  ;;  %v4933_v31 = vld [vmem:[#allocation2 + $0xc0] sm:$0xff]  ;;  %v4972_v14 = vld [vmem:[#allocation2 + $0x1f8] sm:$0xff]  ;;  %v4947_v9 = vld [vmem:[#allocation2 + $0x130] sm:$0xff] }
 0x896   :  { %5249 = vmatprep.subr.bf16.mxu1 %v5004_v45  ;;  %v4932_v34 = vld [vmem:[#allocation2 + $0xb8] sm:$0xff]  ;;  %v4963_v42 = vld [vmem:[#allocation2 + $0x1b0] sm:$0xff]  ;;  %v4962_v44 = vld [vmem:[#allocation2 + $0x1a8] sm:$0xff] }
 0x897   :  { %5164 = vmatpush1.bf16.msra.mxu0 %v4999_v35  ;;  %v4971_v35 = vld [vmem:[#allocation2 + $0x1f0] sm:$0xff]  ;;  %v4948_v38 = vld [vmem:[#allocation2 + $0x138] sm:$0xff]  ;;  %v4978_v45 = vld [vmem:[#allocation2 + $0x228] sm:$0xff] }
 0x898   :  { %5165 = vmatprep.subr.bf16.mxu0 %v5015_v39  ;;  %v4987_v39 = vld [vmem:[#allocation2 + $0x270] sm:$0xff]  ;;  %vm18109_vm10 = vmpackc.low %vm2589_vm2, %vm15773_vm9 }
 0x899   :  { %5250 = vmatpush1.bf16.msra.mxu1 %v5003_v49  ;;  %v4977_v49 = vld [vmem:[#allocation2 + $0x220] sm:$0xff] }
 0x89a   :  { %5251 = vmatprep.subr.bf16.mxu1 %v5019_v51  ;;  %v4993_v51 = vld [vmem:[#allocation2 + $0x2a0] sm:$0xff] }
 0x89b   :  { %5166 = vmatpush1.bf16.msra.mxu0 %v5014_v61  ;;  %v4986_v61 = vld [vmem:[#allocation2 + $0x268] sm:$0xff] }
 0x89c   :  { %5167 = vmatprep.subr.bf16.mxu0 %v5030_v43  ;;  %v5002_v43 = vld [vmem:[#allocation2 + $0x2e8] sm:$0xff] }
 0x89d   :  { %5252 = vmatpush1.bf16.msra.mxu1 %v5018_v54  ;;  %v4992_v54 = vld [vmem:[#allocation2 + $0x298] sm:$0xff] }
 0x89e   :  { %5253 = vmatprep.subr.bf16.mxu1 %v5034_v57  ;;  %v5008_v57 = vld [vmem:[#allocation2 + $0x318] sm:$0xff] }
 0x89f   :  { %5168 = vmatpush1.bf16.msra.mxu0 %v5029_v63  ;;  %v5001_v63 = vld [vmem:[#allocation2 + $0x2e0] sm:$0xff] }
 0x8a0   :  { %5169 = vmatprep.subr.bf16.mxu0 %v5045_v48  ;;  %v5017_v48 = vld [vmem:[#allocation2 + $0x360] sm:$0xff] }
 0x8a1   :  { %5254 = vmatpush1.bf16.msra.mxu1 %v5033_v59  ;;  %v5007_v59 = vld [vmem:[#allocation2 + $0x310] sm:$0xff] }
 0x8a2   :  { %5255 = vmatprep.subr.bf16.mxu1 %v5049_v1  ;;  %v5023_v1 = vld [vmem:[#allocation2 + $0x390] sm:$0xff] }
 0x8a3   :  { %5170 = vmatpush1.bf16.msra.mxu0 %v5044_v50  ;;  %v5016_v50 = vld [vmem:[#allocation2 + $0x358] sm:$0xff] }
 0x8a4   :  { %5171 = vmatprep.subr.bf16.mxu0 %v5060_v53  ;;  %v5032_v53 = vld [vmem:[#allocation2 + $0x3d8] sm:$0xff] }
 0x8a5   :  { %5256 = vmatpush1.bf16.msra.mxu1 %v5048_v12  ;;  %v5022_v12 = vld [vmem:[#allocation2 + $0x388] sm:$0xff] }
 0x8a6   :  { %5257 = vmatprep.subr.bf16.mxu1 %v5064_v2  ;;  %v5038_v2 = vld [vmem:[#allocation2 + $0x408] sm:$0xff] }
 0x8a7   :  { %5172 = vmatpush1.bf16.msra.mxu0 %v5059_v5  ;;  %v5031_v5 = vld [vmem:[#allocation2 + $0x3d0] sm:$0xff] }
 0x8a8   :  { %5173 = vmatprep.subr.bf16.mxu0 %v5075_v13  ;;  %v5047_v13 = vld [vmem:[#allocation2 + $0x450] sm:$0xff] }
 0x8a9   :  { %5258 = vmatpush1.bf16.msra.mxu1 %v5063_v6  ;;  %v5037_v6 = vld [vmem:[#allocation2 + $0x400] sm:$0xff] }
 0x8aa   :  { %5259 = vmatprep.subr.bf16.mxu1 %v5079_v37  ;;  %v5053_v37 = vld [vmem:[#allocation2 + $0x480] sm:$0xff] }
 0x8ab   :  { %5174 = vmatpush1.bf16.msra.mxu0 %v5074_v0  ;;  %v5046_v0 = vld [vmem:[#allocation2 + $0x448] sm:$0xff] }
 0x8ac   :  { %5175 = vmatprep.subr.bf16.mxu0 %v5090_v11  ;;  %v5062_v11 = vld [vmem:[#allocation2 + $0x4c8] sm:$0xff] }
 0x8ad   :  { %5260 = vmatpush1.bf16.msra.mxu1 %v5078_v52  ;;  %v5052_v52 = vld [vmem:[#allocation2 + $0x478] sm:$0xff] }
 0x8ae   :  { %5261 = vmatprep.subr.bf16.mxu1 %v5094_v33  ;;  %v5068_v33 = vld [vmem:[#allocation2 + $0x4f8] sm:$0xff] }
 0x8af   :  { %5176 = vmatpush1.bf16.msra.mxu0 %v5089_v26  ;;  %v5061_v26 = vld [vmem:[#allocation2 + $0x4c0] sm:$0xff] }
 0x8b0   :  { %5177 = vmatprep.subr.bf16.mxu0 %v5105_v62  ;;  %v5077_v62 = vld [vmem:[#allocation2 + $0x540] sm:$0xff] }
 0x8b1   :  { %5262 = vmatpush1.bf16.msra.mxu1 %v5093_v22  ;;  %v5067_v22 = vld [vmem:[#allocation2 + $0x4f0] sm:$0xff] }
 0x8b2   :  { %5263 = vmatprep.subr.bf16.mxu1 %v5109_v46  ;;  %v5083_v46 = vld [vmem:[#allocation2 + $0x570] sm:$0xff] }
 0x8b3   :  { %5178 = vmatpush1.bf16.msra.mxu0 %v5104_v36  ;;  %v5076_v36 = vld [vmem:[#allocation2 + $0x538] sm:$0xff] }
 0x8b4   :  { %5179 = vmatprep.subr.bf16.mxu0 %v5120_v4  ;;  %v5092_v4 = vld [vmem:[#allocation2 + $0x5b8] sm:$0xff] }
 0x8b5   :  { %5264 = vmatpush1.bf16.msra.mxu1 %v5108_v19  ;;  %v5082_v19 = vld [vmem:[#allocation2 + $0x568] sm:$0xff] }
 0x8b6   :  { %5265 = vmatprep.subr.bf16.mxu1 %v5124_v58  ;;  %v5098_v58 = vld [vmem:[#allocation2 + $0x5e8] sm:$0xff] }
 0x8b7   :  { %5180 = vmatpush1.bf16.msra.mxu0 %v5119_v40  ;;  %v5091_v40 = vld [vmem:[#allocation2 + $0x5b0] sm:$0xff] }
 0x8b8   :  { %5181 = vmatprep.subr.bf16.mxu0 %v5135_v18  ;;  %v5107_v18 = vld [vmem:[#allocation2 + $0x630] sm:$0xff] }
 0x8b9   :  { %5266 = vmatpush1.bf16.msra.mxu1 %v5123_v24  ;;  %v5097_v24 = vld [vmem:[#allocation2 + $0x5e0] sm:$0xff] }
 0x8ba   :  { %5267 = vmatprep.subr.bf16.mxu1 %v5139_v8  ;;  %v5113_v8 = vld [vmem:[#allocation2 + $0x660] sm:$0xff] }
 0x8bb   :  { %5182 = vmatpush1.bf16.msra.mxu0 %v5134_v27  ;;  %v5106_v27 = vld [vmem:[#allocation2 + $0x628] sm:$0xff] }
 0x8bc   :  { %5194 = vmatprep.subr.bf16.mxu0 %v4912_v55  ;;  %v5122_v55 = vld [vmem:[#allocation2 + $0x6a8] sm:$0xff] }
 0x8bd   :  { %5268 = vmatpush1.bf16.msra.mxu1 %v5138_v32  ;;  %v5112_v32 = vld [vmem:[#allocation2 + $0x658] sm:$0xff] }
 0x8be   :  { %5184 = vmatmul.mubr.bf16.vlgmr.msra.gmra.mrb[36].mxu0 %v18076_v16  ;;  %5323 = vmatprep.subr.bf16.mxu1 %v4918_v28  ;;  %v5128_v28 = vld [vmem:[#allocation2 + $0x6d8] sm:$0xff] }
 0x8bf   :  { %5195 = vmatpush1.bf16.msra.mxu0 %v4911_v21  ;;  %5226 = vmatprep.mubr.bf16.mxu0 %v18070_v41  ;;  %v5121_v21 = vld [vmem:[#allocation2 + $0x6a0] sm:$0xff] }
 0x8c0   :  { %5196 = vmatprep.subr.bf16.mxu0 %v4927_v20  ;;  %5270 = vmatmul.mubr.bf16.vlgmr.msra.gmra.mrb[28].mxu1 %v18076_v16  ;;  %v5137_v20 = vld [vmem:[#allocation2 + $0x720] sm:$0xff] }
 0x8c1   :  { %5324 = vmatpush1.bf16.msra.mxu1 %v4917_v23  ;;  %5355 = vmatprep.mubr.bf16.mxu1 %v18070_v41  ;;  %v5127_v23 = vld [vmem:[#allocation2 + $0x6d0] sm:$0xff] }
 0x8c2   :  { %5325 = vmatprep.subr.bf16.mxu1 %v4933_v31  ;;  %v5143_v31 = vld [vmem:[#allocation2 + $0x750] sm:$0xff] }
 0x8c3   :  { %5197 = vmatpush1.bf16.msra.mxu0 %v4926_v25  ;;  %v5136_v25 = vld [vmem:[#allocation2 + $0x718] sm:$0xff] }
 0x8c4   :  { %5198 = vmatprep.subr.bf16.mxu0 %v4942_v15  ;;  %v4916_v15 = vld [vmem:[#allocation2 + $0x38] sm:$0xff] }
 0x8c5   :  { %5326 = vmatpush1.bf16.msra.mxu1 %v4932_v34  ;;  %v5142_v34 = vld [vmem:[#allocation2 + $0x748] sm:$0xff] }
 0x8c6   :  { %5327 = vmatprep.subr.bf16.mxu1 %v4948_v38  ;;  %v4922_v38 = vld [vmem:[#allocation2 + $0x68] sm:$0xff] }
 0x8c7   :  { %5199 = vmatpush1.bf16.msra.mxu0 %v4941_v60  ;;  %v4915_v60 = vld [vmem:[#allocation2 + $0x30] sm:$0xff] }
 0x8c8   :  { %5200 = vmatprep.subr.bf16.mxu0 %v4957_v3  ;;  %v4931_v3 = vld [vmem:[#allocation2 + $0xb0] sm:$0xff] }
 0x8c9   :  { %5328 = vmatpush1.bf16.msra.mxu1 %v4947_v9  ;;  %v4921_v9 = vld [vmem:[#allocation2 + $0x60] sm:$0xff] }
 0x8ca   :  { %5329 = vmatprep.subr.bf16.mxu1 %v4963_v42  ;;  %v4937_v42 = vld [vmem:[#allocation2 + $0xe0] sm:$0xff] }
 0x8cb   :  { %5201 = vmatpush1.bf16.msra.mxu0 %v4956_v30  ;;  %v4930_v30 = vld [vmem:[#allocation2 + $0xa8] sm:$0xff] }
 0x8cc   :  { %5202 = vmatprep.subr.bf16.mxu0 %v4972_v14  ;;  %v4946_v14 = vld [vmem:[#allocation2 + $0x128] sm:$0xff] }
 0x8cd   :  { %5330 = vmatpush1.bf16.msra.mxu1 %v4962_v44  ;;  %v4936_v44 = vld [vmem:[#allocation2 + $0xd8] sm:$0xff] }
 0x8ce   :  { %5331 = vmatprep.subr.bf16.mxu1 %v4978_v45  ;;  %v4952_v45 = vld [vmem:[#allocation2 + $0x158] sm:$0xff] }
 0x8cf   :  { %5203 = vmatpush1.bf16.msra.mxu0 %v4971_v35  ;;  %v4945_v35 = vld [vmem:[#allocation2 + $0x120] sm:$0xff] }
 0x8d0   :  { %5204 = vmatprep.subr.bf16.mxu0 %v4987_v39  ;;  %v4961_v39 = vld [vmem:[#allocation2 + $0x1a0] sm:$0xff] }
 0x8d1   :  { %5332 = vmatpush1.bf16.msra.mxu1 %v4977_v49  ;;  %v4951_v49 = vld [vmem:[#allocation2 + $0x150] sm:$0xff] }
 0x8d2   :  { %5333 = vmatprep.subr.bf16.mxu1 %v4993_v51  ;;  %v4967_v51 = vld [vmem:[#allocation2 + $0x1d0] sm:$0xff] }
 0x8d3   :  { %5205 = vmatpush1.bf16.msra.mxu0 %v4986_v61  ;;  %v4960_v61 = vld [vmem:[#allocation2 + $0x198] sm:$0xff] }
 0x8d4   :  { %5206 = vmatprep.subr.bf16.mxu0 %v5002_v43  ;;  %v4976_v43 = vld [vmem:[#allocation2 + $0x218] sm:$0xff] }
 0x8d5   :  { %5334 = vmatpush1.bf16.msra.mxu1 %v4992_v54  ;;  %v4966_v54 = vld [vmem:[#allocation2 + $0x1c8] sm:$0xff] }
 0x8d6   :  { %5335 = vmatprep.subr.bf16.mxu1 %v5008_v57  ;;  %v4982_v57 = vld [vmem:[#allocation2 + $0x248] sm:$0xff] }
 0x8d7   :  { %5207 = vmatpush1.bf16.msra.mxu0 %v5001_v63  ;;  %v4975_v63 = vld [vmem:[#allocation2 + $0x210] sm:$0xff] }
 0x8d8   :  { %5208 = vmatprep.subr.bf16.mxu0 %v5017_v48  ;;  %v4991_v48 = vld [vmem:[#allocation2 + $0x290] sm:$0xff] }
 0x8d9   :  { %5336 = vmatpush1.bf16.msra.mxu1 %v5007_v59  ;;  %v4981_v59 = vld [vmem:[#allocation2 + $0x240] sm:$0xff] }
 0x8da   :  { %5337 = vmatprep.subr.bf16.mxu1 %v5023_v1  ;;  %v4997_v1 = vld [vmem:[#allocation2 + $0x2c0] sm:$0xff] }
 0x8db   :  { %5209 = vmatpush1.bf16.msra.mxu0 %v5016_v50  ;;  %v4990_v50 = vld [vmem:[#allocation2 + $0x288] sm:$0xff] }
 0x8dc   :  { %5210 = vmatprep.subr.bf16.mxu0 %v5032_v53  ;;  %v5006_v53 = vld [vmem:[#allocation2 + $0x308] sm:$0xff] }
 0x8dd   :  { %5338 = vmatpush1.bf16.msra.mxu1 %v5022_v12  ;;  %v4996_v12 = vld [vmem:[#allocation2 + $0x2b8] sm:$0xff] }
 0x8de   :  { %5339 = vmatprep.subr.bf16.mxu1 %v5038_v2  ;;  %v5012_v2 = vld [vmem:[#allocation2 + $0x338] sm:$0xff] }
 0x8df   :  { %5211 = vmatpush1.bf16.msra.mxu0 %v5031_v5  ;;  %v5005_v5 = vld [vmem:[#allocation2 + $0x300] sm:$0xff] }
 0x8e0   :  { %5212 = vmatprep.subr.bf16.mxu0 %v5047_v13  ;;  %v5021_v13 = vld [vmem:[#allocation2 + $0x380] sm:$0xff] }
 0x8e1   :  { %5340 = vmatpush1.bf16.msra.mxu1 %v5037_v6  ;;  %v5011_v6 = vld [vmem:[#allocation2 + $0x330] sm:$0xff] }
 0x8e2   :  { %5341 = vmatprep.subr.bf16.mxu1 %v5053_v37  ;;  %v5027_v37 = vld [vmem:[#allocation2 + $0x3b0] sm:$0xff] }
 0x8e3   :  { %5213 = vmatpush1.bf16.msra.mxu0 %v5046_v0  ;;  %v5020_v0 = vld [vmem:[#allocation2 + $0x378] sm:$0xff] }
 0x8e4   :  { %5214 = vmatprep.subr.bf16.mxu0 %v5062_v11  ;;  %v5036_v11 = vld [vmem:[#allocation2 + $0x3f8] sm:$0xff] }
 0x8e5   :  { %5342 = vmatpush1.bf16.msra.mxu1 %v5052_v52  ;;  %v5026_v52 = vld [vmem:[#allocation2 + $0x3a8] sm:$0xff] }
 0x8e6   :  { %5343 = vmatprep.subr.bf16.mxu1 %v5068_v33  ;;  %v5042_v33 = vld [vmem:[#allocation2 + $0x428] sm:$0xff] }
 0x8e7   :  { %5215 = vmatpush1.bf16.msra.mxu0 %v5061_v26  ;;  %v5035_v26 = vld [vmem:[#allocation2 + $0x3f0] sm:$0xff] }
 0x8e8   :  { %5216 = vmatprep.subr.bf16.mxu0 %v5077_v62  ;;  %v5051_v62 = vld [vmem:[#allocation2 + $0x470] sm:$0xff] }
 0x8e9   :  { %5344 = vmatpush1.bf16.msra.mxu1 %v5067_v22  ;;  %v5041_v22 = vld [vmem:[#allocation2 + $0x420] sm:$0xff] }
 0x8ea   :  { %5345 = vmatprep.subr.bf16.mxu1 %v5083_v46  ;;  %v5057_v46 = vld [vmem:[#allocation2 + $0x4a0] sm:$0xff] }
 0x8eb   :  { %5217 = vmatpush1.bf16.msra.mxu0 %v5076_v36  ;;  %v5050_v36 = vld [vmem:[#allocation2 + $0x468] sm:$0xff] }
 0x8ec   :  { %5218 = vmatprep.subr.bf16.mxu0 %v5092_v4  ;;  %v5066_v4 = vld [vmem:[#allocation2 + $0x4e8] sm:$0xff] }
 0x8ed   :  { %5346 = vmatpush1.bf16.msra.mxu1 %v5082_v19  ;;  %v5056_v19 = vld [vmem:[#allocation2 + $0x498] sm:$0xff] }
 0x8ee   :  { %5347 = vmatprep.subr.bf16.mxu1 %v5098_v58  ;;  %v5072_v58 = vld [vmem:[#allocation2 + $0x518] sm:$0xff] }
 0x8ef   :  { %5219 = vmatpush1.bf16.msra.mxu0 %v5091_v40  ;;  %v5065_v40 = vld [vmem:[#allocation2 + $0x4e0] sm:$0xff] }
 0x8f0   :  { %5220 = vmatprep.subr.bf16.mxu0 %v5107_v18  ;;  %v5081_v18 = vld [vmem:[#allocation2 + $0x560] sm:$0xff] }
 0x8f1   :  { %5348 = vmatpush1.bf16.msra.mxu1 %v5097_v24  ;;  %v5071_v24 = vld [vmem:[#allocation2 + $0x510] sm:$0xff] }
 0x8f2   :  { %5349 = vmatprep.subr.bf16.mxu1 %v5113_v8  ;;  %v5087_v8 = vld [vmem:[#allocation2 + $0x590] sm:$0xff] }
 0x8f3   :  { %5221 = vmatpush1.bf16.msra.mxu0 %v5106_v27  ;;  %v5080_v27 = vld [vmem:[#allocation2 + $0x558] sm:$0xff] }
 0x8f4   :  { %5222 = vmatprep.subr.bf16.mxu0 %v5122_v55  ;;  %v5096_v55 = vld [vmem:[#allocation2 + $0x5d8] sm:$0xff] }
 0x8f5   :  { %5350 = vmatpush1.bf16.msra.mxu1 %v5112_v32  ;;  %v5086_v32 = vld [vmem:[#allocation2 + $0x588] sm:$0xff] }
 0x8f6   :  { %5351 = vmatprep.subr.bf16.mxu1 %v5128_v28  ;;  %v5102_v28 = vld [vmem:[#allocation2 + $0x608] sm:$0xff] }
 0x8f7   :  { %5223 = vmatpush1.bf16.msra.mxu0 %v5121_v21  ;;  %v5095_v21 = vld [vmem:[#allocation2 + $0x5d0] sm:$0xff] }
 0x8f8   :  { %5224 = vmatprep.subr.bf16.mxu0 %v5137_v20  ;;  %v5111_v20 = vld [vmem:[#allocation2 + $0x650] sm:$0xff] }
 0x8f9   :  { %5352 = vmatpush1.bf16.msra.mxu1 %v5127_v23  ;;  %v5101_v23 = vld [vmem:[#allocation2 + $0x600] sm:$0xff] }
 0x8fa   :  { %5353 = vmatprep.subr.bf16.mxu1 %v5143_v31  ;;  %v5117_v31 = vld [vmem:[#allocation2 + $0x680] sm:$0xff] }
 0x8fb   :  { %5225 = vmatpush1.bf16.msra.mxu0 %v5136_v25  ;;  %v5110_v25 = vld [vmem:[#allocation2 + $0x648] sm:$0xff] }
 0x8fc   :  { %5280 = vmatprep.subr.bf16.mxu0 %v4916_v15  ;;  %v5126_v15 = vld [vmem:[#allocation2 + $0x6c8] sm:$0xff] }
 0x8fd   :  { %5354 = vmatpush1.bf16.msra.mxu1 %v5142_v34  ;;  %v5116_v34 = vld [vmem:[#allocation2 + $0x678] sm:$0xff] }
 0x8fe   :  { %5227 = vmatmul.mubr.bf16.vlgmr.msra.gmra.mrb[40].mxu0 %v18076_v16  ;;  %5409 = vmatprep.subr.bf16.mxu1 %v4922_v38  ;;  %v5132_v38 = vld [vmem:[#allocation2 + $0x6f8] sm:$0xff] }
 0x8ff   :  { %5281 = vmatpush1.bf16.msra.mxu0 %v4915_v60  ;;  %5312 = vmatprep.mubr.bf16.mxu0 %v18070_v41  ;;  %v5125_v60 = vld [vmem:[#allocation2 + $0x6c0] sm:$0xff] }
 0x900   :  { %5282 = vmatprep.subr.bf16.mxu0 %v4931_v3  ;;  %5356 = vmatmul.mubr.bf16.vlgmr.msra.gmra.mrb[32].mxu1 %v18076_v16  ;;  %v5141_v3 = vld [vmem:[#allocation2 + $0x740] sm:$0xff] }
 0x901   :  { %5410 = vmatpush1.bf16.msra.mxu1 %v4921_v9  ;;  %5441 = vmatprep.mubr.bf16.mxu1 %v18070_v41  ;;  %v5131_v9 = vld [vmem:[#allocation2 + $0x6f0] sm:$0xff] }
 0x902   :  { %5411 = vmatprep.subr.bf16.mxu1 %v4937_v42  ;;  %v5147_v42 = vld [vmem:[#allocation2 + $0x770] sm:$0xff] }
 0x903   :  { %5283 = vmatpush1.bf16.msra.mxu0 %v4930_v30  ;;  %v5140_v30 = vld [vmem:[#allocation2 + $0x738] sm:$0xff] }
 0x904   :  { %5284 = vmatprep.subr.bf16.mxu0 %v4946_v14  ;;  %v4920_v14 = vld [vmem:[#allocation2 + $0x58] sm:$0xff] }
 0x905   :  { %5412 = vmatpush1.bf16.msra.mxu1 %v4936_v44  ;;  %v5146_v44 = vld [vmem:[#allocation2 + $0x768] sm:$0xff] }
 0x906   :  { %5413 = vmatprep.subr.bf16.mxu1 %v4952_v45  ;;  %v4965_v45 = vld [vmem:[#allocation2 + $0x1c0] sm:$0xff] }
 0x907   :  { %5285 = vmatpush1.bf16.msra.mxu0 %v4945_v35  ;;  %v4919_v35 = vld [vmem:[#allocation2 + $0x50] sm:$0xff] }
 0x908   :  { %5286 = vmatprep.subr.bf16.mxu0 %v4961_v39  ;;  %v4935_v39 = vld [vmem:[#allocation2 + $0xd0] sm:$0xff] }
 0x909   :  { %5414 = vmatpush1.bf16.msra.mxu1 %v4951_v49  ;;  %v4980_v49 = vld [vmem:[#allocation2 + $0x238] sm:$0xff] }
 0x90a   :  { %5415 = vmatprep.subr.bf16.mxu1 %v4967_v51  ;;  %v4995_v51 = vld [vmem:[#allocation2 + $0x2b0] sm:$0xff] }
 0x90b   :  { %5287 = vmatpush1.bf16.msra.mxu0 %v4960_v61  ;;  %v4934_v61 = vld [vmem:[#allocation2 + $0xc8] sm:$0xff] }
 0x90c   :  { %5288 = vmatprep.subr.bf16.mxu0 %v4976_v43  ;;  %v4950_v43 = vld [vmem:[#allocation2 + $0x148] sm:$0xff] }
 0x90d   :  { %5416 = vmatpush1.bf16.msra.mxu1 %v4966_v54  ;;  %v5010_v54 = vld [vmem:[#allocation2 + $0x328] sm:$0xff] }
 0x90e   :  { %5417 = vmatprep.subr.bf16.mxu1 %v4982_v57  ;;  %v5025_v57 = vld [vmem:[#allocation2 + $0x3a0] sm:$0xff] }
 0x90f   :  { %5289 = vmatpush1.bf16.msra.mxu0 %v4975_v63  ;;  %v4949_v63 = vld [vmem:[#allocation2 + $0x140] sm:$0xff] }
 0x910   :  { %5290 = vmatprep.subr.bf16.mxu0 %v4991_v48  ;;  %v4964_v48 = vld [vmem:[#allocation2 + $0x1b8] sm:$0xff] }
 0x911   :  { %5418 = vmatpush1.bf16.msra.mxu1 %v4981_v59  ;;  %v5040_v59 = vld [vmem:[#allocation2 + $0x418] sm:$0xff] }
 0x912   :  { %5419 = vmatprep.subr.bf16.mxu1 %v4997_v1  ;;  %v5055_v1 = vld [vmem:[#allocation2 + $0x490] sm:$0xff] }
 0x913   :  { %5291 = vmatpush1.bf16.msra.mxu0 %v4990_v50  ;;  %v4979_v50 = vld [vmem:[#allocation2 + $0x230] sm:$0xff] }
 0x914   :  { %5292 = vmatprep.subr.bf16.mxu0 %v5006_v53  ;;  %v4994_v53 = vld [vmem:[#allocation2 + $0x2a8] sm:$0xff] }
 0x915   :  { %5420 = vmatpush1.bf16.msra.mxu1 %v4996_v12  ;;  %v5070_v12 = vld [vmem:[#allocation2 + $0x508] sm:$0xff] }
 0x916   :  { %5421 = vmatprep.subr.bf16.mxu1 %v5012_v2  ;;  %v5085_v2 = vld [vmem:[#allocation2 + $0x580] sm:$0xff] }
 0x917   :  { %5293 = vmatpush1.bf16.msra.mxu0 %v5005_v5  ;;  %v5009_v5 = vld [vmem:[#allocation2 + $0x320] sm:$0xff] }
 0x918   :  { %5294 = vmatprep.subr.bf16.mxu0 %v5021_v13  ;;  %v5024_v13 = vld [vmem:[#allocation2 + $0x398] sm:$0xff] }
 0x919   :  { %5422 = vmatpush1.bf16.msra.mxu1 %v5011_v6  ;;  %v5100_v6 = vld [vmem:[#allocation2 + $0x5f8] sm:$0xff] }
 0x91a   :  { %5423 = vmatprep.subr.bf16.mxu1 %v5027_v37  ;;  %v5115_v37 = vld [vmem:[#allocation2 + $0x670] sm:$0xff] }
 0x91b   :  { %5295 = vmatpush1.bf16.msra.mxu0 %v5020_v0  ;;  %v5039_v0 = vld [vmem:[#allocation2 + $0x410] sm:$0xff] }
 0x91c   :  { %5296 = vmatprep.subr.bf16.mxu0 %v5036_v11  ;;  %v5054_v11 = vld [vmem:[#allocation2 + $0x488] sm:$0xff] }
 0x91d   :  { %5424 = vmatpush1.bf16.msra.mxu1 %v5026_v52  ;;  %v5130_v52 = vld [vmem:[#allocation2 + $0x6e8] sm:$0xff] }
 0x91e   :  { %5425 = vmatprep.subr.bf16.mxu1 %v5042_v33  ;;  %v5145_v33 = vld [vmem:[#allocation2 + $0x760] sm:$0xff] }
 0x91f   :  { %5297 = vmatpush1.bf16.msra.mxu0 %v5035_v26  ;;  %v5069_v26 = vld [vmem:[#allocation2 + $0x500] sm:$0xff] }
 0x920   :  { %5298 = vmatprep.subr.bf16.mxu0 %v5051_v62  ;;  %v5084_v62 = vld [vmem:[#allocation2 + $0x578] sm:$0xff] }
 0x921   :  { %5426 = vmatpush1.bf16.msra.mxu1 %v5041_v22  ;;  %v5043_v22 = vld [vmem:[#allocation2 + $0x430] sm:$0xff] }
 0x922   :  { %5427 = vmatprep.subr.bf16.mxu1 %v5057_v46  ;;  %v5058_v46 = vld [vmem:[#allocation2 + $0x4a8] sm:$0xff] }
 0x923   :  { %5299 = vmatpush1.bf16.msra.mxu0 %v5050_v36  ;;  %v5099_v36 = vld [vmem:[#allocation2 + $0x5f0] sm:$0xff] }
 0x924   :  { %5300 = vmatprep.subr.bf16.mxu0 %v5066_v4  ;;  %v5114_v4 = vld [vmem:[#allocation2 + $0x668] sm:$0xff] }
 0x925   :  { %5428 = vmatpush1.bf16.msra.mxu1 %v5056_v19  ;;  %v5073_v19 = vld [vmem:[#allocation2 + $0x520] sm:$0xff] }
 0x926   :  { %5429 = vmatprep.subr.bf16.mxu1 %v5072_v58  ;;  %v5088_v58 = vld [vmem:[#allocation2 + $0x598] sm:$0xff] }
 0x927   :  { %5301 = vmatpush1.bf16.msra.mxu0 %v5065_v40  ;;  %v5129_v40 = vld [vmem:[#allocation2 + $0x6e0] sm:$0xff] }
 0x928   :  { %5302 = vmatprep.subr.bf16.mxu0 %v5081_v18  ;;  %v5144_v18 = vld [vmem:[#allocation2 + $0x758] sm:$0xff] }
 0x929   :  { %5430 = vmatpush1.bf16.msra.mxu1 %v5071_v24  ;;  %v5103_v24 = vld [vmem:[#allocation2 + $0x610] sm:$0xff] }
 0x92a   :  { %5431 = vmatprep.subr.bf16.mxu1 %v5087_v8  ;;  %v5118_v8 = vld [vmem:[#allocation2 + $0x688] sm:$0xff] }
 0x92b   :  { %5303 = vmatpush1.bf16.msra.mxu0 %v5080_v27  ;;  %v4923_v27 = vld [vmem:[#allocation2 + $0x70] sm:$0xff] }
 0x92c   :  { %5304 = vmatprep.subr.bf16.mxu0 %v5096_v55  ;;  %v4938_v55 = vld [vmem:[#allocation2 + $0xe8] sm:$0xff] }
 0x92d   :  { %5432 = vmatpush1.bf16.msra.mxu1 %v5086_v32 }
 0x92e   :  { %5433 = vmatprep.subr.bf16.mxu1 %v5102_v28 }
 0x92f   :  { %5305 = vmatpush1.bf16.msra.mxu0 %v5095_v21  ;;  %v4953_v21 = vld [vmem:[#allocation2 + $0x160] sm:$0xff] }
 0x930   :  { %5306 = vmatprep.subr.bf16.mxu0 %v5111_v20  ;;  %v4968_v20 = vld [vmem:[#allocation2 + $0x1d8] sm:$0xff] }
 0x931   :  { %5434 = vmatpush1.bf16.msra.mxu1 %v5101_v23 }
 0x932   :  { %5435 = vmatprep.subr.bf16.mxu1 %v5117_v31 }
 0x933   :  { %5307 = vmatpush1.bf16.msra.mxu0 %v5110_v25  ;;  %v4983_v25 = vld [vmem:[#allocation2 + $0x250] sm:$0xff] }
 0x934   :  { %5308 = vmatprep.subr.bf16.mxu0 %v5126_v15  ;;  %v4998_v15 = vld [vmem:[#allocation2 + $0x2c8] sm:$0xff] }
 0x935   :  { %5436 = vmatpush1.bf16.msra.mxu1 %v5116_v34  ;;  %v13049_v34 = vld [vmem:[%s20249_s11 + $0x20] sm:$0xff] }
 0x936   :  { %5437 = vmatprep.subr.bf16.mxu1 %v5132_v38 }
 0x937   :  { %5309 = vmatpush1.bf16.msra.mxu0 %v5125_v60 }
 0x938   :  { %5310 = vmatprep.subr.bf16.mxu0 %v5141_v3 }
 0x939   :  { %5438 = vmatpush1.bf16.msra.mxu1 %v5131_v9 }
 0x93a   :  { %5439 = vmatprep.subr.bf16.mxu1 %v5147_v42 }
 0x93b   :  { %5311 = vmatpush1.bf16.msra.mxu0 %v5140_v30  ;;  %v5013_v30 = vld [vmem:[#allocation2 + $0x340] sm:$0xff] }
 0x93c   :  { %5366 = vmatprep.subr.bf16.mxu0 %v4920_v14  ;;  %v5148_v14 = vld [vmem:[#allocation2 + $0x778] sm:$0xff] }
 0x93d   :  { %5440 = vmatpush1.bf16.msra.mxu1 %v5146_v44 }
 0x93e   :  { %5313 = vmatmul.mubr.bf16.vlgmr.msra.gmra.mrb[44].mxu0 %v18076_v16 }
 0x93f   :  { %5367 = vmatpush1.bf16.msra.mxu0 %v4919_v35  ;;  %5398 = vmatprep.mubr.bf16.mxu0 %v18070_v41  ;;  %v5028_v35 = vld [vmem:[#allocation2 + $0x3b8] sm:$0xff] }
 0x940   :  { %5368 = vmatprep.subr.bf16.mxu0 %v4935_v39  ;;  %5442 = vmatmul.mubr.bf16.vlgmr.msra.gmra.mrb[36].mxu1 %v18076_v16 }
 0x941   :  { %13797 = vmatprep.mubr.msk.f32.mxu1 %vm5502_vm8, %v13049_v34 }
 0x943   :  { %5369 = vmatpush1.bf16.msra.mxu0 %v4934_v61 }
 0x944   :  { %5370 = vmatprep.subr.bf16.mxu0 %v4950_v43 }
 0x947   :  { %5371 = vmatpush1.bf16.msra.mxu0 %v4949_v63 }
 0x948   :  { %5372 = vmatprep.subr.bf16.mxu0 %v4965_v45  ;;  %v13051_v45 = vld [vmem:[%s20249_s11 + $0x30] sm:$0xff] }
 0x94b   :  { %5373 = vmatpush1.bf16.msra.mxu0 %v4964_v48 }
 0x94c   :  { %5374 = vmatprep.subr.bf16.mxu0 %v4980_v49 }
 0x94f   :  { %5375 = vmatpush1.bf16.msra.mxu0 %v4979_v50 }
 0x950   :  { %5376 = vmatprep.subr.bf16.mxu0 %v4995_v51 }
 0x953   :  { %5377 = vmatpush1.bf16.msra.mxu0 %v4994_v53 }
 0x954   :  { %5378 = vmatprep.subr.bf16.mxu0 %v5010_v54  ;;  %v13052_v54 = vld [vmem:[%s20249_s11 + $0x38] sm:$0x3] }
 0x957   :  { %5379 = vmatpush1.bf16.msra.mxu0 %v5009_v5  ;;  %v13068_v5 = vld [vmem:[%s20249_s11 + $0x60] sm:$0xff] }
 0x958   :  { %5380 = vmatprep.subr.bf16.mxu0 %v5025_v57 }
 0x95b   :  { %5381 = vmatpush1.bf16.msra.mxu0 %v5024_v13 }
 0x95c   :  { %5382 = vmatprep.subr.bf16.mxu0 %v5040_v59 }
 0x95f   :  { %5383 = vmatpush1.bf16.msra.mxu0 %v5039_v0 }
 0x960   :  { %5384 = vmatprep.subr.bf16.mxu0 %v5055_v1 }
 0x963   :  { %5385 = vmatpush1.bf16.msra.mxu0 %v5054_v11 }
 0x964   :  { %5386 = vmatprep.subr.bf16.mxu0 %v5070_v12 }
 0x967   :  { %5387 = vmatpush1.bf16.msra.mxu0 %v5069_v26 }
 0x968   :  { %5388 = vmatprep.subr.bf16.mxu0 %v5085_v2 }
 0x96b   :  { %5389 = vmatpush1.bf16.msra.mxu0 %v5084_v62 }
 0x96c   :  { %5390 = vmatprep.subr.bf16.mxu0 %v5100_v6 }
 0x96f   :  { %5391 = vmatpush1.bf16.msra.mxu0 %v5099_v36 }
 0x970   :  { %5392 = vmatprep.subr.bf16.mxu0 %v5115_v37 }
 0x973   :  { %5393 = vmatpush1.bf16.msra.mxu0 %v5114_v4 }
 0x974   :  { %5394 = vmatprep.subr.bf16.mxu0 %v5130_v52 }
 0x977   :  { %5395 = vmatpush1.bf16.msra.mxu0 %v5129_v40 }
 0x978   :  { %5396 = vmatprep.subr.bf16.mxu0 %v5145_v33 }
 0x97b   :  { %5397 = vmatpush1.bf16.msra.mxu0 %v5144_v18 }
 0x97c   :  { %13505 = vmatprep.subr.bf16.mxu0 %v5043_v22 }
 0x97e   :  { %5399 = vmatmul.mubr.bf16.vlgmr.msra.gmra.mrb[48].mxu0 %v18076_v16 }
 0x97f   :  { %13506 = vmatpush3.bf16.msra.mxu0 %v4923_v27  ;;  %5484 = vmatprep.mubr.bf16.mxu0 %v18070_v41  ;;  %v5133_v41 = vld [vmem:[#allocation2 + $0x700] sm:$0xff] }
 0x980   :  { %13507 = vmatprep.subr.bf16.mxu0 %v5058_v46 }
 0x983   :  { %13508 = vmatpush3.bf16.msra.mxu0 %v4938_v55 }
 0x984   :  { %13509 = vmatprep.subr.bf16.mxu0 %v5073_v19 }
 0x987   :  { %13510 = vmatpush3.bf16.msra.mxu0 %v4953_v21 }
 0x988   :  { %13511 = vmatprep.subr.bf16.mxu0 %v5088_v58  ;;  %v13069_v58 = vld [vmem:[%s20249_s11 + $0x68] sm:$0xff] }
 0x98b   :  { %13512 = vmatpush3.bf16.msra.mxu0 %v4968_v20  ;;  %v13070_v20 = vld [vmem:[%s20249_s11 + $0x70] sm:$0xff] }
 0x98c   :  { %13513 = vmatprep.subr.bf16.mxu0 %v5103_v24  ;;  %v13071_v24 = vld [vmem:[%s20249_s11 + $0x78] sm:$0x3] }
 0x98f   :  { %13514 = vmatpush3.bf16.msra.mxu0 %v4983_v25  ;;  %v13083_v25 = vld [vmem:[%s20249_s11 + $0x80] sm:$0xff] }
 0x990   :  { %13515 = vmatprep.subr.bf16.mxu0 %v5118_v8  ;;  %v13084_v8 = vld [vmem:[%s20249_s11 + $0x88] sm:$0xff] }
 0x991   :  { %v18091_v32 = vpop.f32.mrb[36].mxu0 }
 0x992   :  { %v18093_v60 = vpop.f32.mrb[37].mxu0 }
 0x993   :  { %v18095_v28 = vpop.f32.mrb[38].mxu0  ;;  %13516 = vmatpush3.bf16.msra.mxu0 %v4998_v15  ;;  %v5271_v38 = vpop.f32.mrb[28].mxu1  ;;  %v13085_v15 = vld [vmem:[%s20249_s11 + $0x90] sm:$0xff] }
 0x994   :  { %v14206_v3 = vpack.c.bf16 %v18095_v28, %v18091_v32  ;;  %v18099_v23 = vpop.f32.mrb[39].mxu0  ;;  %13517 = vmatprep.subr.bf16.mxu0 %v5133_v41  ;;  %v5273_v39 = vpop.f32.mrb[29].mxu1 }
 0x995   :  { %v14203_v31 = vpack.c.bf16 %v18099_v23, %v18093_v60  ;;  %v5275_v9 = vpop.f32.mrb[30].mxu1 }
 0x996   :  { %v14167_v42 = vpack.c.bf16 %v5275_v9, %v5271_v38  ;;  %v5277_v43 = vpop.f32.mrb[31].mxu1  ;;  %v5496_v38 = vld [vmem:[%s20249_s11 + $0x18] sm:$0x3]  ;;  %v13065_v9 = vld [vmem:[%s20249_s11 + $0x48] sm:$0xff] }
 0x997   :  { %13518 = vmatpush3.bf16.msra.mxu0 %v5013_v30  ;;  %v14173_v44 = vpack.c.bf16 %v5277_v43, %v5273_v39  ;;  %v13064_v39 = vld [vmem:[%s20249_s11 + $0x40] sm:$0xff]  ;;  %v13067_v43 = vld [vmem:[%s20249_s11 + $0x58] sm:$0x3] }
 0x998   :  { %13519 = vmatprep.subr.bf16.mxu0 %v5148_v14  ;;  %v5493_v14 = vld [vmem:[%s20249_s11] sm:$0xff] }
 0x999   :  { %14175 = vmatprep.subr.msk.bf16.mxu1 %vm18109_vm10, %v14173_v44 }
 0x99a   :  { %14178 = vmatpush3.bf16.msk.msra.mxu1 %vm18109_vm10, %v14173_v44  ;;  %v6677_v44 = vld [vmem:[#allocation20 + $0x100] sm:$0xff] }
 0x99b   :  { %13520 = vmatpush3.bf16.msra.mxu0 %v5028_v35  ;;  %v5495_v35 = vld [vmem:[%s20249_s11 + $0x10] sm:$0xff] }
 0x99c   :  { %14169 = vmatprep.subr.msk.bf16.mxu0 %vm18109_vm10, %v14167_v42  ;;  %v13066_v42 = vld [vmem:[%s20249_s11 + $0x50] sm:$0xff] }
 0x99e   :  { %5485 = vmatmul.mubr.bf16.vlgmr.msra.gmra.mrb[52].mxu0 %v18076_v16  ;;  %v13050_v16 = vld [vmem:[%s20249_s11 + $0x28] sm:$0xff] }
 0x99f   :  { %5588 = vmatprep.mubr.f32.mxu0 %v15772_v29  ;;  %13798 = vmatmul.mubr.msk.f32.vlgmr.msra.gmra.mrb[26].mxu1 %vm5502_vm8, %v13050_v16 }
 0x9a0   :  { %13800 = vmatprep.mubr.msk.f32.mxu1 %vm5502_vm8, %v13051_v45 }
 0x9a3   :  { %13801 = vmatmul.mubr.msk.f32.gmra.mrb[40].mxu1 %vm5502_vm8, %v13052_v54 }
 0x9a4   :  { %13807 = vmatprep.mubr.msk.f32.mxu1 %vm5502_vm8, %v13068_v5 }
 0x9d1   :  { %v5228_v63 = vpop.f32.mrb[40].mxu0 }
 0x9d2   :  { %v5230_v48 = vpop.f32.mrb[41].mxu0 }
 0x9d3   :  { %v5232_v49 = vpop.f32.mrb[42].mxu0  ;;  %v5357_v57 = vpop.f32.mrb[32].mxu1 }
 0x9d4   :  { %v18128_v50 = vpack.c.bf16 %v5232_v49, %v5228_v63  ;;  %v5234_v51 = vpop.f32.mrb[43].mxu0  ;;  %v5359_v13 = vpop.f32.mrb[33].mxu1  ;;  %v6662_v49 = vld [vmem:[#allocation20 + $0x88] sm:$0xff] }
 0x9d5   :  { %v14170_v53 = vpack.c.bf16 %v5234_v51, %v5230_v48  ;;  %v5361_v59 = vpop.f32.mrb[34].mxu1  ;;  %v6661_v48 = vld [vmem:[#allocation20 + $0x80] sm:$0xff] }
 0x9d6   :  { %v18143_v0 = vpack.c.bf16 %v5361_v59, %v5357_v57  ;;  %v5363_v1 = vpop.f32.mrb[35].mxu1  ;;  %v14227_v51 = vpack.c.bf16 %v6662_v49, %v6661_v48  ;;  %v6663_v59 = vld [vmem:[#allocation20 + $0x90] sm:$0xff] }
 0x9d7   :  { %14172 = vmatpush1.bf16.msk.msra.mxu0 %vm18109_vm10, %v14170_v53  ;;  %v14182_v11 = vpack.c.bf16 %v5363_v1, %v5359_v13  ;;  %v6680_v53 = vld [vmem:[#allocation20 + $0x118] sm:$0xff]  ;;  %v6681_v1 = vld [vmem:[#allocation20 + $0x120] sm:$0xff]  ;;  %v6691_v48 = vld [vmem:[#allocation20 + $0x170] sm:$0xff] }
 0x9da   :  { %13055 = vmatmul.mubr.msk.f32.vlgmr.msra.gmra.mrb[34].mxu0 %vm5502_vm8, %v13049_v34  ;;  %v5494_v34 = vld [vmem:[%s20249_s11 + $0x8] sm:$0xff] }
 0x9db   :  { %5594 = vmatprep.mubr.f32.mxu0 %v15772_v29 }
 0x9de   :  { %13056 = vmatmul.mubr.msk.f32.gmra.mrb[56].mxu0 %vm5502_vm8, %v13050_v16  ;;  %v6678_v16 = vld [vmem:[#allocation20 + $0x108] sm:$0xff] }
 0x9df   :  { %5600 = vmatprep.mubr.f32.mxu0 %v15772_v29  ;;  %v14260_v63 = vpack.c.bf16 %v6678_v16, %v6677_v44  ;;  %v6673_v16 = vld [vmem:[#allocation20 + $0xe0] sm:$0xff] }
 0x9e2   :  { %13057 = vmatmul.mubr.msk.f32.gmra.mrb[58].mxu0 %vm5502_vm8, %v13051_v45  ;;  %v15774_v45 = vmov 0.0|0.0  }
 0x9e3   :  { %5606 = vmatprep.mubr.f32.mxu0 %v15772_v29 }
 0x9e6   :  { %13058 = vmatmul.mubr.msk.f32.gmra.mrb[60].mxu0 %vm5502_vm8, %v13052_v54  ;;  %v6645_v54 = vld [vmem:[#allocation20] sm:$0xff] }
 0x9e7   :  { %5793 = vmatprep.mubr.f32.mxu0 %v15772_v29 }
 0xa11   :  { %v18150_v12 = vpop.f32.mrb[44].mxu0 }
 0xa12   :  { %v5316_v26 = vpop.f32.mrb[45].mxu0 }
 0xa13   :  { %v18152_v2 = vpop.f32.mrb[46].mxu0  ;;  %v5443_v37 = vpop.f32.mrb[36].mxu1 }
 0xa14   :  { %v14218_v62 = vpack.c.bf16 %v18152_v2, %v18150_v12  ;;  %v5320_v6 = vpop.f32.mrb[47].mxu0  ;;  %v5445_v4 = vpop.f32.mrb[37].mxu1  ;;  %v6682_v12 = vld [vmem:[#allocation20 + $0x128] sm:$0xff]  ;;  %v6648_v2 = vld [vmem:[#allocation20 + $0x18] sm:$0xff] }
 0xa15   :  { %v14215_v36 = vpack.c.bf16 %v5320_v6, %v5316_v26  ;;  %v5447_v52 = vpop.f32.mrb[38].mxu1  ;;  %v6647_v26 = vld [vmem:[#allocation20 + $0x10] sm:$0xff] }
 0xa16   :  { %v14194_v40 = vpack.c.bf16 %v5447_v52, %v5443_v37  ;;  %v5449_v33 = vpop.f32.mrb[39].mxu1  ;;  %v14233_v6 = vpack.c.bf16 %v6648_v2, %v6647_v26  ;;  %v6666_v37 = vld [vmem:[#allocation20 + $0xa8] sm:$0xff]  ;;  %v4908_v2 = vld [vmem:[#allocation19 + $0x8] sm:$0x7] }
 0xa17   :  { %v14191_v18 = vpack.c.bf16 %v5449_v33, %v5445_v4  ;;  %v6683_v4 = vld [vmem:[#allocation20 + $0x130] sm:$0xff]  ;;  %v6649_v33 = vld [vmem:[#allocation20 + $0x20] sm:$0xff] }
 0xa51   :  { %v5400_v22 = vpop.f32.mrb[48].mxu0 }
 0xa52   :  { %v5402_v27 = vpop.f32.mrb[49].mxu0 }
 0xa53   :  { %v5404_v46 = vpop.f32.mrb[50].mxu0 }
 0xa54   :  { %v14179_v55 = vpack.c.bf16 %v5404_v46, %v5400_v22  ;;  %v5406_v19 = vpop.f32.mrb[51].mxu0  ;;  %v6667_v46 = vld [vmem:[#allocation20 + $0xb0] sm:$0xff] }
 0xa55   :  { %v14185_v21 = vpack.c.bf16 %v5406_v19, %v5402_v27  ;;  %v6685_v19 = vld [vmem:[#allocation20 + $0x140] sm:$0xff] }
 0xa56   :  { %14181 = vmatprep.subr.msk.bf16.mxu0 %vm18109_vm10, %v14179_v55  ;;  %v6668_v55 = vld [vmem:[#allocation20 + $0xb8] sm:$0xff] }
 0xa57   :  { %14184 = vmatpush1.bf16.msk.msra.mxu0 %vm18109_vm10, %v14182_v11  ;;  %14187 = vmatprep.subr.msk.bf16.mxu1 %vm18109_vm10, %v14185_v21 }
 0xa58   :  { %14190 = vmatpush3.bf16.msk.msra.mxu1 %vm18109_vm10, %v14185_v21  ;;  %14193 = vmatprep.subr.msk.bf16.mxu0 %vm18109_vm10, %v14191_v18  ;;  %v6650_v18 = vld [vmem:[#allocation20 + $0x28] sm:$0xff]  ;;  %v14239_v21 = vpack.c.bf16 %v6668_v55, %v6667_v46 }
 0xa59   :  { %v14237_v27 = vpack.c.bf16 %v6650_v18, %v6649_v33 }
 0xa5a   :  { %13074 = vmatmul.mubr.msk.f32.vlgmr.msra.gmra.mrb[34].mxu0 %vm5502_vm8, %v13068_v5  ;;  %v6646_v5 = vld [vmem:[#allocation20 + $0x8] sm:$0xff] }
 0xa5b   :  { %14196 = vmatpush1.bf16.msk.msra.mxu0 %vm18109_vm10, %v14194_v40  ;;  %5799 = vmatprep.mubr.f32.mxu0 %v15772_v29  ;;  %v14229_v13 = vpack.c.bf16 %v6646_v5, %v6645_v54  ;;  %v6684_v40 = vld [vmem:[#allocation20 + $0x138] sm:$0xff] }
 0xa5c   :  { %14205 = vmatprep.subr.msk.bf16.mxu0 %vm18109_vm10, %v14203_v31  ;;  %13808 = vmatmul.mubr.msk.f32.vlgmr.msra.gmra.mrb[26].mxu1 %vm5502_vm8, %v13069_v58  ;;  %v14269_v22 = vpack.c.bf16 %v6684_v40, %v6683_v4 }
 0xa5d   :  { %13810 = vmatprep.mubr.msk.f32.mxu1 %vm5502_vm8, %v13070_v20 }
 0xa5e   :  { %13075 = vmatmul.mubr.msk.f32.gmra.mrb[56].mxu0 %vm5502_vm8, %v13069_v58  ;;  %v6686_v58 = vld [vmem:[#allocation20 + $0x148] sm:$0xff] }
 0xa5f   :  { %5805 = vmatprep.mubr.f32.mxu0 %v15772_v29 }
 0xa60   :  { %13811 = vmatmul.mubr.msk.f32.gmra.mrb[40].mxu1 %vm5502_vm8, %v13071_v24 }
 0xa61   :  { %13817 = vmatprep.mubr.msk.f32.mxu1 %vm5502_vm8, %v13083_v25 }
 0xa62   :  { %13076 = vmatmul.mubr.msk.f32.gmra.mrb[58].mxu0 %vm5502_vm8, %v13070_v20  ;;  %v6651_v20 = vld [vmem:[#allocation20 + $0x30] sm:$0xff] }
 0xa63   :  { %5811 = vmatprep.mubr.f32.mxu0 %v15772_v29 }
 0xa66   :  { %13077 = vmatmul.mubr.msk.f32.gmra.mrb[60].mxu0 %vm5502_vm8, %v13071_v24  ;;  %v6652_v24 = vld [vmem:[#allocation20 + $0x38] sm:$0xff] }
 0xa67   :  { %5993 = vmatprep.mubr.f32.mxu0 %v15772_v29 }
 0xa6a   :  { %13089 = vmatmul.mubr.msk.f32.vlgmr.msra.gmra.mrb[34].mxu0 %vm5502_vm8, %v13083_v25  ;;  %v14272_v25 = vpack.c.bf16 %v6686_v58, %v6685_v19 }
 0xa6b   :  { %14208 = vmatpush1.bf16.msk.msra.mxu0 %vm18109_vm10, %v14206_v3  ;;  %5999 = vmatprep.mubr.f32.mxu0 %v15772_v29  ;;  %v13086_v3 = vld [vmem:[%s20249_s11 + $0x98] sm:$0x3] }
 0xa6c   :  { %14217 = vmatprep.subr.msk.bf16.mxu0 %vm18109_vm10, %v14215_v36  ;;  %v6665_v36 = vld [vmem:[#allocation20 + $0xa0] sm:$0xff] }
 0xa6d   :  { %v14235_v52 = vpack.c.bf16 %v6666_v37, %v6665_v36 }
 0xa6e   :  { %13090 = vmatmul.mubr.msk.f32.gmra.mrb[56].mxu0 %vm5502_vm8, %v13084_v8 }
 0xa6f   :  { %6005 = vmatprep.mubr.f32.mxu0 %v15772_v29 }
 0xa71   :  { %v13521_v32 = vpop.f32.mrb[52].mxu0 }
 0xa72   :  { %v13522_v41 = vpop.f32.mrb[53].mxu0  ;;  %13091 = vmatmul.mubr.msk.f32.gmra.mrb[58].mxu0 %vm5502_vm8, %v13085_v15 }
 0xa73   :  { %v13523_v60 = vadd.f32 %v13522_v41, %v13521_v32  ;;  %v13524_v28 = vpop.f32.mrb[54].mxu0  ;;  %6011 = vmatprep.mubr.f32.mxu0 %v15772_v29  ;;  %v6670_v32 = vld [vmem:[#allocation20 + $0xc8] sm:$0xff]  ;;  %v6687_v41 = vld [vmem:[#allocation20 + $0x150] sm:$0xff] }
 0xa74   :  { %v13525_v23 = vpop.f32.mrb[55].mxu0 }
 0xa75   :  { %v13526_v30 = vadd.f32 %v13525_v23, %v13524_v28  ;;  %v6688_v28 = vld [vmem:[#allocation20 + $0x158] sm:$0xff]  ;;  %v6654_v23 = vld [vmem:[#allocation20 + $0x48] sm:$0xff] }
 0xa76   :  { %13092 = vmatmul.mubr.msk.f32.gmra.mrb[60].mxu0 %vm5502_vm8, %v13086_v3 }
 0xa77   :  { %v14197_v31 = vpack.c.bf16 %v13526_v30, %v13523_v60  ;;  %6188 = vmatprep.mubr.f32.mxu0 %v15772_v29  ;;  %v14275_v30 = vpack.c.bf16 %v6688_v28, %v6687_v41 }
 0xa79   :  { %14199 = vmatprep.subr.msk.bf16.mxu1 %vm18109_vm10, %v14197_v31 }
 0xa7a   :  { %14202 = vmatpush3.bf16.msk.msra.mxu1 %vm18109_vm10, %v14197_v31  ;;  %13100 = vmatmul.mubr.msk.f32.vlgmr.msra.gmra.mrb[34].mxu0 %vm5502_vm8, %v5493_v14 }
 0xa7b   :  { %14220 = vmatpush1.bf16.msk.msra.mxu0 %vm18109_vm10, %v14218_v62  ;;  %14211 = vmatprep.subr.msk.bf16.mxu1 %vm18109_vm10, %v18128_v50  ;;  %v14266_v62 = vpack.c.bf16 %v6682_v12, %v6681_v1  ;;  %v6660_v1 = vld [vmem:[#allocation20 + $0x78] sm:$0xff] }
 0xa7c   :  { %6194 = vmatprep.mubr.f32.mxu0 %v15772_v29  ;;  %14259 = vmatprep.subr.bf16.mxu0 %v15774_v45  ;;  %v18300_v12 = vld [vmem:[#allocation19] sm:$0x77] }
 0xa7d   :  { %13818 = vmatmul.mubr.msk.f32.vlgmr.msra.gmra.mrb[26].mxu1 %vm5502_vm8, %v13084_v8  ;;  %v14241_v8 = vpack.c.bf16 %v6652_v24, %v6651_v20  ;;  %v6522_v26 = vrot.slane %v18300_v12, %v17609_v7 }
 0xa7e   :  { %13101 = vmatmul.mubr.msk.f32.gmra.mrb[56].mxu0 %vm5502_vm8, %v5494_v34  ;;  %14214 = vmatpush3.bf16.msk.msra.mxu1 %vm18109_vm10, %v18128_v50  ;;  %v6679_v50 = vld [vmem:[#allocation20 + $0x110] sm:$0xff] }
 0xa7f   :  { %14223 = vmatprep.subr.msk.bf16.mxu1 %vm18109_vm10, %v18143_v0  ;;  %13820 = vmatprep.mubr.msk.f32.mxu1 %vm5502_vm8, %v13085_v15  ;;  %v14263_v57 = vpack.c.bf16 %v6680_v53, %v6679_v50  ;;  %v6669_v15 = vld [vmem:[#allocation20 + $0xc0] sm:$0xff]  ;;  %v6692_v50 = vld [vmem:[#allocation20 + $0x178] sm:$0xff]  ;;  %v6658_v53 = vld [vmem:[#allocation20 + $0x68] sm:$0xff]  ;;  %v6537_v36 = vrot.slane %v6522_v26, %v17609_v7 }
 0xa80   :  { %6200 = vmatprep.mubr.f32.mxu0 %v15772_v29  ;;  %v14243_v60 = vpack.c.bf16 %v6670_v32, %v6669_v15  ;;  %v14281_v54 = vpack.c.bf16 %v6692_v50, %v6691_v48 }
 0xa81   :  { %13821 = vmatmul.mubr.msk.f32.gmra.mrb[40].mxu1 %vm5502_vm8, %v13086_v3  ;;  %v6653_v3 = vld [vmem:[#allocation20 + $0x40] sm:$0xff] }
 0xa82   :  { %13102 = vmatmul.mubr.msk.f32.gmra.mrb[58].mxu0 %vm5502_vm8, %v5495_v35  ;;  %13827 = vmatprep.mubr.msk.f32.mxu1 %vm5502_vm8, %v5493_v14  ;;  %v14245_v31 = vpack.c.bf16 %v6654_v23, %v6653_v3  ;;  %v6671_v14 = vld [vmem:[#allocation20 + $0xd0] sm:$0xff] }
 0xa83   :  { %6206 = vmatprep.mubr.f32.mxu0 %v15772_v29 }
 0xa85   :  { %13828 = vmatmul.mubr.msk.f32.vlgmr.msra.gmra.mrb[26].mxu1 %vm5502_vm8, %v5494_v34  ;;  %v6672_v34 = vld [vmem:[#allocation20 + $0xd8] sm:$0xff] }
 0xa86   :  { %14226 = vmatpush3.bf16.msk.msra.mxu1 %vm18109_vm10, %v18143_v0  ;;  %13103 = vmatmul.mubr.msk.f32.gmra.mrb[60].mxu0 %vm5502_vm8, %v5496_v38  ;;  %v6664_v0 = vld [vmem:[#allocation20 + $0x98] sm:$0xff] }
 0xa87   :  { %13830 = vmatprep.mubr.msk.f32.mxu1 %vm5502_vm8, %v5495_v35  ;;  %6383 = vmatprep.mubr.f32.mxu0 %v15772_v29  ;;  %v14231_v11 = vpack.c.bf16 %v6664_v0, %v6663_v59  ;;  %v6689_v35 = vld [vmem:[#allocation20 + $0x160] sm:$0xff]  ;;  %v6659_v0 = vld [vmem:[#allocation20 + $0x70] sm:$0xff] }
 0xa88   :  { %14228 = vmatprep.subr.bf16.mxu1 %v14227_v51  ;;  %v6657_v51 = vld [vmem:[#allocation20 + $0x60] sm:$0xff] }
 0xa89   :  { %13831 = vmatmul.mubr.msk.f32.gmra.mrb[40].mxu1 %vm5502_vm8, %v5496_v38  ;;  %v14247_v38 = vpack.c.bf16 %v6672_v34, %v6671_v14  ;;  %v14253_v5 = vpack.c.bf16 %v6658_v53, %v6657_v51 }
 0xa8a   :  { %13111 = vmatmul.mubr.msk.f32.vlgmr.msra.gmra.mrb[34].mxu0 %vm5502_vm8, %v13064_v39  ;;  %13837 = vmatprep.mubr.msk.f32.mxu1 %vm5502_vm8, %v13064_v39  ;;  %v6690_v39 = vld [vmem:[#allocation20 + $0x168] sm:$0xff] }
 0xa8b   :  { %6389 = vmatprep.mubr.f32.mxu0 %v15772_v29  ;;  %14261 = vmatpush3.bf16.msra.mxu0 %v14260_v63  ;;  %v6674_v63 = vld [vmem:[#allocation20 + $0xe8] sm:$0xff] }
 0xa8c   :  { %14262 = vmatprep.subr.bf16.mxu0 %v15774_v45  ;;  %v14251_v49 = vpack.c.bf16 %v6674_v63, %v6673_v16 }
 0xa8d   :  { %13838 = vmatmul.mubr.msk.f32.vlgmr.msra.gmra.mrb[26].mxu1 %vm5502_vm8, %v13065_v9 }
 0xa8e   :  { %13112 = vmatmul.mubr.msk.f32.gmra.mrb[56].mxu0 %vm5502_vm8, %v13065_v9  ;;  %13840 = vmatprep.mubr.msk.f32.mxu1 %vm5502_vm8, %v13066_v42  ;;  %v6655_v9 = vld [vmem:[#allocation20 + $0x50] sm:$0xff] }
 0xa8f   :  { %6395 = vmatprep.mubr.f32.mxu0 %v15772_v29  ;;  %14264 = vmatpush3.bf16.msra.mxu0 %v14263_v57  ;;  %v6675_v57 = vld [vmem:[#allocation20 + $0xf0] sm:$0xff] }
 0xa90   :  { %14230 = vmatpush3.bf16.msra.mxu1 %v14229_v13  ;;  %14265 = vmatprep.subr.bf16.mxu0 %v15774_v45  ;;  %v6676_v13 = vld [vmem:[#allocation20 + $0xf8] sm:$0xff] }
 0xa91   :  { %13841 = vmatmul.mubr.msk.f32.gmra.mrb[40].mxu1 %vm5502_vm8, %v13067_v43  ;;  %14232 = vmatprep.subr.bf16.mxu1 %v14231_v11  ;;  %v14255_v59 = vpack.c.bf16 %v6676_v13, %v6675_v57  ;;  %v14257_v11 = vpack.c.bf16 %v6660_v1, %v6659_v0 }
 0xa92   :  { %13113 = vmatmul.mubr.msk.f32.gmra.mrb[58].mxu0 %vm5502_vm8, %v13066_v42  ;;  %v6656_v42 = vld [vmem:[#allocation20 + $0x58] sm:$0xff] }
 0xa93   :  { %6401 = vmatprep.mubr.f32.mxu0 %v15772_v29  ;;  %14267 = vmatpush3.bf16.msra.mxu0 %v14266_v62  ;;  %v14249_v44 = vpack.c.bf16 %v6656_v42, %v6655_v9  ;;  %v6526_v62 = vrot.slane %v18300_v12, %v17616_v10 }
 0xa94   :  { %14234 = vmatpush3.bf16.msra.mxu1 %v14233_v6  ;;  %14268 = vmatprep.subr.bf16.mxu0 %v15774_v45  ;;  %v6530_v6 = vrot.slane %v4908_v2, %v17609_v7 }
 0xa95   :  { %14236 = vmatprep.subr.bf16.mxu1 %v14235_v52  ;;  %v6541_v37 = vrot.slane %v6526_v62, %v17609_v7 }
 0xa96   :  { %13114 = vmatmul.mubr.msk.f32.gmra.mrb[60].mxu0 %vm5502_vm8, %v13067_v43  ;;  %v14278_v43 = vpack.c.bf16 %v6690_v39, %v6689_v35  ;;  %v6545_v52 = vrot.slane %v6530_v6, %v17609_v7 }
 0xa97   :  { %14270 = vmatpush3.bf16.msra.mxu0 %v14269_v22  ;;  %13875 = vmatprep.mubr.msk.f32.mxu0 %vm15775_vm11, %v15772_v29 }
 0xa98   :  { %14238 = vmatpush3.bf16.msra.mxu1 %v14237_v27  ;;  %14271 = vmatprep.subr.bf16.mxu0 %v15774_v45 }
 0xa99   :  { %14240 = vmatprep.subr.bf16.mxu1 %v14239_v21 }
 0xa9b   :  { %14273 = vmatpush3.bf16.msra.mxu0 %v14272_v25 }
 0xa9c   :  { %14242 = vmatpush3.bf16.msra.mxu1 %v14241_v8  ;;  %14274 = vmatprep.subr.bf16.mxu0 %v15774_v45 }
 0xa9d   :  { %14244 = vmatprep.subr.bf16.mxu1 %v14243_v60 }
 0xa9f   :  { %14276 = vmatpush3.bf16.msra.mxu0 %v14275_v30 }
 0xaa0   :  { %14246 = vmatpush3.bf16.msra.mxu1 %v14245_v31  ;;  %14277 = vmatprep.subr.bf16.mxu0 %v15774_v45 }
 0xaa1   :  { %14248 = vmatprep.subr.bf16.mxu1 %v14247_v38 }
 0xaa3   :  { %14279 = vmatpush3.bf16.msra.mxu0 %v14278_v43 }
 0xaa4   :  { %14250 = vmatpush3.bf16.msra.mxu1 %v14249_v44  ;;  %14280 = vmatprep.subr.bf16.mxu0 %v15774_v45 }
 0xaa5   :  { %14252 = vmatprep.subr.bf16.mxu1 %v14251_v49 }
 0xaa7   :  { %14282 = vmatpush3.bf16.msra.mxu0 %v14281_v54 }
 0xaa8   :  { %14254 = vmatpush3.bf16.msra.mxu1 %v14253_v5  ;;  %14315 = vmatprep.subr.bf16.mxu0 %v15774_v45 }
 0xaa9   :  { %14256 = vmatprep.subr.bf16.mxu1 %v14255_v59 }
 0xaac   :  { %14258 = vmatpush3.bf16.msra.mxu1 %v14257_v11 }
 0xb5d   :  { %v6385_v4 = vpop.f32.mrb[34].mxu0 }
 0xb5e   :  { %v6546_v40 = vadd.f32 %v6537_v36, %v6385_v4  ;;  %v6387_v33 = vpop.f32.mrb[35].mxu0 }
 0xb5f   :  { %v6547_v18 = vadd.f32 %v6541_v37, %v6387_v33 }
 0xb60   :  { %v13839_v22 = vpop.f32.mrb[26].mxu1  ;;  %v18310_v19 = vmax.f32 %v6546_v40, 0.0 }
 0xb61   :  { %v6551_v27 = vadd.f32 %v13839_v22, %v6545_v52  ;;  %v6391_v46 = vpop.f32.mrb[56].mxu0  ;;  %v6474_v55 = vpop.f32.mrb[27].mxu1  ;;  %v18314_v8 = vmax.f32 %v6547_v18, 0.0 }
 0xb62   :  { %v6549_v21 = vadd.f32 %v6537_v36, %v6391_v46  ;;  %v6548_v58 = vadd.f32 %v6545_v52, %v6474_v55  ;;  %v6393_v20 = vpop.f32.mrb[57].mxu0  ;;  %v6600_v30 = vmul.f32 %v18310_v19, %v18310_v19 }
 0xb63   :  { %v18312_v24 = vmax.f32 %v6551_v27, 0.0  ;;  %v6550_v25 = vadd.f32 %v6541_v37, %v6393_v20  ;;  %v6601_v42 = vmul.f32 %v18314_v8, %v18314_v8 }
 0xb64   :  { %v18316_v15 = vmax.f32 %v6549_v21, 0.0  ;;  %v18318_v32 = vmax.f32 %v6548_v58, 0.0  ;;  %v13842_v41 = vpop.f32.mrb[40].mxu1 }
 0xb65   :  { %v18320_v60 = vmax.f32 %v6550_v25, 0.0  ;;  %v6557_v28 = vadd.f32 %v13842_v41, %v6545_v52  ;;  %v6397_v3 = vpop.f32.mrb[58].mxu0  ;;  %v6484_v23 = vpop.f32.mrb[41].mxu1  ;;  %v6605_v31 = vmul.f32 %v18312_v24, %v18312_v24 }
 0xb66   :  { %v6603_v14 = vmul.f32 %v18316_v15, %v18316_v15  ;;  %v6399_v34 = vpop.f32.mrb[59].mxu0  ;;  %v6602_v35 = vmul.f32 %v18318_v32, %v18318_v32  ;;  %v6552_v9 = vadd.f32 %v6537_v36, %v6397_v3  ;;  %v6570_v43 = vadd.f32 %v18316_v15, %v18310_v19 }
 0xb67   :  { %v6604_v38 = vmul.f32 %v18320_v60, %v18320_v60  ;;  %v18332_v39 = vmax.f32 %v6557_v28, 0.0  ;;  %v6554_v44 = vadd.f32 %v6545_v52, %v6484_v23  ;;  %v6553_v16 = vadd.f32 %v6541_v37, %v6399_v34 }
 0xb68   :  { %v6590_v63 = vadd.f32 %v18312_v24, %v18318_v32  ;;  %v6580_v48 = vadd.f32 %v18320_v60, %v18314_v8  ;;  %v18344_v50 = vmax.f32 %v6552_v9, 0.0  ;;  %v6612_v53 = vadd.f32 %v6603_v14, %v6600_v30 }
 0xb69   :  { %v6611_v49 = vmul.f32 %v18332_v39, %v18332_v39  ;;  %v6403_v51 = vpop.f32.mrb[60].mxu0  ;;  %v18346_v54 = vmax.f32 %v6554_v44, 0.0  ;;  %v18348_v5 = vmax.f32 %v6553_v16, 0.0  ;;  %v6632_v59 = vadd.f32 %v6605_v31, %v6602_v35 }
 0xb6a   :  { %v6555_v57 = vadd.f32 %v6537_v36, %v6403_v51  ;;  %v6405_v13 = vpop.f32.mrb[61].mxu0  ;;  %v6622_v0 = vadd.f32 %v6604_v38, %v6601_v42  ;;  %v6606_v1 = vmul.f32 %v18344_v50, %v18344_v50  ;;  %v6592_v26 = vsel %vm2589_vm2, %v18332_v39, 0.0 }
 0xb6b   :  { %v6556_v11 = vadd.f32 %v6541_v37, %v6405_v13  ;;  %v6634_v2 = vsel %vm2589_vm2, %v6611_v49, 0.0  ;;  %v6591_v62 = vadd.f32 %v6590_v63, %v18346_v54  ;;  %v6608_v6 = vmul.f32 %v18346_v54, %v18346_v54 }
 0xb6c   :  { %v6571_v4 = vadd.f32 %v6570_v43, %v18344_v50  ;;  %v6607_v36 = vmul.f32 %v18348_v5, %v18348_v5  ;;  %v18361_v52 = vmax.f32 %v6555_v57, 0.0  ;;  %v6613_v37 = vadd.f32 %v6612_v53, %v6606_v1 }
 0xb6d   :  { %v18363_v40 = vmax.f32 %v6556_v11, 0.0  ;;  %v6593_v33 = vadd.f32 %v6592_v26, %v6591_v62  ;;  %v6633_v18 = vadd.f32 %v6632_v59, %v6608_v6  ;;  %v6581_v22 = vadd.f32 %v6580_v48, %v18348_v5 }
 0xb6e   :  { %v6572_v27 = vsel %vm2589_vm2, %v18361_v52, 0.0  ;;  %v6609_v46 = vmul.f32 %v18361_v52, %v18361_v52  ;;  %v6623_v28 = vadd.f32 %v6622_v0, %v6607_v36 }
 0xb6f   :  { %v6582_v55 = vsel %vm2589_vm2, %v18363_v40, 0.0  ;;  %v6610_v21 = vmul.f32 %v18363_v40, %v18363_v40  ;;  %v6594_v58 = vrot.slane %v6593_v33, 4  ;;  %v6635_v20 = vadd.f32 %v6634_v2, %v6633_v18 }
 0xb70   :  { %v6573_v25 = vadd.f32 %v6572_v27, %v6571_v4  ;;  %v6583_v41 = vadd.f32 %v6582_v55, %v6581_v22  ;;  %v6614_v3 = vsel %vm2589_vm2, %v6609_v46, 0.0 }
 0xb71   :  { %v6624_v23 = vsel %vm2589_vm2, %v6610_v21, 0.0  ;;  %v6595_v30 = vadd.f32 %v6594_v58, %v6593_v33  ;;  %v6636_v31 = vrot.slane %v6635_v20, 4  ;;  %v6615_v34 = vadd.f32 %v6614_v3, %v6613_v37  ;;  %v6864_v3 = vld [vmem:[#allocation22 + $0x20] sm:$0xff] }
 0xb72   :  { %v6574_v14 = vrot.slane %v6573_v25, 4  ;;  %v6584_v35 = vrot.slane %v6583_v41, 4  ;;  %v6625_v38 = vadd.f32 %v6624_v23, %v6623_v28  ;;  %v6861_v28 = vld [vmem:[#allocation22 + $0x8] sm:$0xff] }
 0xb73   :  { %v6596_v9 = vrot.slane %v6595_v30, 2  ;;  %v6637_v42 = vadd.f32 %v6636_v31, %v6635_v20  ;;  %v6616_v44 = vrot.slane %v6615_v34, 4  ;;  %v14283_v23 = vpack.c.bf16 %v6864_v3, %v6861_v28  ;;  %v6863_v31 = vld [vmem:[#allocation22 + $0x18] sm:$0xff]  ;;  %v6894_v3 = vld [vmem:[#allocation22 + $0x110] sm:$0xff] }
 0xb74   :  { %v6575_v43 = vadd.f32 %v6574_v14, %v6573_v25  ;;  %v6626_v16 = vrot.slane %v6625_v38, 4  ;;  %v6585_v63 = vadd.f32 %v6584_v35, %v6583_v41  ;;  %v6862_v14 = vld [vmem:[#allocation22 + $0x10] sm:$0xff]  ;;  %v6865_v35 = vld [vmem:[#allocation22 + $0x28] sm:$0xff]  ;;  %v6891_v28 = vld [vmem:[#allocation22 + $0xf8] sm:$0xff] }
 0xb75   :  { %v6617_v49 = vadd.f32 %v6616_v44, %v6615_v34  ;;  %v6597_v51 = vadd.f32 %v6596_v9, %v6595_v30  ;;  %v6638_v53 = vrot.slane %v6637_v42, 2  ;;  %v6860_v30 = vld [vmem:[#allocation22] sm:$0xff]  ;;  %14284 = vmatprep.subr.bf16.mxu1 %v14283_v23  ;;  %v6867_v9 = vld [vmem:[#allocation22 + $0x38] sm:$0xff]  ;;  %v6866_v44 = vld [vmem:[#allocation22 + $0x30] sm:$0xff] }
 0xb76   :  { %v6576_v48 = vrot.slane %v6575_v43, 2  ;;  %v6586_v57 = vrot.slane %v6585_v63, 2  ;;  %v6627_v13 = vadd.f32 %v6626_v16, %v6625_v38  ;;  %v14285_v34 = vpack.c.bf16 %v6863_v31, %v6860_v30  ;;  %v6869_v16 = vld [vmem:[#allocation22 + $0x48] sm:$0xff] }
 0xb77   :  { %v6618_v59 = vrot.slane %v6617_v49, 2  ;;  %v6598_v0 = vrot.slane %v6597_v51, 1  ;;  %v6639_v1 = vadd.f32 %v6638_v53, %v6637_v42  ;;  %v14316_v38 = vpack.c.bf16 %v6865_v35, %v6862_v14  ;;  %v6870_v42 = vld [vmem:[#allocation22 + $0x50] sm:$0xff]  ;;  %v6873_v53 = vld [vmem:[#allocation22 + $0x68] sm:$0xff]  ;;  %v6892_v35 = vld [vmem:[#allocation22 + $0x100] sm:$0xff] }
 0xb78   :  { %v6577_v11 = vadd.f32 %v6576_v48, %v6575_v43  ;;  %v6587_v26 = vadd.f32 %v6586_v57, %v6585_v63  ;;  %v6628_v2 = vrot.slane %v6627_v13, 2  ;;  %v14287_v43 = vpack.c.bf16 %v6870_v42, %v6867_v9  ;;  %v6868_v63 = vld [vmem:[#allocation22 + $0x40] sm:$0xff]  ;;  %v6890_v14 = vld [vmem:[#allocation22 + $0xf0] sm:$0xff]  ;;  %v6897_v9 = vld [vmem:[#allocation22 + $0x128] sm:$0xff] }
 0xb79   :  { %v6640_v62 = vrot.slane %v6639_v1, 1  ;;  %v6619_v6 = vadd.f32 %v6618_v59, %v6617_v49  ;;  %v6599_v37 = vadd.f32 %v6598_v0, %v6597_v51  ;;  %v14289_v48 = vpack.c.bf16 %v6869_v16, %v6866_v44  ;;  %v6871_v49 = vld [vmem:[#allocation22 + $0x58] sm:$0xff]  ;;  %v6876_v57 = vld [vmem:[#allocation22 + $0x80] sm:$0xff] }
 0xb7a   :  { %v6588_v4 = vrot.slane %v6587_v26, 1  ;;  %v6629_v36 = vadd.f32 %v6628_v2, %v6627_v13  ;;  %v6578_v18 = vrot.slane %v6577_v11, 1  ;;  %v14319_v51 = vpack.c.bf16 %v6871_v49, %v6868_v63  ;;  %v6872_v59 = vld [vmem:[#allocation22 + $0x60] sm:$0xff]  ;;  %v6875_v0 = vld [vmem:[#allocation22 + $0x78] sm:$0xff]  ;;  %v6898_v49 = vld [vmem:[#allocation22 + $0x130] sm:$0xff] }
 0xb7b   :  { %v6641_v33 = vadd.f32 %v6640_v62, %v6639_v1  ;;  %v6620_v22 = vrot.slane %v6619_v6, 1  ;;  %v14291_v13 = vpack.c.bf16 %v6876_v57, %v6873_v53  ;;  %v6874_v1 = vld [vmem:[#allocation22 + $0x70] sm:$0xff]  ;;  %v6879_v2 = vld [vmem:[#allocation22 + $0x98] sm:$0xff]  ;;  %v14303_v31 = vpack.c.bf16 %v6894_v3, %v6891_v28  ;;  %v6900_v42 = vld [vmem:[#allocation22 + $0x140] sm:$0xff] }
 0xb7c   :  { %v6630_v27 = vrot.slane %v6629_v36, 1  ;;  %v6589_v21 = vadd.f32 %v6588_v4, %v6587_v26  ;;  %v6579_v20 = vadd.f32 %v6578_v18, %v6577_v11  ;;  %v14293_v11 = vpack.c.bf16 %v6875_v0, %v6872_v59  ;;  %v6877_v26 = vld [vmem:[#allocation22 + $0x88] sm:$0xff]  ;;  %v6882_v62 = vld [vmem:[#allocation22 + $0xb0] sm:$0xff]  ;;  %v6896_v63 = vld [vmem:[#allocation22 + $0x120] sm:$0xff] }
 0xb7d   :  { %v6644_v46 = vsel %vm4644_vm7, %v6599_v37, %v6641_v33  ;;  %v6621_v55 = vadd.f32 %v6620_v22, %v6619_v6  ;;  %v14322_v6 = vpack.c.bf16 %v6877_v26, %v6874_v1  ;;  %v14295_v4 = vpack.c.bf16 %v6882_v62, %v6879_v2  ;;  %v6881_v37 = vld [vmem:[#allocation22 + $0xa8] sm:$0xff]  ;;  %v6880_v33 = vld [vmem:[#allocation22 + $0xa0] sm:$0xff]  ;;  %v6883_v22 = vld [vmem:[#allocation22 + $0xb8] sm:$0xff] }
 0xb7e   :  { %13876 = vmatmul.mubr.f32.vlgmr.msra.gmra.mrb[62].mxu0 %v6644_v46  ;;  %v6631_v58 = vadd.f32 %v6630_v27, %v6629_v36  ;;  %v6878_v36 = vld [vmem:[#allocation22 + $0x90] sm:$0xff]  ;;  %v6885_v27 = vld [vmem:[#allocation22 + $0xc8] sm:$0xff]  ;;  %v6888_v46 = vld [vmem:[#allocation22 + $0xe0] sm:$0xff]  ;;  %v14307_v16 = vpack.c.bf16 %v6900_v42, %v6897_v9 }
 0xb7f   :  { %13910 = vmatprep.mubr.msk.f32.mxu0 %vm15775_vm11, %v15772_v29  ;;  %v6642_v41 = vsel %vm4644_vm7, %v6579_v20, %v6621_v55  ;;  %14317 = vmatpush3.bf16.msra.mxu0 %v14316_v38  ;;  %v14297_v18 = vpack.c.bf16 %v6881_v37, %v6878_v36  ;;  %v14325_v55 = vpack.c.bf16 %v6883_v22, %v6880_v33  ;;  %v6887_v20 = vld [vmem:[#allocation22 + $0xd8] sm:$0xff]  ;;  %v6906_v57 = vld [vmem:[#allocation22 + $0x170] sm:$0xff]  ;;  %v6904_v26 = vld [vmem:[#allocation22 + $0x160] sm:$0xff] }
 0xb80   :  { %v6643_v25 = vsel %vm4644_vm7, %v6589_v21, %v6631_v58  ;;  %14318 = vmatprep.subr.bf16.mxu0 %v15774_v45  ;;  %v14299_v21 = vpack.c.bf16 %v6888_v46, %v6885_v27  ;;  %v6884_v58 = vld [vmem:[#allocation22 + $0xc0] sm:$0xff]  ;;  %v6895_v38 = vld [vmem:[#allocation22 + $0x118] sm:$0xff]  ;;  %v6902_v1 = vld [vmem:[#allocation22 + $0x150] sm:$0xff] }
 0xb81   :  { %6757 = vmatprep.mubr.f32.mxu1 %v6643_v25  ;;  %v6886_v25 = vld [vmem:[#allocation22 + $0xd0] sm:$0xff]  ;;  %v14301_v23 = vpack.c.bf16 %v6887_v20, %v6884_v58  ;;  %v14331_v44 = vpack.c.bf16 %v6895_v38, %v6892_v35  ;;  %v6903_v53 = vld [vmem:[#allocation22 + $0x158] sm:$0xff] }
 0xb82   :  { %6758 = vmatmul.mubr.f32.vlgmr.msra.gmra.mrb[42].mxu1 %v6642_v41  ;;  %v6889_v41 = vld [vmem:[#allocation22 + $0xe8] sm:$0xff]  ;;  %v14311_v0 = vpack.c.bf16 %v6906_v57, %v6903_v53  ;;  %v6907_v2 = vld [vmem:[#allocation22 + $0x178] sm:$0xff] }
 0xb83   :  { %6972 = vmatprep.mubr.f32.mxu1 %v15772_v29  ;;  %14286 = vmatpush1.bf16.msra.mxu1 %v14285_v34  ;;  %v14328_v30 = vpack.c.bf16 %v6889_v41, %v6886_v25  ;;  %v6893_v34 = vld [vmem:[#allocation22 + $0x108] sm:$0xff] }
 0xb84   :  { %14288 = vmatprep.subr.bf16.mxu1 %v14287_v43  ;;  %14320 = vmatpush3.bf16.msra.mxu0 %v14319_v51  ;;  %v14305_v43 = vpack.c.bf16 %v6893_v34, %v6890_v14  ;;  %v6901_v51 = vld [vmem:[#allocation22 + $0x148] sm:$0xff] }
 0xb85   :  { %14321 = vmatprep.subr.bf16.mxu0 %v15774_v45  ;;  %v14334_v59 = vpack.c.bf16 %v6901_v51, %v6898_v49 }
 0xb87   :  { %14290 = vmatpush1.bf16.msra.mxu1 %v14289_v48  ;;  %v6899_v48 = vld [vmem:[#allocation22 + $0x138] sm:$0xff] }
 0xb88   :  { %14292 = vmatprep.subr.bf16.mxu1 %v14291_v13  ;;  %14323 = vmatpush3.bf16.msra.mxu0 %v14322_v6  ;;  %v14309_v13 = vpack.c.bf16 %v6899_v48, %v6896_v63  ;;  %v14337_v6 = vpack.c.bf16 %v6907_v2, %v6904_v26 }
 0xb89   :  { %14324 = vmatprep.subr.bf16.mxu0 %v15774_v45 }
 0xb8b   :  { %14294 = vmatpush1.bf16.msra.mxu1 %v14293_v11  ;;  %v6905_v11 = vld [vmem:[#allocation22 + $0x168] sm:$0xff] }
 0xb8c   :  { %14296 = vmatprep.subr.bf16.mxu1 %v14295_v4  ;;  %14326 = vmatpush3.bf16.msra.mxu0 %v14325_v55  ;;  %v14313_v62 = vpack.c.bf16 %v6905_v11, %v6902_v1 }
 0xb8d   :  { %14327 = vmatprep.subr.bf16.mxu0 %v15774_v45 }
 0xb8f   :  { %14298 = vmatpush1.bf16.msra.mxu1 %v14297_v18 }
 0xb90   :  { %14300 = vmatprep.subr.bf16.mxu1 %v14299_v21  ;;  %14329 = vmatpush3.bf16.msra.mxu0 %v14328_v30 }
 0xb91   :  { %14330 = vmatprep.subr.bf16.mxu0 %v15774_v45 }
 0xb93   :  { %14302 = vmatpush1.bf16.msra.mxu1 %v14301_v23 }
 0xb94   :  { %14304 = vmatprep.subr.bf16.mxu1 %v14303_v31  ;;  %14332 = vmatpush3.bf16.msra.mxu0 %v14331_v44 }
 0xb95   :  { %14333 = vmatprep.subr.bf16.mxu0 %v15774_v45 }
 0xb97   :  { %14306 = vmatpush1.bf16.msra.mxu1 %v14305_v43 }
 0xb98   :  { %14308 = vmatprep.subr.bf16.mxu1 %v14307_v16  ;;  %14335 = vmatpush3.bf16.msra.mxu0 %v14334_v59 }
 0xb99   :  { %14336 = vmatprep.subr.bf16.mxu0 %v15774_v45 }
 0xb9b   :  { %14310 = vmatpush1.bf16.msra.mxu1 %v14309_v13 }
 0xb9c   :  { %14312 = vmatprep.subr.bf16.mxu1 %v14311_v0  ;;  %14338 = vmatpush3.bf16.msra.mxu0 %v14337_v6 }
 0xb9f   :  { %14314 = vmatpush1.bf16.msra.mxu1 %v14313_v62 }
 0xc51   :  { %v6829_v4 = vpop.f32.mrb[62].mxu0 }
 0xc52   :  { %v13877_v36 = vpop.f32.mrb[63].mxu0 }
 0xc55   :  { %v13589_v37 = vpop.f32.mrb[42].mxu1 }
 0xc56   :  { %v13590_v33 = vpop.f32.mrb[43].mxu1 }
 0xc57   :  { %v13591_v18 = vadd.f32 %v13590_v33, %v13589_v37 }
 0xc59   :  { %v6830_v22 = vadd.f32 %v13591_v18, %v6829_v4 }
 0xc5b   :  { %v6833_v27 = vmul.f32 0.00295858, %v6830_v22 }
 0xc5d   :  { %v6834_v46 = vmul.f32 %v6833_v27, %v6833_v27 }
 0xc5f   :  { %v6836_v55 = vrot.slane %v6834_v46, 7 }
 0xc61   :  { %v6838_v21 = vsub.f32 %v6833_v27, %v6836_v55 }
 0xc63   :  { %v6839_v58 = vadd.f32 1e-05, %v6838_v21 }
 0xc65   :  { %15273 = vrsqrt.f32 %v6839_v58 }
 0xc6f   :  { %v15274_v20 = vpop.eup %15273 }
 0xc70   :  { %v6841_v25 = vmul.f32 %v15274_v20, %v18300_v12 }
 0xc72   :  { %v6846_v41 = vrot.slane %v6841_v25, %v17751_v47 }
 0xc74   :  { %v6848_v28 = vmul.f32 %v6846_v41, %v6833_v27 }
 0xc76   :  { %v6850_v3 = vrot.slane %v6848_v28, 6 }
 0xc78   :  { %v6852_v23 = vsub.f32 %v18300_v12, %v6850_v3 }
 0xc7a   :  { %v6857_v30 = vrot.slane %v6852_v23, %v17757_v56 }
 0xc7c   :  { %v6859_v31 = vsel %vm4644_vm7, %v6846_v41, %v6857_v30 }
 0xc7d   :  { %6973 = vmatmul.mubr.f32.vlgmr.msra.gmra.mrb[44].mxu1 %v6859_v31  ;;  %13911 = vmatmul.mubr.f32.vlgmr.msra.gmra.mrb[64].mxu0 %v6859_v31 }
 0xd50   :  { %v6974_v14 = vpop.f32.mrb[44].mxu1  ;;  %v7045_v34 = vpop.f32.mrb[64].mxu0 }
 0xd51   :  { %v7052_v35 = vrot.slane %v6974_v14, %v17609_v7  ;;  %v7060_v38 = vrot.slane %v7045_v34, %v17609_v7  ;;  %v6976_v9 = vpop.f32.mrb[45].mxu1  ;;  %v13912_v42 = vpop.f32.mrb[65].mxu0  ;;  %v7076_v43 = vrot.slane %v6974_v14, %v17751_v47  ;;  %v7084_v44 = vrot.slane %v7045_v34, %v17751_v47 }
 0xd52   :  { %v7056_v12 = vrot.slane %v6976_v9, %v17609_v7  ;;  %v7080_v16 = vrot.slane %v6976_v9, %v17751_v47 }
 0xd53   :  { %v7061_v63 = vmul.f32 %v7052_v35, %v18310_v19  ;;  %v7064_v48 = vmul.f32 %v7052_v35, %v18316_v15  ;;  %v7067_v49 = vmul.f32 %v7052_v35, %v18344_v50  ;;  %v7070_v51 = vmul.f32 %v7052_v35, %v18361_v52 }
 0xd54   :  { %v7063_v53 = vmul.f32 %v7060_v38, %v18318_v32  ;;  %v7066_v57 = vmul.f32 %v7060_v38, %v18312_v24  ;;  %v7069_v13 = vmul.f32 %v7060_v38, %v18346_v54  ;;  %v7072_v59 = vmul.f32 %v7060_v38, %v18332_v39 }
 0xd55   :  { %v18408_v0 = vadd.f32 %v7076_v43, %v7061_v63  ;;  %v18410_v1 = vadd.f32 %v7076_v43, %v7064_v48  ;;  %v18412_v11 = vadd.f32 %v7076_v43, %v7067_v49  ;;  %v18414_v19 = vadd.f32 %v7076_v43, %v7070_v51 }
 0xd56   :  { %v18416_v15 = vadd.f32 %v7084_v44, %v7063_v53  ;;  %v18418_v50 = vadd.f32 %v7084_v44, %v7066_v57  ;;  %v18420_v52 = vadd.f32 %v7084_v44, %v7069_v13  ;;  %v18422_v32 = vadd.f32 %v7084_v44, %v7072_v59 }
 0xd57   :  { %v7062_v24 = vmul.f32 %v7056_v12, %v18314_v8  ;;  %v7065_v39 = vmul.f32 %v7056_v12, %v18320_v60  ;;  %v7068_v54 = vmul.f32 %v7056_v12, %v18348_v5  ;;  %v7071_v26 = vmul.f32 %v7056_v12, %v18363_v40 }
 0xd59   :  { %v7086_v2 = vadd.f32 %v7080_v16, %v7062_v24  ;;  %v7089_v62 = vadd.f32 %v7080_v16, %v7065_v39  ;;  %v18428_v6 = vadd.f32 %v7080_v16, %v7068_v54  ;;  %v18430_v4 = vadd.f32 %v7080_v16, %v7071_v26 }
 0xd5a   :  { %15731 = dma.done.wait [#allocation5 + $0x1], 46080 }
 0xd5b   :  { %15732 = vsyncadd [#allocation5 + $0x1], 4294921216  ;;  %v18432_v36 = vpack.c.bf16 %v7089_v62, %v7086_v2  ;;  %v7104_v8 = vld [vmem:[#allocation3 + $0x8] sm:$0xff]  ;;  %v7106_v60 = vld [vmem:[#allocation3 + $0x18] sm:$0xff]  ;;  %vm8326_vm12 = vcmask 211968  }
 0xd5c   :  { %v7103_v37 = vld [vmem:[#allocation3] sm:$0xff]  ;;  %7469 = vmatprep.subr.bf16.mxu1 %v7104_v8  ;;  %7575 = vmatprep.subr.bf16.mxu0 %v7106_v60  ;;  %v7105_v5 = vld [vmem:[#allocation3 + $0x10] sm:$0xff]  ;;  %v7118_v18 = vld [vmem:[#allocation3 + $0x78] sm:$0xff] }
 0xd5d   :  { %7501 = vmatprep.mubr.bf16.mxu1 %v18432_v36  ;;  %7607 = vmatprep.mubr.bf16.mxu0 %v18432_v36  ;;  %v7119_v40 = vld [vmem:[#allocation3 + $0x80] sm:$0xff]  ;;  %v7121_v33 = vld [vmem:[#allocation3 + $0x90] sm:$0xff]  ;;  %v7120_v22 = vld [vmem:[#allocation3 + $0x88] sm:$0xff] }
 0xd5e   :  { %7470 = vmatpush1.bf16.msra.mxu1 %v7103_v37  ;;  %7576 = vmatpush1.bf16.msra.mxu0 %v7105_v5  ;;  %v7134_v27 = vld [vmem:[#allocation3 + $0xf8] sm:$0xff]  ;;  %v7136_v46 = vld [vmem:[#allocation3 + $0x108] sm:$0xff]  ;;  %v7133_v55 = vld [vmem:[#allocation3 + $0xf0] sm:$0xff] }
 0xd5f   :  { %7471 = vmatprep.subr.bf16.mxu1 %v7119_v40  ;;  %7577 = vmatprep.subr.bf16.mxu0 %v7121_v33  ;;  %v7135_v21 = vld [vmem:[#allocation3 + $0x100] sm:$0xff]  ;;  %v7149_v58 = vld [vmem:[#allocation3 + $0x170] sm:$0xff]  ;;  %v7148_v25 = vld [vmem:[#allocation3 + $0x168] sm:$0xff] }
 0xd60   :  { %v7151_v20 = vld [vmem:[#allocation3 + $0x180] sm:$0xff]  ;;  %v7150_v41 = vld [vmem:[#allocation3 + $0x178] sm:$0xff]  ;;  %v7164_v28 = vld [vmem:[#allocation3 + $0x1e8] sm:$0xff] }
 0xd61   :  { %v7166_v3 = vld [vmem:[#allocation3 + $0x1f8] sm:$0xff]  ;;  %v7163_v23 = vld [vmem:[#allocation3 + $0x1e0] sm:$0xff]  ;;  %v7165_v30 = vld [vmem:[#allocation3 + $0x1f0] sm:$0xff] }
 0xd62   :  { %7472 = vmatpush1.bf16.msra.mxu1 %v7118_v18  ;;  %7578 = vmatpush1.bf16.msra.mxu0 %v7120_v22  ;;  %v7179_v31 = vld [vmem:[#allocation3 + $0x260] sm:$0xff]  ;;  %v7181_v14 = vld [vmem:[#allocation3 + $0x270] sm:$0xff]  ;;  %v7178_v34 = vld [vmem:[#allocation3 + $0x258] sm:$0xff] }
 0xd63   :  { %7473 = vmatprep.subr.bf16.mxu1 %v7134_v27  ;;  %7579 = vmatprep.subr.bf16.mxu0 %v7136_v46  ;;  %v7180_v35 = vld [vmem:[#allocation3 + $0x268] sm:$0xff]  ;;  %v7194_v38 = vld [vmem:[#allocation3 + $0x2d8] sm:$0xff]  ;;  %v7193_v42 = vld [vmem:[#allocation3 + $0x2d0] sm:$0xff] }
 0xd64   :  { %v7196_v9 = vld [vmem:[#allocation3 + $0x2e8] sm:$0xff]  ;;  %v7195_v43 = vld [vmem:[#allocation3 + $0x2e0] sm:$0xff]  ;;  %v7209_v44 = vld [vmem:[#allocation3 + $0x350] sm:$0xff] }
 0xd65   :  { %v7211_v12 = vld [vmem:[#allocation3 + $0x360] sm:$0xff]  ;;  %v7208_v16 = vld [vmem:[#allocation3 + $0x348] sm:$0xff]  ;;  %v7210_v63 = vld [vmem:[#allocation3 + $0x358] sm:$0xff] }
 0xd66   :  { %7474 = vmatpush1.bf16.msra.mxu1 %v7133_v55  ;;  %7580 = vmatpush1.bf16.msra.mxu0 %v7135_v21  ;;  %v7224_v48 = vld [vmem:[#allocation3 + $0x3c8] sm:$0xff]  ;;  %v7226_v49 = vld [vmem:[#allocation3 + $0x3d8] sm:$0xff]  ;;  %v7223_v51 = vld [vmem:[#allocation3 + $0x3c0] sm:$0xff] }
 0xd67   :  { %7475 = vmatprep.subr.bf16.mxu1 %v7149_v58  ;;  %7581 = vmatprep.subr.bf16.mxu0 %v7151_v20  ;;  %v7225_v53 = vld [vmem:[#allocation3 + $0x3d0] sm:$0xff]  ;;  %v7239_v57 = vld [vmem:[#allocation3 + $0x440] sm:$0xff]  ;;  %v7238_v59 = vld [vmem:[#allocation3 + $0x438] sm:$0xff] }
 0xd68   :  { %v7241_v13 = vld [vmem:[#allocation3 + $0x450] sm:$0xff]  ;;  %v7240_v24 = vld [vmem:[#allocation3 + $0x448] sm:$0xff]  ;;  %v7254_v39 = vld [vmem:[#allocation3 + $0x4b8] sm:$0xff] }
 0xd69   :  { %v7256_v54 = vld [vmem:[#allocation3 + $0x4c8] sm:$0xff]  ;;  %v7253_v26 = vld [vmem:[#allocation3 + $0x4b0] sm:$0xff]  ;;  %v7255_v2 = vld [vmem:[#allocation3 + $0x4c0] sm:$0xff] }
 0xd6a   :  { %7476 = vmatpush1.bf16.msra.mxu1 %v7148_v25  ;;  %7582 = vmatpush1.bf16.msra.mxu0 %v7150_v41  ;;  %v7269_v62 = vld [vmem:[#allocation3 + $0x530] sm:$0xff]  ;;  %v7271_v8 = vld [vmem:[#allocation3 + $0x540] sm:$0xff]  ;;  %v7268_v60 = vld [vmem:[#allocation3 + $0x528] sm:$0xff] }
 0xd6b   :  { %7477 = vmatprep.subr.bf16.mxu1 %v7164_v28  ;;  %7583 = vmatprep.subr.bf16.mxu0 %v7166_v3  ;;  %v7270_v37 = vld [vmem:[#allocation3 + $0x538] sm:$0xff]  ;;  %v7284_v5 = vld [vmem:[#allocation3 + $0x5a8] sm:$0xff]  ;;  %v7283_v33 = vld [vmem:[#allocation3 + $0x5a0] sm:$0xff] }
 0xd6c   :  { %v7286_v40 = vld [vmem:[#allocation3 + $0x5b8] sm:$0xff]  ;;  %v7285_v18 = vld [vmem:[#allocation3 + $0x5b0] sm:$0xff]  ;;  %v7299_v22 = vld [vmem:[#allocation3 + $0x620] sm:$0xff] }
 0xd6d   :  { %v7301_v27 = vld [vmem:[#allocation3 + $0x630] sm:$0xff]  ;;  %v7298_v46 = vld [vmem:[#allocation3 + $0x618] sm:$0xff]  ;;  %v7300_v55 = vld [vmem:[#allocation3 + $0x628] sm:$0xff] }
 0xd6e   :  { %7478 = vmatpush1.bf16.msra.mxu1 %v7163_v23  ;;  %7584 = vmatpush1.bf16.msra.mxu0 %v7165_v30  ;;  %v7314_v21 = vld [vmem:[#allocation3 + $0x698] sm:$0xff]  ;;  %v7316_v58 = vld [vmem:[#allocation3 + $0x6a8] sm:$0xff]  ;;  %v7313_v20 = vld [vmem:[#allocation3 + $0x690] sm:$0xff] }
 0xd6f   :  { %7479 = vmatprep.subr.bf16.mxu1 %v7179_v31  ;;  %7585 = vmatprep.subr.bf16.mxu0 %v7181_v14  ;;  %v7315_v25 = vld [vmem:[#allocation3 + $0x6a0] sm:$0xff]  ;;  %v7329_v41 = vld [vmem:[#allocation3 + $0x710] sm:$0xff]  ;;  %v7328_v3 = vld [vmem:[#allocation3 + $0x708] sm:$0xff]  ;;  %v18438_v14 = vpack.c.bf16 %v18410_v1, %v18408_v0 }
 0xd70   :  { %v7331_v28 = vld [vmem:[#allocation3 + $0x720] sm:$0xff]  ;;  %v7330_v23 = vld [vmem:[#allocation3 + $0x718] sm:$0xff]  ;;  %v7344_v30 = vld [vmem:[#allocation3 + $0x788] sm:$0xff] }
 0xd71   :  { %v7346_v31 = vld [vmem:[#allocation3 + $0x798] sm:$0xff]  ;;  %v7360_v1 = vld [vmem:[#allocation3 + $0x808] sm:$0xff] }
 0xd72   :  { %7480 = vmatpush1.bf16.msra.mxu1 %v7178_v34  ;;  %7586 = vmatpush1.bf16.msra.mxu0 %v7180_v35  ;;  %v7343_v34 = vld [vmem:[#allocation3 + $0x780] sm:$0xff]  ;;  %v7345_v35 = vld [vmem:[#allocation3 + $0x790] sm:$0xff]  ;;  %v7358_v0 = vld [vmem:[#allocation3 + $0x7f8] sm:$0xff] }
 0xd73   :  { %7481 = vmatprep.subr.bf16.mxu1 %v7194_v38  ;;  %7587 = vmatprep.subr.bf16.mxu0 %v7196_v9  ;;  %v7359_v38 = vld [vmem:[#allocation3 + $0x800] sm:$0xff]  ;;  %v7361_v9 = vld [vmem:[#allocation3 + $0x810] sm:$0xff] }
 0xd76   :  { %7482 = vmatpush1.bf16.msra.mxu1 %v7193_v42  ;;  %7588 = vmatpush1.bf16.msra.mxu0 %v7195_v43  ;;  %v18442_v42 = vpack.c.bf16 %v18430_v4, %v18428_v6  ;;  %v7374_v43 = vld [vmem:[#allocation3 + $0x878] sm:$0xff]  ;;  %v18450_v6 = vpack.c.bf16 %v18414_v19, %v18412_v11  ;;  %v7373_v4 = vld [vmem:[#allocation3 + $0x870] sm:$0xff]  ;;  %v7404_v11 = vld [vmem:[#allocation3 + $0x968] sm:$0xff] }
 0xd77   :  { %7483 = vmatprep.subr.bf16.mxu1 %v7209_v44  ;;  %7589 = vmatprep.subr.bf16.mxu0 %v7211_v12  ;;  %v7376_v44 = vld [vmem:[#allocation3 + $0x888] sm:$0xff]  ;;  %v7375_v12 = vld [vmem:[#allocation3 + $0x880] sm:$0xff]  ;;  %v7406_v19 = vld [vmem:[#allocation3 + $0x978] sm:$0xff] }
 0xd7a   :  { %7484 = vmatpush1.bf16.msra.mxu1 %v7208_v16  ;;  %7590 = vmatpush1.bf16.msra.mxu0 %v7210_v63  ;;  %v7389_v16 = vld [vmem:[#allocation3 + $0x8f0] sm:$0xff]  ;;  %v7391_v63 = vld [vmem:[#allocation3 + $0x900] sm:$0xff] }
 0xd7b   :  { %7485 = vmatprep.subr.bf16.mxu1 %v7224_v48  ;;  %7591 = vmatprep.subr.bf16.mxu0 %v7226_v49  ;;  %v7388_v48 = vld [vmem:[#allocation3 + $0x8e8] sm:$0xff]  ;;  %v7390_v49 = vld [vmem:[#allocation3 + $0x8f8] sm:$0xff] }
 0xd7e   :  { %7486 = vmatpush1.bf16.msra.mxu1 %v7223_v51  ;;  %7592 = vmatpush1.bf16.msra.mxu0 %v7225_v53  ;;  %v7403_v51 = vld [vmem:[#allocation3 + $0x960] sm:$0xff]  ;;  %v7405_v53 = vld [vmem:[#allocation3 + $0x970] sm:$0xff] }
 0xd7f   :  { %7487 = vmatprep.subr.bf16.mxu1 %v7239_v57  ;;  %7593 = vmatprep.subr.bf16.mxu0 %v7241_v13  ;;  %v7419_v57 = vld [vmem:[#allocation3 + $0x9e0] sm:$0xff]  ;;  %v7421_v13 = vld [vmem:[#allocation3 + $0x9f0] sm:$0xff] }
 0xd82   :  { %7488 = vmatpush1.bf16.msra.mxu1 %v7238_v59  ;;  %7594 = vmatpush1.bf16.msra.mxu0 %v7240_v24  ;;  %v7418_v59 = vld [vmem:[#allocation3 + $0x9d8] sm:$0xff]  ;;  %v7420_v24 = vld [vmem:[#allocation3 + $0x9e8] sm:$0xff] }
 0xd83   :  { %7489 = vmatprep.subr.bf16.mxu1 %v7254_v39  ;;  %7595 = vmatprep.subr.bf16.mxu0 %v7256_v54  ;;  %v7434_v39 = vld [vmem:[#allocation3 + $0xa58] sm:$0xff]  ;;  %v7436_v54 = vld [vmem:[#allocation3 + $0xa68] sm:$0xff] }
 0xd86   :  { %7490 = vmatpush1.bf16.msra.mxu1 %v7253_v26  ;;  %7596 = vmatpush1.bf16.msra.mxu0 %v7255_v2  ;;  %v7433_v26 = vld [vmem:[#allocation3 + $0xa50] sm:$0xff]  ;;  %v7435_v2 = vld [vmem:[#allocation3 + $0xa60] sm:$0xff] }
 0xd87   :  { %7491 = vmatprep.subr.bf16.mxu1 %v7269_v62  ;;  %7597 = vmatprep.subr.bf16.mxu0 %v7271_v8  ;;  %v7449_v62 = vld [vmem:[#allocation3 + $0xad0] sm:$0xff]  ;;  %v7451_v8 = vld [vmem:[#allocation3 + $0xae0] sm:$0xff] }
 0xd8a   :  { %7492 = vmatpush1.bf16.msra.mxu1 %v7268_v60  ;;  %7598 = vmatpush1.bf16.msra.mxu0 %v7270_v37  ;;  %v7448_v60 = vld [vmem:[#allocation3 + $0xac8] sm:$0xff]  ;;  %v7450_v37 = vld [vmem:[#allocation3 + $0xad8] sm:$0xff] }
 0xd8b   :  { %7493 = vmatprep.subr.bf16.mxu1 %v7284_v5  ;;  %7599 = vmatprep.subr.bf16.mxu0 %v7286_v40  ;;  %v7108_v5 = vld [vmem:[#allocation3 + $0x28] sm:$0xff]  ;;  %v7110_v40 = vld [vmem:[#allocation3 + $0x38] sm:$0xff] }
 0xd8e   :  { %7494 = vmatpush1.bf16.msra.mxu1 %v7283_v33  ;;  %7600 = vmatpush1.bf16.msra.mxu0 %v7285_v18  ;;  %v18458_v33 = vpack.c.bf16 %v18418_v50, %v18416_v15  ;;  %v7107_v18 = vld [vmem:[#allocation3 + $0x20] sm:$0xff]  ;;  %v7138_v15 = vld [vmem:[#allocation3 + $0x118] sm:$0xff]  ;;  %v7140_v50 = vld [vmem:[#allocation3 + $0x128] sm:$0xff] }
 0xd8f   :  { %7495 = vmatprep.subr.bf16.mxu1 %v7299_v22  ;;  %7601 = vmatprep.subr.bf16.mxu0 %v7301_v27  ;;  %v7109_v22 = vld [vmem:[#allocation3 + $0x30] sm:$0xff]  ;;  %v7123_v27 = vld [vmem:[#allocation3 + $0xa0] sm:$0xff] }
 0xd92   :  { %7496 = vmatpush1.bf16.msra.mxu1 %v7298_v46  ;;  %7602 = vmatpush1.bf16.msra.mxu0 %v7300_v55  ;;  %v7125_v46 = vld [vmem:[#allocation3 + $0xb0] sm:$0xff]  ;;  %v7122_v55 = vld [vmem:[#allocation3 + $0x98] sm:$0xff] }
 0xd93   :  { %7497 = vmatprep.subr.bf16.mxu1 %v7314_v21  ;;  %7603 = vmatprep.subr.bf16.mxu0 %v7316_v58  ;;  %v7124_v21 = vld [vmem:[#allocation3 + $0xa8] sm:$0xff]  ;;  %v18466_v58 = vpack.c.bf16 %v18422_v32, %v18420_v52  ;;  %v7170_v32 = vld [vmem:[#allocation3 + $0x218] sm:$0xff] }
 0xd94   :  { %v7168_v52 = vld [vmem:[#allocation3 + $0x208] sm:$0xff] }
 0xd96   :  { %7498 = vmatpush1.bf16.msra.mxu1 %v7313_v20  ;;  %7604 = vmatpush1.bf16.msra.mxu0 %v7315_v25  ;;  %v7137_v20 = vld [vmem:[#allocation3 + $0x110] sm:$0xff]  ;;  %v7139_v25 = vld [vmem:[#allocation3 + $0x120] sm:$0xff] }
 0xd97   :  { %7499 = vmatprep.subr.bf16.mxu1 %v7329_v41  ;;  %7605 = vmatprep.subr.bf16.mxu0 %v7331_v28  ;;  %v7153_v41 = vld [vmem:[#allocation3 + $0x190] sm:$0xff]  ;;  %v7155_v28 = vld [vmem:[#allocation3 + $0x1a0] sm:$0xff] }
 0xd9a   :  { %7500 = vmatpush1.bf16.msra.mxu1 %v7328_v3  ;;  %7606 = vmatpush1.bf16.msra.mxu0 %v7330_v23  ;;  %v7152_v3 = vld [vmem:[#allocation3 + $0x188] sm:$0xff]  ;;  %v7154_v23 = vld [vmem:[#allocation3 + $0x198] sm:$0xff] }
 0xd9b   :  { %7522 = vmatprep.subr.bf16.mxu1 %v7344_v30  ;;  %7628 = vmatprep.subr.bf16.mxu0 %v7346_v31  ;;  %v7167_v30 = vld [vmem:[#allocation3 + $0x200] sm:$0xff]  ;;  %v7169_v31 = vld [vmem:[#allocation3 + $0x210] sm:$0xff] }
 0xd9d   :  { %7502 = vmatmul.mubr.bf16.vlgmr.msra.gmra.mrb[48].mxu1 %v18438_v14  ;;  %7608 = vmatmul.mubr.bf16.vlgmr.msra.gmra.mrb[68].mxu0 %v18438_v14 }
 0xd9e   :  { %7523 = vmatpush1.bf16.msra.mxu1 %v7343_v34  ;;  %7629 = vmatpush1.bf16.msra.mxu0 %v7345_v35  ;;  %v7183_v34 = vld [vmem:[#allocation3 + $0x280] sm:$0xff]  ;;  %v7185_v35 = vld [vmem:[#allocation3 + $0x290] sm:$0xff] }
 0xd9f   :  { %7524 = vmatprep.subr.bf16.mxu1 %v7359_v38  ;;  %7630 = vmatprep.subr.bf16.mxu0 %v7361_v9  ;;  %v7182_v38 = vld [vmem:[#allocation3 + $0x278] sm:$0xff]  ;;  %v7184_v9 = vld [vmem:[#allocation3 + $0x288] sm:$0xff] }
 0xda0   :  { %7511 = vmatprep.mubr.bf16.mxu1 %v18442_v42  ;;  %7617 = vmatprep.mubr.bf16.mxu0 %v18442_v42 }
 0xda2   :  { %7525 = vmatpush1.bf16.msra.mxu1 %v7358_v0  ;;  %7631 = vmatpush1.bf16.msra.mxu0 %v7360_v1  ;;  %v7198_v0 = vld [vmem:[#allocation3 + $0x2f8] sm:$0xff]  ;;  %v7200_v1 = vld [vmem:[#allocation3 + $0x308] sm:$0xff] }
 0xda3   :  { %7526 = vmatprep.subr.bf16.mxu1 %v7374_v43  ;;  %7632 = vmatprep.subr.bf16.mxu0 %v7376_v44  ;;  %v7197_v43 = vld [vmem:[#allocation3 + $0x2f0] sm:$0xff]  ;;  %v7199_v44 = vld [vmem:[#allocation3 + $0x300] sm:$0xff] }
 0xda5   :  { %7512 = vmatmul.mubr.bf16.gmra.mrb[52].mxu1 %v18450_v6  ;;  %7618 = vmatmul.mubr.bf16.gmra.mrb[72].mxu0 %v18450_v6 }
 0xda6   :  { %7527 = vmatpush1.bf16.msra.mxu1 %v7373_v4  ;;  %7633 = vmatpush1.bf16.msra.mxu0 %v7375_v12  ;;  %v7213_v4 = vld [vmem:[#allocation3 + $0x370] sm:$0xff]  ;;  %v7215_v12 = vld [vmem:[#allocation3 + $0x380] sm:$0xff] }
 0xda7   :  { %7528 = vmatprep.subr.bf16.mxu1 %v7389_v16  ;;  %7634 = vmatprep.subr.bf16.mxu0 %v7391_v63  ;;  %v7212_v16 = vld [vmem:[#allocation3 + $0x368] sm:$0xff]  ;;  %v7214_v63 = vld [vmem:[#allocation3 + $0x378] sm:$0xff] }
 0xda8   :  { %7554 = vmatprep.mubr.bf16.mxu1 %v15759_v17  ;;  %7660 = vmatprep.mubr.bf16.mxu0 %v15759_v17 }
 0xdaa   :  { %7529 = vmatpush1.bf16.msra.mxu1 %v7388_v48  ;;  %7635 = vmatpush1.bf16.msra.mxu0 %v7390_v49  ;;  %v7228_v48 = vld [vmem:[#allocation3 + $0x3e8] sm:$0xff]  ;;  %v7230_v49 = vld [vmem:[#allocation3 + $0x3f8] sm:$0xff] }
 0xdab   :  { %7530 = vmatprep.subr.bf16.mxu1 %v7404_v11  ;;  %7636 = vmatprep.subr.bf16.mxu0 %v7406_v19  ;;  %v7227_v11 = vld [vmem:[#allocation3 + $0x3e0] sm:$0xff]  ;;  %v7229_v19 = vld [vmem:[#allocation3 + $0x3f0] sm:$0xff] }
 0xdae   :  { %7531 = vmatpush1.bf16.msra.mxu1 %v7403_v51  ;;  %7637 = vmatpush1.bf16.msra.mxu0 %v7405_v53  ;;  %v7243_v51 = vld [vmem:[#allocation3 + $0x460] sm:$0xff]  ;;  %v7245_v53 = vld [vmem:[#allocation3 + $0x470] sm:$0xff] }
 0xdaf   :  { %7532 = vmatprep.subr.bf16.mxu1 %v7419_v57  ;;  %7638 = vmatprep.subr.bf16.mxu0 %v7421_v13  ;;  %v7242_v57 = vld [vmem:[#allocation3 + $0x458] sm:$0xff]  ;;  %v7244_v13 = vld [vmem:[#allocation3 + $0x468] sm:$0xff] }
 0xdb2   :  { %7533 = vmatpush1.bf16.msra.mxu1 %v7418_v59  ;;  %7639 = vmatpush1.bf16.msra.mxu0 %v7420_v24  ;;  %v7258_v59 = vld [vmem:[#allocation3 + $0x4d8] sm:$0xff]  ;;  %v7260_v24 = vld [vmem:[#allocation3 + $0x4e8] sm:$0xff] }
 0xdb3   :  { %7534 = vmatprep.subr.bf16.mxu1 %v7434_v39  ;;  %7640 = vmatprep.subr.bf16.mxu0 %v7436_v54  ;;  %v7257_v39 = vld [vmem:[#allocation3 + $0x4d0] sm:$0xff]  ;;  %v7259_v54 = vld [vmem:[#allocation3 + $0x4e0] sm:$0xff] }
 0xdb6   :  { %7535 = vmatpush1.bf16.msra.mxu1 %v7433_v26  ;;  %7641 = vmatpush1.bf16.msra.mxu0 %v7435_v2  ;;  %v7273_v26 = vld [vmem:[#allocation3 + $0x550] sm:$0xff]  ;;  %v7275_v2 = vld [vmem:[#allocation3 + $0x560] sm:$0xff] }
 0xdb7   :  { %7536 = vmatprep.subr.bf16.mxu1 %v7449_v62  ;;  %7642 = vmatprep.subr.bf16.mxu0 %v7451_v8  ;;  %v7272_v62 = vld [vmem:[#allocation3 + $0x548] sm:$0xff]  ;;  %v7274_v8 = vld [vmem:[#allocation3 + $0x558] sm:$0xff] }
 0xdba   :  { %7537 = vmatpush1.bf16.msra.mxu1 %v7448_v60  ;;  %7643 = vmatpush1.bf16.msra.mxu0 %v7450_v37  ;;  %v7288_v60 = vld [vmem:[#allocation3 + $0x5c8] sm:$0xff]  ;;  %v7290_v37 = vld [vmem:[#allocation3 + $0x5d8] sm:$0xff] }
 0xdbb   :  { %7681 = vmatprep.subr.bf16.mxu1 %v7108_v5  ;;  %7787 = vmatprep.subr.bf16.mxu0 %v7110_v40  ;;  %v7287_v5 = vld [vmem:[#allocation3 + $0x5c0] sm:$0xff]  ;;  %v7289_v40 = vld [vmem:[#allocation3 + $0x5d0] sm:$0xff] }
 0xdbd   :  { %7555 = vmatmul.mubr.bf16.vlgmr.msra.gmra.mrb[48].mxu1 %v18458_v33  ;;  %7661 = vmatmul.mubr.bf16.vlgmr.msra.gmra.mrb[68].mxu0 %v18458_v33 }
 0xdbe   :  { %7682 = vmatpush1.bf16.msra.mxu1 %v7107_v18  ;;  %7788 = vmatpush1.bf16.msra.mxu0 %v7109_v22  ;;  %v7303_v18 = vld [vmem:[#allocation3 + $0x640] sm:$0xff]  ;;  %v7305_v22 = vld [vmem:[#allocation3 + $0x650] sm:$0xff] }
 0xdbf   :  { %7683 = vmatprep.subr.bf16.mxu1 %v7123_v27  ;;  %7789 = vmatprep.subr.bf16.mxu0 %v7125_v46  ;;  %v7302_v27 = vld [vmem:[#allocation3 + $0x638] sm:$0xff]  ;;  %v7304_v46 = vld [vmem:[#allocation3 + $0x648] sm:$0xff] }
 0xdc0   :  { %7564 = vmatprep.mubr.bf16.mxu1 %v15759_v17  ;;  %7670 = vmatprep.mubr.bf16.mxu0 %v15759_v17 }
 0xdc2   :  { %7684 = vmatpush1.bf16.msra.mxu1 %v7122_v55  ;;  %7790 = vmatpush1.bf16.msra.mxu0 %v7124_v21  ;;  %v7318_v55 = vld [vmem:[#allocation3 + $0x6b8] sm:$0xff]  ;;  %v7320_v21 = vld [vmem:[#allocation3 + $0x6c8] sm:$0xff] }
 0xdc3   :  { %7685 = vmatprep.subr.bf16.mxu1 %v7138_v15  ;;  %7791 = vmatprep.subr.bf16.mxu0 %v7140_v50  ;;  %v7317_v15 = vld [vmem:[#allocation3 + $0x6b0] sm:$0xff]  ;;  %v7319_v50 = vld [vmem:[#allocation3 + $0x6c0] sm:$0xff] }
 0xdc5   :  { %7565 = vmatmul.mubr.bf16.gmra.mrb[52].mxu1 %v18466_v58  ;;  %7671 = vmatmul.mubr.bf16.gmra.mrb[72].mxu0 %v18466_v58 }
 0xdc6   :  { %7686 = vmatpush1.bf16.msra.mxu1 %v7137_v20  ;;  %7792 = vmatpush1.bf16.msra.mxu0 %v7139_v25  ;;  %v7333_v20 = vld [vmem:[#allocation3 + $0x730] sm:$0xff]  ;;  %v7335_v25 = vld [vmem:[#allocation3 + $0x740] sm:$0xff] }
 0xdc7   :  { %7687 = vmatprep.subr.bf16.mxu1 %v7153_v41  ;;  %7793 = vmatprep.subr.bf16.mxu0 %v7155_v28  ;;  %v7332_v41 = vld [vmem:[#allocation3 + $0x728] sm:$0xff]  ;;  %v7334_v28 = vld [vmem:[#allocation3 + $0x738] sm:$0xff] }
 0xdc8   :  { %7713 = vmatprep.mubr.bf16.mxu1 %v18432_v36  ;;  %7819 = vmatprep.mubr.bf16.mxu0 %v18432_v36 }
 0xdca   :  { %7688 = vmatpush1.bf16.msra.mxu1 %v7152_v3  ;;  %7794 = vmatpush1.bf16.msra.mxu0 %v7154_v23  ;;  %v7348_v3 = vld [vmem:[#allocation3 + $0x7a8] sm:$0xff]  ;;  %v7350_v23 = vld [vmem:[#allocation3 + $0x7b8] sm:$0xff] }
 0xdcb   :  { %7689 = vmatprep.subr.bf16.mxu1 %v7168_v52  ;;  %7795 = vmatprep.subr.bf16.mxu0 %v7170_v32  ;;  %v7347_v52 = vld [vmem:[#allocation3 + $0x7a0] sm:$0xff]  ;;  %v7349_v32 = vld [vmem:[#allocation3 + $0x7b0] sm:$0xff] }
 0xdce   :  { %7690 = vmatpush1.bf16.msra.mxu1 %v7167_v30  ;;  %7796 = vmatpush1.bf16.msra.mxu0 %v7169_v31  ;;  %v7363_v30 = vld [vmem:[#allocation3 + $0x820] sm:$0xff]  ;;  %v7365_v31 = vld [vmem:[#allocation3 + $0x830] sm:$0xff] }
 0xdcf   :  { %7691 = vmatprep.subr.bf16.mxu1 %v7183_v34  ;;  %7797 = vmatprep.subr.bf16.mxu0 %v7185_v35  ;;  %v7362_v34 = vld [vmem:[#allocation3 + $0x818] sm:$0xff]  ;;  %v7364_v35 = vld [vmem:[#allocation3 + $0x828] sm:$0xff] }
 0xdd2   :  { %7692 = vmatpush1.bf16.msra.mxu1 %v7182_v38  ;;  %7798 = vmatpush1.bf16.msra.mxu0 %v7184_v9  ;;  %v7378_v38 = vld [vmem:[#allocation3 + $0x898] sm:$0xff]  ;;  %v7380_v9 = vld [vmem:[#allocation3 + $0x8a8] sm:$0xff] }
 0xdd3   :  { %7693 = vmatprep.subr.bf16.mxu1 %v7198_v0  ;;  %7799 = vmatprep.subr.bf16.mxu0 %v7200_v1  ;;  %v7377_v0 = vld [vmem:[#allocation3 + $0x890] sm:$0xff]  ;;  %v7379_v1 = vld [vmem:[#allocation3 + $0x8a0] sm:$0xff] }
 0xdd6   :  { %7694 = vmatpush1.bf16.msra.mxu1 %v7197_v43  ;;  %7800 = vmatpush1.bf16.msra.mxu0 %v7199_v44  ;;  %v7393_v43 = vld [vmem:[#allocation3 + $0x910] sm:$0xff]  ;;  %v7395_v44 = vld [vmem:[#allocation3 + $0x920] sm:$0xff] }
 0xdd7   :  { %7695 = vmatprep.subr.bf16.mxu1 %v7213_v4  ;;  %7801 = vmatprep.subr.bf16.mxu0 %v7215_v12  ;;  %v7392_v4 = vld [vmem:[#allocation3 + $0x908] sm:$0xff]  ;;  %v7394_v12 = vld [vmem:[#allocation3 + $0x918] sm:$0xff] }
 0xdda   :  { %7696 = vmatpush1.bf16.msra.mxu1 %v7212_v16  ;;  %7802 = vmatpush1.bf16.msra.mxu0 %v7214_v63  ;;  %v7408_v16 = vld [vmem:[#allocation3 + $0x988] sm:$0xff]  ;;  %v7410_v63 = vld [vmem:[#allocation3 + $0x998] sm:$0xff] }
 0xddb   :  { %7697 = vmatprep.subr.bf16.mxu1 %v7228_v48  ;;  %7803 = vmatprep.subr.bf16.mxu0 %v7230_v49  ;;  %v7407_v48 = vld [vmem:[#allocation3 + $0x980] sm:$0xff]  ;;  %v7409_v49 = vld [vmem:[#allocation3 + $0x990] sm:$0xff] }
 0xdde   :  { %7698 = vmatpush1.bf16.msra.mxu1 %v7227_v11  ;;  %7804 = vmatpush1.bf16.msra.mxu0 %v7229_v19  ;;  %v7423_v11 = vld [vmem:[#allocation3 + $0xa00] sm:$0xff]  ;;  %v7425_v19 = vld [vmem:[#allocation3 + $0xa10] sm:$0xff] }
 0xddf   :  { %7699 = vmatprep.subr.bf16.mxu1 %v7243_v51  ;;  %7805 = vmatprep.subr.bf16.mxu0 %v7245_v53  ;;  %v7422_v51 = vld [vmem:[#allocation3 + $0x9f8] sm:$0xff]  ;;  %v7424_v53 = vld [vmem:[#allocation3 + $0xa08] sm:$0xff] }
 0xde2   :  { %7700 = vmatpush1.bf16.msra.mxu1 %v7242_v57  ;;  %7806 = vmatpush1.bf16.msra.mxu0 %v7244_v13  ;;  %v7438_v57 = vld [vmem:[#allocation3 + $0xa78] sm:$0xff]  ;;  %v7440_v13 = vld [vmem:[#allocation3 + $0xa88] sm:$0xff] }
 0xde3   :  { %7701 = vmatprep.subr.bf16.mxu1 %v7258_v59  ;;  %7807 = vmatprep.subr.bf16.mxu0 %v7260_v24  ;;  %v7437_v59 = vld [vmem:[#allocation3 + $0xa70] sm:$0xff]  ;;  %v7439_v24 = vld [vmem:[#allocation3 + $0xa80] sm:$0xff] }
 0xde6   :  { %7702 = vmatpush1.bf16.msra.mxu1 %v7257_v39  ;;  %7808 = vmatpush1.bf16.msra.mxu0 %v7259_v54  ;;  %v7453_v39 = vld [vmem:[#allocation3 + $0xaf0] sm:$0xff]  ;;  %v7455_v54 = vld [vmem:[#allocation3 + $0xb00] sm:$0xff] }
 0xde7   :  { %7703 = vmatprep.subr.bf16.mxu1 %v7273_v26  ;;  %7809 = vmatprep.subr.bf16.mxu0 %v7275_v2  ;;  %v7452_v26 = vld [vmem:[#allocation3 + $0xae8] sm:$0xff]  ;;  %v7454_v2 = vld [vmem:[#allocation3 + $0xaf8] sm:$0xff] }
 0xdea   :  { %7704 = vmatpush1.bf16.msra.mxu1 %v7272_v62  ;;  %7810 = vmatpush1.bf16.msra.mxu0 %v7274_v8  ;;  %v7112_v62 = vld [vmem:[#allocation3 + $0x48] sm:$0xff]  ;;  %v7114_v8 = vld [vmem:[#allocation3 + $0x58] sm:$0xff] }
 0xdeb   :  { %7705 = vmatprep.subr.bf16.mxu1 %v7288_v60  ;;  %7811 = vmatprep.subr.bf16.mxu0 %v7290_v37  ;;  %v7111_v60 = vld [vmem:[#allocation3 + $0x40] sm:$0xff]  ;;  %v7113_v37 = vld [vmem:[#allocation3 + $0x50] sm:$0xff] }
 0xdee   :  { %7706 = vmatpush1.bf16.msra.mxu1 %v7287_v5  ;;  %7812 = vmatpush1.bf16.msra.mxu0 %v7289_v40  ;;  %v7127_v5 = vld [vmem:[#allocation3 + $0xc0] sm:$0xff]  ;;  %v7129_v40 = vld [vmem:[#allocation3 + $0xd0] sm:$0xff] }
 0xdef   :  { %7707 = vmatprep.subr.bf16.mxu1 %v7303_v18  ;;  %7813 = vmatprep.subr.bf16.mxu0 %v7305_v22  ;;  %v7126_v18 = vld [vmem:[#allocation3 + $0xb8] sm:$0xff]  ;;  %v7128_v22 = vld [vmem:[#allocation3 + $0xc8] sm:$0xff] }
 0xdf2   :  { %7708 = vmatpush1.bf16.msra.mxu1 %v7302_v27  ;;  %7814 = vmatpush1.bf16.msra.mxu0 %v7304_v46  ;;  %v7142_v27 = vld [vmem:[#allocation3 + $0x138] sm:$0xff]  ;;  %v7144_v46 = vld [vmem:[#allocation3 + $0x148] sm:$0xff] }
 0xdf3   :  { %7709 = vmatprep.subr.bf16.mxu1 %v7318_v55  ;;  %7815 = vmatprep.subr.bf16.mxu0 %v7320_v21  ;;  %v7141_v55 = vld [vmem:[#allocation3 + $0x130] sm:$0xff]  ;;  %v7143_v21 = vld [vmem:[#allocation3 + $0x140] sm:$0xff] }
 0xdf6   :  { %7710 = vmatpush1.bf16.msra.mxu1 %v7317_v15  ;;  %7816 = vmatpush1.bf16.msra.mxu0 %v7319_v50  ;;  %v7157_v15 = vld [vmem:[#allocation3 + $0x1b0] sm:$0xff]  ;;  %v7159_v50 = vld [vmem:[#allocation3 + $0x1c0] sm:$0xff] }
 0xdf7   :  { %7711 = vmatprep.subr.bf16.mxu1 %v7333_v20  ;;  %7817 = vmatprep.subr.bf16.mxu0 %v7335_v25  ;;  %v7156_v20 = vld [vmem:[#allocation3 + $0x1a8] sm:$0xff]  ;;  %v7158_v25 = vld [vmem:[#allocation3 + $0x1b8] sm:$0xff] }
 0xdfa   :  { %7712 = vmatpush1.bf16.msra.mxu1 %v7332_v41  ;;  %7818 = vmatpush1.bf16.msra.mxu0 %v7334_v28  ;;  %v7172_v41 = vld [vmem:[#allocation3 + $0x228] sm:$0xff]  ;;  %v7174_v28 = vld [vmem:[#allocation3 + $0x238] sm:$0xff] }
 0xdfb   :  { %7734 = vmatprep.subr.bf16.mxu1 %v7348_v3  ;;  %7840 = vmatprep.subr.bf16.mxu0 %v7350_v23  ;;  %v7171_v3 = vld [vmem:[#allocation3 + $0x220] sm:$0xff]  ;;  %v7173_v23 = vld [vmem:[#allocation3 + $0x230] sm:$0xff] }
 0xdfd   :  { %7714 = vmatmul.mubr.bf16.vlgmr.msra.gmra.mrb[56].mxu1 %v18438_v14  ;;  %7820 = vmatmul.mubr.bf16.vlgmr.msra.gmra.mrb[76].mxu0 %v18438_v14 }
 0xdfe   :  { %7735 = vmatpush1.bf16.msra.mxu1 %v7347_v52  ;;  %7841 = vmatpush1.bf16.msra.mxu0 %v7349_v32  ;;  %v7187_v52 = vld [vmem:[#allocation3 + $0x2a0] sm:$0xff]  ;;  %v7189_v32 = vld [vmem:[#allocation3 + $0x2b0] sm:$0xff] }
 0xdff   :  { %7736 = vmatprep.subr.bf16.mxu1 %v7363_v30  ;;  %7842 = vmatprep.subr.bf16.mxu0 %v7365_v31  ;;  %v7186_v30 = vld [vmem:[#allocation3 + $0x298] sm:$0xff]  ;;  %v7188_v31 = vld [vmem:[#allocation3 + $0x2a8] sm:$0xff] }
 0xe00   :  { %7723 = vmatprep.mubr.bf16.mxu1 %v18442_v42  ;;  %7829 = vmatprep.mubr.bf16.mxu0 %v18442_v42 }
 0xe02   :  { %7737 = vmatpush1.bf16.msra.mxu1 %v7362_v34  ;;  %7843 = vmatpush1.bf16.msra.mxu0 %v7364_v35  ;;  %v7202_v34 = vld [vmem:[#allocation3 + $0x318] sm:$0xff]  ;;  %v7204_v35 = vld [vmem:[#allocation3 + $0x328] sm:$0xff] }
 0xe03   :  { %7738 = vmatprep.subr.bf16.mxu1 %v7378_v38  ;;  %7844 = vmatprep.subr.bf16.mxu0 %v7380_v9  ;;  %v7201_v38 = vld [vmem:[#allocation3 + $0x310] sm:$0xff]  ;;  %v7203_v9 = vld [vmem:[#allocation3 + $0x320] sm:$0xff] }
 0xe05   :  { %7724 = vmatmul.mubr.bf16.gmra.mrb[60].mxu1 %v18450_v6  ;;  %7830 = vmatmul.mubr.bf16.gmra.mrb[80].mxu0 %v18450_v6 }
 0xe06   :  { %7739 = vmatpush1.bf16.msra.mxu1 %v7377_v0  ;;  %7845 = vmatpush1.bf16.msra.mxu0 %v7379_v1  ;;  %v7217_v0 = vld [vmem:[#allocation3 + $0x390] sm:$0xff]  ;;  %v7219_v1 = vld [vmem:[#allocation3 + $0x3a0] sm:$0xff] }
 0xe07   :  { %7740 = vmatprep.subr.bf16.mxu1 %v7393_v43  ;;  %7846 = vmatprep.subr.bf16.mxu0 %v7395_v44  ;;  %v7216_v43 = vld [vmem:[#allocation3 + $0x388] sm:$0xff]  ;;  %v7218_v44 = vld [vmem:[#allocation3 + $0x398] sm:$0xff] }
 0xe08   :  { %7766 = vmatprep.mubr.bf16.mxu1 %v15759_v17  ;;  %7872 = vmatprep.mubr.bf16.mxu0 %v15759_v17 }
 0xe0a   :  { %7741 = vmatpush1.bf16.msra.mxu1 %v7392_v4  ;;  %7847 = vmatpush1.bf16.msra.mxu0 %v7394_v12  ;;  %v7232_v4 = vld [vmem:[#allocation3 + $0x408] sm:$0xff]  ;;  %v7234_v12 = vld [vmem:[#allocation3 + $0x418] sm:$0xff] }
 0xe0b   :  { %7742 = vmatprep.subr.bf16.mxu1 %v7408_v16  ;;  %7848 = vmatprep.subr.bf16.mxu0 %v7410_v63  ;;  %v7231_v16 = vld [vmem:[#allocation3 + $0x400] sm:$0xff]  ;;  %v7233_v63 = vld [vmem:[#allocation3 + $0x410] sm:$0xff] }
 0xe0e   :  { %7743 = vmatpush1.bf16.msra.mxu1 %v7407_v48  ;;  %7849 = vmatpush1.bf16.msra.mxu0 %v7409_v49  ;;  %v7247_v48 = vld [vmem:[#allocation3 + $0x480] sm:$0xff]  ;;  %v7249_v49 = vld [vmem:[#allocation3 + $0x490] sm:$0xff] }
 0xe0f   :  { %7744 = vmatprep.subr.bf16.mxu1 %v7423_v11  ;;  %7850 = vmatprep.subr.bf16.mxu0 %v7425_v19  ;;  %v7246_v11 = vld [vmem:[#allocation3 + $0x478] sm:$0xff]  ;;  %v7248_v19 = vld [vmem:[#allocation3 + $0x488] sm:$0xff] }
 0xe12   :  { %7745 = vmatpush1.bf16.msra.mxu1 %v7422_v51  ;;  %7851 = vmatpush1.bf16.msra.mxu0 %v7424_v53  ;;  %v7262_v51 = vld [vmem:[#allocation3 + $0x4f8] sm:$0xff]  ;;  %v7264_v53 = vld [vmem:[#allocation3 + $0x508] sm:$0xff] }
 0xe13   :  { %7746 = vmatprep.subr.bf16.mxu1 %v7438_v57  ;;  %7852 = vmatprep.subr.bf16.mxu0 %v7440_v13  ;;  %v7261_v57 = vld [vmem:[#allocation3 + $0x4f0] sm:$0xff]  ;;  %v7263_v13 = vld [vmem:[#allocation3 + $0x500] sm:$0xff] }
 0xe16   :  { %7747 = vmatpush1.bf16.msra.mxu1 %v7437_v59  ;;  %7853 = vmatpush1.bf16.msra.mxu0 %v7439_v24  ;;  %v7277_v59 = vld [vmem:[#allocation3 + $0x570] sm:$0xff]  ;;  %v7279_v24 = vld [vmem:[#allocation3 + $0x580] sm:$0xff] }
 0xe17   :  { %7748 = vmatprep.subr.bf16.mxu1 %v7453_v39  ;;  %7854 = vmatprep.subr.bf16.mxu0 %v7455_v54  ;;  %v7276_v39 = vld [vmem:[#allocation3 + $0x568] sm:$0xff]  ;;  %v7278_v54 = vld [vmem:[#allocation3 + $0x578] sm:$0xff] }
 0xe1a   :  { %7749 = vmatpush1.bf16.msra.mxu1 %v7452_v26  ;;  %7855 = vmatpush1.bf16.msra.mxu0 %v7454_v2  ;;  %v7292_v26 = vld [vmem:[#allocation3 + $0x5e8] sm:$0xff]  ;;  %v7294_v2 = vld [vmem:[#allocation3 + $0x5f8] sm:$0xff] }
 0xe1b   :  { %7893 = vmatprep.subr.bf16.mxu1 %v7112_v62  ;;  %7999 = vmatprep.subr.bf16.mxu0 %v7114_v8  ;;  %v7291_v62 = vld [vmem:[#allocation3 + $0x5e0] sm:$0xff]  ;;  %v7293_v8 = vld [vmem:[#allocation3 + $0x5f0] sm:$0xff] }
 0xe1d   :  { %7767 = vmatmul.mubr.bf16.vlgmr.msra.gmra.mrb[56].mxu1 %v18458_v33  ;;  %7873 = vmatmul.mubr.bf16.vlgmr.msra.gmra.mrb[76].mxu0 %v18458_v33 }
 0xe1e   :  { %7894 = vmatpush1.bf16.msra.mxu1 %v7111_v60  ;;  %8000 = vmatpush1.bf16.msra.mxu0 %v7113_v37  ;;  %v7307_v60 = vld [vmem:[#allocation3 + $0x660] sm:$0xff]  ;;  %v7309_v37 = vld [vmem:[#allocation3 + $0x670] sm:$0xff] }
 0xe1f   :  { %7895 = vmatprep.subr.bf16.mxu1 %v7127_v5  ;;  %8001 = vmatprep.subr.bf16.mxu0 %v7129_v40  ;;  %v7306_v5 = vld [vmem:[#allocation3 + $0x658] sm:$0xff]  ;;  %v7308_v40 = vld [vmem:[#allocation3 + $0x668] sm:$0xff] }
 0xe20   :  { %7776 = vmatprep.mubr.bf16.mxu1 %v15759_v17  ;;  %7882 = vmatprep.mubr.bf16.mxu0 %v15759_v17 }
 0xe22   :  { %7896 = vmatpush1.bf16.msra.mxu1 %v7126_v18  ;;  %8002 = vmatpush1.bf16.msra.mxu0 %v7128_v22  ;;  %v7322_v18 = vld [vmem:[#allocation3 + $0x6d8] sm:$0xff]  ;;  %v7324_v22 = vld [vmem:[#allocation3 + $0x6e8] sm:$0xff] }
 0xe23   :  { %7897 = vmatprep.subr.bf16.mxu1 %v7142_v27  ;;  %8003 = vmatprep.subr.bf16.mxu0 %v7144_v46  ;;  %v7321_v27 = vld [vmem:[#allocation3 + $0x6d0] sm:$0xff]  ;;  %v7323_v46 = vld [vmem:[#allocation3 + $0x6e0] sm:$0xff] }
 0xe25   :  { %7777 = vmatmul.mubr.bf16.gmra.mrb[60].mxu1 %v18466_v58  ;;  %7883 = vmatmul.mubr.bf16.gmra.mrb[80].mxu0 %v18466_v58 }
 0xe26   :  { %7898 = vmatpush1.bf16.msra.mxu1 %v7141_v55  ;;  %8004 = vmatpush1.bf16.msra.mxu0 %v7143_v21  ;;  %v7337_v55 = vld [vmem:[#allocation3 + $0x750] sm:$0xff]  ;;  %v7339_v21 = vld [vmem:[#allocation3 + $0x760] sm:$0xff] }
 0xe27   :  { %7899 = vmatprep.subr.bf16.mxu1 %v7157_v15  ;;  %8005 = vmatprep.subr.bf16.mxu0 %v7159_v50  ;;  %v7336_v15 = vld [vmem:[#allocation3 + $0x748] sm:$0xff]  ;;  %v7338_v50 = vld [vmem:[#allocation3 + $0x758] sm:$0xff] }
 0xe28   :  { %7925 = vmatprep.mubr.bf16.mxu1 %v18432_v36  ;;  %8031 = vmatprep.mubr.bf16.mxu0 %v18432_v36 }
 0xe2a   :  { %7900 = vmatpush1.bf16.msra.mxu1 %v7156_v20  ;;  %8006 = vmatpush1.bf16.msra.mxu0 %v7158_v25  ;;  %v7352_v20 = vld [vmem:[#allocation3 + $0x7c8] sm:$0xff]  ;;  %v7354_v25 = vld [vmem:[#allocation3 + $0x7d8] sm:$0xff] }
 0xe2b   :  { %7901 = vmatprep.subr.bf16.mxu1 %v7172_v41  ;;  %8007 = vmatprep.subr.bf16.mxu0 %v7174_v28  ;;  %v7351_v41 = vld [vmem:[#allocation3 + $0x7c0] sm:$0xff]  ;;  %v7353_v28 = vld [vmem:[#allocation3 + $0x7d0] sm:$0xff] }
 0xe2e   :  { %7902 = vmatpush1.bf16.msra.mxu1 %v7171_v3  ;;  %8008 = vmatpush1.bf16.msra.mxu0 %v7173_v23  ;;  %v7367_v3 = vld [vmem:[#allocation3 + $0x840] sm:$0xff]  ;;  %v7369_v23 = vld [vmem:[#allocation3 + $0x850] sm:$0xff] }
 0xe2f   :  { %7903 = vmatprep.subr.bf16.mxu1 %v7187_v52  ;;  %8009 = vmatprep.subr.bf16.mxu0 %v7189_v32  ;;  %v7366_v52 = vld [vmem:[#allocation3 + $0x838] sm:$0xff]  ;;  %v7368_v32 = vld [vmem:[#allocation3 + $0x848] sm:$0xff] }
 0xe32   :  { %7904 = vmatpush1.bf16.msra.mxu1 %v7186_v30  ;;  %8010 = vmatpush1.bf16.msra.mxu0 %v7188_v31  ;;  %v7382_v30 = vld [vmem:[#allocation3 + $0x8b8] sm:$0xff]  ;;  %v7384_v31 = vld [vmem:[#allocation3 + $0x8c8] sm:$0xff] }
 0xe33   :  { %7905 = vmatprep.subr.bf16.mxu1 %v7202_v34  ;;  %8011 = vmatprep.subr.bf16.mxu0 %v7204_v35  ;;  %v7381_v34 = vld [vmem:[#allocation3 + $0x8b0] sm:$0xff]  ;;  %v7383_v35 = vld [vmem:[#allocation3 + $0x8c0] sm:$0xff] }
 0xe36   :  { %7906 = vmatpush1.bf16.msra.mxu1 %v7201_v38  ;;  %8012 = vmatpush1.bf16.msra.mxu0 %v7203_v9  ;;  %v7397_v38 = vld [vmem:[#allocation3 + $0x930] sm:$0xff]  ;;  %v7399_v9 = vld [vmem:[#allocation3 + $0x940] sm:$0xff] }
 0xe37   :  { %7907 = vmatprep.subr.bf16.mxu1 %v7217_v0  ;;  %8013 = vmatprep.subr.bf16.mxu0 %v7219_v1  ;;  %v7396_v0 = vld [vmem:[#allocation3 + $0x928] sm:$0xff]  ;;  %v7398_v1 = vld [vmem:[#allocation3 + $0x938] sm:$0xff] }
 0xe3a   :  { %7908 = vmatpush1.bf16.msra.mxu1 %v7216_v43  ;;  %8014 = vmatpush1.bf16.msra.mxu0 %v7218_v44  ;;  %v7412_v43 = vld [vmem:[#allocation3 + $0x9a8] sm:$0xff]  ;;  %v7414_v44 = vld [vmem:[#allocation3 + $0x9b8] sm:$0xff] }
 0xe3b   :  { %7909 = vmatprep.subr.bf16.mxu1 %v7232_v4  ;;  %8015 = vmatprep.subr.bf16.mxu0 %v7234_v12  ;;  %v7411_v4 = vld [vmem:[#allocation3 + $0x9a0] sm:$0xff]  ;;  %v7413_v12 = vld [vmem:[#allocation3 + $0x9b0] sm:$0xff] }
 0xe3e   :  { %7910 = vmatpush1.bf16.msra.mxu1 %v7231_v16  ;;  %8016 = vmatpush1.bf16.msra.mxu0 %v7233_v63  ;;  %v7427_v16 = vld [vmem:[#allocation3 + $0xa20] sm:$0xff]  ;;  %v7429_v63 = vld [vmem:[#allocation3 + $0xa30] sm:$0xff] }
 0xe3f   :  { %7911 = vmatprep.subr.bf16.mxu1 %v7247_v48  ;;  %8017 = vmatprep.subr.bf16.mxu0 %v7249_v49  ;;  %v7426_v48 = vld [vmem:[#allocation3 + $0xa18] sm:$0xff]  ;;  %v7428_v49 = vld [vmem:[#allocation3 + $0xa28] sm:$0xff] }
 0xe42   :  { %7912 = vmatpush1.bf16.msra.mxu1 %v7246_v11  ;;  %8018 = vmatpush1.bf16.msra.mxu0 %v7248_v19  ;;  %v7442_v11 = vld [vmem:[#allocation3 + $0xa98] sm:$0xff]  ;;  %v7444_v19 = vld [vmem:[#allocation3 + $0xaa8] sm:$0xff] }
 0xe43   :  { %7913 = vmatprep.subr.bf16.mxu1 %v7262_v51  ;;  %8019 = vmatprep.subr.bf16.mxu0 %v7264_v53  ;;  %v7441_v51 = vld [vmem:[#allocation3 + $0xa90] sm:$0xff]  ;;  %v7443_v53 = vld [vmem:[#allocation3 + $0xaa0] sm:$0xff] }
 0xe46   :  { %7914 = vmatpush1.bf16.msra.mxu1 %v7261_v57  ;;  %8020 = vmatpush1.bf16.msra.mxu0 %v7263_v13  ;;  %v7457_v57 = vld [vmem:[#allocation3 + $0xb10] sm:$0xff]  ;;  %v7459_v13 = vld [vmem:[#allocation3 + $0xb20] sm:$0xff] }
 0xe47   :  { %7915 = vmatprep.subr.bf16.mxu1 %v7277_v59  ;;  %8021 = vmatprep.subr.bf16.mxu0 %v7279_v24  ;;  %v7456_v59 = vld [vmem:[#allocation3 + $0xb08] sm:$0xff]  ;;  %v7458_v24 = vld [vmem:[#allocation3 + $0xb18] sm:$0xff] }
 0xe4a   :  { %7916 = vmatpush1.bf16.msra.mxu1 %v7276_v39  ;;  %8022 = vmatpush1.bf16.msra.mxu0 %v7278_v54  ;;  %v7116_v39 = vld [vmem:[#allocation3 + $0x68] sm:$0xff]  ;;  %v7237_v54 = vld [vmem:[#allocation3 + $0x430] sm:$0xff] }
 0xe4b   :  { %7917 = vmatprep.subr.bf16.mxu1 %v7292_v26  ;;  %8023 = vmatprep.subr.bf16.mxu0 %v7294_v2  ;;  %v7115_v26 = vld [vmem:[#allocation3 + $0x60] sm:$0xff]  ;;  %v7117_v2 = vld [vmem:[#allocation3 + $0x70] sm:$0xff] }
 0xe4e   :  { %7918 = vmatpush1.bf16.msra.mxu1 %v7291_v62  ;;  %8024 = vmatpush1.bf16.msra.mxu0 %v7293_v8  ;;  %v7131_v62 = vld [vmem:[#allocation3 + $0xe0] sm:$0xff]  ;;  %v7252_v8 = vld [vmem:[#allocation3 + $0x4a8] sm:$0xff] }
 0xe4f   :  { %7919 = vmatprep.subr.bf16.mxu1 %v7307_v60  ;;  %8025 = vmatprep.subr.bf16.mxu0 %v7309_v37  ;;  %v7130_v60 = vld [vmem:[#allocation3 + $0xd8] sm:$0xff]  ;;  %v7132_v37 = vld [vmem:[#allocation3 + $0xe8] sm:$0xff] }
 0xe52   :  { %7920 = vmatpush1.bf16.msra.mxu1 %v7306_v5  ;;  %8026 = vmatpush1.bf16.msra.mxu0 %v7308_v40  ;;  %v7146_v5 = vld [vmem:[#allocation3 + $0x158] sm:$0xff]  ;;  %v7267_v40 = vld [vmem:[#allocation3 + $0x520] sm:$0xff] }
 0xe53   :  { %7921 = vmatprep.subr.bf16.mxu1 %v7322_v18  ;;  %8027 = vmatprep.subr.bf16.mxu0 %v7324_v22  ;;  %v7145_v18 = vld [vmem:[#allocation3 + $0x150] sm:$0xff]  ;;  %v7147_v22 = vld [vmem:[#allocation3 + $0x160] sm:$0xff] }
 0xe56   :  { %7922 = vmatpush1.bf16.msra.mxu1 %v7321_v27  ;;  %8028 = vmatpush1.bf16.msra.mxu0 %v7323_v46  ;;  %v7161_v27 = vld [vmem:[#allocation3 + $0x1d0] sm:$0xff]  ;;  %v7282_v46 = vld [vmem:[#allocation3 + $0x598] sm:$0xff] }
 0xe57   :  { %7923 = vmatprep.subr.bf16.mxu1 %v7337_v55  ;;  %8029 = vmatprep.subr.bf16.mxu0 %v7339_v21  ;;  %v7160_v55 = vld [vmem:[#allocation3 + $0x1c8] sm:$0xff]  ;;  %v7162_v21 = vld [vmem:[#allocation3 + $0x1d8] sm:$0xff] }
 0xe5a   :  { %7924 = vmatpush1.bf16.msra.mxu1 %v7336_v15  ;;  %8030 = vmatpush1.bf16.msra.mxu0 %v7338_v50  ;;  %v7176_v15 = vld [vmem:[#allocation3 + $0x248] sm:$0xff]  ;;  %v7297_v50 = vld [vmem:[#allocation3 + $0x610] sm:$0xff] }
 0xe5b   :  { %7946 = vmatprep.subr.bf16.mxu1 %v7352_v20  ;;  %8052 = vmatprep.subr.bf16.mxu0 %v7354_v25  ;;  %v7175_v20 = vld [vmem:[#allocation3 + $0x240] sm:$0xff]  ;;  %v7177_v25 = vld [vmem:[#allocation3 + $0x250] sm:$0xff] }
 0xe5d   :  { %7926 = vmatmul.mubr.bf16.vlgmr.msra.gmra.mrb[64].mxu1 %v18438_v14  ;;  %8032 = vmatmul.mubr.bf16.vlgmr.msra.gmra.mrb[84].mxu0 %v18438_v14 }
 0xe5e   :  { %7947 = vmatpush1.bf16.msra.mxu1 %v7351_v41  ;;  %8053 = vmatpush1.bf16.msra.mxu0 %v7353_v28  ;;  %v7191_v41 = vld [vmem:[#allocation3 + $0x2c0] sm:$0xff]  ;;  %v7312_v28 = vld [vmem:[#allocation3 + $0x688] sm:$0xff] }
 0xe5f   :  { %7948 = vmatprep.subr.bf16.mxu1 %v7367_v3  ;;  %8054 = vmatprep.subr.bf16.mxu0 %v7369_v23  ;;  %v7190_v3 = vld [vmem:[#allocation3 + $0x2b8] sm:$0xff]  ;;  %v7192_v23 = vld [vmem:[#allocation3 + $0x2c8] sm:$0xff] }
 0xe60   :  { %7935 = vmatprep.mubr.bf16.mxu1 %v18442_v42  ;;  %8041 = vmatprep.mubr.bf16.mxu0 %v18442_v42 }
 0xe62   :  { %7949 = vmatpush1.bf16.msra.mxu1 %v7366_v52  ;;  %8055 = vmatpush1.bf16.msra.mxu0 %v7368_v32  ;;  %v7206_v32 = vld [vmem:[#allocation3 + $0x338] sm:$0xff] }
 0xe63   :  { %7950 = vmatprep.subr.bf16.mxu1 %v7382_v30  ;;  %8056 = vmatprep.subr.bf16.mxu0 %v7384_v31  ;;  %v7327_v30 = vld [vmem:[#allocation3 + $0x700] sm:$0xff] }
 0xe65   :  { %7936 = vmatmul.mubr.bf16.gmra.mrb[68].mxu1 %v18450_v6  ;;  %8042 = vmatmul.mubr.bf16.gmra.mrb[88].mxu0 %v18450_v6 }
 0xe66   :  { %7951 = vmatpush1.bf16.msra.mxu1 %v7381_v34  ;;  %8057 = vmatpush1.bf16.msra.mxu0 %v7383_v35 }
 0xe67   :  { %7952 = vmatprep.subr.bf16.mxu1 %v7397_v38  ;;  %8058 = vmatprep.subr.bf16.mxu0 %v7399_v9 }
 0xe68   :  { %7978 = vmatprep.mubr.bf16.mxu1 %v15759_v17  ;;  %8084 = vmatprep.mubr.bf16.mxu0 %v15759_v17 }
 0xe6a   :  { %7953 = vmatpush1.bf16.msra.mxu1 %v7396_v0  ;;  %8059 = vmatpush1.bf16.msra.mxu0 %v7398_v1  ;;  %v7205_v1 = vld [vmem:[#allocation3 + $0x330] sm:$0xff] }
 0xe6b   :  { %7954 = vmatprep.subr.bf16.mxu1 %v7412_v43  ;;  %8060 = vmatprep.subr.bf16.mxu0 %v7414_v44  ;;  %v7207_v43 = vld [vmem:[#allocation3 + $0x340] sm:$0xff] }
 0xe6e   :  { %7955 = vmatpush1.bf16.msra.mxu1 %v7411_v4  ;;  %8061 = vmatpush1.bf16.msra.mxu0 %v7413_v12 }
 0xe6f   :  { %7956 = vmatprep.subr.bf16.mxu1 %v7427_v16  ;;  %8062 = vmatprep.subr.bf16.mxu0 %v7429_v63  ;;  %v7221_v16 = vld [vmem:[#allocation3 + $0x3b0] sm:$0xff]  ;;  %v7342_v63 = vld [vmem:[#allocation3 + $0x778] sm:$0xff] }
 0xe72   :  { %7957 = vmatpush1.bf16.msra.mxu1 %v7426_v48  ;;  %8063 = vmatpush1.bf16.msra.mxu0 %v7428_v49  ;;  %v7220_v49 = vld [vmem:[#allocation3 + $0x3a8] sm:$0xff] }
 0xe73   :  { %7958 = vmatprep.subr.bf16.mxu1 %v7442_v11  ;;  %8064 = vmatprep.subr.bf16.mxu0 %v7444_v19  ;;  %v7222_v11 = vld [vmem:[#allocation3 + $0x3b8] sm:$0xff] }
 0xe76   :  { %7959 = vmatpush1.bf16.msra.mxu1 %v7441_v51  ;;  %8065 = vmatpush1.bf16.msra.mxu0 %v7443_v53  ;;  %v7236_v51 = vld [vmem:[#allocation3 + $0x428] sm:$0xff]  ;;  %v7357_v53 = vld [vmem:[#allocation3 + $0x7f0] sm:$0xff] }
 0xe77   :  { %7960 = vmatprep.subr.bf16.mxu1 %v7457_v57  ;;  %8066 = vmatprep.subr.bf16.mxu0 %v7459_v13 }
 0xe7a   :  { %7961 = vmatpush1.bf16.msra.mxu1 %v7456_v59  ;;  %8067 = vmatpush1.bf16.msra.mxu0 %v7458_v24 }
 0xe7b   :  { %8105 = vmatprep.subr.bf16.mxu1 %v7116_v39  ;;  %13626 = vmatprep.subr.bf16.mxu0 %v7237_v54 }
 0xe7d   :  { %7979 = vmatmul.mubr.bf16.vlgmr.msra.gmra.mrb[64].mxu1 %v18458_v33  ;;  %8085 = vmatmul.mubr.bf16.vlgmr.msra.gmra.mrb[84].mxu0 %v18458_v33 }
 0xe7e   :  { %8106 = vmatpush1.bf16.msra.mxu1 %v7115_v26  ;;  %13627 = vmatpush3.bf16.msra.mxu0 %v7117_v2  ;;  %v7235_v2 = vld [vmem:[#allocation3 + $0x420] sm:$0xff] }
 0xe7f   :  { %8107 = vmatprep.subr.bf16.mxu1 %v7131_v62  ;;  %13628 = vmatprep.subr.bf16.mxu0 %v7252_v8 }
 0xe80   :  { %7988 = vmatprep.mubr.bf16.mxu1 %v15759_v17  ;;  %8094 = vmatprep.mubr.bf16.mxu0 %v15759_v17 }
 0xe82   :  { %8108 = vmatpush1.bf16.msra.mxu1 %v7130_v60  ;;  %13629 = vmatpush3.bf16.msra.mxu0 %v7132_v37  ;;  %v7251_v37 = vld [vmem:[#allocation3 + $0x4a0] sm:$0xff] }
 0xe83   :  { %8109 = vmatprep.subr.bf16.mxu1 %v7146_v5  ;;  %13630 = vmatprep.subr.bf16.mxu0 %v7267_v40  ;;  %v7372_v5 = vld [vmem:[#allocation3 + $0x868] sm:$0xff] }
 0xe85   :  { %7989 = vmatmul.mubr.bf16.gmra.mrb[68].mxu1 %v18466_v58  ;;  %8095 = vmatmul.mubr.bf16.gmra.mrb[88].mxu0 %v18466_v58 }
 0xe86   :  { %8110 = vmatpush1.bf16.msra.mxu1 %v7145_v18  ;;  %13631 = vmatpush3.bf16.msra.mxu0 %v7147_v22  ;;  %v7250_v18 = vld [vmem:[#allocation3 + $0x498] sm:$0xff] }
 0xe87   :  { %8111 = vmatprep.subr.bf16.mxu1 %v7161_v27  ;;  %13632 = vmatprep.subr.bf16.mxu0 %v7282_v46  ;;  %v7266_v22 = vld [vmem:[#allocation3 + $0x518] sm:$0xff]  ;;  %v7387_v27 = vld [vmem:[#allocation3 + $0x8e0] sm:$0xff]  ;;  %v7265_v46 = vld [vmem:[#allocation3 + $0x510] sm:$0xff] }
 0xe88   :  { %8243 = vmatprep.mubr.bf16.mxu0 %v18432_v36  ;;  %8137 = vmatprep.mubr.bf16.mxu1 %v18432_v36 }
 0xe8a   :  { %8112 = vmatpush1.bf16.msra.mxu1 %v7160_v55  ;;  %13633 = vmatpush3.bf16.msra.mxu0 %v7162_v21  ;;  %v7281_v55 = vld [vmem:[#allocation3 + $0x590] sm:$0xff]  ;;  %v7402_v21 = vld [vmem:[#allocation3 + $0x958] sm:$0xff] }
 0xe8b   :  { %8113 = vmatprep.subr.bf16.mxu1 %v7176_v15  ;;  %13634 = vmatprep.subr.bf16.mxu0 %v7297_v50  ;;  %v7280_v15 = vld [vmem:[#allocation3 + $0x588] sm:$0xff] }
 0xe8c   :  { %v7296_v50 = vld [vmem:[#allocation3 + $0x608] sm:$0xff] }
 0xe8e   :  { %8114 = vmatpush1.bf16.msra.mxu1 %v7175_v20  ;;  %13635 = vmatpush3.bf16.msra.mxu0 %v7177_v25  ;;  %v7417_v20 = vld [vmem:[#allocation3 + $0x9d0] sm:$0xff]  ;;  %v7295_v25 = vld [vmem:[#allocation3 + $0x600] sm:$0xff] }
 0xe8f   :  { %8115 = vmatprep.subr.bf16.mxu1 %v7191_v41  ;;  %13636 = vmatprep.subr.bf16.mxu0 %v7312_v28  ;;  %v7311_v41 = vld [vmem:[#allocation3 + $0x680] sm:$0xff]  ;;  %v7432_v28 = vld [vmem:[#allocation3 + $0xa48] sm:$0xff] }
 0xe90   :  { %v18504_v52 = vpop.f32.mrb[48].mxu1  ;;  %v7662_v31 = vpop.f32.mrb[68].mxu0 }
 0xe91   :  { %v18506_v36 = vpop.f32.mrb[49].mxu1  ;;  %v18508_v34 = vpop.f32.mrb[69].mxu0 }
 0xe92   :  { %v18510_v35 = vpop.f32.mrb[50].mxu1  ;;  %8116 = vmatpush1.bf16.msra.mxu1 %v7190_v3  ;;  %13637 = vmatpush3.bf16.msra.mxu0 %v7192_v23  ;;  %v7666_v38 = vpop.f32.mrb[70].mxu0  ;;  %v7310_v3 = vld [vmem:[#allocation3 + $0x678] sm:$0xff] }
 0xe93   :  { %v14401_v9 = vpack.c.bf16 %v18510_v35, %v18504_v52  ;;  %v18514_v0 = vpop.f32.mrb[51].mxu1  ;;  %8117 = vmatprep.subr.bf16.mxu1 %v7206_v32  ;;  %13638 = vmatprep.subr.bf16.mxu0 %v7327_v30  ;;  %v18516_v44 = vpack.c.bf16 %v7666_v38, %v7662_v31  ;;  %v18518_v4 = vpop.f32.mrb[71].mxu0  ;;  %v7326_v23 = vld [vmem:[#allocation3 + $0x6f8] sm:$0xff]  ;;  %v7447_v32 = vld [vmem:[#allocation3 + $0xac0] sm:$0xff]  ;;  %v7325_v30 = vld [vmem:[#allocation3 + $0x6f0] sm:$0xff] }
 0xe94   :  { %v14399_v12 = vpack.c.bf16 %v18514_v0, %v18506_v36  ;;  %v14341_v48 = vpack.c.bf16 %v18518_v4, %v18508_v34  ;;  %v7341_v31 = vld [vmem:[#allocation3 + $0x770] sm:$0xff]  ;;  %v7462_v38 = vld [vmem:[#allocation3 + $0xb38] sm:$0xff]  ;;  %v13152_v36 = vld [vmem:[%s20254_s16 + $0xa8] sm:$0xff] }
 0xe95   :  { %v13153_v52 = vld [vmem:[%s20254_s16 + $0xb0] sm:$0xff]  ;;  %v13154_v35 = vld [vmem:[%s20254_s16 + $0xb8] sm:$0x3] }
 0xe96   :  { %8118 = vmatpush1.bf16.msra.mxu1 %v7205_v1  ;;  %13639 = vmatpush3.bf16.msra.mxu0 %v7207_v43  ;;  %v7340_v1 = vld [vmem:[#allocation3 + $0x768] sm:$0xff]  ;;  %v9862_v0 = vld [vmem:[#allocation25 + $0x88] sm:$0xff] }
 0xe97   :  { %8119 = vmatprep.subr.bf16.mxu1 %v7221_v16  ;;  %13640 = vmatprep.subr.bf16.mxu0 %v7342_v63  ;;  %v7356_v43 = vld [vmem:[#allocation3 + $0x7e8] sm:$0xff]  ;;  %v7355_v16 = vld [vmem:[#allocation3 + $0x7e0] sm:$0xff] }
 0xe98   :  { %v18524_v19 = vpop.f32.mrb[52].mxu1  ;;  %v7672_v57 = vpop.f32.mrb[72].mxu0  ;;  %v7371_v63 = vld [vmem:[#allocation3 + $0x860] sm:$0xff] }
 0xe99   :  { %v18526_v13 = vpop.f32.mrb[53].mxu1  ;;  %v18528_v59 = vpop.f32.mrb[73].mxu0 }
 0xe9a   :  { %v18530_v24 = vpop.f32.mrb[54].mxu1  ;;  %8120 = vmatpush1.bf16.msra.mxu1 %v7220_v49  ;;  %13641 = vmatpush3.bf16.msra.mxu0 %v7222_v11  ;;  %v7676_v39 = vpop.f32.mrb[74].mxu0  ;;  %v7370_v49 = vld [vmem:[#allocation3 + $0x858] sm:$0xff] }
 0xe9b   :  { %v14406_v54 = vpack.c.bf16 %v18530_v24, %v18524_v19  ;;  %v18534_v26 = vpop.f32.mrb[55].mxu1  ;;  %8121 = vmatprep.subr.bf16.mxu1 %v7236_v51  ;;  %13913 = vmatprep.subr.bf16.mxu0 %v7357_v53  ;;  %v18536_v62 = vpack.c.bf16 %v7676_v39, %v7672_v57  ;;  %v18538_v8 = vpop.f32.mrb[75].mxu0  ;;  %v7386_v11 = vld [vmem:[#allocation3 + $0x8d8] sm:$0xff]  ;;  %v7385_v51 = vld [vmem:[#allocation3 + $0x8d0] sm:$0xff]  ;;  %v7400_v57 = vld [vmem:[#allocation3 + $0x948] sm:$0xff] }
 0xe9c   :  { %v14403_v60 = vpack.c.bf16 %v18534_v26, %v18526_v13  ;;  %v14346_v40 = vpack.c.bf16 %v18538_v8, %v18528_v59  ;;  %v7431_v39 = vld [vmem:[#allocation3 + $0xa40] sm:$0xff]  ;;  %v13123_v59 = vld [vmem:[%s20254_s16 + $0x58] sm:$0xff]  ;;  %v9845_v19 = vld [vmem:[#allocation25] sm:$0xff] }
 0xe9d   :  { %8244 = vmatmul.mubr.bf16.vlgmr.msra.gmra.mrb[92].mxu0 %v18438_v14  ;;  %v13124_v8 = vld [vmem:[%s20254_s16 + $0x60] sm:$0xff]  ;;  %v9846_v13 = vld [vmem:[#allocation25 + $0x8] sm:$0xff] }
 0xe9e   :  { %8122 = vmatpush1.bf16.msra.mxu1 %v7235_v2  ;;  %13914 = vmatpush3.bf16.msra.mxu0 %v7357_v53  ;;  %v7401_v53 = vld [vmem:[#allocation3 + $0x950] sm:$0xff]  ;;  %v7430_v2 = vld [vmem:[#allocation3 + $0xa38] sm:$0xff]  ;;  %v14441_v24 = vpack.c.bf16 %v9846_v13, %v9845_v19  ;;  %v9864_v26 = vld [vmem:[#allocation25 + $0x98] sm:$0xff] }
 0xe9f   :  { %8123 = vmatprep.subr.bf16.mxu1 %v7251_v37  ;;  %13915 = vmatprep.subr.bf16.mxu0 %v7372_v5  ;;  %v7446_v37 = vld [vmem:[#allocation3 + $0xab8] sm:$0xff] }
 0xea0   :  { %8251 = vmatprep.mubr.bf16.mxu0 %v18442_v42 }
 0xea2   :  { %8124 = vmatpush1.bf16.msra.mxu1 %v7250_v18  ;;  %13916 = vmatpush3.bf16.msra.mxu0 %v7372_v5  ;;  %v7445_v5 = vld [vmem:[#allocation3 + $0xab0] sm:$0xff] }
 0xea3   :  { %8125 = vmatprep.subr.bf16.mxu1 %v7266_v22  ;;  %13917 = vmatprep.subr.bf16.mxu0 %v7387_v27  ;;  %v7461_v18 = vld [vmem:[#allocation3 + $0xb30] sm:$0xff]  ;;  %v13120_v22 = vld [vmem:[%s20254_s16 + $0x40] sm:$0xff] }
 0xea5   :  { %8252 = vmatmul.mubr.bf16.gmra.mrb[96].mxu0 %v18450_v6 }
 0xea6   :  { %8126 = vmatpush1.bf16.msra.mxu1 %v7265_v46  ;;  %13918 = vmatpush3.bf16.msra.mxu0 %v7387_v27 }
 0xea7   :  { %8127 = vmatprep.subr.bf16.mxu1 %v7281_v55  ;;  %13919 = vmatprep.subr.bf16.mxu0 %v7402_v21 }
 0xea8   :  { %13929 = vmatprep.mubr.bf16.mxu0 %v18458_v33 }
 0xeaa   :  { %8128 = vmatpush1.bf16.msra.mxu1 %v7280_v15  ;;  %13920 = vmatpush3.bf16.msra.mxu0 %v7402_v21 }
 0xeab   :  { %8129 = vmatprep.subr.bf16.mxu1 %v7296_v50  ;;  %13921 = vmatprep.subr.bf16.mxu0 %v7417_v20 }
 0xeae   :  { %8130 = vmatpush1.bf16.msra.mxu1 %v7295_v25  ;;  %13922 = vmatpush3.bf16.msra.mxu0 %v7417_v20 }
 0xeaf   :  { %8131 = vmatprep.subr.bf16.mxu1 %v7311_v41  ;;  %13923 = vmatprep.subr.bf16.mxu0 %v7432_v28 }
 0xeb2   :  { %8132 = vmatpush1.bf16.msra.mxu1 %v7310_v3  ;;  %13924 = vmatpush3.bf16.msra.mxu0 %v7432_v28 }
 0xeb3   :  { %8133 = vmatprep.subr.bf16.mxu1 %v7326_v23  ;;  %13925 = vmatprep.subr.bf16.mxu0 %v7447_v32 }
 0xeb6   :  { %8134 = vmatpush1.bf16.msra.mxu1 %v7325_v30  ;;  %13926 = vmatpush3.bf16.msra.mxu0 %v7447_v32 }
 0xeb7   :  { %8135 = vmatprep.subr.bf16.mxu1 %v7341_v31  ;;  %13927 = vmatprep.subr.bf16.mxu0 %v7462_v38 }
 0xeba   :  { %8136 = vmatpush1.bf16.msra.mxu1 %v7340_v1  ;;  %13928 = vmatpush3.bf16.msra.mxu0 %v7462_v38 }
 0xebb   :  { %8158 = vmatprep.subr.bf16.mxu1 %v7356_v43 }
 0xebd   :  { %13930 = vmatmul.mubr.bf16.vlgmr.msra.gmra.mrb[100].mxu0 %v18466_v58  ;;  %8138 = vmatmul.mubr.bf16.vlgmr.msra.gmra.mrb[72].mxu1 %v18438_v14  ;;  %v7416_v14 = vld [vmem:[#allocation3 + $0x9c8] sm:$0xff] }
 0xebe   :  { %8159 = vmatpush1.bf16.msra.mxu1 %v7355_v16  ;;  %8147 = vmatprep.mubr.bf16.mxu1 %v18442_v42  ;;  %v7415_v42 = vld [vmem:[#allocation3 + $0x9c0] sm:$0xff] }
 0xebf   :  { %8160 = vmatprep.subr.bf16.mxu1 %v7371_v63  ;;  %8424 = vmatprep.mubr.f32.mxu0 %v15772_v29 }
 0xec2   :  { %8161 = vmatpush1.bf16.msra.mxu1 %v7370_v49  ;;  %v13122_v49 = vld [vmem:[%s20254_s16 + $0x50] sm:$0xff] }
 0xec3   :  { %8162 = vmatprep.subr.bf16.mxu1 %v7386_v11  ;;  %v13126_v11 = vld [vmem:[%s20254_s16 + $0x70] sm:$0xff] }
 0xec5   :  { %8148 = vmatmul.mubr.bf16.gmra.mrb[76].mxu1 %v18450_v6  ;;  %v7460_v6 = vld [vmem:[#allocation3 + $0xb28] sm:$0xff] }
 0xec6   :  { %8163 = vmatpush1.bf16.msra.mxu1 %v7385_v51  ;;  %8190 = vmatprep.mubr.bf16.mxu1 %v15759_v17  ;;  %v13127_v51 = vld [vmem:[%s20254_s16 + $0x78] sm:$0x3] }
 0xec7   :  { %8164 = vmatprep.subr.bf16.mxu1 %v7401_v53  ;;  %v13155_v53 = vld [vmem:[%s20254_s16 + $0xc0] sm:$0xff] }
 0xeca   :  { %8165 = vmatpush1.bf16.msra.mxu1 %v7400_v57 }
 0xecb   :  { %8166 = vmatprep.subr.bf16.mxu1 %v7416_v14 }
 0xece   :  { %8167 = vmatpush1.bf16.msra.mxu1 %v7415_v42 }
 0xecf   :  { %8168 = vmatprep.subr.bf16.mxu1 %v7431_v39 }
 0xed2   :  { %8169 = vmatpush1.bf16.msra.mxu1 %v7430_v2 }
 0xed3   :  { %8170 = vmatprep.subr.bf16.mxu1 %v7446_v37 }
 0xed6   :  { %8171 = vmatpush1.bf16.msra.mxu1 %v7445_v5 }
 0xed7   :  { %8172 = vmatprep.subr.bf16.mxu1 %v7461_v18 }
 0xeda   :  { %8173 = vmatpush1.bf16.msra.mxu1 %v7460_v6 }
 0xedd   :  { %8191 = vmatmul.mubr.bf16.vlgmr.msra.gmra.mrb[72].mxu1 %v18458_v33 }
 0xede   :  { %8200 = vmatprep.mubr.bf16.mxu1 %v15759_v17 }
 0xee5   :  { %8201 = vmatmul.mubr.bf16.gmra.mrb[76].mxu1 %v18466_v58 }
 0xee6   :  { %13941 = vmatprep.mubr.msk.f32.mxu1 %vm8326_vm12, %v13120_v22 }
 0xef0   :  { %v7768_v27 = vpop.f32.mrb[56].mxu1  ;;  %v18561_v46 = vpop.f32.mrb[76].mxu0 }
 0xef1   :  { %v7770_v55 = vpop.f32.mrb[57].mxu1  ;;  %v18563_v21 = vpop.f32.mrb[77].mxu0 }
 0xef2   :  { %v7772_v15 = vpop.f32.mrb[58].mxu1  ;;  %v18565_v50 = vpop.f32.mrb[78].mxu0 }
 0xef3   :  { %v14339_v33 = vpack.c.bf16 %v7772_v15, %v7768_v27  ;;  %v7774_v20 = vpop.f32.mrb[59].mxu1  ;;  %v14421_v58 = vpack.c.bf16 %v18565_v50, %v18561_v46  ;;  %v18569_v25 = vpop.f32.mrb[79].mxu0  ;;  %v9847_v46 = vld [vmem:[#allocation25 + $0x10] sm:$0xff] }
 0xef4   :  { %v14349_v41 = vpack.c.bf16 %v7774_v20, %v7770_v55  ;;  %v14419_v28 = vpack.c.bf16 %v18569_v25, %v18563_v21  ;;  %v9848_v21 = vld [vmem:[#allocation25 + $0x18] sm:$0xff]  ;;  %v9866_v25 = vld [vmem:[#allocation25 + $0xa8] sm:$0xff] }
 0xef5   :  { %14340 = vmatprep.subr.bf16.mxu0 %v14339_v33  ;;  %v14445_v50 = vpack.c.bf16 %v9848_v21, %v9847_v46 }
 0xef6   :  { %14342 = vmatpush1.bf16.msra.mxu0 %v14341_v48  ;;  %14350 = vmatprep.subr.bf16.mxu1 %v14349_v41  ;;  %v13121_v48 = vld [vmem:[%s20254_s16 + $0x48] sm:$0xff] }
 0xef7   :  { %14352 = vmatpush3.bf16.msra.mxu1 %v14349_v41 }
 0xef8   :  { %v7778_v3 = vpop.f32.mrb[60].mxu1  ;;  %v18576_v23 = vpop.f32.mrb[80].mxu0 }
 0xef9   :  { %v7780_v32 = vpop.f32.mrb[61].mxu1  ;;  %v18578_v30 = vpop.f32.mrb[81].mxu0 }
 0xefa   :  { %v7782_v31 = vpop.f32.mrb[62].mxu1  ;;  %v18580_v38 = vpop.f32.mrb[82].mxu0 }
 0xefb   :  { %v14343_v1 = vpack.c.bf16 %v7782_v31, %v7778_v3  ;;  %v7784_v43 = vpop.f32.mrb[63].mxu1  ;;  %v14426_v16 = vpack.c.bf16 %v18580_v38, %v18576_v23  ;;  %v18584_v63 = vpop.f32.mrb[83].mxu0  ;;  %v9849_v23 = vld [vmem:[#allocation25 + $0x20] sm:$0xff] }
 0xefc   :  { %v14353_v34 = vpack.c.bf16 %v7784_v43, %v7780_v32  ;;  %v14423_v4 = vpack.c.bf16 %v18584_v63, %v18578_v30  ;;  %v9850_v30 = vld [vmem:[#allocation25 + $0x28] sm:$0xff]  ;;  %v9868_v63 = vld [vmem:[#allocation25 + $0xb8] sm:$0xff] }
 0xefd   :  { %14345 = vmatprep.subr.msk.bf16.mxu0 %vm18109_vm10, %v14343_v1  ;;  %v14449_v38 = vpack.c.bf16 %v9850_v30, %v9849_v23 }
 0xefe   :  { %14348 = vmatpush1.bf16.msk.msra.mxu0 %vm18109_vm10, %v14346_v40  ;;  %14355 = vmatprep.subr.msk.bf16.mxu1 %vm18109_vm10, %v14353_v34  ;;  %v13125_v40 = vld [vmem:[%s20254_s16 + $0x68] sm:$0xff] }
 0xeff   :  { %14358 = vmatpush3.bf16.msk.msra.mxu1 %vm18109_vm10, %v14353_v34 }
 0xf01   :  { %13130 = vmatmul.mubr.msk.f32.vlgmr.msra.gmra.mrb[66].mxu0 %vm8326_vm12, %v13120_v22 }
 0xf02   :  { %13942 = vmatmul.mubr.msk.f32.vlgmr.msra.gmra.mrb[46].mxu1 %vm8326_vm12, %v13121_v48  ;;  %8430 = vmatprep.mubr.f32.mxu0 %v15772_v29 }
 0xf03   :  { %13944 = vmatprep.mubr.msk.f32.mxu1 %vm8326_vm12, %v13122_v49 }
 0xf05   :  { %13131 = vmatmul.mubr.msk.f32.gmra.mrb[104].mxu0 %vm8326_vm12, %v13121_v48 }
 0xf06   :  { %13945 = vmatmul.mubr.msk.f32.gmra.mrb[80].mxu1 %vm8326_vm12, %v13123_v59  ;;  %8436 = vmatprep.mubr.f32.mxu0 %v15772_v29 }
 0xf07   :  { %13947 = vmatprep.mubr.msk.f32.mxu1 %vm8326_vm12, %v13124_v8 }
 0xf09   :  { %13132 = vmatmul.mubr.msk.f32.gmra.mrb[106].mxu0 %vm8326_vm12, %v13122_v49 }
 0xf0a   :  { %13948 = vmatmul.mubr.msk.f32.gmra.mrb[82].mxu1 %vm8326_vm12, %v13125_v40  ;;  %8442 = vmatprep.mubr.f32.mxu0 %v15772_v29 }
 0xf0b   :  { %13950 = vmatprep.mubr.msk.f32.mxu1 %vm8326_vm12, %v13126_v11 }
 0xf0d   :  { %13133 = vmatmul.mubr.msk.f32.gmra.mrb[108].mxu0 %vm8326_vm12, %v13123_v59  ;;  %v13156_v59 = vld [vmem:[%s20254_s16 + $0xc8] sm:$0xff] }
 0xf0e   :  { %13951 = vmatmul.mubr.msk.f32.gmra.mrb[84].mxu1 %vm8326_vm12, %v13127_v51  ;;  %8448 = vmatprep.mubr.f32.mxu0 %v15772_v29 }
 0xf0f   :  { %13961 = vmatprep.mubr.msk.f32.mxu1 %vm8326_vm12, %v13155_v53 }
 0xf11   :  { %13134 = vmatmul.mubr.msk.f32.gmra.mrb[110].mxu0 %vm8326_vm12, %v13124_v8  ;;  %v13157_v8 = vld [vmem:[%s20254_s16 + $0xd0] sm:$0xff] }
 0xf12   :  { %8454 = vmatprep.mubr.f32.mxu0 %v15772_v29 }
 0xf15   :  { %13135 = vmatmul.mubr.msk.f32.gmra.mrb[112].mxu0 %vm8326_vm12, %v13125_v40  ;;  %v13158_v40 = vld [vmem:[%s20254_s16 + $0xd8] sm:$0xff] }
 0xf16   :  { %8460 = vmatprep.mubr.f32.mxu0 %v15772_v29 }
 0xf19   :  { %13136 = vmatmul.mubr.msk.f32.gmra.mrb[114].mxu0 %vm8326_vm12, %v13126_v11  ;;  %v13159_v11 = vld [vmem:[%s20254_s16 + $0xe0] sm:$0xff] }
 0xf1a   :  { %8466 = vmatprep.mubr.f32.mxu0 %v15772_v29 }
 0xf1d   :  { %13137 = vmatmul.mubr.msk.f32.gmra.mrb[116].mxu0 %vm8326_vm12, %v13127_v51  ;;  %v13160_v51 = vld [vmem:[%s20254_s16 + $0xe8] sm:$0xff] }
 0xf1e   :  { %8693 = vmatprep.mubr.f32.mxu0 %v15772_v29 }
 0xf50   :  { %v7980_v57 = vpop.f32.mrb[64].mxu1  ;;  %v8086_v14 = vpop.f32.mrb[84].mxu0 }
 0xf51   :  { %v7982_v42 = vpop.f32.mrb[65].mxu1  ;;  %v8088_v39 = vpop.f32.mrb[85].mxu0 }
 0xf52   :  { %v7984_v2 = vpop.f32.mrb[66].mxu1  ;;  %v8090_v37 = vpop.f32.mrb[86].mxu0 }
 0xf53   :  { %v18647_v5 = vpack.c.bf16 %v7984_v2, %v7980_v57  ;;  %v14359_v18 = vpack.c.bf16 %v8090_v37, %v8086_v14  ;;  %v7986_v6 = vpop.f32.mrb[67].mxu1  ;;  %v8092_v22 = vpop.f32.mrb[87].mxu0  ;;  %v13162_v57 = vld [vmem:[%s20254_s16 + $0xf8] sm:$0x3]  ;;  %v18695_v14 = vld [vmem:[%s20254_s16 + $0x100] sm:$0xff] }
 0xf54   :  { %v14361_v27 = vpack.c.bf16 %v7986_v6, %v7982_v42  ;;  %v14369_v55 = vpack.c.bf16 %v8092_v22, %v8088_v39 }
 0xf55   :  { %14360 = vmatprep.subr.bf16.mxu0 %v14359_v18 }
 0xf56   :  { %14362 = vmatpush1.bf16.msra.mxu0 %v14361_v27  ;;  %14370 = vmatprep.subr.bf16.mxu1 %v14369_v55 }
 0xf57   :  { %14372 = vmatpush3.bf16.msra.mxu1 %v14369_v55 }
 0xf58   :  { %v7990_v15 = vpop.f32.mrb[68].mxu1  ;;  %v8096_v33 = vpop.f32.mrb[88].mxu0 }
 0xf59   :  { %v7992_v20 = vpop.f32.mrb[69].mxu1  ;;  %v8098_v41 = vpop.f32.mrb[89].mxu0 }
 0xf5a   :  { %v7994_v3 = vpop.f32.mrb[70].mxu1  ;;  %v8100_v32 = vpop.f32.mrb[90].mxu0 }
 0xf5b   :  { %v18649_v31 = vpack.c.bf16 %v7994_v3, %v7990_v15  ;;  %v14363_v1 = vpack.c.bf16 %v8100_v32, %v8096_v33  ;;  %v7996_v43 = vpop.f32.mrb[71].mxu1  ;;  %v8102_v34 = vpop.f32.mrb[91].mxu0 }
 0xf5c   :  { %v14366_v48 = vpack.c.bf16 %v7996_v43, %v7992_v20  ;;  %v14373_v49 = vpack.c.bf16 %v8102_v34, %v8098_v41 }
 0xf5d   :  { %14365 = vmatprep.subr.msk.bf16.mxu0 %vm18109_vm10, %v14363_v1 }
 0xf5e   :  { %14368 = vmatpush1.bf16.msk.msra.mxu0 %vm18109_vm10, %v14366_v48  ;;  %14375 = vmatprep.subr.msk.bf16.mxu1 %vm18109_vm10, %v14373_v49 }
 0xf5f   :  { %14378 = vmatpush3.bf16.msk.msra.mxu1 %vm18109_vm10, %v14373_v49 }
 0xf61   :  { %13165 = vmatmul.mubr.msk.f32.vlgmr.msra.gmra.mrb[66].mxu0 %vm8326_vm12, %v13155_v53  ;;  %v13161_v53 = vld [vmem:[%s20254_s16 + $0xf0] sm:$0xff] }
 0xf62   :  { %13962 = vmatmul.mubr.msk.f32.vlgmr.msra.gmra.mrb[46].mxu1 %vm8326_vm12, %v13156_v59  ;;  %8699 = vmatprep.mubr.f32.mxu0 %v15772_v29 }
 0xf63   :  { %13964 = vmatprep.mubr.msk.f32.mxu1 %vm8326_vm12, %v13157_v8 }
 0xf65   :  { %13166 = vmatmul.mubr.msk.f32.gmra.mrb[104].mxu0 %vm8326_vm12, %v13156_v59 }
 0xf66   :  { %13965 = vmatmul.mubr.msk.f32.gmra.mrb[80].mxu1 %vm8326_vm12, %v13158_v40  ;;  %8705 = vmatprep.mubr.f32.mxu0 %v15772_v29 }
 0xf67   :  { %13967 = vmatprep.mubr.msk.f32.mxu1 %vm8326_vm12, %v13159_v11 }
 0xf69   :  { %13167 = vmatmul.mubr.msk.f32.gmra.mrb[106].mxu0 %vm8326_vm12, %v13157_v8 }
 0xf6a   :  { %13968 = vmatmul.mubr.msk.f32.gmra.mrb[82].mxu1 %vm8326_vm12, %v13160_v51  ;;  %8711 = vmatprep.mubr.f32.mxu0 %v15772_v29 }
 0xf6b   :  { %13970 = vmatprep.mubr.msk.f32.mxu1 %vm8326_vm12, %v13161_v53 }
 0xf6d   :  { %13168 = vmatmul.mubr.msk.f32.gmra.mrb[108].mxu0 %vm8326_vm12, %v13158_v40  ;;  %v18717_v40 = vld [vmem:[%s20254_s16 + $0x108] sm:$0xff] }
 0xf6e   :  { %13971 = vmatmul.mubr.msk.f32.gmra.mrb[84].mxu1 %vm8326_vm12, %v13162_v57  ;;  %8717 = vmatprep.mubr.f32.mxu0 %v15772_v29 }
 0xf6f   :  { %13981 = vmatprep.mubr.msk.f32.mxu1 %vm8326_vm12, %v18695_v14 }
 0xf70   :  { %v13642_v42 = vpop.f32.mrb[92].mxu0 }
 0xf71   :  { %v13643_v39 = vpop.f32.mrb[93].mxu0  ;;  %13169 = vmatmul.mubr.msk.f32.gmra.mrb[110].mxu0 %vm8326_vm12, %v13159_v11  ;;  %v18723_v11 = vld [vmem:[%s20254_s16 + $0x110] sm:$0xff] }
 0xf72   :  { %v13644_v2 = vadd.f32 %v13643_v39, %v13642_v42  ;;  %v13645_v37 = vpop.f32.mrb[94].mxu0  ;;  %8723 = vmatprep.mubr.f32.mxu0 %v15772_v29  ;;  %v18773_v42 = vld [vmem:[%s20254_s16] sm:$0xff]  ;;  %v18782_v39 = vld [vmem:[%s20254_s16 + $0x8] sm:$0xff] }
 0xf73   :  { %v13646_v18 = vpop.f32.mrb[95].mxu0 }
 0xf74   :  { %v13647_v6 = vadd.f32 %v13646_v18, %v13645_v37 }
 0xf75   :  { %13170 = vmatmul.mubr.msk.f32.gmra.mrb[112].mxu0 %vm8326_vm12, %v13160_v51  ;;  %v18733_v51 = vld [vmem:[%s20254_s16 + $0x118] sm:$0xff] }
 0xf76   :  { %8729 = vmatprep.mubr.f32.mxu0 %v15772_v29 }
 0xf78   :  { %v13648_v22 = vpop.f32.mrb[96].mxu0 }
 0xf79   :  { %v13649_v27 = vpop.f32.mrb[97].mxu0  ;;  %13171 = vmatmul.mubr.msk.f32.gmra.mrb[114].mxu0 %vm8326_vm12, %v13161_v53  ;;  %v18741_v53 = vld [vmem:[%s20254_s16 + $0x120] sm:$0xff] }
 0xf7a   :  { %v13650_v55 = vadd.f32 %v13649_v27, %v13648_v22  ;;  %v13651_v15 = vpop.f32.mrb[98].mxu0  ;;  %8735 = vmatprep.mubr.f32.mxu0 %v15772_v29  ;;  %v18805_v27 = vld [vmem:[%s20254_s16 + $0x20] sm:$0xff] }
 0xf7b   :  { %v13652_v33 = vpop.f32.mrb[99].mxu0 }
 0xf7c   :  { %v13653_v20 = vadd.f32 %v13652_v33, %v13651_v15  ;;  %v18817_v33 = vld [vmem:[%s20254_s16 + $0x28] sm:$0xff] }
 0xf7d   :  { %13172 = vmatmul.mubr.msk.f32.gmra.mrb[116].mxu0 %vm8326_vm12, %v13162_v57  ;;  %v18759_v57 = vld [vmem:[%s20254_s16 + $0x130] sm:$0xff] }
 0xf7e   :  { %8953 = vmatprep.mubr.f32.mxu0 %v15772_v29 }
 0xf90   :  { %v13931_v41 = vpop.f32.mrb[100].mxu0 }
 0xf91   :  { %v8303_v3 = vadd.f32 %v13931_v41, %v13650_v55  ;;  %v8294_v32 = vpop.f32.mrb[101].mxu0 }
 0xf92   :  { %v8295_v1 = vadd.f32 %v13644_v2, %v8294_v32  ;;  %v13932_v43 = vpop.f32.mrb[102].mxu0  ;;  %v18787_v2 = vld [vmem:[%s20254_s16 + $0x10] sm:$0xff] }
 0xf93   :  { %v8306_v34 = vadd.f32 %v13932_v43, %v13653_v20  ;;  %v8297_v48 = vpop.f32.mrb[103].mxu0  ;;  %v18822_v20 = vld [vmem:[%s20254_s16 + $0x30] sm:$0xff] }
 0xf94   :  { %v8298_v49 = vadd.f32 %v13647_v6, %v8297_v48  ;;  %v18795_v6 = vld [vmem:[%s20254_s16 + $0x18] sm:$0xff] }
 0xf95   :  { %v14393_v59 = vpack.c.bf16 %v8306_v34, %v8303_v3  ;;  %v8316_v3 = vld [vmem:[%s20254_s16 + $0x38] sm:$0x3] }
 0xf96   :  { %v14389_v8 = vpack.c.bf16 %v8298_v49, %v8295_v1  ;;  %v13147_v1 = vld [vmem:[%s20254_s16 + $0x80] sm:$0xff]  ;;  %v13148_v49 = vld [vmem:[%s20254_s16 + $0x88] sm:$0xff] }
 0xf98   :  { %14390 = vmatprep.subr.bf16.mxu1 %v14389_v8 }
 0xf99   :  { %14392 = vmatpush3.bf16.msra.mxu1 %v14389_v8  ;;  %v13150_v8 = vld [vmem:[%s20254_s16 + $0x98] sm:$0xff] }
 0xf9a   :  { %14395 = vmatprep.subr.msk.bf16.mxu1 %vm18109_vm10, %v14393_v59 }
 0xf9d   :  { %14398 = vmatpush3.bf16.msk.msra.mxu1 %vm18109_vm10, %v14393_v59  ;;  %v13149_v59 = vld [vmem:[%s20254_s16 + $0x90] sm:$0xff] }
 0xf9e   :  { %14410 = vmatprep.subr.bf16.mxu1 %v18516_v44 }
 0xfa0   :  { %13982 = vmatmul.mubr.msk.f32.vlgmr.msra.gmra.mrb[46].mxu1 %vm8326_vm12, %v18717_v40 }
 0xfa1   :  { %14412 = vmatpush3.bf16.msra.mxu1 %v18516_v44  ;;  %13984 = vmatprep.mubr.msk.f32.mxu1 %vm8326_vm12, %v18723_v11  ;;  %v18753_v44 = vld [vmem:[%s20254_s16 + $0x128] sm:$0xff] }
 0xfa2   :  { %14415 = vmatprep.subr.msk.bf16.mxu1 %vm18109_vm10, %v18536_v62 }
 0xfa4   :  { %13985 = vmatmul.mubr.msk.f32.gmra.mrb[80].mxu1 %vm8326_vm12, %v18733_v51 }
 0xfa5   :  { %14418 = vmatpush3.bf16.msk.msra.mxu1 %vm18109_vm10, %v18536_v62  ;;  %13987 = vmatprep.mubr.msk.f32.mxu1 %vm8326_vm12, %v18741_v53  ;;  %v18768_v62 = vld [vmem:[%s20254_s16 + $0x138] sm:$0x3] }
 0xfa6   :  { %14430 = vmatprep.subr.bf16.mxu1 %v18647_v5 }
 0xfa8   :  { %13988 = vmatmul.mubr.msk.f32.gmra.mrb[82].mxu1 %vm8326_vm12, %v18753_v44 }
 0xfa9   :  { %13990 = vmatprep.mubr.msk.f32.mxu1 %vm8326_vm12, %v18759_v57 }
 0xfac   :  { %13991 = vmatmul.mubr.msk.f32.gmra.mrb[84].mxu1 %vm8326_vm12, %v18768_v62 }
 0xfad   :  { %14001 = vmatprep.mubr.msk.f32.mxu1 %vm8326_vm12, %v18773_v42 }
 0xfb0   :  { %v8192_v37 = vpop.f32.mrb[72].mxu1  ;;  %14002 = vmatmul.mubr.msk.f32.vlgmr.msra.gmra.mrb[46].mxu1 %vm8326_vm12, %v18782_v39 }
 0xfb1   :  { %14432 = vmatpush3.bf16.msra.mxu1 %v18647_v5  ;;  %v8194_v18 = vpop.f32.mrb[73].mxu1  ;;  %14004 = vmatprep.mubr.msk.f32.mxu1 %vm8326_vm12, %v18787_v2 }
 0xfb2   :  { %14435 = vmatprep.subr.msk.bf16.mxu1 %vm18109_vm10, %v18649_v31  ;;  %v8196_v22 = vpop.f32.mrb[74].mxu1 }
 0xfb3   :  { %v14381_v5 = vpack.c.bf16 %v8196_v22, %v8192_v37  ;;  %v8198_v55 = vpop.f32.mrb[75].mxu1  ;;  %v13151_v37 = vld [vmem:[%s20254_s16 + $0xa0] sm:$0xff] }
 0xfb4   :  { %v14379_v15 = vpack.c.bf16 %v8198_v55, %v8194_v18  ;;  %14005 = vmatmul.mubr.msk.f32.gmra.mrb[80].mxu1 %vm8326_vm12, %v18795_v6  ;;  %v9856_v22 = vld [vmem:[#allocation25 + $0x58] sm:$0xff]  ;;  %v9874_v55 = vld [vmem:[#allocation25 + $0xe8] sm:$0xff] }
 0xfb5   :  { %14438 = vmatpush3.bf16.msk.msra.mxu1 %vm18109_vm10, %v18649_v31  ;;  %14007 = vmatprep.mubr.msk.f32.mxu1 %vm8326_vm12, %v18805_v27 }
 0xfb6   :  { %14380 = vmatprep.subr.bf16.mxu0 %v14379_v15  ;;  %v9857_v15 = vld [vmem:[#allocation25 + $0x60] sm:$0xff] }
 0xfb7   :  { %14382 = vmatpush1.bf16.msra.mxu0 %v14381_v5  ;;  %v9873_v5 = vld [vmem:[#allocation25 + $0xe0] sm:$0xff] }
 0xfb8   :  { %v8202_v41 = vpop.f32.mrb[76].mxu1  ;;  %14008 = vmatmul.mubr.msk.f32.gmra.mrb[82].mxu1 %vm8326_vm12, %v18817_v33 }
 0xfb9   :  { %v8204_v31 = vpop.f32.mrb[77].mxu1  ;;  %14010 = vmatprep.mubr.msk.f32.mxu1 %vm8326_vm12, %v18822_v20 }
 0xfba   :  { %v8206_v32 = vpop.f32.mrb[78].mxu1 }
 0xfbb   :  { %v14386_v43 = vpack.c.bf16 %v8206_v32, %v8202_v41  ;;  %v8208_v34 = vpop.f32.mrb[79].mxu1  ;;  %v9875_v41 = vld [vmem:[#allocation25 + $0xf0] sm:$0xff] }
 0xfbc   :  { %v14383_v48 = vpack.c.bf16 %v8208_v34, %v8204_v31  ;;  %14011 = vmatmul.mubr.msk.f32.gmra.mrb[84].mxu1 %vm8326_vm12, %v8316_v3  ;;  %v9876_v31 = vld [vmem:[#allocation25 + $0xf8] sm:$0xff] }
 0xfbd   :  { %14021 = vmatprep.mubr.msk.f32.mxu1 %vm8326_vm12, %v13147_v1  ;;  %v14467_v32 = vpack.c.bf16 %v9876_v31, %v9875_v41 }
 0xfbe   :  { %14385 = vmatprep.subr.msk.bf16.mxu0 %vm18109_vm10, %v14383_v48 }
 0xfbf   :  { %14388 = vmatpush1.bf16.msk.msra.mxu0 %vm18109_vm10, %v14386_v43  ;;  %v9860_v43 = vld [vmem:[#allocation25 + $0x78] sm:$0xff] }
 0xfc0   :  { %14400 = vmatprep.subr.bf16.mxu0 %v14399_v12  ;;  %14022 = vmatmul.mubr.msk.f32.vlgmr.msra.gmra.mrb[46].mxu1 %vm8326_vm12, %v13148_v49 }
 0xfc1   :  { %14024 = vmatprep.mubr.msk.f32.mxu1 %vm8326_vm12, %v13149_v59 }
 0xfc2   :  { %13192 = vmatmul.mubr.msk.f32.vlgmr.msra.gmra.mrb[66].mxu0 %vm8326_vm12, %v18695_v14  ;;  %v9851_v14 = vld [vmem:[#allocation25 + $0x30] sm:$0xff] }
 0xfc3   :  { %14402 = vmatpush1.bf16.msra.mxu0 %v14401_v9  ;;  %8959 = vmatprep.mubr.f32.mxu0 %v15772_v29  ;;  %v9861_v9 = vld [vmem:[#allocation25 + $0x80] sm:$0xff] }
 0xfc4   :  { %14405 = vmatprep.subr.msk.bf16.mxu0 %vm18109_vm10, %v14403_v60  ;;  %14025 = vmatmul.mubr.msk.f32.gmra.mrb[80].mxu1 %vm8326_vm12, %v13150_v8  ;;  %v14439_v12 = vpack.c.bf16 %v9862_v0, %v9861_v9  ;;  %v7102_v9 = vld [vmem:[#allocation23 + $0x8] sm:$0x7] }
 0xfc5   :  { %14027 = vmatprep.mubr.msk.f32.mxu1 %vm8326_vm12, %v13151_v37  ;;  %v9670_v0 = vrot.slane %v7102_v9, %v17609_v7 }
 0xfc6   :  { %13193 = vmatmul.mubr.msk.f32.gmra.mrb[104].mxu0 %vm8326_vm12, %v18717_v40  ;;  %14440 = vmatprep.subr.bf16.mxu1 %v14439_v12  ;;  %v9852_v40 = vld [vmem:[#allocation25 + $0x38] sm:$0xff] }
 0xfc7   :  { %14408 = vmatpush1.bf16.msk.msra.mxu0 %vm18109_vm10, %v14406_v54  ;;  %8965 = vmatprep.mubr.f32.mxu0 %v15772_v29  ;;  %v9863_v54 = vld [vmem:[#allocation25 + $0x90] sm:$0xff]  ;;  %v18970_v19 = vrot.slane %v9670_v0, %v17609_v7 }
 0xfc8   :  { %14420 = vmatprep.subr.bf16.mxu0 %v14419_v28  ;;  %14028 = vmatmul.mubr.msk.f32.gmra.mrb[82].mxu1 %vm8326_vm12, %v13152_v36  ;;  %v14443_v60 = vpack.c.bf16 %v9864_v26, %v9863_v54 }
 0xfc9   :  { %14030 = vmatprep.mubr.msk.f32.mxu1 %vm8326_vm12, %v13153_v52  ;;  %14442 = vmatpush3.bf16.msra.mxu1 %v14441_v24  ;;  %v18972_v24 = vld [vmem:[#allocation23] sm:$0x77] }
 0xfca   :  { %13194 = vmatmul.mubr.msk.f32.gmra.mrb[106].mxu0 %vm8326_vm12, %v18723_v11  ;;  %14444 = vmatprep.subr.bf16.mxu1 %v14443_v60  ;;  %v14453_v11 = vpack.c.bf16 %v9852_v40, %v9851_v14  ;;  %v9662_v46 = vrot.slane %v18972_v24, %v17609_v7  ;;  %v9666_v21 = vrot.slane %v18972_v24, %v17616_v10 }
 0xfcb   :  { %8971 = vmatprep.mubr.f32.mxu0 %v15772_v29 }
 0xfcc   :  { %14031 = vmatmul.mubr.msk.f32.gmra.mrb[84].mxu1 %vm8326_vm12, %v13154_v35  ;;  %v18985_v23 = vrot.slane %v9662_v46, %v17609_v7  ;;  %v18988_v30 = vrot.slane %v9666_v21, %v17609_v7 }
 0xfcd   :  { %14446 = vmatpush3.bf16.msra.mxu1 %v14445_v50 }
 0xfce   :  { %13195 = vmatmul.mubr.msk.f32.gmra.mrb[108].mxu0 %vm8326_vm12, %v18733_v51  ;;  %v9869_v51 = vld [vmem:[#allocation25 + $0xc0] sm:$0xff] }
 0xfcf   :  { %8977 = vmatprep.mubr.f32.mxu0 %v15772_v29 }
 0xfd2   :  { %13196 = vmatmul.mubr.msk.f32.gmra.mrb[110].mxu0 %vm8326_vm12, %v18741_v53  ;;  %v9870_v53 = vld [vmem:[#allocation25 + $0xc8] sm:$0xff] }
 0xfd3   :  { %8983 = vmatprep.mubr.f32.mxu0 %v15772_v29 }
 0xfd6   :  { %13197 = vmatmul.mubr.msk.f32.gmra.mrb[112].mxu0 %vm8326_vm12, %v18753_v44  ;;  %v14455_v44 = vpack.c.bf16 %v9870_v53, %v9869_v51 }
 0xfd7   :  { %8989 = vmatprep.mubr.f32.mxu0 %v15772_v29 }
 0xfda   :  { %13198 = vmatmul.mubr.msk.f32.gmra.mrb[114].mxu0 %vm8326_vm12, %v18759_v57  ;;  %v9853_v57 = vld [vmem:[#allocation25 + $0x40] sm:$0xff] }
 0xfdb   :  { %8995 = vmatprep.mubr.f32.mxu0 %v15772_v29 }
 0xfde   :  { %13199 = vmatmul.mubr.msk.f32.gmra.mrb[116].mxu0 %vm8326_vm12, %v18768_v62  ;;  %v9854_v62 = vld [vmem:[#allocation25 + $0x48] sm:$0xff] }
 0xfdf   :  { %9204 = vmatprep.mubr.f32.mxu0 %v15772_v29 }
 0xfe2   :  { %13211 = vmatmul.mubr.msk.f32.vlgmr.msra.gmra.mrb[66].mxu0 %vm8326_vm12, %v18773_v42  ;;  %v14457_v42 = vpack.c.bf16 %v9854_v62, %v9853_v57 }
 0xfe3   :  { %14422 = vmatpush1.bf16.msra.mxu0 %v14421_v58  ;;  %9210 = vmatprep.mubr.f32.mxu0 %v15772_v29  ;;  %v9865_v58 = vld [vmem:[#allocation25 + $0xa0] sm:$0xff] }
 0xfe4   :  { %14425 = vmatprep.subr.msk.bf16.mxu0 %vm18109_vm10, %v14423_v4  ;;  %v14447_v28 = vpack.c.bf16 %v9866_v25, %v9865_v58 }
 0xfe6   :  { %13212 = vmatmul.mubr.msk.f32.gmra.mrb[104].mxu0 %vm8326_vm12, %v18782_v39  ;;  %14448 = vmatprep.subr.bf16.mxu1 %v14447_v28  ;;  %v9871_v39 = vld [vmem:[#allocation25 + $0xd0] sm:$0xff] }
 0xfe7   :  { %14428 = vmatpush1.bf16.msk.msra.mxu0 %vm18109_vm10, %v14426_v16  ;;  %9216 = vmatprep.mubr.f32.mxu0 %v15772_v29  ;;  %v9867_v16 = vld [vmem:[#allocation25 + $0xb0] sm:$0xff] }
 0xfe8   :  { %14450 = vmatpush3.bf16.msra.mxu1 %v14449_v38  ;;  %v14451_v4 = vpack.c.bf16 %v9868_v63, %v9867_v16 }
 0xfea   :  { %13213 = vmatmul.mubr.msk.f32.gmra.mrb[106].mxu0 %vm8326_vm12, %v18787_v2  ;;  %14452 = vmatprep.subr.bf16.mxu1 %v14451_v4  ;;  %v9872_v2 = vld [vmem:[#allocation25 + $0xd8] sm:$0xff] }
 0xfeb   :  { %9222 = vmatprep.mubr.f32.mxu0 %v15772_v29  ;;  %v14459_v18 = vpack.c.bf16 %v9872_v2, %v9871_v39 }
 0xfec   :  { %14454 = vmatpush3.bf16.msra.mxu1 %v14453_v11 }
 0xfed   :  { %14456 = vmatprep.subr.bf16.mxu1 %v14455_v44 }
 0xfee   :  { %13214 = vmatmul.mubr.msk.f32.gmra.mrb[108].mxu0 %vm8326_vm12, %v18795_v6  ;;  %v9855_v6 = vld [vmem:[#allocation25 + $0x50] sm:$0xff] }
 0xfef   :  { %9228 = vmatprep.mubr.f32.mxu0 %v15772_v29 }
 0xff0   :  { %14458 = vmatpush3.bf16.msra.mxu1 %v14457_v42 }
 0xff1   :  { %14460 = vmatprep.subr.bf16.mxu1 %v14459_v18 }
 0xff2   :  { %13215 = vmatmul.mubr.msk.f32.gmra.mrb[110].mxu0 %vm8326_vm12, %v18805_v27  ;;  %v14461_v27 = vpack.c.bf16 %v9856_v22, %v9855_v6 }
 0xff3   :  { %9234 = vmatprep.mubr.f32.mxu0 %v15772_v29 }
 0xff4   :  { %14462 = vmatpush3.bf16.msra.mxu1 %v14461_v27 }
 0xff6   :  { %13216 = vmatmul.mubr.msk.f32.gmra.mrb[112].mxu0 %vm8326_vm12, %v18817_v33  ;;  %v14463_v33 = vpack.c.bf16 %v9874_v55, %v9873_v5 }
 0xff7   :  { %9240 = vmatprep.mubr.f32.mxu0 %v15772_v29 }
 0xff8   :  { %14464 = vmatprep.subr.bf16.mxu1 %v14463_v33 }
 0xffa   :  { %13217 = vmatmul.mubr.msk.f32.gmra.mrb[114].mxu0 %vm8326_vm12, %v18822_v20  ;;  %v9858_v20 = vld [vmem:[#allocation25 + $0x68] sm:$0xff] }
 0xffb   :  { %9246 = vmatprep.mubr.f32.mxu0 %v15772_v29 }
 0xffe   :  { %13218 = vmatmul.mubr.msk.f32.gmra.mrb[116].mxu0 %vm8326_vm12, %v8316_v3  ;;  %v14465_v3 = vpack.c.bf16 %v9858_v20, %v9857_v15 }
 0xfff   :  { %9455 = vmatprep.mubr.f32.mxu0 %v15772_v29 }
0x1000   :  { %14466 = vmatpush3.bf16.msra.mxu1 %v14465_v3 }
0x1001   :  { %14468 = vmatprep.subr.bf16.mxu1 %v14467_v32 }
0x1002   :  { %13230 = vmatmul.mubr.msk.f32.vlgmr.msra.gmra.mrb[66].mxu0 %vm8326_vm12, %v13147_v1  ;;  %v9859_v1 = vld [vmem:[#allocation25 + $0x70] sm:$0xff] }
0x1003   :  { %9461 = vmatprep.mubr.f32.mxu0 %v15772_v29  ;;  %v14469_v34 = vpack.c.bf16 %v9860_v43, %v9859_v1 }
0x1005   :  { %14470 = vmatpush3.bf16.msra.mxu1 %v14469_v34 }
0x1006   :  { %13231 = vmatmul.mubr.msk.f32.gmra.mrb[104].mxu0 %vm8326_vm12, %v13148_v49  ;;  %14471 = vmatprep.subr.bf16.mxu1 %v15774_v45 }
0x1007   :  { %9467 = vmatprep.mubr.f32.mxu0 %v15772_v29 }
0x100a   :  { %13232 = vmatmul.mubr.msk.f32.gmra.mrb[106].mxu0 %vm8326_vm12, %v13149_v59 }
0x100b   :  { %9473 = vmatprep.mubr.f32.mxu0 %v15772_v29 }
0x100e   :  { %13233 = vmatmul.mubr.msk.f32.gmra.mrb[108].mxu0 %vm8326_vm12, %v13150_v8 }
0x100f   :  { %9479 = vmatprep.mubr.f32.mxu0 %v15772_v29 }
0x1012   :  { %13234 = vmatmul.mubr.msk.f32.gmra.mrb[110].mxu0 %vm8326_vm12, %v13151_v37 }
0x1013   :  { %9485 = vmatprep.mubr.f32.mxu0 %v15772_v29 }
0x1016   :  { %13235 = vmatmul.mubr.msk.f32.gmra.mrb[112].mxu0 %vm8326_vm12, %v13152_v36 }
0x1017   :  { %9491 = vmatprep.mubr.f32.mxu0 %v15772_v29 }
0x101a   :  { %13236 = vmatmul.mubr.msk.f32.gmra.mrb[114].mxu0 %vm8326_vm12, %v13153_v52 }
0x101b   :  { %9497 = vmatprep.mubr.f32.mxu0 %v15772_v29 }
0x101e   :  { %13237 = vmatmul.mubr.msk.f32.gmra.mrb[116].mxu0 %vm8326_vm12, %v13154_v35 }
0x101f   :  { %10172 = vmatprep.mubr.f32.mxu0 %v15772_v29 }
0x1093   :  { %v14023_v48 = vpop.f32.mrb[46].mxu1 }
0x1094   :  { %v9570_v49 = vpop.f32.mrb[47].mxu1  ;;  %v9691_v26 = vadd.f32 %v14023_v48, %v18970_v19 }
0x1095   :  { %v9688_v60 = vadd.f32 %v18970_v19, %v9570_v49 }
0x1096   :  { %v18980_v25 = vmax.f32 %v9691_v26, 0.0 }
0x1097   :  { %v14026_v59 = vpop.f32.mrb[80].mxu1  ;;  %v18982_v28 = vmax.f32 %v9688_v60, 0.0 }
0x1098   :  { %v9580_v8 = vpop.f32.mrb[81].mxu1  ;;  %v9697_v16 = vadd.f32 %v14026_v59, %v18970_v19  ;;  %v9781_v14 = vmul.f32 %v18980_v25, %v18980_v25 }
0x1099   :  { %v9778_v40 = vmul.f32 %v18982_v28, %v18982_v28  ;;  %v9694_v57 = vadd.f32 %v18970_v19, %v9580_v8  ;;  %v9762_v2 = vadd.f32 %v18980_v25, %v18982_v28 }
0x109a   :  { %v18999_v44 = vmax.f32 %v9697_v16, 0.0 }
0x109b   :  { %v14029_v37 = vpop.f32.mrb[82].mxu1  ;;  %v19011_v27 = vadd.f32 %v9781_v14, %v9778_v40  ;;  %v19022_v41 = vmax.f32 %v9694_v57, 0.0 }
0x109c   :  { %v9590_v36 = vpop.f32.mrb[83].mxu1  ;;  %v19020_v20 = vmul.f32 %v18999_v44, %v18999_v44  ;;  %v19028_v32 = vadd.f32 %v14029_v37, %v18970_v19 }
0x109d   :  { %v19036_v48 = vadd.f32 %v9762_v2, %v19022_v41  ;;  %v19039_v49 = vadd.f32 %v18970_v19, %v9590_v36 }
0x109f   :  { %v18964_v52 = vpop.f32.mrb[84].mxu1 }
0x10a0   :  { %v18966_v35 = vpop.f32.mrb[85].mxu1 }
0x10d5   :  { %v9457_v12 = vpop.f32.mrb[66].mxu0 }
0x10d6   :  { %v9459_v13 = vpop.f32.mrb[67].mxu0  ;;  %v9686_v11 = vadd.f32 %v18985_v23, %v9457_v12 }
0x10d7   :  { %v9687_v51 = vadd.f32 %v18988_v30, %v9459_v13 }
0x10d8   :  { %v19013_v5 = vmax.f32 %v9686_v11, 0.0 }
0x10d9   :  { %v9463_v54 = vpop.f32.mrb[104].mxu0  ;;  %v19015_v55 = vmax.f32 %v9687_v51, 0.0 }
0x10da   :  { %v9465_v50 = vpop.f32.mrb[105].mxu0  ;;  %v9689_v63 = vadd.f32 %v18985_v23, %v9463_v54  ;;  %v9776_v9 = vmul.f32 %v19013_v5, %v19013_v5 }
0x10db   :  { %v9690_v4 = vadd.f32 %v18988_v30, %v9465_v50  ;;  %v9777_v0 = vmul.f32 %v19015_v55, %v19015_v55 }
0x10dc   :  { %v19003_v42 = vmax.f32 %v9689_v63, 0.0 }
0x10dd   :  { %v9469_v58 = vpop.f32.mrb[106].mxu0  ;;  %v19008_v18 = vmax.f32 %v9690_v4, 0.0 }
0x10de   :  { %v9471_v38 = vpop.f32.mrb[107].mxu0  ;;  %v9692_v62 = vadd.f32 %v18985_v23, %v9469_v58  ;;  %v9779_v1 = vmul.f32 %v19003_v42, %v19003_v42  ;;  %v9734_v36 = vadd.f32 %v19003_v42, %v19013_v5 }
0x10df   :  { %v9693_v39 = vadd.f32 %v18988_v30, %v9471_v38  ;;  %v9780_v59 = vmul.f32 %v19008_v18, %v19008_v18  ;;  %v9748_v50 = vadd.f32 %v19008_v18, %v19015_v55 }
0x10e0   :  { %v19024_v31 = vmax.f32 %v9692_v62, 0.0  ;;  %v9800_v21 = vadd.f32 %v9779_v1, %v9776_v9 }
0x10e1   :  { %v9475_v10 = vpop.f32.mrb[108].mxu0  ;;  %v19032_v43 = vmax.f32 %v9693_v39, 0.0  ;;  %v9814_v16 = vadd.f32 %v9780_v59, %v9777_v0 }
0x10e2   :  { %v9477_v53 = vpop.f32.mrb[109].mxu0  ;;  %v9695_v6 = vadd.f32 %v18985_v23, %v9475_v10  ;;  %v9782_v26 = vmul.f32 %v19024_v31, %v19024_v31  ;;  %v9735_v63 = vadd.f32 %v9734_v36, %v19024_v31 }
0x10e3   :  { %v9696_v15 = vadd.f32 %v18988_v30, %v9477_v53  ;;  %v9783_v58 = vmul.f32 %v19032_v43, %v19032_v43  ;;  %v9749_v40 = vadd.f32 %v9748_v50, %v19032_v43 }
0x10e4   :  { %v19043_v8 = vmax.f32 %v9695_v6, 0.0  ;;  %v9801_v62 = vadd.f32 %v9800_v21, %v9782_v26 }
0x10e5   :  { %v9481_v22 = vpop.f32.mrb[110].mxu0  ;;  %v19049_v12 = vmax.f32 %v9696_v15, 0.0 }
0x10e6   :  { %v9483_v33 = vpop.f32.mrb[111].mxu0  ;;  %v9698_v3 = vadd.f32 %v18985_v23, %v9481_v22  ;;  %v9785_v4 = vmul.f32 %v19043_v8, %v19043_v8  ;;  %v9736_v39 = vadd.f32 %v9735_v63, %v19043_v8  ;;  %v9815_v22 = vadd.f32 %v9814_v16, %v9783_v58 }
0x10e7   :  { %v9699_v34 = vadd.f32 %v18988_v30, %v9483_v33  ;;  %v9786_v11 = vmul.f32 %v19049_v12, %v19049_v12  ;;  %v9750_v15 = vadd.f32 %v9749_v40, %v19049_v12 }
0x10e8   :  { %v19056_v60 = vmax.f32 %v9698_v3, 0.0  ;;  %v9802_v1 = vadd.f32 %v9801_v62, %v9785_v4 }
0x10e9   :  { %v9487_v37 = vpop.f32.mrb[112].mxu0  ;;  %v19063_v38 = vmax.f32 %v9699_v34, 0.0  ;;  %v9816_v0 = vadd.f32 %v9815_v22, %v9786_v11 }
0x10ea   :  { %v9701_v13 = vadd.f32 %v18985_v23, %v9487_v37  ;;  %v9489_v54 = vpop.f32.mrb[113].mxu0  ;;  %v9788_v2 = vmul.f32 %v19056_v60, %v19056_v60  ;;  %v9737_v34 = vadd.f32 %v9736_v39, %v19056_v60 }
0x10eb   :  { %v9702_v46 = vadd.f32 %v18988_v30, %v9489_v54  ;;  %v9789_v33 = vmul.f32 %v19063_v38, %v19063_v38 }
0x10ec   :  { %v19068_v10 = vmax.f32 %v9701_v13, 0.0  ;;  %v9751_v13 = vadd.f32 %v9750_v15, %v19063_v38 }
0x10ed   :  { %v9493_v14 = vpop.f32.mrb[114].mxu0  ;;  %v19073_v51 = vmax.f32 %v9702_v46, 0.0  ;;  %v9803_v46 = vadd.f32 %v9802_v1, %v9788_v2  ;;  %v9817_v16 = vadd.f32 %v9816_v0, %v9789_v33  ;;  %v19118_v33 = vmax.f32 %v19039_v49, 0.0 }
0x10ee   :  { %v9704_v53 = vadd.f32 %v18985_v23, %v9493_v14  ;;  %v9495_v57 = vpop.f32.mrb[115].mxu0  ;;  %v9791_v59 = vmul.f32 %v19068_v10, %v19068_v10  ;;  %v9738_v21 = vadd.f32 %v9737_v34, %v19068_v10  ;;  %v9764_v49 = vadd.f32 %v19036_v48, %v18999_v44 }
0x10ef   :  { %v9705_v6 = vadd.f32 %v18988_v30, %v9495_v57  ;;  %v9792_v54 = vmul.f32 %v19073_v51, %v19073_v51  ;;  %v9752_v63 = vadd.f32 %v9751_v13, %v19073_v51 }
0x10f0   :  { %v19083_v3 = vmax.f32 %v9704_v53, 0.0  ;;  %v9804_v40 = vadd.f32 %v9803_v46, %v9791_v59  ;;  %v19124_v46 = vmax.f32 %v19028_v32, 0.0  ;;  %v9709_v32 = vadd.f32 %v18964_v52, %v18970_v19 }
0x10f1   :  { %v19088_v37 = vmax.f32 %v9705_v6, 0.0  ;;  %v9499_v9 = vpop.f32.mrb[116].mxu0  ;;  %v9818_v57 = vadd.f32 %v9817_v16, %v9792_v54 }
0x10f2   :  { %v9707_v36 = vadd.f32 %v18985_v23, %v9499_v9  ;;  %v9501_v26 = vpop.f32.mrb[117].mxu0  ;;  %v9794_v50 = vmul.f32 %v19083_v3, %v19083_v3  ;;  %v9784_v23 = vmul.f32 %v19022_v41, %v19022_v41  ;;  %v9739_v11 = vadd.f32 %v9738_v21, %v19083_v3 }
0x10f3   :  { %v9708_v58 = vadd.f32 %v18988_v30, %v9501_v26  ;;  %v9795_v4 = vmul.f32 %v19088_v37, %v19088_v37  ;;  %v9753_v62 = vadd.f32 %v9752_v63, %v19088_v37  ;;  %v9793_v48 = vmul.f32 %v19124_v46, %v19124_v46 }
0x10f4   :  { %v19101_v14 = vmax.f32 %v9707_v36, 0.0  ;;  %v9805_v2 = vadd.f32 %v9804_v40, %v9794_v50  ;;  %v9829_v9 = vadd.f32 %v19011_v27, %v9784_v23 }
0x10f5   :  { %v19106_v53 = vmax.f32 %v9708_v58, 0.0  ;;  %v9819_v1 = vadd.f32 %v9818_v57, %v9795_v4  ;;  %v9790_v58 = vmul.f32 %v19118_v33, %v19118_v33  ;;  %v9706_v4 = vadd.f32 %v18970_v19, %v18966_v35 }
0x10f6   :  { %v9740_v30 = vsel %vm2589_vm2, %v19101_v14, 0.0  ;;  %v9797_v39 = vmul.f32 %v19101_v14, %v19101_v14  ;;  %v9830_v27 = vadd.f32 %v9829_v9, %v19020_v20  ;;  %v9877_v9 = vld [vmem:[#allocation25 + $0x100] sm:$0xff] }
0x10f7   :  { %v9741_v6 = vadd.f32 %v9740_v30, %v9739_v11  ;;  %v9754_v22 = vsel %vm2589_vm2, %v19106_v53, 0.0  ;;  %v9798_v15 = vmul.f32 %v19106_v53, %v19106_v53 }
0x10f8   :  { %v9806_v34 = vsel %vm2589_vm2, %v9797_v39, 0.0  ;;  %v9755_v59 = vadd.f32 %v9754_v22, %v9753_v62  ;;  %v9831_v20 = vadd.f32 %v9830_v27, %v9790_v58  ;;  %v19138_v22 = vmax.f32 %v9706_v4, 0.0  ;;  %v9879_v27 = vld [vmem:[#allocation25 + $0x110] sm:$0xff]  ;;  %v9880_v4 = vld [vmem:[#allocation25 + $0x118] sm:$0xff] }
0x10f9   :  { %v9742_v0 = vrot.slane %v9741_v6, 4  ;;  %v9807_v13 = vadd.f32 %v9806_v34, %v9805_v2  ;;  %v9820_v54 = vsel %vm2589_vm2, %v9798_v15, 0.0  ;;  %v19140_v15 = vmax.f32 %v9709_v32, 0.0 }
0x10fa   :  { %v9756_v36 = vrot.slane %v9755_v59, 4  ;;  %v9821_v26 = vadd.f32 %v9820_v54, %v9819_v1  ;;  %v9796_v54 = vmul.f32 %v19138_v22, %v19138_v22 }
0x10fb   :  { %v9743_v21 = vadd.f32 %v9742_v0, %v9741_v6  ;;  %v9808_v50 = vrot.slane %v9807_v13, 4  ;;  %v9765_v6 = vadd.f32 %v9764_v49, %v19118_v33  ;;  %v9878_v0 = vld [vmem:[#allocation25 + $0x108] sm:$0xff] }
0x10fc   :  { %v9822_v16 = vrot.slane %v9821_v26, 4  ;;  %v9757_v63 = vadd.f32 %v9756_v36, %v9755_v59  ;;  %v9832_v36 = vadd.f32 %v9831_v20, %v9793_v48  ;;  %v9882_v48 = vld [vmem:[#allocation25 + $0x128] sm:$0xff]  ;;  %v9883_v20 = vld [vmem:[#allocation25 + $0x130] sm:$0xff] }
0x10fd   :  { %v9744_v23 = vrot.slane %v9743_v21, 2  ;;  %v9809_v40 = vadd.f32 %v9808_v50, %v9807_v13  ;;  %v9766_v13 = vadd.f32 %v9765_v6, %v19124_v46 }
0x10fe   :  { %v9758_v11 = vrot.slane %v9757_v63, 2  ;;  %v9823_v57 = vadd.f32 %v9822_v16, %v9821_v26  ;;  %v14472_v16 = vpack.c.bf16 %v9878_v0, %v9877_v9 }
0x10ff   :  { %v9810_v62 = vrot.slane %v9809_v40, 2  ;;  %v9745_v30 = vadd.f32 %v9744_v23, %v9743_v21  ;;  %v9799_v21 = vmul.f32 %v19140_v15, %v19140_v15  ;;  %v9767_v23 = vadd.f32 %v9766_v13, %v19138_v22 }
0x1100   :  { %v9759_v39 = vadd.f32 %v9758_v11, %v9757_v63  ;;  %v9824_v2 = vrot.slane %v9823_v57, 2  ;;  %v9768_v11 = vsel %vm2589_vm2, %v19140_v15, 0.0 }
0x1101   :  { %v9811_v35 = vadd.f32 %v9810_v62, %v9809_v40  ;;  %v9746_v52 = vrot.slane %v9745_v30, 1  ;;  %v9833_v40 = vadd.f32 %v9832_v36, %v9796_v54  ;;  %v14475_v62 = vpack.c.bf16 %v9880_v4, %v9879_v27  ;;  %v9887_v54 = vld [vmem:[#allocation25 + $0x150] sm:$0xff]  ;;  %v9888_v36 = vld [vmem:[#allocation25 + $0x158] sm:$0xff] }
0x1102   :  { %v9760_v1 = vrot.slane %v9759_v39, 1  ;;  %v9825_v34 = vadd.f32 %v9824_v2, %v9823_v57  ;;  %v9834_v57 = vsel %vm2589_vm2, %v9799_v21, 0.0  ;;  %v9891_v4 = vld [vmem:[#allocation25 + $0x170] sm:$0xff] }
0x1103   :  { %v9812_v19 = vrot.slane %v9811_v35, 1  ;;  %v9747_v58 = vadd.f32 %v9746_v52, %v9745_v30  ;;  %v9881_v30 = vld [vmem:[#allocation25 + $0x120] sm:$0xff]  ;;  %v9835_v2 = vadd.f32 %v9834_v57, %v9833_v40 }
0x1104   :  { %v9826_v59 = vrot.slane %v9825_v34, 1  ;;  %v9761_v50 = vadd.f32 %v9760_v1, %v9759_v39  ;;  %v9769_v39 = vadd.f32 %v9768_v11, %v9767_v23  ;;  %v14478_v6 = vpack.c.bf16 %v9882_v48, %v9881_v30  ;;  %v9892_v23 = vld [vmem:[#allocation25 + $0x178] sm:$0xff] }
0x1105   :  { %v9813_v26 = vadd.f32 %v9812_v19, %v9811_v35  ;;  %v9884_v35 = vld [vmem:[#allocation25 + $0x138] sm:$0xff]  ;;  %v9885_v19 = vld [vmem:[#allocation25 + $0x140] sm:$0xff]  ;;  %v14493_v11 = vpack.c.bf16 %v9892_v23, %v9891_v4 }
0x1106   :  { %v9827_v49 = vadd.f32 %v9826_v59, %v9825_v34  ;;  %v9770_v1 = vrot.slane %v9769_v39, 4  ;;  %v9836_v34 = vrot.slane %v9835_v2, 4  ;;  %v14481_v52 = vpack.c.bf16 %v9884_v35, %v9883_v20  ;;  %v9886_v59 = vld [vmem:[#allocation25 + $0x148] sm:$0xff]  ;;  %v10061_v48 = vld [vmem:[%s20257_s19 + $0x8] sm:$0xff] }
0x1107   :  { %v9842_v32 = vsel %vm4644_vm7, %v9747_v58, %v9813_v26  ;;  %v14484_v13 = vpack.c.bf16 %v9886_v59, %v9885_v19  ;;  %v9890_v58 = vld [vmem:[#allocation25 + $0x168] sm:$0xff]  ;;  %v10077_v23 = vld [vmem:[%s20257_s19 + $0x88] sm:$0xff] }
0x1108   :  { %v9843_v63 = vsel %vm4644_vm7, %v9761_v50, %v9827_v49  ;;  %v9771_v9 = vadd.f32 %v9770_v1, %v9769_v39  ;;  %v9837_v0 = vadd.f32 %v9836_v34, %v9835_v2  ;;  %v14487_v50 = vpack.c.bf16 %v9888_v36, %v9887_v54  ;;  %v9889_v49 = vld [vmem:[#allocation25 + $0x160] sm:$0xff]  ;;  %v10064_v39 = vld [vmem:[%s20257_s19 + $0x20] sm:$0xff]  ;;  %v10063_v20 = vld [vmem:[%s20257_s19 + $0x18] sm:$0xff] }
0x1109   :  { %9957 = vmatprep.mubr.f32.mxu1 %v9843_v63  ;;  %v14490_v27 = vpack.c.bf16 %v9890_v58, %v9889_v49  ;;  %v14495_v2 = vpack.c.bf16 %v10064_v39, %v10061_v48  ;;  %v10062_v35 = vld [vmem:[%s20257_s19 + $0x10] sm:$0xff]  ;;  %v10065_v34 = vld [vmem:[%s20257_s19 + $0x28] sm:$0xff]  ;;  %v10067_v19 = vld [vmem:[%s20257_s19 + $0x38] sm:$0xff] }
0x110a   :  { %9958 = vmatmul.mubr.f32.vlgmr.msra.gmra.mrb[86].mxu1 %v9842_v32  ;;  %v9772_v26 = vrot.slane %v9771_v9, 2  ;;  %v9838_v21 = vrot.slane %v9837_v0, 2  ;;  %v10070_v59 = vld [vmem:[%s20257_s19 + $0x50] sm:$0xff]  ;;  %v10068_v54 = vld [vmem:[%s20257_s19 + $0x40] sm:$0xff] }
0x110b   :  { %14473 = vmatpush3.bf16.msra.mxu1 %v14472_v16  ;;  %14065 = vmatprep.mubr.msk.f32.mxu1 %vm15775_vm11, %v15772_v29  ;;  %v10076_v49 = vld [vmem:[%s20257_s19 + $0x80] sm:$0xff] }
0x110c   :  { %14474 = vmatprep.subr.bf16.mxu1 %v15774_v45  ;;  %v9773_v16 = vadd.f32 %v9772_v26, %v9771_v9  ;;  %v9839_v63 = vadd.f32 %v9838_v21, %v9837_v0  ;;  %14496 = vmatprep.subr.bf16.mxu0 %v14495_v2  ;;  %v14499_v9 = vpack.c.bf16 %v10070_v59, %v10067_v19  ;;  %v10066_v0 = vld [vmem:[%s20257_s19 + $0x30] sm:$0xff]  ;;  %v10071_v26 = vld [vmem:[%s20257_s19 + $0x58] sm:$0xff]  ;;  %v10080_v48 = vld [vmem:[%s20257_s19 + $0xa0] sm:$0xff] }
0x110d   :  { %v14531_v21 = vpack.c.bf16 %v10071_v26, %v10068_v54  ;;  %v10083_v2 = vld [vmem:[%s20257_s19 + $0xb8] sm:$0xff]  ;;  %v10086_v19 = vld [vmem:[%s20257_s19 + $0xd0] sm:$0xff] }
0x110e   :  { %v9774_v40 = vrot.slane %v9773_v16, 1  ;;  %v9840_v32 = vrot.slane %v9839_v63, 1  ;;  %v10094_v54 = vld [vmem:[%s20257_s19 + $0x110] sm:$0xff] }
0x110f   :  { %14476 = vmatpush3.bf16.msra.mxu1 %v14475_v62  ;;  %v10090_v26 = vld [vmem:[%s20257_s19 + $0xf0] sm:$0xff] }
0x1110   :  { %14477 = vmatprep.subr.bf16.mxu1 %v15774_v45  ;;  %v9775_v57 = vadd.f32 %v9774_v40, %v9773_v16  ;;  %v9841_v62 = vadd.f32 %v9840_v32, %v9839_v63  ;;  %v10072_v16 = vld [vmem:[%s20257_s19 + $0x60] sm:$0xff]  ;;  %v10075_v63 = vld [vmem:[%s20257_s19 + $0x78] sm:$0xff] }
0x1111   :  { %v14505_v4 = vpack.c.bf16 %v10075_v63, %v10072_v16  ;;  %v10079_v32 = vld [vmem:[%s20257_s19 + $0x98] sm:$0xff]  ;;  %v10097_v63 = vld [vmem:[%s20257_s19 + $0x128] sm:$0xff] }
0x1112   :  { %v9844_v30 = vsel %vm4644_vm7, %v9775_v57, %v9841_v62  ;;  %v10078_v62 = vld [vmem:[%s20257_s19 + $0x90] sm:$0xff] }
0x1113   :  { %14479 = vmatpush3.bf16.msra.mxu1 %v14478_v6  ;;  %v10060_v6 = vld [vmem:[%s20257_s19] sm:$0xff] }
0x1114   :  { %14480 = vmatprep.subr.bf16.mxu1 %v15774_v45  ;;  %v14497_v1 = vpack.c.bf16 %v10063_v20, %v10060_v6  ;;  %v14537_v6 = vpack.c.bf16 %v10083_v2, %v10080_v48  ;;  %v10085_v20 = vld [vmem:[%s20257_s19 + $0xc8] sm:$0xff]  ;;  %v10106_v48 = vld [vmem:[%s20257_s19 + $0x170] sm:$0xff] }
0x1115   :  { %v10102_v2 = vld [vmem:[%s20257_s19 + $0x150] sm:$0xff] }
0x1116   :  { %14498 = vmatpush1.bf16.msra.mxu0 %v14497_v1 }
0x1117   :  { %14482 = vmatpush3.bf16.msra.mxu1 %v14481_v52  ;;  %v14528_v52 = vpack.c.bf16 %v10065_v34, %v10062_v35  ;;  %14500 = vmatprep.subr.bf16.mxu0 %v14499_v9  ;;  %v10088_v35 = vld [vmem:[%s20257_s19 + $0xe0] sm:$0xff]  ;;  %v10089_v9 = vld [vmem:[%s20257_s19 + $0xe8] sm:$0xff] }
0x1118   :  { %14483 = vmatprep.subr.bf16.mxu1 %v15774_v45  ;;  %v14511_v1 = vpack.c.bf16 %v10088_v35, %v10085_v20  ;;  %v10084_v34 = vld [vmem:[%s20257_s19 + $0xc0] sm:$0xff] }
0x1119   :  { %v10104_v20 = vld [vmem:[%s20257_s19 + $0x160] sm:$0xff] }
0x111b   :  { %14485 = vmatpush3.bf16.msra.mxu1 %v14484_v13  ;;  %v10069_v13 = vld [vmem:[%s20257_s19 + $0x48] sm:$0xff] }
0x111c   :  { %14486 = vmatprep.subr.bf16.mxu1 %v15774_v45  ;;  %v14501_v36 = vpack.c.bf16 %v10069_v13, %v10066_v0  ;;  %v14540_v0 = vpack.c.bf16 %v10089_v9, %v10086_v19  ;;  %v10091_v13 = vld [vmem:[%s20257_s19 + $0xf8] sm:$0xff] }
0x111e   :  { %14502 = vmatpush1.bf16.msra.mxu0 %v14501_v36  ;;  %v14515_v36 = vpack.c.bf16 %v10094_v54, %v10091_v13 }
0x111f   :  { %14488 = vmatpush3.bf16.msra.mxu1 %v14487_v50  ;;  %v10073_v50 = vld [vmem:[%s20257_s19 + $0x68] sm:$0xff] }
0x1120   :  { %14489 = vmatprep.subr.bf16.mxu1 %v15774_v45  ;;  %v14503_v58 = vpack.c.bf16 %v10076_v49, %v10073_v50  ;;  %v10092_v50 = vld [vmem:[%s20257_s19 + $0x100] sm:$0xff] }
0x1122   :  { %14504 = vmatprep.subr.bf16.mxu0 %v14503_v58  ;;  %v10095_v58 = vld [vmem:[%s20257_s19 + $0x118] sm:$0xff] }
0x1123   :  { %14491 = vmatpush3.bf16.msra.mxu1 %v14490_v27  ;;  %v10074_v27 = vld [vmem:[%s20257_s19 + $0x70] sm:$0xff]  ;;  %14506 = vmatpush1.bf16.msra.mxu0 %v14505_v4  ;;  %v14543_v16 = vpack.c.bf16 %v10095_v58, %v10092_v50 }
0x1124   :  { %14492 = vmatprep.subr.bf16.mxu1 %v15774_v45  ;;  %v14534_v40 = vpack.c.bf16 %v10077_v23, %v10074_v27  ;;  %v10100_v27 = vld [vmem:[%s20257_s19 + $0x140] sm:$0xff] }
0x1125   :  { %v14519_v4 = vpack.c.bf16 %v10100_v27, %v10097_v63  ;;  %v10096_v23 = vld [vmem:[%s20257_s19 + $0x120] sm:$0xff] }
0x1127   :  { %14494 = vmatpush3.bf16.msra.mxu1 %v14493_v11  ;;  %v10082_v11 = vld [vmem:[%s20257_s19 + $0xb0] sm:$0xff] }
0x1128   :  { %14527 = vmatprep.subr.bf16.mxu1 %v15774_v45  ;;  %v14507_v57 = vpack.c.bf16 %v10082_v11, %v10079_v32  ;;  %v10098_v32 = vld [vmem:[%s20257_s19 + $0x130] sm:$0xff] }
0x112a   :  { %14066 = vmatmul.mubr.f32.vlgmr.msra.gmra.mrb[88].mxu1 %v9844_v30  ;;  %v10081_v30 = vld [vmem:[%s20257_s19 + $0xa8] sm:$0xff]  ;;  %14508 = vmatprep.subr.bf16.mxu0 %v14507_v57 }
0x112b   :  { %14100 = vmatprep.mubr.msk.f32.mxu1 %vm15775_vm11, %v15772_v29  ;;  %14529 = vmatpush3.bf16.msra.mxu1 %v14528_v52  ;;  %v14509_v39 = vpack.c.bf16 %v10081_v30, %v10078_v62  ;;  %v10087_v52 = vld [vmem:[%s20257_s19 + $0xd8] sm:$0xff]  ;;  %v10101_v57 = vld [vmem:[%s20257_s19 + $0x148] sm:$0xff] }
0x112c   :  { %14530 = vmatprep.subr.bf16.mxu1 %v15774_v45  ;;  %v14513_v59 = vpack.c.bf16 %v10087_v52, %v10084_v34  ;;  %v14546_v62 = vpack.c.bf16 %v10101_v57, %v10098_v32  ;;  %v10103_v30 = vld [vmem:[%s20257_s19 + $0x158] sm:$0xff] }
0x112d   :  { %14510 = vmatpush1.bf16.msra.mxu0 %v14509_v39  ;;  %v14523_v39 = vpack.c.bf16 %v10106_v48, %v10103_v30 }
0x112e   :  { %14512 = vmatprep.subr.bf16.mxu0 %v14511_v1  ;;  %v10107_v1 = vld [vmem:[%s20257_s19 + $0x178] sm:$0xff] }
0x112f   :  { %14532 = vmatpush3.bf16.msra.mxu1 %v14531_v21  ;;  %v10093_v21 = vld [vmem:[%s20257_s19 + $0x108] sm:$0xff]  ;;  %v14549_v34 = vpack.c.bf16 %v10107_v1, %v10104_v20 }
0x1130   :  { %14533 = vmatprep.subr.bf16.mxu1 %v15774_v45  ;;  %v14517_v49 = vpack.c.bf16 %v10093_v21, %v10090_v26 }
0x1131   :  { %14514 = vmatpush1.bf16.msra.mxu0 %v14513_v59 }
0x1132   :  { %14516 = vmatprep.subr.bf16.mxu0 %v14515_v36 }
0x1133   :  { %14535 = vmatpush3.bf16.msra.mxu1 %v14534_v40  ;;  %v10099_v40 = vld [vmem:[%s20257_s19 + $0x138] sm:$0xff] }
0x1134   :  { %14536 = vmatprep.subr.bf16.mxu1 %v15774_v45  ;;  %v14521_v11 = vpack.c.bf16 %v10099_v40, %v10096_v23 }
0x1135   :  { %14518 = vmatpush1.bf16.msra.mxu0 %v14517_v49 }
0x1136   :  { %14520 = vmatprep.subr.bf16.mxu0 %v14519_v4 }
0x1137   :  { %14538 = vmatpush3.bf16.msra.mxu1 %v14537_v6  ;;  %v10105_v6 = vld [vmem:[%s20257_s19 + $0x168] sm:$0xff] }
0x1138   :  { %14539 = vmatprep.subr.bf16.mxu1 %v15774_v45  ;;  %v14525_v35 = vpack.c.bf16 %v10105_v6, %v10102_v2 }
0x1139   :  { %14522 = vmatpush1.bf16.msra.mxu0 %v14521_v11 }
0x113a   :  { %14524 = vmatprep.subr.bf16.mxu0 %v14523_v39 }
0x113b   :  { %14541 = vmatpush3.bf16.msra.mxu1 %v14540_v0 }
0x113c   :  { %14542 = vmatprep.subr.bf16.mxu1 %v15774_v45 }
0x113d   :  { %14526 = vmatpush1.bf16.msra.mxu0 %v14525_v35 }
0x113f   :  { %14544 = vmatpush3.bf16.msra.mxu1 %v14543_v16 }
0x1140   :  { %14545 = vmatprep.subr.bf16.mxu1 %v15774_v45 }
0x1143   :  { %14547 = vmatpush3.bf16.msra.mxu1 %v14546_v62 }
0x1144   :  { %14548 = vmatprep.subr.bf16.mxu1 %v15774_v45 }
0x1147   :  { %14550 = vmatpush3.bf16.msra.mxu1 %v14549_v34 }
0x11dd   :  { %v13756_v52 = vpop.f32.mrb[86].mxu1 }
0x11de   :  { %v13757_v19 = vpop.f32.mrb[87].mxu1 }
0x11df   :  { %v13758_v59 = vadd.f32 %v13757_v19, %v13756_v52 }
0x11fd   :  { %v10029_v9 = vpop.f32.mrb[88].mxu1 }
0x11fe   :  { %v10030_v0 = vadd.f32 %v13758_v59, %v10029_v9  ;;  %v14067_v13 = vpop.f32.mrb[89].mxu1 }
0x1200   :  { %v10033_v54 = vmul.f32 0.0005945303, %v10030_v0 }
0x1202   :  { %v10034_v36 = vmul.f32 %v10033_v54, %v10033_v54 }
0x1204   :  { %v10036_v26 = vrot.slane %v10034_v36, 7 }
0x1206   :  { %v10038_v21 = vsub.f32 %v10033_v54, %v10036_v26 }
0x1208   :  { %v10039_v45 = vadd.f32 1e-05, %v10038_v21 }
0x120a   :  { %15275 = vrsqrt.f32 %v10039_v45 }
0x1214   :  { %v15276_v50 = vpop.eup %15275 }
0x1215   :  { %v10041_v49 = vmul.f32 %v15276_v50, %v18972_v24 }
0x1217   :  { %v10046_v58 = vrot.slane %v10041_v49, %v17751_v47 }
0x1219   :  { %v10048_v16 = vmul.f32 %v10046_v58, %v10033_v54 }
0x121b   :  { %v10050_v63 = vrot.slane %v10048_v16, 6 }
0x121d   :  { %v10052_v27 = vsub.f32 %v18972_v24, %v10050_v63 }
0x121f   :  { %v10057_v4 = vrot.slane %v10052_v27, %v17757_v56 }
0x1221   :  { %v10059_v23 = vsel %vm4644_vm7, %v10046_v58, %v10057_v4 }
0x1222   :  { %10173 = vmatmul.mubr.f32.vlgmr.msra.gmra.mrb[118].mxu0 %v10059_v23  ;;  %14101 = vmatmul.mubr.f32.vlgmr.msra.gmra.mrb[90].mxu1 %v10059_v23 }
0x12f5   :  { %v10174_v40 = vpop.f32.mrb[118].mxu0  ;;  %v10245_v32 = vpop.f32.mrb[90].mxu1 }
0x12f6   :  { %v10252_v11 = vrot.slane %v10174_v40, %v17609_v7  ;;  %v10288_v57 = vrot.slane %v10174_v40, %v17751_v47  ;;  %v10176_v62 = vpop.f32.mrb[119].mxu0  ;;  %v14102_v30 = vpop.f32.mrb[91].mxu1  ;;  %v10260_v48 = vrot.slane %v10245_v32, %v17609_v7  ;;  %v10296_v39 = vrot.slane %v10245_v32, %v17751_v47 }
0x12f7   :  { %v10256_v24 = vrot.slane %v10176_v62, %v17609_v7  ;;  %v10292_v56 = vrot.slane %v10176_v62, %v17751_v47 }
0x12f8   :  { %v10261_v2 = vmul.f32 %v10252_v11, %v19013_v5  ;;  %v10264_v6 = vmul.f32 %v10252_v11, %v19003_v42  ;;  %v10267_v20 = vmul.f32 %v10252_v11, %v19024_v31  ;;  %v10270_v35 = vmul.f32 %v10252_v11, %v19043_v8 }
0x12f9   :  { %v10273_v1 = vmul.f32 %v10252_v11, %v19056_v60  ;;  %v10276_v34 = vmul.f32 %v10252_v11, %v19068_v10  ;;  %v10279_v52 = vmul.f32 %v10252_v11, %v19083_v3  ;;  %v10282_v19 = vmul.f32 %v10252_v11, %v19101_v14 }
0x12fa   :  { %v19336_v59 = vadd.f32 %v10288_v57, %v10261_v2  ;;  %v19338_v9 = vadd.f32 %v10288_v57, %v10264_v6  ;;  %v19340_v0 = vadd.f32 %v10288_v57, %v10267_v20  ;;  %v19342_v5 = vadd.f32 %v10288_v57, %v10270_v35 }
0x12fb   :  { %v19344_v42 = vadd.f32 %v10288_v57, %v10273_v1  ;;  %v19346_v31 = vadd.f32 %v10288_v57, %v10276_v34  ;;  %v19348_v8 = vadd.f32 %v10288_v57, %v10279_v52  ;;  %v19350_v60 = vadd.f32 %v10288_v57, %v10282_v19 }
0x12fc   :  { %v10263_v10 = vmul.f32 %v10260_v48, %v18982_v28  ;;  %v10266_v3 = vmul.f32 %v10260_v48, %v18980_v25  ;;  %v10269_v14 = vmul.f32 %v10260_v48, %v19022_v41  ;;  %v10272_v13 = vmul.f32 %v10260_v48, %v18999_v44 }
0x12fd   :  { %v10275_v54 = vmul.f32 %v10260_v48, %v19118_v33  ;;  %v10278_v36 = vmul.f32 %v10260_v48, %v19124_v46  ;;  %v10281_v26 = vmul.f32 %v10260_v48, %v19138_v22  ;;  %v10284_v21 = vmul.f32 %v10260_v48, %v19140_v15 }
0x12fe   :  { %v19360_v45 = vadd.f32 %v10296_v39, %v10263_v10  ;;  %v19362_v50 = vadd.f32 %v10296_v39, %v10266_v3  ;;  %v19364_v49 = vadd.f32 %v10296_v39, %v10269_v14  ;;  %v19366_v28 = vadd.f32 %v10296_v39, %v10272_v13 }
0x12ff   :  { %v19368_v25 = vadd.f32 %v10296_v39, %v10275_v54  ;;  %v19370_v41 = vadd.f32 %v10296_v39, %v10278_v36  ;;  %v19372_v44 = vadd.f32 %v10296_v39, %v10281_v26  ;;  %v19374_v33 = vadd.f32 %v10296_v39, %v10284_v21 }
0x1300   :  { %v10262_v46 = vmul.f32 %v10256_v24, %v19015_v55  ;;  %v10265_v22 = vmul.f32 %v10256_v24, %v19008_v18  ;;  %v10268_v15 = vmul.f32 %v10256_v24, %v19032_v43  ;;  %v10271_v58 = vmul.f32 %v10256_v24, %v19049_v12 }
0x1301   :  { %v10274_v16 = vmul.f32 %v10256_v24, %v19063_v38  ;;  %v10277_v63 = vmul.f32 %v10256_v24, %v19073_v51  ;;  %v10280_v27 = vmul.f32 %v10256_v24, %v19088_v37  ;;  %v10283_v4 = vmul.f32 %v10256_v24, %v19106_v53 }
0x1302   :  { %v10298_v23 = vadd.f32 %v10292_v56, %v10262_v46  ;;  %v10301_v40 = vadd.f32 %v10292_v56, %v10265_v22  ;;  %v19384_v32 = vadd.f32 %v10292_v56, %v10268_v15  ;;  %v19386_v11 = vadd.f32 %v10292_v56, %v10271_v58 }
0x1303   :  { %v19388_v55 = vadd.f32 %v10292_v56, %v10274_v16  ;;  %v19390_v18 = vadd.f32 %v10292_v56, %v10277_v63  ;;  %v19392_v43 = vadd.f32 %v10292_v56, %v10280_v27  ;;  %v19394_v12 = vadd.f32 %v10292_v56, %v10283_v4 }
0x1304   :  { %15733 = dma.done.wait [#allocation5 + $0x2], 30720 }
0x1305   :  { %15734 = vsyncadd [#allocation5 + $0x2], 4294936576  ;;  %v19396_v38 = vpack.c.bf16 %v10301_v40, %v10298_v23  ;;  %v10325_v51 = vld [vmem:[#allocation4 + $0x8] sm:$0xff]  ;;  %v10327_v37 = vld [vmem:[#allocation4 + $0x18] sm:$0xff]  ;;  %vm11340_vm13 = vcmask 474112   ;;  %s20290_s5 = sld [smem:[#allocation52_spill]] }
0x1306   :  { %v10324_v53 = vld [vmem:[#allocation4] sm:$0xff]  ;;  %10577 = vmatprep.subr.bf16.mxu0 %v10325_v51  ;;  %10723 = vmatprep.subr.bf16.mxu1 %v10327_v37  ;;  %v10326_v57 = vld [vmem:[#allocation4 + $0x10] sm:$0xff]  ;;  %v10335_v62 = vld [vmem:[#allocation4 + $0x58] sm:$0xff] }
0x1307   :  { %10609 = vmatprep.mubr.bf16.mxu0 %v19396_v38  ;;  %10755 = vmatprep.mubr.bf16.mxu1 %v19396_v38  ;;  %v10337_v30 = vld [vmem:[#allocation4 + $0x68] sm:$0xff]  ;;  %v10334_v48 = vld [vmem:[#allocation4 + $0x50] sm:$0xff]  ;;  %v10336_v39 = vld [vmem:[#allocation4 + $0x60] sm:$0xff] }
0x1308   :  { %10578 = vmatpush1.bf16.msra.mxu0 %v10324_v53  ;;  %10724 = vmatpush1.bf16.msra.mxu1 %v10326_v57  ;;  %v10345_v24 = vld [vmem:[#allocation4 + $0xa8] sm:$0xff]  ;;  %v10347_v56 = vld [vmem:[#allocation4 + $0xb8] sm:$0xff]  ;;  %v10344_v2 = vld [vmem:[#allocation4 + $0xa0] sm:$0xff] }
0x1309   :  { %10579 = vmatprep.subr.bf16.mxu0 %v10335_v62  ;;  %10725 = vmatprep.subr.bf16.mxu1 %v10337_v30  ;;  %v10346_v6 = vld [vmem:[#allocation4 + $0xb0] sm:$0xff]  ;;  %v10355_v20 = vld [vmem:[#allocation4 + $0xf8] sm:$0xff]  ;;  %v10357_v35 = vld [vmem:[#allocation4 + $0x108] sm:$0xff] }
0x130a   :  { %v10354_v1 = vld [vmem:[#allocation4 + $0xf0] sm:$0xff]  ;;  %v10356_v34 = vld [vmem:[#allocation4 + $0x100] sm:$0xff]  ;;  %v10365_v52 = vld [vmem:[#allocation4 + $0x148] sm:$0xff] }
0x130b   :  { %v10367_v19 = vld [vmem:[#allocation4 + $0x158] sm:$0xff]  ;;  %v10364_v10 = vld [vmem:[#allocation4 + $0x140] sm:$0xff]  ;;  %v10366_v3 = vld [vmem:[#allocation4 + $0x150] sm:$0xff] }
0x130c   :  { %10580 = vmatpush1.bf16.msra.mxu0 %v10334_v48  ;;  %10726 = vmatpush1.bf16.msra.mxu1 %v10336_v39  ;;  %v10375_v14 = vld [vmem:[#allocation4 + $0x198] sm:$0xff]  ;;  %v10377_v13 = vld [vmem:[#allocation4 + $0x1a8] sm:$0xff]  ;;  %v10374_v54 = vld [vmem:[#allocation4 + $0x190] sm:$0xff] }
0x130d   :  { %10581 = vmatprep.subr.bf16.mxu0 %v10345_v24  ;;  %10727 = vmatprep.subr.bf16.mxu1 %v10347_v56  ;;  %v10376_v36 = vld [vmem:[#allocation4 + $0x1a0] sm:$0xff]  ;;  %v10385_v26 = vld [vmem:[#allocation4 + $0x1e8] sm:$0xff]  ;;  %v10387_v21 = vld [vmem:[#allocation4 + $0x1f8] sm:$0xff] }
0x130e   :  { %v10384_v46 = vld [vmem:[#allocation4 + $0x1e0] sm:$0xff]  ;;  %v10386_v22 = vld [vmem:[#allocation4 + $0x1f0] sm:$0xff]  ;;  %v10395_v15 = vld [vmem:[#allocation4 + $0x238] sm:$0xff] }
0x130f   :  { %v10397_v58 = vld [vmem:[#allocation4 + $0x248] sm:$0xff]  ;;  %v10394_v16 = vld [vmem:[#allocation4 + $0x230] sm:$0xff]  ;;  %v10396_v63 = vld [vmem:[#allocation4 + $0x240] sm:$0xff] }
0x1310   :  { %10582 = vmatpush1.bf16.msra.mxu0 %v10344_v2  ;;  %10728 = vmatpush1.bf16.msra.mxu1 %v10346_v6  ;;  %v10405_v27 = vld [vmem:[#allocation4 + $0x288] sm:$0xff]  ;;  %v10407_v4 = vld [vmem:[#allocation4 + $0x298] sm:$0xff]  ;;  %v10404_v23 = vld [vmem:[#allocation4 + $0x280] sm:$0xff] }
0x1311   :  { %10583 = vmatprep.subr.bf16.mxu0 %v10355_v20  ;;  %10729 = vmatprep.subr.bf16.mxu1 %v10357_v35  ;;  %v10406_v40 = vld [vmem:[#allocation4 + $0x290] sm:$0xff]  ;;  %v10415_v51 = vld [vmem:[#allocation4 + $0x2d8] sm:$0xff]  ;;  %v10417_v37 = vld [vmem:[#allocation4 + $0x2e8] sm:$0xff] }
0x1312   :  { %v10414_v53 = vld [vmem:[#allocation4 + $0x2d0] sm:$0xff]  ;;  %v10416_v57 = vld [vmem:[#allocation4 + $0x2e0] sm:$0xff]  ;;  %v10425_v62 = vld [vmem:[#allocation4 + $0x328] sm:$0xff] }
0x1313   :  { %v10427_v30 = vld [vmem:[#allocation4 + $0x338] sm:$0xff]  ;;  %v10424_v48 = vld [vmem:[#allocation4 + $0x320] sm:$0xff]  ;;  %v10426_v39 = vld [vmem:[#allocation4 + $0x330] sm:$0xff] }
0x1314   :  { %10584 = vmatpush1.bf16.msra.mxu0 %v10354_v1  ;;  %10730 = vmatpush1.bf16.msra.mxu1 %v10356_v34  ;;  %v10435_v24 = vld [vmem:[#allocation4 + $0x378] sm:$0xff]  ;;  %v10437_v56 = vld [vmem:[#allocation4 + $0x388] sm:$0xff]  ;;  %v10434_v2 = vld [vmem:[#allocation4 + $0x370] sm:$0xff] }
0x1315   :  { %10585 = vmatprep.subr.bf16.mxu0 %v10365_v52  ;;  %10731 = vmatprep.subr.bf16.mxu1 %v10367_v19  ;;  %v10436_v6 = vld [vmem:[#allocation4 + $0x380] sm:$0xff]  ;;  %v10445_v20 = vld [vmem:[#allocation4 + $0x3c8] sm:$0xff]  ;;  %v10447_v35 = vld [vmem:[#allocation4 + $0x3d8] sm:$0xff] }
0x1316   :  { %v10444_v1 = vld [vmem:[#allocation4 + $0x3c0] sm:$0xff]  ;;  %v10446_v34 = vld [vmem:[#allocation4 + $0x3d0] sm:$0xff]  ;;  %v10455_v52 = vld [vmem:[#allocation4 + $0x418] sm:$0xff] }
0x1317   :  { %v10457_v19 = vld [vmem:[#allocation4 + $0x428] sm:$0xff]  ;;  %v11313_v61 = vld [vmem:[%s20259_s21 + $0x30] sm:$0xff] }
0x1318   :  { %10586 = vmatpush1.bf16.msra.mxu0 %v10364_v10  ;;  %10732 = vmatpush1.bf16.msra.mxu1 %v10366_v3  ;;  %v10454_v10 = vld [vmem:[#allocation4 + $0x410] sm:$0xff]  ;;  %v10456_v3 = vld [vmem:[#allocation4 + $0x420] sm:$0xff] }
0x1319   :  { %10587 = vmatprep.subr.bf16.mxu0 %v10375_v14  ;;  %10733 = vmatprep.subr.bf16.mxu1 %v10377_v13  ;;  %v10465_v14 = vld [vmem:[#allocation4 + $0x468] sm:$0xff]  ;;  %v10467_v13 = vld [vmem:[#allocation4 + $0x478] sm:$0xff] }
0x131c   :  { %10588 = vmatpush1.bf16.msra.mxu0 %v10374_v54  ;;  %10734 = vmatpush1.bf16.msra.mxu1 %v10376_v36  ;;  %v10464_v54 = vld [vmem:[#allocation4 + $0x460] sm:$0xff]  ;;  %v10466_v36 = vld [vmem:[#allocation4 + $0x470] sm:$0xff] }
0x131d   :  { %10589 = vmatprep.subr.bf16.mxu0 %v10385_v26  ;;  %10735 = vmatprep.subr.bf16.mxu1 %v10387_v21  ;;  %v10475_v26 = vld [vmem:[#allocation4 + $0x4b8] sm:$0xff]  ;;  %v10477_v21 = vld [vmem:[#allocation4 + $0x4c8] sm:$0xff] }
0x1320   :  { %10590 = vmatpush1.bf16.msra.mxu0 %v10384_v46  ;;  %10736 = vmatpush1.bf16.msra.mxu1 %v10386_v22  ;;  %v10474_v46 = vld [vmem:[#allocation4 + $0x4b0] sm:$0xff]  ;;  %v10476_v22 = vld [vmem:[#allocation4 + $0x4c0] sm:$0xff] }
0x1321   :  { %10591 = vmatprep.subr.bf16.mxu0 %v10395_v15  ;;  %10737 = vmatprep.subr.bf16.mxu1 %v10397_v58  ;;  %v10485_v15 = vld [vmem:[#allocation4 + $0x508] sm:$0xff]  ;;  %v10487_v58 = vld [vmem:[#allocation4 + $0x518] sm:$0xff] }
0x1324   :  { %10592 = vmatpush1.bf16.msra.mxu0 %v10394_v16  ;;  %10738 = vmatpush1.bf16.msra.mxu1 %v10396_v63  ;;  %v19402_v16 = vpack.c.bf16 %v19338_v9, %v19336_v59  ;;  %v10484_v63 = vld [vmem:[#allocation4 + $0x500] sm:$0xff]  ;;  %v10494_v59 = vld [vmem:[#allocation4 + $0x550] sm:$0xff] }
0x1325   :  { %10593 = vmatprep.subr.bf16.mxu0 %v10405_v27  ;;  %10739 = vmatprep.subr.bf16.mxu1 %v10407_v4  ;;  %v10486_v27 = vld [vmem:[#allocation4 + $0x510] sm:$0xff]  ;;  %v10495_v4 = vld [vmem:[#allocation4 + $0x558] sm:$0xff]  ;;  %v10496_v9 = vld [vmem:[#allocation4 + $0x560] sm:$0xff] }
0x1328   :  { %10594 = vmatpush1.bf16.msra.mxu0 %v10404_v23  ;;  %10740 = vmatpush1.bf16.msra.mxu1 %v10406_v40  ;;  %v10497_v23 = vld [vmem:[#allocation4 + $0x568] sm:$0xff]  ;;  %v19406_v40 = vpack.c.bf16 %v19386_v11, %v19384_v32  ;;  %v19414_v32 = vpack.c.bf16 %v19342_v5, %v19340_v0  ;;  %v10504_v11 = vld [vmem:[#allocation4 + $0x5a0] sm:$0xff]  ;;  %v10514_v0 = vld [vmem:[#allocation4 + $0x5f0] sm:$0xff] }
0x1329   :  { %10595 = vmatprep.subr.bf16.mxu0 %v10415_v51  ;;  %10741 = vmatprep.subr.bf16.mxu1 %v10417_v37  ;;  %v10505_v51 = vld [vmem:[#allocation4 + $0x5a8] sm:$0xff]  ;;  %v10507_v37 = vld [vmem:[#allocation4 + $0x5b8] sm:$0xff]  ;;  %v10516_v5 = vld [vmem:[#allocation4 + $0x600] sm:$0xff] }
0x132c   :  { %10596 = vmatpush1.bf16.msra.mxu0 %v10414_v53  ;;  %10742 = vmatpush1.bf16.msra.mxu1 %v10416_v57  ;;  %v10506_v53 = vld [vmem:[#allocation4 + $0x5b0] sm:$0xff]  ;;  %v10515_v57 = vld [vmem:[#allocation4 + $0x5f8] sm:$0xff] }
0x132d   :  { %10597 = vmatprep.subr.bf16.mxu0 %v10425_v62  ;;  %10743 = vmatprep.subr.bf16.mxu1 %v10427_v30  ;;  %v10517_v62 = vld [vmem:[#allocation4 + $0x608] sm:$0xff]  ;;  %v19418_v30 = vpack.c.bf16 %v19390_v18, %v19388_v55  ;;  %v19426_v55 = vpack.c.bf16 %v19346_v31, %v19344_v42  ;;  %v10524_v18 = vld [vmem:[#allocation4 + $0x640] sm:$0xff]  ;;  %v10534_v42 = vld [vmem:[#allocation4 + $0x690] sm:$0xff] }
0x132e   :  { %v10536_v31 = vld [vmem:[#allocation4 + $0x6a0] sm:$0xff] }
0x1330   :  { %10598 = vmatpush1.bf16.msra.mxu0 %v10424_v48  ;;  %10744 = vmatpush1.bf16.msra.mxu1 %v10426_v39  ;;  %v10525_v48 = vld [vmem:[#allocation4 + $0x648] sm:$0xff]  ;;  %v10527_v39 = vld [vmem:[#allocation4 + $0x658] sm:$0xff] }
0x1331   :  { %10599 = vmatprep.subr.bf16.mxu0 %v10435_v24  ;;  %10745 = vmatprep.subr.bf16.mxu1 %v10437_v56  ;;  %v10526_v24 = vld [vmem:[#allocation4 + $0x650] sm:$0xff]  ;;  %v10535_v56 = vld [vmem:[#allocation4 + $0x698] sm:$0xff] }
0x1334   :  { %10600 = vmatpush1.bf16.msra.mxu0 %v10434_v2  ;;  %10746 = vmatpush1.bf16.msra.mxu1 %v10436_v6  ;;  %v10537_v2 = vld [vmem:[#allocation4 + $0x6a8] sm:$0xff]  ;;  %v19430_v6 = vpack.c.bf16 %v19394_v12, %v19392_v43  ;;  %v19438_v43 = vpack.c.bf16 %v19350_v60, %v19348_v8  ;;  %v10544_v12 = vld [vmem:[#allocation4 + $0x6e0] sm:$0xff]  ;;  %v10331_v60 = vld [vmem:[#allocation4 + $0x38] sm:$0xff] }
0x1335   :  { %10601 = vmatprep.subr.bf16.mxu0 %v10445_v20  ;;  %10747 = vmatprep.subr.bf16.mxu1 %v10447_v35  ;;  %v10545_v20 = vld [vmem:[#allocation4 + $0x6e8] sm:$0xff]  ;;  %v10547_v35 = vld [vmem:[#allocation4 + $0x6f8] sm:$0xff] }
0x1336   :  { %v10329_v8 = vld [vmem:[#allocation4 + $0x28] sm:$0xff] }
0x1338   :  { %10602 = vmatpush1.bf16.msra.mxu0 %v10444_v1  ;;  %10748 = vmatpush1.bf16.msra.mxu1 %v10446_v34  ;;  %v10546_v1 = vld [vmem:[#allocation4 + $0x6f0] sm:$0xff]  ;;  %v10555_v34 = vld [vmem:[#allocation4 + $0x738] sm:$0xff] }
0x1339   :  { %10603 = vmatprep.subr.bf16.mxu0 %v10455_v52  ;;  %10749 = vmatprep.subr.bf16.mxu1 %v10457_v19  ;;  %v10557_v52 = vld [vmem:[#allocation4 + $0x748] sm:$0xff]  ;;  %v10554_v19 = vld [vmem:[#allocation4 + $0x730] sm:$0xff] }
0x133c   :  { %10604 = vmatpush1.bf16.msra.mxu0 %v10454_v10  ;;  %10750 = vmatpush1.bf16.msra.mxu1 %v10456_v3  ;;  %v10556_v10 = vld [vmem:[#allocation4 + $0x740] sm:$0xff]  ;;  %v19446_v3 = vpack.c.bf16 %v19362_v50, %v19360_v45  ;;  %v10349_v45 = vld [vmem:[#allocation4 + $0xc8] sm:$0xff]  ;;  %v10351_v50 = vld [vmem:[#allocation4 + $0xd8] sm:$0xff] }
0x133d   :  { %10605 = vmatprep.subr.bf16.mxu0 %v10465_v14  ;;  %10751 = vmatprep.subr.bf16.mxu1 %v10467_v13  ;;  %v10328_v14 = vld [vmem:[#allocation4 + $0x20] sm:$0xff]  ;;  %v10330_v13 = vld [vmem:[#allocation4 + $0x30] sm:$0xff] }
0x1340   :  { %10606 = vmatpush1.bf16.msra.mxu0 %v10464_v54  ;;  %10752 = vmatpush1.bf16.msra.mxu1 %v10466_v36  ;;  %v10339_v54 = vld [vmem:[#allocation4 + $0x78] sm:$0xff]  ;;  %v10341_v36 = vld [vmem:[#allocation4 + $0x88] sm:$0xff] }
0x1341   :  { %10607 = vmatprep.subr.bf16.mxu0 %v10475_v26  ;;  %10753 = vmatprep.subr.bf16.mxu1 %v10477_v21  ;;  %v10338_v26 = vld [vmem:[#allocation4 + $0x70] sm:$0xff]  ;;  %v10340_v21 = vld [vmem:[#allocation4 + $0x80] sm:$0xff] }
0x1344   :  { %10608 = vmatpush1.bf16.msra.mxu0 %v10474_v46  ;;  %10754 = vmatpush1.bf16.msra.mxu1 %v10476_v22  ;;  %v19454_v46 = vpack.c.bf16 %v19366_v28, %v19364_v49  ;;  %v10348_v22 = vld [vmem:[#allocation4 + $0xc0] sm:$0xff]  ;;  %v10369_v49 = vld [vmem:[#allocation4 + $0x168] sm:$0xff]  ;;  %v10371_v28 = vld [vmem:[#allocation4 + $0x178] sm:$0xff] }
0x1345   :  { %10650 = vmatprep.subr.bf16.mxu0 %v10485_v15  ;;  %10796 = vmatprep.subr.bf16.mxu1 %v10487_v58  ;;  %v10350_v15 = vld [vmem:[#allocation4 + $0xd0] sm:$0xff]  ;;  %v10359_v58 = vld [vmem:[#allocation4 + $0x118] sm:$0xff] }
0x1347   :  { %10610 = vmatmul.mubr.bf16.vlgmr.msra.gmra.mrb[120].mxu0 %v19402_v16  ;;  %10756 = vmatmul.mubr.bf16.vlgmr.msra.gmra.mrb[92].mxu1 %v19402_v16 }
0x1348   :  { %10651 = vmatpush1.bf16.msra.mxu0 %v10484_v63  ;;  %10797 = vmatpush1.bf16.msra.mxu1 %v10486_v27  ;;  %v10361_v63 = vld [vmem:[#allocation4 + $0x128] sm:$0xff]  ;;  %v10358_v27 = vld [vmem:[#allocation4 + $0x110] sm:$0xff] }
0x1349   :  { %10652 = vmatprep.subr.bf16.mxu0 %v10495_v4  ;;  %10798 = vmatprep.subr.bf16.mxu1 %v10497_v23  ;;  %v10360_v4 = vld [vmem:[#allocation4 + $0x120] sm:$0xff]  ;;  %v19462_v23 = vpack.c.bf16 %v19370_v41, %v19368_v25  ;;  %v10389_v25 = vld [vmem:[#allocation4 + $0x208] sm:$0xff]  ;;  %v10391_v41 = vld [vmem:[#allocation4 + $0x218] sm:$0xff] }
0x134a   :  { %10619 = vmatprep.mubr.bf16.mxu0 %v19406_v40  ;;  %10765 = vmatprep.mubr.bf16.mxu1 %v19406_v40 }
0x134c   :  { %10653 = vmatpush1.bf16.msra.mxu0 %v10494_v59  ;;  %10799 = vmatpush1.bf16.msra.mxu1 %v10496_v9  ;;  %v10368_v59 = vld [vmem:[#allocation4 + $0x160] sm:$0xff]  ;;  %v10370_v9 = vld [vmem:[#allocation4 + $0x170] sm:$0xff] }
0x134d   :  { %10654 = vmatprep.subr.bf16.mxu0 %v10505_v51  ;;  %10800 = vmatprep.subr.bf16.mxu1 %v10507_v37  ;;  %v10379_v51 = vld [vmem:[#allocation4 + $0x1b8] sm:$0xff]  ;;  %v10381_v37 = vld [vmem:[#allocation4 + $0x1c8] sm:$0xff] }
0x134f   :  { %10620 = vmatmul.mubr.bf16.gmra.mrb[124].mxu0 %v19414_v32  ;;  %10766 = vmatmul.mubr.bf16.gmra.mrb[96].mxu1 %v19414_v32 }
0x1350   :  { %10655 = vmatpush1.bf16.msra.mxu0 %v10504_v11  ;;  %10801 = vmatpush1.bf16.msra.mxu1 %v10506_v53  ;;  %v10378_v11 = vld [vmem:[#allocation4 + $0x1b0] sm:$0xff]  ;;  %v10380_v53 = vld [vmem:[#allocation4 + $0x1c0] sm:$0xff] }
0x1351   :  { %10656 = vmatprep.subr.bf16.mxu0 %v10515_v57  ;;  %10802 = vmatprep.subr.bf16.mxu1 %v10517_v62  ;;  %v19470_v57 = vpack.c.bf16 %v19374_v33, %v19372_v44  ;;  %v10388_v62 = vld [vmem:[#allocation4 + $0x200] sm:$0xff]  ;;  %v10409_v44 = vld [vmem:[#allocation4 + $0x2a8] sm:$0xff]  ;;  %v10411_v33 = vld [vmem:[#allocation4 + $0x2b8] sm:$0xff] }
0x1352   :  { %10629 = vmatprep.mubr.bf16.mxu0 %v19418_v30  ;;  %10775 = vmatprep.mubr.bf16.mxu1 %v19418_v30 }
0x1354   :  { %10657 = vmatpush1.bf16.msra.mxu0 %v10514_v0  ;;  %10803 = vmatpush1.bf16.msra.mxu1 %v10516_v5  ;;  %v10390_v0 = vld [vmem:[#allocation4 + $0x210] sm:$0xff]  ;;  %v10399_v5 = vld [vmem:[#allocation4 + $0x258] sm:$0xff] }
0x1355   :  { %10658 = vmatprep.subr.bf16.mxu0 %v10525_v48  ;;  %10804 = vmatprep.subr.bf16.mxu1 %v10527_v39  ;;  %v10401_v48 = vld [vmem:[#allocation4 + $0x268] sm:$0xff]  ;;  %v10398_v39 = vld [vmem:[#allocation4 + $0x250] sm:$0xff] }
0x1357   :  { %10630 = vmatmul.mubr.bf16.gmra.mrb[128].mxu0 %v19426_v55  ;;  %10776 = vmatmul.mubr.bf16.gmra.mrb[100].mxu1 %v19426_v55 }
0x1358   :  { %10659 = vmatpush1.bf16.msra.mxu0 %v10524_v18  ;;  %10805 = vmatpush1.bf16.msra.mxu1 %v10526_v24  ;;  %v10400_v18 = vld [vmem:[#allocation4 + $0x260] sm:$0xff] }
0x1359   :  { %10660 = vmatprep.subr.bf16.mxu0 %v10535_v56  ;;  %10806 = vmatprep.subr.bf16.mxu1 %v10537_v2  ;;  %v10408_v24 = vld [vmem:[#allocation4 + $0x2a0] sm:$0xff]  ;;  %v10410_v56 = vld [vmem:[#allocation4 + $0x2b0] sm:$0xff]  ;;  %v10419_v2 = vld [vmem:[#allocation4 + $0x2f8] sm:$0xff] }
0x135a   :  { %10639 = vmatprep.mubr.bf16.mxu0 %v19430_v6  ;;  %10785 = vmatprep.mubr.bf16.mxu1 %v19430_v6 }
0x135c   :  { %10661 = vmatpush1.bf16.msra.mxu0 %v10534_v42  ;;  %10807 = vmatpush1.bf16.msra.mxu1 %v10536_v31  ;;  %v10421_v42 = vld [vmem:[#allocation4 + $0x308] sm:$0xff]  ;;  %v10418_v31 = vld [vmem:[#allocation4 + $0x2f0] sm:$0xff] }
0x135d   :  { %10662 = vmatprep.subr.bf16.mxu0 %v10545_v20  ;;  %10808 = vmatprep.subr.bf16.mxu1 %v10547_v35  ;;  %v10420_v20 = vld [vmem:[#allocation4 + $0x300] sm:$0xff]  ;;  %v10429_v35 = vld [vmem:[#allocation4 + $0x348] sm:$0xff] }
0x135f   :  { %10640 = vmatmul.mubr.bf16.gmra.mrb[132].mxu0 %v19438_v43  ;;  %10786 = vmatmul.mubr.bf16.gmra.mrb[104].mxu1 %v19438_v43 }
0x1360   :  { %10663 = vmatpush1.bf16.msra.mxu0 %v10544_v12  ;;  %10809 = vmatpush1.bf16.msra.mxu1 %v10546_v1  ;;  %v10431_v12 = vld [vmem:[#allocation4 + $0x358] sm:$0xff]  ;;  %v10428_v1 = vld [vmem:[#allocation4 + $0x340] sm:$0xff] }
0x1361   :  { %10664 = vmatprep.subr.bf16.mxu0 %v10555_v34  ;;  %10810 = vmatprep.subr.bf16.mxu1 %v10557_v52  ;;  %v10430_v34 = vld [vmem:[#allocation4 + $0x350] sm:$0xff]  ;;  %v10439_v52 = vld [vmem:[#allocation4 + $0x398] sm:$0xff] }
0x1362   :  { %10682 = vmatprep.mubr.bf16.mxu0 %v15759_v17  ;;  %10828 = vmatprep.mubr.bf16.mxu1 %v15759_v17 }
0x1364   :  { %10665 = vmatpush1.bf16.msra.mxu0 %v10554_v19  ;;  %10811 = vmatpush1.bf16.msra.mxu1 %v10556_v10  ;;  %v10441_v19 = vld [vmem:[#allocation4 + $0x3a8] sm:$0xff]  ;;  %v10438_v10 = vld [vmem:[#allocation4 + $0x390] sm:$0xff] }
0x1365   :  { %10869 = vmatprep.subr.bf16.mxu0 %v10329_v8  ;;  %11015 = vmatprep.subr.bf16.mxu1 %v10331_v60  ;;  %v10440_v8 = vld [vmem:[#allocation4 + $0x3a0] sm:$0xff]  ;;  %v10449_v60 = vld [vmem:[#allocation4 + $0x3e8] sm:$0xff] }
0x1367   :  { %10683 = vmatmul.mubr.bf16.vlgmr.msra.gmra.mrb[120].mxu0 %v19446_v3  ;;  %10829 = vmatmul.mubr.bf16.vlgmr.msra.gmra.mrb[92].mxu1 %v19446_v3 }
0x1368   :  { %10870 = vmatpush1.bf16.msra.mxu0 %v10328_v14  ;;  %11016 = vmatpush1.bf16.msra.mxu1 %v10330_v13  ;;  %v10451_v14 = vld [vmem:[#allocation4 + $0x3f8] sm:$0xff]  ;;  %v10448_v13 = vld [vmem:[#allocation4 + $0x3e0] sm:$0xff] }
0x1369   :  { %10871 = vmatprep.subr.bf16.mxu0 %v10339_v54  ;;  %11017 = vmatprep.subr.bf16.mxu1 %v10341_v36  ;;  %v10450_v54 = vld [vmem:[#allocation4 + $0x3f0] sm:$0xff]  ;;  %v10459_v36 = vld [vmem:[#allocation4 + $0x438] sm:$0xff] }
0x136a   :  { %10692 = vmatprep.mubr.bf16.mxu0 %v15759_v17  ;;  %10838 = vmatprep.mubr.bf16.mxu1 %v15759_v17 }
0x136c   :  { %10872 = vmatpush1.bf16.msra.mxu0 %v10338_v26  ;;  %11018 = vmatpush1.bf16.msra.mxu1 %v10340_v21  ;;  %v10461_v26 = vld [vmem:[#allocation4 + $0x448] sm:$0xff]  ;;  %v10458_v21 = vld [vmem:[#allocation4 + $0x430] sm:$0xff] }
0x136d   :  { %10873 = vmatprep.subr.bf16.mxu0 %v10349_v45  ;;  %11019 = vmatprep.subr.bf16.mxu1 %v10351_v50  ;;  %v10460_v45 = vld [vmem:[#allocation4 + $0x440] sm:$0xff]  ;;  %v10469_v50 = vld [vmem:[#allocation4 + $0x488] sm:$0xff] }
0x136f   :  { %10693 = vmatmul.mubr.bf16.gmra.mrb[124].mxu0 %v19454_v46  ;;  %10839 = vmatmul.mubr.bf16.gmra.mrb[96].mxu1 %v19454_v46 }
0x1370   :  { %10874 = vmatpush1.bf16.msra.mxu0 %v10348_v22  ;;  %11020 = vmatpush1.bf16.msra.mxu1 %v10350_v15  ;;  %v10471_v22 = vld [vmem:[#allocation4 + $0x498] sm:$0xff]  ;;  %v10468_v15 = vld [vmem:[#allocation4 + $0x480] sm:$0xff] }
0x1371   :  { %10875 = vmatprep.subr.bf16.mxu0 %v10359_v58  ;;  %11021 = vmatprep.subr.bf16.mxu1 %v10361_v63  ;;  %v10470_v58 = vld [vmem:[#allocation4 + $0x490] sm:$0xff]  ;;  %v10479_v63 = vld [vmem:[#allocation4 + $0x4d8] sm:$0xff] }
0x1372   :  { %10702 = vmatprep.mubr.bf16.mxu0 %v15759_v17  ;;  %10848 = vmatprep.mubr.bf16.mxu1 %v15759_v17 }
0x1374   :  { %10876 = vmatpush1.bf16.msra.mxu0 %v10358_v27  ;;  %11022 = vmatpush1.bf16.msra.mxu1 %v10360_v4  ;;  %v10481_v27 = vld [vmem:[#allocation4 + $0x4e8] sm:$0xff]  ;;  %v10478_v4 = vld [vmem:[#allocation4 + $0x4d0] sm:$0xff] }
0x1375   :  { %10877 = vmatprep.subr.bf16.mxu0 %v10369_v49  ;;  %11023 = vmatprep.subr.bf16.mxu1 %v10371_v28  ;;  %v10480_v49 = vld [vmem:[#allocation4 + $0x4e0] sm:$0xff]  ;;  %v10489_v28 = vld [vmem:[#allocation4 + $0x528] sm:$0xff] }
0x1377   :  { %10703 = vmatmul.mubr.bf16.gmra.mrb[128].mxu0 %v19462_v23  ;;  %10849 = vmatmul.mubr.bf16.gmra.mrb[100].mxu1 %v19462_v23 }
0x1378   :  { %10878 = vmatpush1.bf16.msra.mxu0 %v10368_v59  ;;  %11024 = vmatpush1.bf16.msra.mxu1 %v10370_v9  ;;  %v10491_v59 = vld [vmem:[#allocation4 + $0x538] sm:$0xff]  ;;  %v10488_v9 = vld [vmem:[#allocation4 + $0x520] sm:$0xff] }
0x1379   :  { %10879 = vmatprep.subr.bf16.mxu0 %v10379_v51  ;;  %11025 = vmatprep.subr.bf16.mxu1 %v10381_v37  ;;  %v10490_v51 = vld [vmem:[#allocation4 + $0x530] sm:$0xff]  ;;  %v10499_v37 = vld [vmem:[#allocation4 + $0x578] sm:$0xff] }
0x137a   :  { %10712 = vmatprep.mubr.bf16.mxu0 %v15759_v17  ;;  %10858 = vmatprep.mubr.bf16.mxu1 %v15759_v17 }
0x137c   :  { %10880 = vmatpush1.bf16.msra.mxu0 %v10378_v11  ;;  %11026 = vmatpush1.bf16.msra.mxu1 %v10380_v53  ;;  %v10501_v11 = vld [vmem:[#allocation4 + $0x588] sm:$0xff]  ;;  %v10498_v53 = vld [vmem:[#allocation4 + $0x570] sm:$0xff] }
0x137d   :  { %10881 = vmatprep.subr.bf16.mxu0 %v10389_v25  ;;  %11027 = vmatprep.subr.bf16.mxu1 %v10391_v41  ;;  %v10500_v25 = vld [vmem:[#allocation4 + $0x580] sm:$0xff]  ;;  %v10509_v41 = vld [vmem:[#allocation4 + $0x5c8] sm:$0xff] }
0x137f   :  { %10713 = vmatmul.mubr.bf16.gmra.mrb[132].mxu0 %v19470_v57  ;;  %10859 = vmatmul.mubr.bf16.gmra.mrb[104].mxu1 %v19470_v57 }
0x1380   :  { %10882 = vmatpush1.bf16.msra.mxu0 %v10388_v62  ;;  %11028 = vmatpush1.bf16.msra.mxu1 %v10390_v0  ;;  %v10511_v62 = vld [vmem:[#allocation4 + $0x5d8] sm:$0xff]  ;;  %v10508_v0 = vld [vmem:[#allocation4 + $0x5c0] sm:$0xff] }
0x1381   :  { %10883 = vmatprep.subr.bf16.mxu0 %v10399_v5  ;;  %11029 = vmatprep.subr.bf16.mxu1 %v10401_v48  ;;  %v10510_v5 = vld [vmem:[#allocation4 + $0x5d0] sm:$0xff]  ;;  %v10519_v48 = vld [vmem:[#allocation4 + $0x618] sm:$0xff] }
0x1382   :  { %10901 = vmatprep.mubr.bf16.mxu0 %v19396_v38  ;;  %11047 = vmatprep.mubr.bf16.mxu1 %v19396_v38 }
0x1384   :  { %10884 = vmatpush1.bf16.msra.mxu0 %v10398_v39  ;;  %11030 = vmatpush1.bf16.msra.mxu1 %v10400_v18  ;;  %v10521_v39 = vld [vmem:[#allocation4 + $0x628] sm:$0xff]  ;;  %v10518_v18 = vld [vmem:[#allocation4 + $0x610] sm:$0xff] }
0x1385   :  { %10885 = vmatprep.subr.bf16.mxu0 %v10409_v44  ;;  %11031 = vmatprep.subr.bf16.mxu1 %v10411_v33  ;;  %v10520_v44 = vld [vmem:[#allocation4 + $0x620] sm:$0xff]  ;;  %v10529_v33 = vld [vmem:[#allocation4 + $0x668] sm:$0xff] }
0x1388   :  { %10886 = vmatpush1.bf16.msra.mxu0 %v10408_v24  ;;  %11032 = vmatpush1.bf16.msra.mxu1 %v10410_v56  ;;  %v10531_v24 = vld [vmem:[#allocation4 + $0x678] sm:$0xff]  ;;  %v10528_v56 = vld [vmem:[#allocation4 + $0x660] sm:$0xff] }
0x1389   :  { %10887 = vmatprep.subr.bf16.mxu0 %v10419_v2  ;;  %11033 = vmatprep.subr.bf16.mxu1 %v10421_v42  ;;  %v10530_v2 = vld [vmem:[#allocation4 + $0x670] sm:$0xff]  ;;  %v10539_v42 = vld [vmem:[#allocation4 + $0x6b8] sm:$0xff] }
0x138c   :  { %10888 = vmatpush1.bf16.msra.mxu0 %v10418_v31  ;;  %11034 = vmatpush1.bf16.msra.mxu1 %v10420_v20  ;;  %v10541_v31 = vld [vmem:[#allocation4 + $0x6c8] sm:$0xff]  ;;  %v10538_v20 = vld [vmem:[#allocation4 + $0x6b0] sm:$0xff] }
0x138d   :  { %10889 = vmatprep.subr.bf16.mxu0 %v10429_v35  ;;  %11035 = vmatprep.subr.bf16.mxu1 %v10431_v12  ;;  %v10540_v35 = vld [vmem:[#allocation4 + $0x6c0] sm:$0xff]  ;;  %v10549_v12 = vld [vmem:[#allocation4 + $0x708] sm:$0xff] }
0x1390   :  { %10890 = vmatpush1.bf16.msra.mxu0 %v10428_v1  ;;  %11036 = vmatpush1.bf16.msra.mxu1 %v10430_v34  ;;  %v10551_v1 = vld [vmem:[#allocation4 + $0x718] sm:$0xff]  ;;  %v10548_v34 = vld [vmem:[#allocation4 + $0x700] sm:$0xff] }
0x1391   :  { %10891 = vmatprep.subr.bf16.mxu0 %v10439_v52  ;;  %11037 = vmatprep.subr.bf16.mxu1 %v10441_v19  ;;  %v10550_v52 = vld [vmem:[#allocation4 + $0x710] sm:$0xff]  ;;  %v10559_v19 = vld [vmem:[#allocation4 + $0x758] sm:$0xff] }
0x1394   :  { %10892 = vmatpush1.bf16.msra.mxu0 %v10438_v10  ;;  %11038 = vmatpush1.bf16.msra.mxu1 %v10440_v8  ;;  %v10561_v10 = vld [vmem:[#allocation4 + $0x768] sm:$0xff]  ;;  %v10558_v8 = vld [vmem:[#allocation4 + $0x750] sm:$0xff] }
0x1395   :  { %10893 = vmatprep.subr.bf16.mxu0 %v10449_v60  ;;  %11039 = vmatprep.subr.bf16.mxu1 %v10451_v14  ;;  %v10560_v60 = vld [vmem:[#allocation4 + $0x760] sm:$0xff]  ;;  %v10333_v14 = vld [vmem:[#allocation4 + $0x48] sm:$0xff] }
0x1398   :  { %10894 = vmatpush1.bf16.msra.mxu0 %v10448_v13  ;;  %11040 = vmatpush1.bf16.msra.mxu1 %v10450_v54  ;;  %v10332_v13 = vld [vmem:[#allocation4 + $0x40] sm:$0xff]  ;;  %v10343_v54 = vld [vmem:[#allocation4 + $0x98] sm:$0xff] }
0x1399   :  { %10895 = vmatprep.subr.bf16.mxu0 %v10459_v36  ;;  %11041 = vmatprep.subr.bf16.mxu1 %v10461_v26  ;;  %v10342_v36 = vld [vmem:[#allocation4 + $0x90] sm:$0xff]  ;;  %v10353_v26 = vld [vmem:[#allocation4 + $0xe8] sm:$0xff] }
0x139c   :  { %10896 = vmatpush1.bf16.msra.mxu0 %v10458_v21  ;;  %11042 = vmatpush1.bf16.msra.mxu1 %v10460_v45  ;;  %v10352_v21 = vld [vmem:[#allocation4 + $0xe0] sm:$0xff]  ;;  %v10363_v45 = vld [vmem:[#allocation4 + $0x138] sm:$0xff] }
0x139d   :  { %10897 = vmatprep.subr.bf16.mxu0 %v10469_v50  ;;  %11043 = vmatprep.subr.bf16.mxu1 %v10471_v22  ;;  %v10362_v50 = vld [vmem:[#allocation4 + $0x130] sm:$0xff]  ;;  %v10373_v22 = vld [vmem:[#allocation4 + $0x188] sm:$0xff] }
0x13a0   :  { %10898 = vmatpush1.bf16.msra.mxu0 %v10468_v15  ;;  %11044 = vmatpush1.bf16.msra.mxu1 %v10470_v58  ;;  %v10372_v15 = vld [vmem:[#allocation4 + $0x180] sm:$0xff]  ;;  %v10383_v58 = vld [vmem:[#allocation4 + $0x1d8] sm:$0xff] }
0x13a1   :  { %10899 = vmatprep.subr.bf16.mxu0 %v10479_v63  ;;  %11045 = vmatprep.subr.bf16.mxu1 %v10481_v27  ;;  %v10382_v63 = vld [vmem:[#allocation4 + $0x1d0] sm:$0xff]  ;;  %v10393_v27 = vld [vmem:[#allocation4 + $0x228] sm:$0xff] }
0x13a4   :  { %10900 = vmatpush1.bf16.msra.mxu0 %v10478_v4  ;;  %11046 = vmatpush1.bf16.msra.mxu1 %v10480_v49  ;;  %v10392_v4 = vld [vmem:[#allocation4 + $0x220] sm:$0xff]  ;;  %v10403_v49 = vld [vmem:[#allocation4 + $0x278] sm:$0xff] }
0x13a5   :  { %10942 = vmatprep.subr.bf16.mxu0 %v10489_v28  ;;  %11088 = vmatprep.subr.bf16.mxu1 %v10491_v59  ;;  %v10402_v28 = vld [vmem:[#allocation4 + $0x270] sm:$0xff]  ;;  %v10413_v59 = vld [vmem:[#allocation4 + $0x2c8] sm:$0xff] }
0x13a7   :  { %10902 = vmatmul.mubr.bf16.vlgmr.msra.gmra.mrb[136].mxu0 %v19402_v16  ;;  %11048 = vmatmul.mubr.bf16.vlgmr.msra.gmra.mrb[108].mxu1 %v19402_v16 }
0x13a8   :  { %10943 = vmatpush1.bf16.msra.mxu0 %v10488_v9  ;;  %11089 = vmatpush1.bf16.msra.mxu1 %v10490_v51  ;;  %v10412_v9 = vld [vmem:[#allocation4 + $0x2c0] sm:$0xff]  ;;  %v10423_v51 = vld [vmem:[#allocation4 + $0x318] sm:$0xff] }
0x13a9   :  { %10944 = vmatprep.subr.bf16.mxu0 %v10499_v37  ;;  %11090 = vmatprep.subr.bf16.mxu1 %v10501_v11  ;;  %v10422_v37 = vld [vmem:[#allocation4 + $0x310] sm:$0xff]  ;;  %v10433_v11 = vld [vmem:[#allocation4 + $0x368] sm:$0xff] }
0x13aa   :  { %10911 = vmatprep.mubr.bf16.mxu0 %v19406_v40  ;;  %11057 = vmatprep.mubr.bf16.mxu1 %v19406_v40 }
0x13ac   :  { %10945 = vmatpush1.bf16.msra.mxu0 %v10498_v53  ;;  %11091 = vmatpush1.bf16.msra.mxu1 %v10500_v25  ;;  %v10432_v53 = vld [vmem:[#allocation4 + $0x360] sm:$0xff]  ;;  %v10443_v25 = vld [vmem:[#allocation4 + $0x3b8] sm:$0xff] }
0x13ad   :  { %10946 = vmatprep.subr.bf16.mxu0 %v10509_v41  ;;  %11092 = vmatprep.subr.bf16.mxu1 %v10511_v62  ;;  %v10453_v41 = vld [vmem:[#allocation4 + $0x408] sm:$0xff]  ;;  %v10452_v62 = vld [vmem:[#allocation4 + $0x400] sm:$0xff] }
0x13af   :  { %10912 = vmatmul.mubr.bf16.gmra.mrb[140].mxu0 %v19414_v32  ;;  %11058 = vmatmul.mubr.bf16.gmra.mrb[112].mxu1 %v19414_v32 }
0x13b0   :  { %10947 = vmatpush1.bf16.msra.mxu0 %v10508_v0  ;;  %11093 = vmatpush1.bf16.msra.mxu1 %v10510_v5  ;;  %v10463_v0 = vld [vmem:[#allocation4 + $0x458] sm:$0xff]  ;;  %v10462_v5 = vld [vmem:[#allocation4 + $0x450] sm:$0xff] }
0x13b1   :  { %10948 = vmatprep.subr.bf16.mxu0 %v10519_v48  ;;  %11094 = vmatprep.subr.bf16.mxu1 %v10521_v39  ;;  %v10473_v48 = vld [vmem:[#allocation4 + $0x4a8] sm:$0xff]  ;;  %v10472_v39 = vld [vmem:[#allocation4 + $0x4a0] sm:$0xff] }
0x13b2   :  { %10921 = vmatprep.mubr.bf16.mxu0 %v19418_v30  ;;  %11067 = vmatprep.mubr.bf16.mxu1 %v19418_v30 }
0x13b4   :  { %10949 = vmatpush1.bf16.msra.mxu0 %v10518_v18  ;;  %11095 = vmatpush1.bf16.msra.mxu1 %v10520_v44  ;;  %v10483_v18 = vld [vmem:[#allocation4 + $0x4f8] sm:$0xff]  ;;  %v10482_v44 = vld [vmem:[#allocation4 + $0x4f0] sm:$0xff] }
0x13b5   :  { %10950 = vmatprep.subr.bf16.mxu0 %v10529_v33  ;;  %11096 = vmatprep.subr.bf16.mxu1 %v10531_v24  ;;  %v10493_v33 = vld [vmem:[#allocation4 + $0x548] sm:$0xff]  ;;  %v10492_v24 = vld [vmem:[#allocation4 + $0x540] sm:$0xff] }
0x13b7   :  { %10922 = vmatmul.mubr.bf16.gmra.mrb[144].mxu0 %v19426_v55  ;;  %11068 = vmatmul.mubr.bf16.gmra.mrb[116].mxu1 %v19426_v55 }
0x13b8   :  { %10951 = vmatpush1.bf16.msra.mxu0 %v10528_v56  ;;  %11097 = vmatpush1.bf16.msra.mxu1 %v10530_v2  ;;  %v10503_v56 = vld [vmem:[#allocation4 + $0x598] sm:$0xff]  ;;  %v10502_v2 = vld [vmem:[#allocation4 + $0x590] sm:$0xff] }
0x13b9   :  { %10952 = vmatprep.subr.bf16.mxu0 %v10539_v42  ;;  %11098 = vmatprep.subr.bf16.mxu1 %v10541_v31  ;;  %v10513_v42 = vld [vmem:[#allocation4 + $0x5e8] sm:$0xff]  ;;  %v10512_v31 = vld [vmem:[#allocation4 + $0x5e0] sm:$0xff] }
0x13ba   :  { %10931 = vmatprep.mubr.bf16.mxu0 %v19430_v6  ;;  %11077 = vmatprep.mubr.bf16.mxu1 %v19430_v6 }
0x13bc   :  { %10953 = vmatpush1.bf16.msra.mxu0 %v10538_v20  ;;  %11099 = vmatpush1.bf16.msra.mxu1 %v10540_v35  ;;  %v10523_v20 = vld [vmem:[#allocation4 + $0x638] sm:$0xff]  ;;  %v10522_v35 = vld [vmem:[#allocation4 + $0x630] sm:$0xff] }
0x13bd   :  { %10954 = vmatprep.subr.bf16.mxu0 %v10549_v12  ;;  %11100 = vmatprep.subr.bf16.mxu1 %v10551_v1  ;;  %v10533_v12 = vld [vmem:[#allocation4 + $0x688] sm:$0xff]  ;;  %v10543_v1 = vld [vmem:[#allocation4 + $0x6d8] sm:$0xff] }
0x13bf   :  { %10932 = vmatmul.mubr.bf16.gmra.mrb[148].mxu0 %v19438_v43  ;;  %11078 = vmatmul.mubr.bf16.gmra.mrb[120].mxu1 %v19438_v43 }
0x13c0   :  { %10955 = vmatpush1.bf16.msra.mxu0 %v10548_v34  ;;  %11101 = vmatpush1.bf16.msra.mxu1 %v10550_v52  ;;  %v10553_v34 = vld [vmem:[#allocation4 + $0x728] sm:$0xff]  ;;  %v10563_v52 = vld [vmem:[#allocation4 + $0x778] sm:$0xff] }
0x13c1   :  { %10956 = vmatprep.subr.bf16.mxu0 %v10559_v19  ;;  %11102 = vmatprep.subr.bf16.mxu1 %v10561_v10 }
0x13c2   :  { %10974 = vmatprep.mubr.bf16.mxu0 %v15759_v17  ;;  %11120 = vmatprep.mubr.bf16.mxu1 %v15759_v17 }
0x13c4   :  { %10957 = vmatpush1.bf16.msra.mxu0 %v10558_v8  ;;  %11103 = vmatpush1.bf16.msra.mxu1 %v10560_v60 }
0x13c5   :  { %11161 = vmatprep.subr.bf16.mxu0 %v10333_v14 }
0x13c7   :  { %10975 = vmatmul.mubr.bf16.vlgmr.msra.gmra.mrb[136].mxu0 %v19446_v3  ;;  %11121 = vmatmul.mubr.bf16.vlgmr.msra.gmra.mrb[108].mxu1 %v19446_v3 }
0x13c8   :  { %11162 = vmatpush1.bf16.msra.mxu0 %v10332_v13  ;;  %10984 = vmatprep.mubr.bf16.mxu0 %v15759_v17 }
0x13c9   :  { %11163 = vmatprep.subr.bf16.mxu0 %v10343_v54  ;;  %11130 = vmatprep.mubr.bf16.mxu1 %v15759_v17 }
0x13cc   :  { %11164 = vmatpush1.bf16.msra.mxu0 %v10342_v36 }
0x13cd   :  { %11165 = vmatprep.subr.bf16.mxu0 %v10353_v26 }
0x13cf   :  { %10985 = vmatmul.mubr.bf16.gmra.mrb[140].mxu0 %v19454_v46  ;;  %11131 = vmatmul.mubr.bf16.gmra.mrb[112].mxu1 %v19454_v46 }
0x13d0   :  { %11166 = vmatpush1.bf16.msra.mxu0 %v10352_v21  ;;  %10994 = vmatprep.mubr.bf16.mxu0 %v15759_v17 }
0x13d1   :  { %11167 = vmatprep.subr.bf16.mxu0 %v10363_v45  ;;  %11140 = vmatprep.mubr.bf16.mxu1 %v15759_v17 }
0x13d4   :  { %11168 = vmatpush1.bf16.msra.mxu0 %v10362_v50 }
0x13d5   :  { %11169 = vmatprep.subr.bf16.mxu0 %v10373_v22 }
0x13d7   :  { %10995 = vmatmul.mubr.bf16.gmra.mrb[144].mxu0 %v19462_v23  ;;  %11141 = vmatmul.mubr.bf16.gmra.mrb[116].mxu1 %v19462_v23 }
0x13d8   :  { %11170 = vmatpush1.bf16.msra.mxu0 %v10372_v15  ;;  %11004 = vmatprep.mubr.bf16.mxu0 %v15759_v17 }
0x13d9   :  { %11171 = vmatprep.subr.bf16.mxu0 %v10383_v58  ;;  %11150 = vmatprep.mubr.bf16.mxu1 %v15759_v17 }
0x13dc   :  { %11172 = vmatpush1.bf16.msra.mxu0 %v10382_v63 }
0x13dd   :  { %11173 = vmatprep.subr.bf16.mxu0 %v10393_v27 }
0x13df   :  { %11005 = vmatmul.mubr.bf16.gmra.mrb[148].mxu0 %v19470_v57  ;;  %11151 = vmatmul.mubr.bf16.gmra.mrb[120].mxu1 %v19470_v57 }
0x13e0   :  { %11174 = vmatpush1.bf16.msra.mxu0 %v10392_v4  ;;  %11193 = vmatprep.mubr.bf16.mxu0 %v19396_v38  ;;  %v10442_v38 = vld [vmem:[#allocation4 + $0x3b0] sm:$0xff] }
0x13e1   :  { %11175 = vmatprep.subr.bf16.mxu0 %v10403_v49  ;;  %11459 = vmatprep.mubr.f32.mxu1 %v15772_v29 }
0x13e4   :  { %11176 = vmatpush1.bf16.msra.mxu0 %v10402_v28 }
0x13e5   :  { %11177 = vmatprep.subr.bf16.mxu0 %v10413_v59 }
0x13e8   :  { %11178 = vmatpush1.bf16.msra.mxu0 %v10412_v9 }
0x13e9   :  { %11179 = vmatprep.subr.bf16.mxu0 %v10423_v51 }
0x13ec   :  { %11180 = vmatpush1.bf16.msra.mxu0 %v10422_v37 }
0x13ed   :  { %11181 = vmatprep.subr.bf16.mxu0 %v10433_v11 }
0x13f0   :  { %11182 = vmatpush1.bf16.msra.mxu0 %v10432_v53 }
0x13f1   :  { %11183 = vmatprep.subr.bf16.mxu0 %v10443_v25 }
0x13f4   :  { %11184 = vmatpush1.bf16.msra.mxu0 %v10442_v38 }
0x13f5   :  { %11185 = vmatprep.subr.bf16.mxu0 %v10453_v41 }
0x13f8   :  { %11186 = vmatpush1.bf16.msra.mxu0 %v10452_v62 }
0x13f9   :  { %11187 = vmatprep.subr.bf16.mxu0 %v10463_v0 }
0x13fc   :  { %11188 = vmatpush1.bf16.msra.mxu0 %v10462_v5 }
0x13fd   :  { %11189 = vmatprep.subr.bf16.mxu0 %v10473_v48 }
0x1400   :  { %11190 = vmatpush1.bf16.msra.mxu0 %v10472_v39 }
0x1401   :  { %11191 = vmatprep.subr.bf16.mxu0 %v10483_v18 }
0x1404   :  { %11192 = vmatpush1.bf16.msra.mxu0 %v10482_v44 }
0x1405   :  { %11234 = vmatprep.subr.bf16.mxu0 %v10493_v33 }
0x1407   :  { %11194 = vmatmul.mubr.bf16.vlgmr.msra.gmra.mrb[152].mxu0 %v19402_v16  ;;  %v10532_v16 = vld [vmem:[#allocation4 + $0x680] sm:$0xff] }
0x1408   :  { %11235 = vmatpush1.bf16.msra.mxu0 %v10492_v24  ;;  %11203 = vmatprep.mubr.bf16.mxu0 %v19406_v40  ;;  %v10542_v40 = vld [vmem:[#allocation4 + $0x6d0] sm:$0xff] }
0x1409   :  { %11236 = vmatprep.subr.bf16.mxu0 %v10503_v56 }
0x140c   :  { %11237 = vmatpush1.bf16.msra.mxu0 %v10502_v2 }
0x140d   :  { %11238 = vmatprep.subr.bf16.mxu0 %v10513_v42  ;;  %v13247_v42 = vld [vmem:[%s20259_s21 + $0x80] sm:$0xff] }
0x140f   :  { %11204 = vmatmul.mubr.bf16.gmra.mrb[156].mxu0 %v19414_v32  ;;  %v10552_v32 = vld [vmem:[#allocation4 + $0x720] sm:$0xff] }
0x1410   :  { %11239 = vmatpush1.bf16.msra.mxu0 %v10512_v31  ;;  %11213 = vmatprep.mubr.bf16.mxu0 %v19418_v30  ;;  %v10562_v30 = vld [vmem:[#allocation4 + $0x770] sm:$0xff]  ;;  %v13248_v31 = vld [vmem:[%s20259_s21 + $0x88] sm:$0xff] }
0x1411   :  { %11240 = vmatprep.subr.bf16.mxu0 %v10523_v20  ;;  %v13249_v20 = vld [vmem:[%s20259_s21 + $0x90] sm:$0xff] }
0x1414   :  { %11241 = vmatpush1.bf16.msra.mxu0 %v10522_v35  ;;  %v13250_v35 = vld [vmem:[%s20259_s21 + $0x98] sm:$0xff] }
0x1415   :  { %11242 = vmatprep.subr.bf16.mxu0 %v10533_v12  ;;  %v13251_v12 = vld [vmem:[%s20259_s21 + $0xa0] sm:$0xff] }
0x1417   :  { %11214 = vmatmul.mubr.bf16.gmra.mrb[160].mxu0 %v19426_v55 }
0x1418   :  { %11243 = vmatpush1.bf16.msra.mxu0 %v10532_v16  ;;  %11223 = vmatprep.mubr.bf16.mxu0 %v19430_v6  ;;  %v13252_v16 = vld [vmem:[%s20259_s21 + $0xa8] sm:$0xff] }
0x1419   :  { %11244 = vmatprep.subr.bf16.mxu0 %v10543_v1  ;;  %v13253_v1 = vld [vmem:[%s20259_s21 + $0xb0] sm:$0xff] }
0x141c   :  { %11245 = vmatpush1.bf16.msra.mxu0 %v10542_v40  ;;  %v13254_v40 = vld [vmem:[%s20259_s21 + $0xb8] sm:$0xff] }
0x141d   :  { %11246 = vmatprep.subr.bf16.mxu0 %v10553_v34  ;;  %v13255_v34 = vld [vmem:[%s20259_s21 + $0xc0] sm:$0xff] }
0x141f   :  { %11224 = vmatmul.mubr.bf16.gmra.mrb[164].mxu0 %v19438_v43 }
0x1420   :  { %11247 = vmatpush1.bf16.msra.mxu0 %v10552_v32  ;;  %11266 = vmatprep.mubr.bf16.mxu0 %v15759_v17  ;;  %v13256_v32 = vld [vmem:[%s20259_s21 + $0xc8] sm:$0xff] }
0x1421   :  { %11248 = vmatprep.subr.bf16.mxu0 %v10563_v52  ;;  %v13257_v52 = vld [vmem:[%s20259_s21 + $0xd0] sm:$0xff] }
0x1424   :  { %11249 = vmatpush1.bf16.msra.mxu0 %v10562_v30  ;;  %v13258_v30 = vld [vmem:[%s20259_s21 + $0xd8] sm:$0xff] }
0x1427   :  { %11267 = vmatmul.mubr.bf16.vlgmr.msra.gmra.mrb[152].mxu0 %v19446_v3 }
0x1428   :  { %11276 = vmatprep.mubr.bf16.mxu0 %v15759_v17 }
0x142f   :  { %11277 = vmatmul.mubr.bf16.gmra.mrb[156].mxu0 %v19454_v46 }
0x1430   :  { %11286 = vmatprep.mubr.bf16.mxu0 %v15759_v17 }
0x1437   :  { %11287 = vmatmul.mubr.bf16.gmra.mrb[160].mxu0 %v19462_v23 }
0x1438   :  { %11296 = vmatprep.mubr.bf16.mxu0 %v15759_v17 }
0x143a   :  { %v19522_v55 = vpop.f32.mrb[120].mxu0  ;;  %v10830_v6 = vpop.f32.mrb[92].mxu1 }
0x143b   :  { %v19524_v43 = vpop.f32.mrb[121].mxu0  ;;  %v10832_v19 = vpop.f32.mrb[93].mxu1 }
0x143c   :  { %v19526_v10 = vpop.f32.mrb[122].mxu0  ;;  %v10834_v8 = vpop.f32.mrb[94].mxu1 }
0x143d   :  { %v14607_v3 = vpack.c.bf16 %v19526_v10, %v19522_v55  ;;  %v14553_v60 = vpack.c.bf16 %v10834_v8, %v10830_v6  ;;  %v19530_v46 = vpop.f32.mrb[123].mxu0  ;;  %v10836_v14 = vpop.f32.mrb[95].mxu1  ;;  %v13259_v6 = vld [vmem:[%s20259_s21 + $0xe0] sm:$0xff]  ;;  %v13261_v8 = vld [vmem:[%s20259_s21 + $0xf0] sm:$0xff] }
0x143e   :  { %v14605_v23 = vpack.c.bf16 %v19530_v46, %v19524_v43  ;;  %v14551_v17 = vpack.c.bf16 %v10836_v14, %v10832_v19  ;;  %v13260_v19 = vld [vmem:[%s20259_s21 + $0xe8] sm:$0xff]  ;;  %v13333_v55 = vld [vmem:[%s20259_s21 + $0x210] sm:$0xff]  ;;  %v13334_v43 = vld [vmem:[%s20259_s21 + $0x218] sm:$0xff] }
0x143f   :  { %11297 = vmatmul.mubr.bf16.gmra.mrb[164].mxu0 %v19470_v57  ;;  %v13335_v10 = vld [vmem:[%s20259_s21 + $0x220] sm:$0xff]  ;;  %v13337_v46 = vld [vmem:[%s20259_s21 + $0x230] sm:$0xff] }
0x1440   :  { %14552 = vmatprep.subr.bf16.mxu1 %v14551_v17  ;;  %12370 = vmatprep.mubr.f32.mxu0 %v15772_v29 }
0x1441   :  { %14554 = vmatpush1.bf16.msra.mxu1 %v14553_v60  ;;  %v13262_v60 = vld [vmem:[%s20259_s21 + $0xf8] sm:$0x3] }
0x1442   :  { %v19536_v13 = vpop.f32.mrb[124].mxu0  ;;  %v10840_v54 = vpop.f32.mrb[96].mxu1 }
0x1443   :  { %v19538_v36 = vpop.f32.mrb[125].mxu0  ;;  %v10842_v26 = vpop.f32.mrb[97].mxu1 }
0x1444   :  { %v19540_v21 = vpop.f32.mrb[126].mxu0  ;;  %v10844_v45 = vpop.f32.mrb[98].mxu1 }
0x1445   :  { %v14611_v50 = vpack.c.bf16 %v19540_v21, %v19536_v13  ;;  %v14557_v22 = vpack.c.bf16 %v10844_v45, %v10840_v54  ;;  %v19544_v15 = vpop.f32.mrb[127].mxu0  ;;  %v10846_v57 = vpop.f32.mrb[99].mxu1  ;;  %v13339_v13 = vld [vmem:[%s20259_s21 + $0x240] sm:$0xff]  ;;  %v13341_v21 = vld [vmem:[%s20259_s21 + $0x250] sm:$0xff] }
0x1446   :  { %v14609_v58 = vpack.c.bf16 %v19544_v15, %v19538_v36  ;;  %v14555_v63 = vpack.c.bf16 %v10846_v57, %v10842_v26  ;;  %v13340_v36 = vld [vmem:[%s20259_s21 + $0x248] sm:$0xff]  ;;  %v13343_v15 = vld [vmem:[%s20259_s21 + $0x260] sm:$0xff] }
0x1448   :  { %14556 = vmatprep.subr.bf16.mxu1 %v14555_v63 }
0x1449   :  { %14558 = vmatpush1.bf16.msra.mxu1 %v14557_v22 }
0x144a   :  { %v19548_v27 = vpop.f32.mrb[128].mxu0  ;;  %v10850_v4 = vpop.f32.mrb[100].mxu1 }
0x144b   :  { %v19550_v49 = vpop.f32.mrb[129].mxu0  ;;  %v10852_v28 = vpop.f32.mrb[101].mxu1 }
0x144c   :  { %v19552_v59 = vpop.f32.mrb[130].mxu0  ;;  %v10854_v9 = vpop.f32.mrb[102].mxu1 }
0x144d   :  { %v14615_v51 = vpack.c.bf16 %v19552_v59, %v19548_v27  ;;  %v14561_v37 = vpack.c.bf16 %v10854_v9, %v10850_v4  ;;  %v19556_v11 = vpop.f32.mrb[131].mxu0  ;;  %v10856_v53 = vpop.f32.mrb[103].mxu1  ;;  %v13345_v27 = vld [vmem:[%s20259_s21 + $0x270] sm:$0xff]  ;;  %v11307_v59 = vld [vmem:[%s20259_s21] sm:$0xff] }
0x144e   :  { %v14613_v25 = vpack.c.bf16 %v19556_v11, %v19550_v49  ;;  %v14559_v38 = vpack.c.bf16 %v10856_v53, %v10852_v28  ;;  %v13346_v49 = vld [vmem:[%s20259_s21 + $0x278] sm:$0x3]  ;;  %v11309_v11 = vld [vmem:[%s20259_s21 + $0x10] sm:$0xff] }
0x1450   :  { %14560 = vmatprep.subr.bf16.mxu1 %v14559_v38 }
0x1451   :  { %14562 = vmatpush1.bf16.msra.mxu1 %v14561_v37 }
0x1452   :  { %v19560_v41 = vpop.f32.mrb[132].mxu0  ;;  %v10860_v62 = vpop.f32.mrb[104].mxu1 }
0x1453   :  { %v19562_v0 = vpop.f32.mrb[133].mxu0  ;;  %v10862_v5 = vpop.f32.mrb[105].mxu1 }
0x1454   :  { %v19564_v48 = vpop.f32.mrb[134].mxu0  ;;  %v10864_v39 = vpop.f32.mrb[106].mxu1 }
0x1455   :  { %v14620_v18 = vpack.c.bf16 %v19564_v48, %v19560_v41  ;;  %v14566_v44 = vpack.c.bf16 %v10864_v39, %v10860_v62  ;;  %v19568_v33 = vpop.f32.mrb[135].mxu0  ;;  %v10866_v24 = vpop.f32.mrb[107].mxu1  ;;  %v11311_v41 = vld [vmem:[%s20259_s21 + $0x20] sm:$0xff]  ;;  %v11314_v48 = vld [vmem:[%s20259_s21 + $0x38] sm:$0xff] }
0x1456   :  { %v14617_v56 = vpack.c.bf16 %v19568_v33, %v19562_v0  ;;  %v14563_v2 = vpack.c.bf16 %v10866_v24, %v10862_v5  ;;  %v11312_v0 = vld [vmem:[%s20259_s21 + $0x28] sm:$0xff] }
0x1457   :  { %v11316_v33 = vld [vmem:[%s20259_s21 + $0x48] sm:$0xff] }
0x1458   :  { %14565 = vmatprep.subr.msk.bf16.mxu1 %vm18109_vm10, %v14563_v2 }
0x1459   :  { %14568 = vmatpush1.bf16.msk.msra.mxu1 %vm18109_vm10, %v14566_v44 }
0x145c   :  { %13265 = vmatmul.mubr.msk.f32.vlgmr.msra.gmra.mrb[124].mxu1 %vm11340_vm13, %v13247_v42 }
0x145d   :  { %11465 = vmatprep.mubr.f32.mxu1 %v15772_v29 }
0x1460   :  { %13266 = vmatmul.mubr.msk.f32.gmra.mrb[126].mxu1 %vm11340_vm13, %v13248_v31 }
0x1461   :  { %11471 = vmatprep.mubr.f32.mxu1 %v15772_v29 }
0x1464   :  { %13267 = vmatmul.mubr.msk.f32.gmra.mrb[128].mxu1 %vm11340_vm13, %v13249_v20 }
0x1465   :  { %11477 = vmatprep.mubr.f32.mxu1 %v15772_v29 }
0x1468   :  { %13268 = vmatmul.mubr.msk.f32.gmra.mrb[130].mxu1 %vm11340_vm13, %v13250_v35 }
0x1469   :  { %11483 = vmatprep.mubr.f32.mxu1 %v15772_v29 }
0x146c   :  { %13269 = vmatmul.mubr.msk.f32.gmra.mrb[132].mxu1 %vm11340_vm13, %v13251_v12 }
0x146d   :  { %11489 = vmatprep.mubr.f32.mxu1 %v15772_v29 }
0x1470   :  { %13270 = vmatmul.mubr.msk.f32.gmra.mrb[134].mxu1 %vm11340_vm13, %v13252_v16 }
0x1471   :  { %11495 = vmatprep.mubr.f32.mxu1 %v15772_v29 }
0x1474   :  { %13271 = vmatmul.mubr.msk.f32.gmra.mrb[136].mxu1 %vm11340_vm13, %v13253_v1 }
0x1475   :  { %11501 = vmatprep.mubr.f32.mxu1 %v15772_v29 }
0x1478   :  { %13272 = vmatmul.mubr.msk.f32.gmra.mrb[138].mxu1 %vm11340_vm13, %v13254_v40 }
0x1479   :  { %11507 = vmatprep.mubr.f32.mxu1 %v15772_v29 }
0x147c   :  { %13273 = vmatmul.mubr.msk.f32.gmra.mrb[140].mxu1 %vm11340_vm13, %v13255_v34 }
0x147d   :  { %11513 = vmatprep.mubr.f32.mxu1 %v15772_v29 }
0x1480   :  { %13274 = vmatmul.mubr.msk.f32.gmra.mrb[142].mxu1 %vm11340_vm13, %v13256_v32 }
0x1481   :  { %11519 = vmatprep.mubr.f32.mxu1 %v15772_v29 }
0x1484   :  { %13275 = vmatmul.mubr.msk.f32.gmra.mrb[144].mxu1 %vm11340_vm13, %v13257_v52 }
0x1485   :  { %11525 = vmatprep.mubr.f32.mxu1 %v15772_v29 }
0x1488   :  { %13276 = vmatmul.mubr.msk.f32.gmra.mrb[146].mxu1 %vm11340_vm13, %v13258_v30 }
0x1489   :  { %11531 = vmatprep.mubr.f32.mxu1 %v15772_v29 }
0x148c   :  { %13277 = vmatmul.mubr.msk.f32.gmra.mrb[148].mxu1 %vm11340_vm13, %v13259_v6 }
0x148d   :  { %11537 = vmatprep.mubr.f32.mxu1 %v15772_v29 }
0x1490   :  { %13278 = vmatmul.mubr.msk.f32.gmra.mrb[150].mxu1 %vm11340_vm13, %v13260_v19 }
0x1491   :  { %11543 = vmatprep.mubr.f32.mxu1 %v15772_v29 }
0x1494   :  { %13279 = vmatmul.mubr.msk.f32.gmra.mrb[152].mxu1 %vm11340_vm13, %v13261_v8 }
0x1495   :  { %11549 = vmatprep.mubr.f32.mxu1 %v15772_v29 }
0x1498   :  { %13280 = vmatmul.mubr.msk.f32.gmra.mrb[154].mxu1 %vm11340_vm13, %v13262_v60 }
0x1499   :  { %11708 = vmatprep.mubr.f32.mxu1 %v15772_v29 }
0x149a   :  { %v10976_v14 = vpop.f32.mrb[136].mxu0  ;;  %v11122_v17 = vpop.f32.mrb[108].mxu1 }
0x149b   :  { %v10978_v54 = vpop.f32.mrb[137].mxu0  ;;  %v11124_v26 = vpop.f32.mrb[109].mxu1 }
0x149c   :  { %v10980_v45 = vpop.f32.mrb[138].mxu0  ;;  %v11126_v22 = vpop.f32.mrb[110].mxu1 }
0x149d   :  { %v19656_v57 = vpack.c.bf16 %v10980_v45, %v10976_v14  ;;  %v14571_v63 = vpack.c.bf16 %v11126_v22, %v11122_v17  ;;  %v10982_v4 = vpop.f32.mrb[139].mxu0  ;;  %v11128_v28 = vpop.f32.mrb[111].mxu1 }
0x149e   :  { %v19658_v9 = vpack.c.bf16 %v10982_v4, %v10978_v54  ;;  %v14569_v37 = vpack.c.bf16 %v11128_v28, %v11124_v26 }
0x14a0   :  { %14570 = vmatprep.subr.bf16.mxu1 %v14569_v37  ;;  %14624 = vmatprep.subr.bf16.mxu0 %v19658_v9 }
0x14a1   :  { %14572 = vmatpush1.bf16.msra.mxu1 %v14571_v63  ;;  %14626 = vmatpush1.bf16.msra.mxu0 %v19656_v57 }
0x14a2   :  { %v10986_v53 = vpop.f32.mrb[140].mxu0  ;;  %v11132_v38 = vpop.f32.mrb[112].mxu1 }
0x14a3   :  { %v10988_v62 = vpop.f32.mrb[141].mxu0  ;;  %v11134_v5 = vpop.f32.mrb[113].mxu1 }
0x14a4   :  { %v10990_v39 = vpop.f32.mrb[142].mxu0  ;;  %v11136_v44 = vpop.f32.mrb[114].mxu1 }
0x14a5   :  { %v19662_v24 = vpack.c.bf16 %v10990_v39, %v10986_v53  ;;  %v14575_v2 = vpack.c.bf16 %v11136_v44, %v11132_v38  ;;  %v10992_v42 = vpop.f32.mrb[143].mxu0  ;;  %v11138_v31 = vpop.f32.mrb[115].mxu1  ;;  %v13299_v39 = vld [vmem:[%s20259_s21 + $0x190] sm:$0xff]  ;;  %v13300_v44 = vld [vmem:[%s20259_s21 + $0x198] sm:$0xff] }
0x14a6   :  { %v19664_v20 = vpack.c.bf16 %v10992_v42, %v10988_v62  ;;  %v14573_v35 = vpack.c.bf16 %v11138_v31, %v11134_v5  ;;  %v13297_v62 = vld [vmem:[%s20259_s21 + $0x180] sm:$0xff]  ;;  %v13298_v5 = vld [vmem:[%s20259_s21 + $0x188] sm:$0xff]  ;;  %v13303_v31 = vld [vmem:[%s20259_s21 + $0x1b0] sm:$0xff] }
0x14a7   :  { %v13302_v42 = vld [vmem:[%s20259_s21 + $0x1a8] sm:$0xff] }
0x14a8   :  { %14574 = vmatprep.subr.bf16.mxu1 %v14573_v35  ;;  %14628 = vmatprep.subr.bf16.mxu0 %v19664_v20  ;;  %v13304_v35 = vld [vmem:[%s20259_s21 + $0x1b8] sm:$0xff] }
0x14a9   :  { %14576 = vmatpush1.bf16.msra.mxu1 %v14575_v2  ;;  %14630 = vmatpush1.bf16.msra.mxu0 %v19662_v24  ;;  %v13301_v2 = vld [vmem:[%s20259_s21 + $0x1a0] sm:$0xff] }
0x14aa   :  { %v10996_v12 = vpop.f32.mrb[144].mxu0  ;;  %v11142_v16 = vpop.f32.mrb[116].mxu1 }
0x14ab   :  { %v10998_v1 = vpop.f32.mrb[145].mxu0  ;;  %v11144_v40 = vpop.f32.mrb[117].mxu1 }
0x14ac   :  { %v11000_v34 = vpop.f32.mrb[146].mxu0  ;;  %v11146_v32 = vpop.f32.mrb[118].mxu1 }
0x14ad   :  { %v19668_v52 = vpack.c.bf16 %v11000_v34, %v10996_v12  ;;  %v14579_v30 = vpack.c.bf16 %v11146_v32, %v11142_v16  ;;  %v11002_v6 = vpop.f32.mrb[147].mxu0  ;;  %v11148_v19 = vpop.f32.mrb[119].mxu1  ;;  %v13305_v12 = vld [vmem:[%s20259_s21 + $0x1c0] sm:$0xff]  ;;  %v13307_v34 = vld [vmem:[%s20259_s21 + $0x1d0] sm:$0xff] }
0x14ae   :  { %v19670_v8 = vpack.c.bf16 %v11002_v6, %v10998_v1  ;;  %v14577_v60 = vpack.c.bf16 %v11148_v19, %v11144_v40  ;;  %v13281_v16 = vld [vmem:[%s20259_s21 + $0x100] sm:$0xff]  ;;  %v13306_v1 = vld [vmem:[%s20259_s21 + $0x1c8] sm:$0xff]  ;;  %v13283_v32 = vld [vmem:[%s20259_s21 + $0x110] sm:$0xff] }
0x14af   :  { %v13282_v40 = vld [vmem:[%s20259_s21 + $0x108] sm:$0xff]  ;;  %v13284_v6 = vld [vmem:[%s20259_s21 + $0x118] sm:$0xff]  ;;  %v13309_v19 = vld [vmem:[%s20259_s21 + $0x1e0] sm:$0xff] }
0x14b0   :  { %14578 = vmatprep.subr.bf16.mxu1 %v14577_v60  ;;  %14632 = vmatprep.subr.bf16.mxu0 %v19670_v8  ;;  %v13285_v60 = vld [vmem:[%s20259_s21 + $0x120] sm:$0xff] }
0x14b1   :  { %14580 = vmatpush1.bf16.msra.mxu1 %v14579_v30  ;;  %14634 = vmatpush1.bf16.msra.mxu0 %v19668_v52  ;;  %v13308_v30 = vld [vmem:[%s20259_s21 + $0x1d8] sm:$0xff] }
0x14b2   :  { %v11006_v14 = vpop.f32.mrb[148].mxu0  ;;  %v11152_v17 = vpop.f32.mrb[120].mxu1 }
0x14b3   :  { %v11008_v54 = vpop.f32.mrb[149].mxu0  ;;  %v11154_v26 = vpop.f32.mrb[121].mxu1 }
0x14b4   :  { %v11010_v45 = vpop.f32.mrb[150].mxu0  ;;  %v11156_v22 = vpop.f32.mrb[122].mxu1 }
0x14b5   :  { %v19674_v63 = vpack.c.bf16 %v11010_v45, %v11006_v14  ;;  %v14584_v4 = vpack.c.bf16 %v11156_v22, %v11152_v17  ;;  %v11012_v28 = vpop.f32.mrb[151].mxu0  ;;  %v11158_v37 = vpop.f32.mrb[123].mxu1  ;;  %v13310_v14 = vld [vmem:[%s20259_s21 + $0x1e8] sm:$0xff]  ;;  %v13312_v45 = vld [vmem:[%s20259_s21 + $0x1f8] sm:$0x3] }
0x14b6   :  { %v19676_v53 = vpack.c.bf16 %v11012_v28, %v11008_v54  ;;  %v14581_v38 = vpack.c.bf16 %v11158_v37, %v11154_v26  ;;  %v13286_v17 = vld [vmem:[%s20259_s21 + $0x128] sm:$0xff]  ;;  %v13311_v54 = vld [vmem:[%s20259_s21 + $0x1f0] sm:$0xff]  ;;  %v13288_v22 = vld [vmem:[%s20259_s21 + $0x138] sm:$0xff] }
0x14b7   :  { %v13287_v26 = vld [vmem:[%s20259_s21 + $0x130] sm:$0xff] }
0x14b8   :  { %14583 = vmatprep.subr.msk.bf16.mxu1 %vm18109_vm10, %v14581_v38  ;;  %14637 = vmatprep.subr.msk.bf16.mxu0 %vm18109_vm10, %v19676_v53  ;;  %v13289_v38 = vld [vmem:[%s20259_s21 + $0x140] sm:$0xff] }
0x14b9   :  { %14586 = vmatpush1.bf16.msk.msra.mxu1 %vm18109_vm10, %v14584_v4  ;;  %14640 = vmatpush1.bf16.msk.msra.mxu0 %vm18109_vm10, %v19674_v63 }
0x14bc   :  { %13315 = vmatmul.mubr.msk.f32.vlgmr.msra.gmra.mrb[124].mxu1 %vm11340_vm13, %v13297_v62  ;;  %13385 = vmatmul.mubr.msk.f32.vlgmr.msra.gmra.mrb[168].mxu0 %vm11340_vm13, %v13281_v16 }
0x14bd   :  { %11714 = vmatprep.mubr.f32.mxu1 %v15772_v29  ;;  %12376 = vmatprep.mubr.f32.mxu0 %v15772_v29 }
0x14c0   :  { %13316 = vmatmul.mubr.msk.f32.gmra.mrb[126].mxu1 %vm11340_vm13, %v13298_v5  ;;  %13386 = vmatmul.mubr.msk.f32.gmra.mrb[170].mxu0 %vm11340_vm13, %v13282_v40  ;;  %v13292_v40 = vld [vmem:[%s20259_s21 + $0x158] sm:$0xff] }
0x14c1   :  { %11720 = vmatprep.mubr.f32.mxu1 %v15772_v29  ;;  %12382 = vmatprep.mubr.f32.mxu0 %v15772_v29 }
0x14c4   :  { %13317 = vmatmul.mubr.msk.f32.gmra.mrb[128].mxu1 %vm11340_vm13, %v13299_v39  ;;  %13387 = vmatmul.mubr.msk.f32.gmra.mrb[172].mxu0 %vm11340_vm13, %v13283_v32 }
0x14c5   :  { %11726 = vmatprep.mubr.f32.mxu1 %v15772_v29  ;;  %12388 = vmatprep.mubr.f32.mxu0 %v15772_v29 }
0x14c8   :  { %13318 = vmatmul.mubr.msk.f32.gmra.mrb[130].mxu1 %vm11340_vm13, %v13300_v44  ;;  %13388 = vmatmul.mubr.msk.f32.gmra.mrb[174].mxu0 %vm11340_vm13, %v13284_v6  ;;  %v13290_v44 = vld [vmem:[%s20259_s21 + $0x148] sm:$0xff]  ;;  %v13293_v6 = vld [vmem:[%s20259_s21 + $0x160] sm:$0xff] }
0x14c9   :  { %11732 = vmatprep.mubr.f32.mxu1 %v15772_v29  ;;  %12394 = vmatprep.mubr.f32.mxu0 %v15772_v29 }
0x14cc   :  { %13319 = vmatmul.mubr.msk.f32.gmra.mrb[132].mxu1 %vm11340_vm13, %v13301_v2  ;;  %13389 = vmatmul.mubr.msk.f32.gmra.mrb[176].mxu0 %vm11340_vm13, %v13285_v60 }
0x14cd   :  { %11738 = vmatprep.mubr.f32.mxu1 %v15772_v29  ;;  %12400 = vmatprep.mubr.f32.mxu0 %v15772_v29 }
0x14d0   :  { %13320 = vmatmul.mubr.msk.f32.gmra.mrb[134].mxu1 %vm11340_vm13, %v13302_v42  ;;  %13390 = vmatmul.mubr.msk.f32.gmra.mrb[178].mxu0 %vm11340_vm13, %v13286_v17 }
0x14d1   :  { %11744 = vmatprep.mubr.f32.mxu1 %v15772_v29  ;;  %12406 = vmatprep.mubr.f32.mxu0 %v15772_v29 }
0x14d4   :  { %13321 = vmatmul.mubr.msk.f32.gmra.mrb[136].mxu1 %vm11340_vm13, %v13303_v31  ;;  %13391 = vmatmul.mubr.msk.f32.gmra.mrb[180].mxu0 %vm11340_vm13, %v13287_v26 }
0x14d5   :  { %11750 = vmatprep.mubr.f32.mxu1 %v15772_v29  ;;  %12412 = vmatprep.mubr.f32.mxu0 %v15772_v29 }
0x14d8   :  { %13322 = vmatmul.mubr.msk.f32.gmra.mrb[138].mxu1 %vm11340_vm13, %v13304_v35  ;;  %13392 = vmatmul.mubr.msk.f32.gmra.mrb[182].mxu0 %vm11340_vm13, %v13288_v22  ;;  %v13291_v35 = vld [vmem:[%s20259_s21 + $0x150] sm:$0xff] }
0x14d9   :  { %11756 = vmatprep.mubr.f32.mxu1 %v15772_v29  ;;  %12418 = vmatprep.mubr.f32.mxu0 %v15772_v29 }
0x14dc   :  { %13323 = vmatmul.mubr.msk.f32.gmra.mrb[140].mxu1 %vm11340_vm13, %v13305_v12  ;;  %13393 = vmatmul.mubr.msk.f32.gmra.mrb[184].mxu0 %vm11340_vm13, %v13289_v38 }
0x14dd   :  { %11762 = vmatprep.mubr.f32.mxu1 %v15772_v29  ;;  %12424 = vmatprep.mubr.f32.mxu0 %v15772_v29 }
0x14e0   :  { %13324 = vmatmul.mubr.msk.f32.gmra.mrb[142].mxu1 %vm11340_vm13, %v13306_v1  ;;  %13394 = vmatmul.mubr.msk.f32.gmra.mrb[186].mxu0 %vm11340_vm13, %v13290_v44 }
0x14e1   :  { %11768 = vmatprep.mubr.f32.mxu1 %v15772_v29  ;;  %12430 = vmatprep.mubr.f32.mxu0 %v15772_v29 }
0x14e4   :  { %13325 = vmatmul.mubr.msk.f32.gmra.mrb[144].mxu1 %vm11340_vm13, %v13307_v34  ;;  %13395 = vmatmul.mubr.msk.f32.gmra.mrb[188].mxu0 %vm11340_vm13, %v13291_v35 }
0x14e5   :  { %11774 = vmatprep.mubr.f32.mxu1 %v15772_v29  ;;  %12436 = vmatprep.mubr.f32.mxu0 %v15772_v29 }
0x14e8   :  { %13326 = vmatmul.mubr.msk.f32.gmra.mrb[146].mxu1 %vm11340_vm13, %v13308_v30  ;;  %13396 = vmatmul.mubr.msk.f32.gmra.mrb[190].mxu0 %vm11340_vm13, %v13292_v40 }
0x14e9   :  { %11780 = vmatprep.mubr.f32.mxu1 %v15772_v29  ;;  %12442 = vmatprep.mubr.f32.mxu0 %v15772_v29 }
0x14ec   :  { %13327 = vmatmul.mubr.msk.f32.gmra.mrb[148].mxu1 %vm11340_vm13, %v13309_v19  ;;  %13397 = vmatmul.mubr.msk.f32.gmra.mrb[192].mxu0 %vm11340_vm13, %v13293_v6 }
0x14ed   :  { %11786 = vmatprep.mubr.f32.mxu1 %v15772_v29 }
0x14f0   :  { %13328 = vmatmul.mubr.msk.f32.gmra.mrb[150].mxu1 %vm11340_vm13, %v13310_v14 }
0x14f1   :  { %11792 = vmatprep.mubr.f32.mxu1 %v15772_v29 }
0x14f4   :  { %13329 = vmatmul.mubr.msk.f32.gmra.mrb[152].mxu1 %vm11340_vm13, %v13311_v54 }
0x14f5   :  { %11798 = vmatprep.mubr.f32.mxu1 %v15772_v29 }
0x14f8   :  { %13330 = vmatmul.mubr.msk.f32.gmra.mrb[154].mxu1 %vm11340_vm13, %v13312_v45 }
0x14f9   :  { %11940 = vmatprep.mubr.f32.mxu1 %v15772_v29 }
0x14fa   :  { %v11268_v4 = vpop.f32.mrb[152].mxu0 }
0x14fb   :  { %v11270_v28 = vpop.f32.mrb[153].mxu0 }
0x14fc   :  { %v11272_v37 = vpop.f32.mrb[154].mxu0 }
0x14fd   :  { %v14589_v62 = vpack.c.bf16 %v11272_v37, %v11268_v4  ;;  %v11274_v5 = vpop.f32.mrb[155].mxu0  ;;  %v13332_v37 = vld [vmem:[%s20259_s21 + $0x208] sm:$0xff] }
0x14fe   :  { %v14587_v39 = vpack.c.bf16 %v11274_v5, %v11270_v28  ;;  %v13331_v28 = vld [vmem:[%s20259_s21 + $0x200] sm:$0xff] }
0x1500   :  { %14588 = vmatprep.subr.bf16.mxu1 %v14587_v39 }
0x1501   :  { %14590 = vmatpush1.bf16.msra.mxu1 %v14589_v62 }
0x1502   :  { %v11278_v2 = vpop.f32.mrb[156].mxu0 }
0x1503   :  { %v11280_v42 = vpop.f32.mrb[157].mxu0 }
0x1504   :  { %v11282_v31 = vpop.f32.mrb[158].mxu0 }
0x1505   :  { %v14593_v12 = vpack.c.bf16 %v11282_v31, %v11278_v2  ;;  %v11284_v16 = vpop.f32.mrb[159].mxu0 }
0x1506   :  { %v14591_v1 = vpack.c.bf16 %v11284_v16, %v11280_v42 }
0x1508   :  { %14592 = vmatprep.subr.bf16.mxu1 %v14591_v1 }
0x1509   :  { %14594 = vmatpush1.bf16.msra.mxu1 %v14593_v12 }
0x150a   :  { %v11288_v34 = vpop.f32.mrb[160].mxu0 }
0x150b   :  { %v11290_v32 = vpop.f32.mrb[161].mxu0 }
0x150c   :  { %v11292_v30 = vpop.f32.mrb[162].mxu0 }
0x150d   :  { %v14597_v19 = vpack.c.bf16 %v11292_v30, %v11288_v34  ;;  %v11294_v60 = vpop.f32.mrb[163].mxu0 }
0x150e   :  { %v14595_v14 = vpack.c.bf16 %v11294_v60, %v11290_v32 }
0x1510   :  { %14596 = vmatprep.subr.bf16.mxu1 %v14595_v14 }
0x1511   :  { %14598 = vmatpush1.bf16.msra.mxu1 %v14597_v19 }
0x1512   :  { %v11298_v17 = vpop.f32.mrb[164].mxu0 }
0x1513   :  { %v11300_v54 = vpop.f32.mrb[165].mxu0 }
0x1514   :  { %v11302_v26 = vpop.f32.mrb[166].mxu0 }
0x1515   :  { %v14602_v45 = vpack.c.bf16 %v11302_v26, %v11298_v17  ;;  %v11304_v22 = vpop.f32.mrb[167].mxu0 }
0x1516   :  { %v14599_v4 = vpack.c.bf16 %v11304_v22, %v11300_v54 }
0x1518   :  { %14601 = vmatprep.subr.msk.bf16.mxu1 %vm18109_vm10, %v14599_v4  ;;  %v10564_v4 = vld [vmem:[#allocation26] sm:$0x3] }
0x1519   :  { %14604 = vmatpush1.bf16.msk.msra.mxu1 %vm18109_vm10, %v14602_v45 }
0x151a   :  { %14606 = vmatprep.subr.bf16.mxu1 %v14605_v23  ;;  %v13338_v23 = vld [vmem:[%s20259_s21 + $0x238] sm:$0xff] }
0x151c   :  { %13349 = vmatmul.mubr.msk.f32.vlgmr.msra.gmra.mrb[124].mxu1 %vm11340_vm13, %v13331_v28  ;;  %v20087_v28 = vrot.slane %v10564_v4, %v17609_v7 }
0x151d   :  { %14608 = vmatpush1.bf16.msra.mxu1 %v14607_v3  ;;  %11946 = vmatprep.mubr.f32.mxu1 %v15772_v29  ;;  %v13336_v3 = vld [vmem:[%s20259_s21 + $0x228] sm:$0xff] }
0x151e   :  { %14610 = vmatprep.subr.bf16.mxu1 %v14609_v58  ;;  %v13344_v58 = vld [vmem:[%s20259_s21 + $0x268] sm:$0xff] }
0x1520   :  { %13350 = vmatmul.mubr.msk.f32.gmra.mrb[126].mxu1 %vm11340_vm13, %v13332_v37 }
0x1521   :  { %14612 = vmatpush1.bf16.msra.mxu1 %v14611_v50  ;;  %11952 = vmatprep.mubr.f32.mxu1 %v15772_v29  ;;  %v13342_v50 = vld [vmem:[%s20259_s21 + $0x258] sm:$0xff] }
0x1522   :  { %14614 = vmatprep.subr.bf16.mxu1 %v14613_v25  ;;  %v11310_v25 = vld [vmem:[%s20259_s21 + $0x18] sm:$0xff] }
0x1524   :  { %13351 = vmatmul.mubr.msk.f32.gmra.mrb[128].mxu1 %vm11340_vm13, %v13333_v55  ;;  %v20090_v55 = vrot.slane %v10564_v4, %v17751_v47 }
0x1525   :  { %14616 = vmatpush1.bf16.msra.mxu1 %v14615_v51  ;;  %11958 = vmatprep.mubr.f32.mxu1 %v15772_v29  ;;  %v11308_v51 = vld [vmem:[%s20259_s21 + $0x8] sm:$0xff] }
0x1526   :  { %14619 = vmatprep.subr.msk.bf16.mxu1 %vm18109_vm10, %v14617_v56  ;;  %v11317_v56 = vld [vmem:[%s20259_s21 + $0x50] sm:$0xff] }
0x1528   :  { %13352 = vmatmul.mubr.msk.f32.gmra.mrb[130].mxu1 %vm11340_vm13, %v13334_v43 }
0x1529   :  { %14622 = vmatpush1.bf16.msk.msra.mxu1 %vm18109_vm10, %v14620_v18  ;;  %11964 = vmatprep.mubr.f32.mxu1 %v15772_v29  ;;  %v11315_v18 = vld [vmem:[%s20259_s21 + $0x40] sm:$0xff] }
0x152a   :  { %14641 = vmatprep.subr.bf16.mxu1 %v19658_v9  ;;  %v11319_v9 = vld [vmem:[%s20259_s21 + $0x60] sm:$0xff] }
0x152c   :  { %13353 = vmatmul.mubr.msk.f32.gmra.mrb[132].mxu1 %vm11340_vm13, %v13335_v10 }
0x152d   :  { %11970 = vmatprep.mubr.f32.mxu1 %v15772_v29 }
0x1530   :  { %13354 = vmatmul.mubr.msk.f32.gmra.mrb[134].mxu1 %vm11340_vm13, %v13336_v3 }
0x1531   :  { %11976 = vmatprep.mubr.f32.mxu1 %v15772_v29 }
0x1534   :  { %13355 = vmatmul.mubr.msk.f32.gmra.mrb[136].mxu1 %vm11340_vm13, %v13337_v46 }
0x1535   :  { %11982 = vmatprep.mubr.f32.mxu1 %v15772_v29 }
0x1538   :  { %13356 = vmatmul.mubr.msk.f32.gmra.mrb[138].mxu1 %vm11340_vm13, %v13338_v23 }
0x1539   :  { %11988 = vmatprep.mubr.f32.mxu1 %v15772_v29 }
0x153c   :  { %13357 = vmatmul.mubr.msk.f32.gmra.mrb[140].mxu1 %vm11340_vm13, %v13339_v13 }
0x153d   :  { %11994 = vmatprep.mubr.f32.mxu1 %v15772_v29 }
0x1540   :  { %13358 = vmatmul.mubr.msk.f32.gmra.mrb[142].mxu1 %vm11340_vm13, %v13340_v36 }
0x1541   :  { %12000 = vmatprep.mubr.f32.mxu1 %v15772_v29 }
0x1544   :  { %13359 = vmatmul.mubr.msk.f32.gmra.mrb[144].mxu1 %vm11340_vm13, %v13341_v21 }
0x1545   :  { %12006 = vmatprep.mubr.f32.mxu1 %v15772_v29 }
0x1548   :  { %13360 = vmatmul.mubr.msk.f32.gmra.mrb[146].mxu1 %vm11340_vm13, %v13342_v50 }
0x1549   :  { %12012 = vmatprep.mubr.f32.mxu1 %v15772_v29 }
0x154c   :  { %13361 = vmatmul.mubr.msk.f32.gmra.mrb[148].mxu1 %vm11340_vm13, %v13343_v15 }
0x154d   :  { %12018 = vmatprep.mubr.f32.mxu1 %v15772_v29 }
0x1550   :  { %13362 = vmatmul.mubr.msk.f32.gmra.mrb[150].mxu1 %vm11340_vm13, %v13344_v58 }
0x1551   :  { %12024 = vmatprep.mubr.f32.mxu1 %v15772_v29 }
0x1554   :  { %13363 = vmatmul.mubr.msk.f32.gmra.mrb[152].mxu1 %vm11340_vm13, %v13345_v27 }
0x1555   :  { %12030 = vmatprep.mubr.f32.mxu1 %v15772_v29 }
0x1558   :  { %13364 = vmatmul.mubr.msk.f32.gmra.mrb[154].mxu1 %vm11340_vm13, %v13346_v49 }
0x1559   :  { %12155 = vmatprep.mubr.f32.mxu1 %v15772_v29 }
0x155c   :  { %13367 = vmatmul.mubr.msk.f32.vlgmr.msra.gmra.mrb[124].mxu1 %vm11340_vm13, %v11307_v59 }
0x155d   :  { %14645 = vmatpush1.bf16.msra.mxu1 %v19656_v57  ;;  %12161 = vmatprep.mubr.f32.mxu1 %v15772_v29  ;;  %v11318_v57 = vld [vmem:[%s20259_s21 + $0x58] sm:$0xff] }
0x155e   :  { %14642 = vmatprep.subr.bf16.mxu1 %v19664_v20  ;;  %v11321_v20 = vld [vmem:[%s20259_s21 + $0x70] sm:$0xff] }
0x1560   :  { %13368 = vmatmul.mubr.msk.f32.gmra.mrb[126].mxu1 %vm11340_vm13, %v11308_v51 }
0x1561   :  { %14646 = vmatpush1.bf16.msra.mxu1 %v19662_v24  ;;  %12167 = vmatprep.mubr.f32.mxu1 %v15772_v29  ;;  %v11320_v24 = vld [vmem:[%s20259_s21 + $0x68] sm:$0xff] }
0x1562   :  { %14643 = vmatprep.subr.bf16.mxu1 %v19670_v8  ;;  %v13294_v8 = vld [vmem:[%s20259_s21 + $0x168] sm:$0xff] }
0x1564   :  { %13369 = vmatmul.mubr.msk.f32.gmra.mrb[128].mxu1 %vm11340_vm13, %v11309_v11 }
0x1565   :  { %14647 = vmatpush1.bf16.msra.mxu1 %v19668_v52  ;;  %12173 = vmatprep.mubr.f32.mxu1 %v15772_v29  ;;  %v11322_v52 = vld [vmem:[%s20259_s21 + $0x78] sm:$0x3] }
0x1566   :  { %14644 = vmatprep.subr.msk.bf16.mxu1 %vm18109_vm10, %v19676_v53  ;;  %v13296_v53 = vld [vmem:[%s20259_s21 + $0x178] sm:$0x3] }
0x1568   :  { %13370 = vmatmul.mubr.msk.f32.gmra.mrb[130].mxu1 %vm11340_vm13, %v11310_v25 }
0x1569   :  { %14648 = vmatpush1.bf16.msk.msra.mxu1 %vm18109_vm10, %v19674_v63  ;;  %12179 = vmatprep.mubr.f32.mxu1 %v15772_v29  ;;  %v13295_v63 = vld [vmem:[%s20259_s21 + $0x170] sm:$0xff] }
0x156c   :  { %13371 = vmatmul.mubr.msk.f32.gmra.mrb[132].mxu1 %vm11340_vm13, %v11311_v41 }
0x156d   :  { %12185 = vmatprep.mubr.f32.mxu1 %v15772_v29 }
0x1570   :  { %13372 = vmatmul.mubr.msk.f32.gmra.mrb[134].mxu1 %vm11340_vm13, %v11312_v0 }
0x1571   :  { %12191 = vmatprep.mubr.f32.mxu1 %v15772_v29 }
0x1574   :  { %13373 = vmatmul.mubr.msk.f32.gmra.mrb[136].mxu1 %vm11340_vm13, %v11313_v61 }
0x1575   :  { %12197 = vmatprep.mubr.f32.mxu1 %v15772_v29 }
0x1578   :  { %13374 = vmatmul.mubr.msk.f32.gmra.mrb[138].mxu1 %vm11340_vm13, %v11314_v48 }
0x1579   :  { %12203 = vmatprep.mubr.f32.mxu1 %v15772_v29 }
0x157c   :  { %13375 = vmatmul.mubr.msk.f32.gmra.mrb[140].mxu1 %vm11340_vm13, %v11315_v18 }
0x157d   :  { %12209 = vmatprep.mubr.f32.mxu1 %v15772_v29 }
0x1580   :  { %13376 = vmatmul.mubr.msk.f32.gmra.mrb[142].mxu1 %vm11340_vm13, %v11316_v33 }
0x1581   :  { %12215 = vmatprep.mubr.f32.mxu1 %v15772_v29 }
0x1584   :  { %13377 = vmatmul.mubr.msk.f32.gmra.mrb[144].mxu1 %vm11340_vm13, %v11317_v56 }
0x1585   :  { %12221 = vmatprep.mubr.f32.mxu1 %v15772_v29 }
0x1588   :  { %13378 = vmatmul.mubr.msk.f32.gmra.mrb[146].mxu1 %vm11340_vm13, %v11318_v57 }
0x1589   :  { %12227 = vmatprep.mubr.f32.mxu1 %v15772_v29 }
0x158c   :  { %13379 = vmatmul.mubr.msk.f32.gmra.mrb[148].mxu1 %vm11340_vm13, %v11319_v9 }
0x158d   :  { %12233 = vmatprep.mubr.f32.mxu1 %v15772_v29 }
0x158f   :  { %v12372_v38 = vpop.f32.mrb[168].mxu0 }
0x1590   :  { %13380 = vmatmul.mubr.msk.f32.gmra.mrb[150].mxu1 %vm11340_vm13, %v11320_v24  ;;  %v12374_v62 = vpop.f32.mrb[169].mxu0 }
0x1591   :  { %12239 = vmatprep.mubr.f32.mxu1 %v15772_v29 }
0x1593   :  { %v12378_v5 = vpop.f32.mrb[170].mxu0 }
0x1594   :  { %13381 = vmatmul.mubr.msk.f32.gmra.mrb[152].mxu1 %vm11340_vm13, %v11321_v20  ;;  %v12380_v39 = vpop.f32.mrb[171].mxu0 }
0x1595   :  { %12245 = vmatprep.mubr.f32.mxu1 %v15772_v29 }
0x1597   :  { %v12384_v44 = vpop.f32.mrb[172].mxu0 }
0x1598   :  { %13382 = vmatmul.mubr.msk.f32.gmra.mrb[154].mxu1 %vm11340_vm13, %v11322_v52  ;;  %v12386_v2 = vpop.f32.mrb[173].mxu0 }
0x1599   :  { %12448 = vmatprep.mubr.f32.mxu1 %v15772_v29 }
0x159b   :  { %v12390_v42 = vpop.f32.mrb[174].mxu0 }
0x159c   :  { %13398 = vmatmul.mubr.msk.f32.vlgmr.msra.gmra.mrb[150].mxu1 %vm11340_vm13, %v13294_v8  ;;  %v12392_v31 = vpop.f32.mrb[175].mxu0 }
0x159d   :  { %12454 = vmatprep.mubr.f32.mxu1 %v15772_v29 }
0x159f   :  { %v20050_v35 = vpop.f32.mrb[176].mxu0 }
0x15a0   :  { %13399 = vmatmul.mubr.msk.f32.gmra.mrb[152].mxu1 %vm11340_vm13, %v13295_v63  ;;  %v20052_v12 = vpop.f32.mrb[177].mxu0 }
0x15a1   :  { %12460 = vmatprep.mubr.f32.mxu1 %v15772_v29 }
0x15a3   :  { %v20054_v16 = vpop.f32.mrb[178].mxu0 }
0x15a4   :  { %13400 = vmatmul.mubr.msk.f32.gmra.mrb[154].mxu1 %vm11340_vm13, %v13296_v53  ;;  %v20056_v29 = vpop.f32.mrb[179].mxu0 }
0x15a7   :  { %v20058_v1 = vpop.f32.mrb[180].mxu0 }
0x15a8   :  { %v20060_v40 = vpop.f32.mrb[181].mxu0 }
0x15ab   :  { %v20062_v34 = vpop.f32.mrb[182].mxu0 }
0x15ac   :  { %v20064_v32 = vpop.f32.mrb[183].mxu0 }
0x15af   :  { %v20066_v30 = vpop.f32.mrb[184].mxu0 }
0x15b0   :  { %v20068_v6 = vpop.f32.mrb[185].mxu0 }
0x15b3   :  { %v20070_v19 = vpop.f32.mrb[186].mxu0 }
0x15b4   :  { %v20072_v60 = vpop.f32.mrb[187].mxu0 }
0x15b7   :  { %v20074_v14 = vpop.f32.mrb[188].mxu0 }
0x15b8   :  { %v20076_v17 = vpop.f32.mrb[189].mxu0 }
0x15bb   :  { %v20078_v54 = vpop.f32.mrb[190].mxu0 }
0x15bc   :  { %v20080_v26 = vpop.f32.mrb[191].mxu0 }
0x15bf   :  { %v20082_v45 = vpop.f32.mrb[192].mxu0 }
0x15c0   :  { %v20084_v22 = vpop.f32.mrb[193].mxu0 }
0x162f   :  { %v12157_v37 = vpop.f32.mrb[124].mxu1 }
0x1630   :  { %v14649_v43 = vadd.f32 %v12372_v38, %v12157_v37  ;;  %v12159_v10 = vpop.f32.mrb[125].mxu1 }
0x1631   :  { %v14650_v3 = vadd.f32 %v12374_v62, %v12159_v10 }
0x1632   :  { %v12542_v46 = vadd.f32 %v14649_v43, %v20087_v28 }
0x1633   :  { %v12543_v23 = vadd.f32 %v14650_v3, %v20090_v55  ;;  %v12163_v13 = vpop.f32.mrb[126].mxu1 }
0x1634   :  { %v12574_v36 = vsub.f32 0.0, %v12542_v46  ;;  %v14651_v21 = vadd.f32 %v12378_v5, %v12163_v13  ;;  %v12165_v50 = vpop.f32.mrb[127].mxu1 }
0x1635   :  { %v12575_v15 = vsub.f32 0.0, %v12543_v23  ;;  %v14652_v58 = vadd.f32 %v12380_v39, %v12165_v50 }
0x1636   :  { %v12606_v27 = vmul.f32 1.442695, %v12574_v36  ;;  %v12544_v7 = vadd.f32 %v14651_v21, %v20087_v28 }
0x1637   :  { %v12608_v49 = vmul.f32 1.442695, %v12575_v15  ;;  %v12545_v47 = vadd.f32 %v14652_v58, %v20090_v55  ;;  %v12169_v59 = vpop.f32.mrb[128].mxu1 }
0x1638   :  { %15277 = vpow2.f32 %v12606_v27  ;;  %v12576_v51 = vsub.f32 0.0, %v12544_v7  ;;  %v14653_v11 = vadd.f32 %v12384_v44, %v12169_v59  ;;  %v12171_v25 = vpop.f32.mrb[129].mxu1 }
0x1639   :  { %15279 = vpow2.f32 %v12608_v49  ;;  %v12577_v41 = vsub.f32 0.0, %v12545_v47  ;;  %v14654_v0 = vadd.f32 %v12386_v2, %v12171_v25 }
0x163a   :  { %v12610_v61 = vmul.f32 1.442695, %v12576_v51  ;;  %v12546_v48 = vadd.f32 %v14653_v11, %v20087_v28 }
0x163b   :  { %v12612_v18 = vmul.f32 1.442695, %v12577_v41  ;;  %v12547_v33 = vadd.f32 %v14654_v0, %v20090_v55  ;;  %v12175_v56 = vpop.f32.mrb[130].mxu1 }
0x163c   :  { %15281 = vpow2.f32 %v12610_v61  ;;  %v12578_v57 = vsub.f32 0.0, %v12546_v48  ;;  %v14655_v9 = vadd.f32 %v12390_v42, %v12175_v56  ;;  %v12177_v24 = vpop.f32.mrb[131].mxu1 }
0x163d   :  { %15283 = vpow2.f32 %v12612_v18  ;;  %v12579_v20 = vsub.f32 0.0, %v12547_v33  ;;  %v14656_v52 = vadd.f32 %v12392_v31, %v12177_v24 }
0x163e   :  { %v12614_v8 = vmul.f32 1.442695, %v12578_v57  ;;  %v12548_v63 = vadd.f32 %v14655_v9, %v20087_v28 }
0x163f   :  { %v12616_v53 = vmul.f32 1.442695, %v12579_v20  ;;  %v12549_v38 = vadd.f32 %v14656_v52, %v20090_v55  ;;  %v12181_v62 = vpop.f32.mrb[132].mxu1 }
0x1640   :  { %15285 = vpow2.f32 %v12614_v8  ;;  %v12580_v5 = vsub.f32 0.0, %v12548_v63  ;;  %v14657_v39 = vadd.f32 %v20050_v35, %v12181_v62  ;;  %v12183_v44 = vpop.f32.mrb[133].mxu1 }
0x1641   :  { %15287 = vpow2.f32 %v12616_v53  ;;  %v12581_v2 = vsub.f32 0.0, %v12549_v38  ;;  %v14658_v42 = vadd.f32 %v20052_v12, %v12183_v44 }
0x1642   :  { %v15278_v4 = vpop.eup %15277  ;;  %v12618_v37 = vmul.f32 1.442695, %v12580_v5  ;;  %v12550_v31 = vadd.f32 %v14657_v39, %v20087_v28 }
0x1643   :  { %v15280_v43 = vpop.eup %15279  ;;  %v12670_v10 = vadd.f32 1.0, %v15278_v4  ;;  %v12620_v3 = vmul.f32 1.442695, %v12581_v2  ;;  %v12551_v46 = vadd.f32 %v14658_v42, %v20090_v55  ;;  %v12187_v23 = vpop.f32.mrb[134].mxu1 }
0x1644   :  { %v12671_v13 = vadd.f32 1.0, %v15280_v43  ;;  %15289 = vpow2.f32 %v12618_v37  ;;  %v12582_v36 = vsub.f32 0.0, %v12550_v31  ;;  %v14659_v35 = vadd.f32 %v20054_v16, %v12187_v23  ;;  %v12189_v21 = vpop.f32.mrb[135].mxu1 }
0x1645   :  { %15291 = vrcp.f32 %v12670_v10  ;;  %v12583_v50 = vsub.f32 0.0, %v12551_v46  ;;  %v14660_v12 = vadd.f32 %v20056_v29, %v12189_v21 }
0x1646   :  { %v15282_v15 = vpop.eup %15281  ;;  %15293 = vrcp.f32 %v12671_v13  ;;  %v12622_v58 = vmul.f32 1.442695, %v12582_v36  ;;  %v12552_v27 = vadd.f32 %v14659_v35, %v20087_v28 }
0x1647   :  { %v15284_v7 = vpop.eup %15283  ;;  %v12672_v49 = vadd.f32 1.0, %v15282_v15  ;;  %15295 = vpow2.f32 %v12620_v3  ;;  %v12624_v47 = vmul.f32 1.442695, %v12583_v50  ;;  %v12553_v59 = vadd.f32 %v14660_v12, %v20090_v55  ;;  %v12193_v51 = vpop.f32.mrb[136].mxu1 }
0x1648   :  { %v12673_v11 = vadd.f32 1.0, %v15284_v7  ;;  %15297 = vpow2.f32 %v12622_v58  ;;  %v12584_v16 = vsub.f32 0.0, %v12552_v27  ;;  %v14661_v25 = vadd.f32 %v20058_v1, %v12193_v51  ;;  %v12195_v41 = vpop.f32.mrb[137].mxu1 }
0x1649   :  { %15299 = vrcp.f32 %v12672_v49  ;;  %v12585_v29 = vsub.f32 0.0, %v12553_v59  ;;  %v14662_v0 = vadd.f32 %v20060_v40, %v12195_v41 }
0x164a   :  { %v15286_v61 = vpop.eup %15285  ;;  %15301 = vrcp.f32 %v12673_v11  ;;  %v12626_v48 = vmul.f32 1.442695, %v12584_v16  ;;  %v12554_v18 = vadd.f32 %v14661_v25, %v20087_v28 }
0x164b   :  { %v15288_v33 = vpop.eup %15287  ;;  %v12674_v56 = vadd.f32 1.0, %v15286_v61  ;;  %15303 = vpow2.f32 %v12624_v47  ;;  %v12628_v57 = vmul.f32 1.442695, %v12585_v29  ;;  %v12555_v9 = vadd.f32 %v14662_v0, %v20090_v55  ;;  %v12199_v24 = vpop.f32.mrb[138].mxu1 }
0x164c   :  { %v12675_v20 = vadd.f32 1.0, %v15288_v33  ;;  %15305 = vpow2.f32 %v12626_v48  ;;  %v12586_v1 = vsub.f32 0.0, %v12554_v18  ;;  %v14663_v52 = vadd.f32 %v20062_v34, %v12199_v24  ;;  %v12201_v8 = vpop.f32.mrb[139].mxu1 }
0x164d   :  { %15307 = vrcp.f32 %v12674_v56  ;;  %v12587_v40 = vsub.f32 0.0, %v12555_v9  ;;  %v14664_v63 = vadd.f32 %v20064_v32, %v12201_v8 }
0x164e   :  { %v15290_v53 = vpop.eup %15289  ;;  %15309 = vrcp.f32 %v12675_v20  ;;  %v12630_v38 = vmul.f32 1.442695, %v12586_v1  ;;  %v12556_v62 = vadd.f32 %v14663_v52, %v20087_v28 }
0x164f   :  { %v15292_v5 = vpop.eup %15291  ;;  %v12676_v39 = vadd.f32 1.0, %v15290_v53  ;;  %15311 = vpow2.f32 %v12628_v57  ;;  %v12632_v44 = vmul.f32 1.442695, %v12587_v40  ;;  %v12557_v2 = vadd.f32 %v14664_v63, %v20090_v55  ;;  %v12205_v42 = vpop.f32.mrb[140].mxu1 }
0x1650   :  { %v15294_v4 = vpop.eup %15293  ;;  %v12734_v37 = vmax.f32 %v15292_v5, 0.0  ;;  %15313 = vpow2.f32 %v12630_v38  ;;  %v12588_v34 = vsub.f32 0.0, %v12556_v62  ;;  %v14665_v31 = vadd.f32 %v20066_v30, %v12205_v42  ;;  %v12207_v43 = vpop.f32.mrb[141].mxu1 }
0x1651   :  { %v15296_v32 = vpop.eup %15295  ;;  %v12735_v10 = vmax.f32 %v15294_v4, 0.0  ;;  %15315 = vrcp.f32 %v12676_v39  ;;  %v12589_v3 = vsub.f32 0.0, %v12557_v2  ;;  %v14666_v46 = vadd.f32 %v20068_v6, %v12207_v43 }
0x1652   :  { %v15298_v23 = vpop.eup %15297  ;;  %v12766_v13 = vmin.f32 %v12734_v37, 1.0  ;;  %v12677_v36 = vadd.f32 1.0, %v15296_v32  ;;  %15317 = vpow2.f32 %v12632_v44  ;;  %v12634_v35 = vmul.f32 1.442695, %v12588_v34 }
0x1653   :  { %v15300_v21 = vpop.eup %15299  ;;  %v12767_v50 = vmin.f32 %v12735_v10, 1.0  ;;  %v12678_v12 = vadd.f32 1.0, %v15298_v23  ;;  %v12636_v15 = vmul.f32 1.442695, %v12589_v3  ;;  %v12558_v58 = vadd.f32 %v14665_v31, %v20087_v28  ;;  %v12211_v27 = vpop.f32.mrb[142].mxu1 }
0x1654   :  { %v15302_v30 = vpop.eup %15301  ;;  %12798 = vst [vmem:[%s20290_s5] sm:$0xff] %v12766_v13  ;;  %v12736_v7 = vmax.f32 %v15300_v21, 0.0  ;;  %15319 = vrcp.f32 %v12677_v36  ;;  %v12559_v6 = vadd.f32 %v14666_v46, %v20090_v55  ;;  %v14667_v49 = vadd.f32 %v20070_v19, %v12211_v27  ;;  %v12213_v47 = vpop.f32.mrb[143].mxu1 }
0x1655   :  { %v15304_v59 = vpop.eup %15303  ;;  %12799 = vst [vmem:[%s20290_s5 + $0x8] sm:$0xff] %v12767_v50  ;;  %v12737_v51 = vmax.f32 %v15302_v30, 0.0  ;;  %15321 = vrcp.f32 %v12678_v12  ;;  %v12590_v11 = vsub.f32 0.0, %v12558_v58  ;;  %v14668_v16 = vadd.f32 %v20072_v60, %v12213_v47 }
0x1656   :  { %v15306_v25 = vpop.eup %15305  ;;  %v12768_v41 = vmin.f32 %v12736_v7, 1.0  ;;  %v12679_v29 = vadd.f32 1.0, %v15304_v59  ;;  %15323 = vpow2.f32 %v12634_v35  ;;  %v12591_v0 = vsub.f32 0.0, %v12559_v6 }
0x1657   :  { %v15308_v61 = vpop.eup %15307  ;;  %v12769_v48 = vmin.f32 %v12737_v51, 1.0  ;;  %v12680_v18 = vadd.f32 1.0, %v15306_v25  ;;  %15325 = vpow2.f32 %v12636_v15  ;;  %v12638_v19 = vmul.f32 1.442695, %v12590_v11  ;;  %v12217_v33 = vpop.f32.mrb[144].mxu1 }
0x1658   :  { %v15310_v56 = vpop.eup %15309  ;;  %12800 = vst [vmem:[%s20290_s5 + $0x10] sm:$0xff] %v12768_v41  ;;  %v12738_v57 = vmax.f32 %v15308_v61, 0.0  ;;  %15327 = vrcp.f32 %v12679_v29  ;;  %v12640_v9 = vmul.f32 1.442695, %v12591_v0  ;;  %v12560_v60 = vadd.f32 %v14667_v49, %v20087_v28  ;;  %v12219_v24 = vpop.f32.mrb[145].mxu1 }
0x1659   :  { %v15312_v20 = vpop.eup %15311  ;;  %12801 = vst [vmem:[%s20290_s5 + $0x18] sm:$0xff] %v12769_v48  ;;  %v12739_v1 = vmax.f32 %v15310_v56, 0.0  ;;  %15329 = vrcp.f32 %v12680_v18  ;;  %v12561_v52 = vadd.f32 %v14668_v16, %v20090_v55  ;;  %v14669_v8 = vadd.f32 %v20074_v14, %v12217_v33 }
0x165a   :  { %v15314_v40 = vpop.eup %15313  ;;  %v12770_v63 = vmin.f32 %v12738_v57, 1.0  ;;  %v12681_v53 = vadd.f32 1.0, %v15312_v20  ;;  %15331 = vpow2.f32 %v12638_v19  ;;  %v12592_v38 = vsub.f32 0.0, %v12560_v60 }
0x165b   :  { %v15316_v62 = vpop.eup %15315  ;;  %v12771_v5 = vmin.f32 %v12739_v1, 1.0  ;;  %v12682_v39 = vadd.f32 1.0, %v15314_v40  ;;  %15333 = vpow2.f32 %v12640_v9  ;;  %v12593_v44 = vsub.f32 0.0, %v12561_v52  ;;  %v12223_v2 = vpop.f32.mrb[146].mxu1 }
0x165c   :  { %v15318_v42 = vpop.eup %15317  ;;  %12802 = vst [vmem:[%s20290_s5 + $0x20] sm:$0xff] %v12770_v63  ;;  %v12740_v4 = vmax.f32 %v15316_v62, 0.0  ;;  %15335 = vrcp.f32 %v12681_v53  ;;  %v12642_v37 = vmul.f32 1.442695, %v12592_v38  ;;  %v12562_v14 = vadd.f32 %v14669_v8, %v20087_v28  ;;  %v12225_v34 = vpop.f32.mrb[147].mxu1 }
0x165d   :  { %12803 = vst [vmem:[%s20290_s5 + $0x28] sm:$0xff] %v12771_v5  ;;  %15337 = vrcp.f32 %v12682_v39  ;;  %v12683_v31 = vadd.f32 1.0, %v15318_v42  ;;  %v12644_v43 = vmul.f32 1.442695, %v12593_v44  ;;  %v14670_v32 = vadd.f32 %v20076_v17, %v12219_v24 }
0x165e   :  { %v15320_v10 = vpop.eup %15319  ;;  %v12772_v3 = vmin.f32 %v12740_v4, 1.0  ;;  %15339 = vpow2.f32 %v12642_v37  ;;  %v12594_v46 = vsub.f32 0.0, %v12562_v14  ;;  %v14671_v23 = vadd.f32 %v20078_v54, %v12223_v2 }
0x165f   :  { %v15322_v13 = vpop.eup %15321  ;;  %v12741_v36 = vmax.f32 %v15320_v10, 0.0  ;;  %15341 = vrcp.f32 %v12683_v31  ;;  %v12563_v35 = vadd.f32 %v14670_v32, %v20090_v55  ;;  %v14672_v21 = vadd.f32 %v20080_v26, %v12225_v34  ;;  %v12229_v50 = vpop.f32.mrb[148].mxu1 }
0x1660   :  { %v15324_v12 = vpop.eup %15323  ;;  %12804 = vst [vmem:[%s20290_s5 + $0x30] sm:$0xff] %v12772_v3  ;;  %v12742_v17 = vmax.f32 %v15322_v13, 0.0  ;;  %15343 = vpow2.f32 %v12644_v43  ;;  %v12646_v15 = vmul.f32 1.442695, %v12594_v46  ;;  %v12564_v58 = vadd.f32 %v14671_v23, %v20087_v28  ;;  %v12231_v27 = vpop.f32.mrb[149].mxu1 }
0x1661   :  { %v15326_v54 = vpop.eup %15325  ;;  %v12773_v30 = vmin.f32 %v12741_v36, 1.0  ;;  %v12684_v7 = vadd.f32 1.0, %v15324_v12  ;;  %v12595_v6 = vsub.f32 0.0, %v12563_v35  ;;  %v12565_v49 = vadd.f32 %v14672_v21, %v20090_v55 }
0x1662   :  { %v15328_v47 = vpop.eup %15327  ;;  %v12774_v26 = vmin.f32 %v12742_v17, 1.0  ;;  %v12685_v59 = vadd.f32 1.0, %v15326_v54  ;;  %15345 = vpow2.f32 %v12646_v15  ;;  %v12596_v51 = vsub.f32 0.0, %v12564_v58 }
0x1663   :  { %v15330_v11 = vpop.eup %15329  ;;  %12805 = vst [vmem:[%s20290_s5 + $0x38] sm:$0xff] %v12773_v30  ;;  %v12743_v16 = vmax.f32 %v15328_v47, 0.0  ;;  %15347 = vrcp.f32 %v12684_v7  ;;  %v12648_v25 = vmul.f32 1.442695, %v12595_v6  ;;  %v12597_v41 = vsub.f32 0.0, %v12565_v49 }
0x1664   :  { %v15332_v29 = vpop.eup %15331  ;;  %12806 = vst [vmem:[%s20290_s5 + $0x40] sm:$0xff] %v12774_v26  ;;  %v12744_v0 = vmax.f32 %v15330_v11, 0.0  ;;  %15349 = vrcp.f32 %v12685_v59  ;;  %v12650_v61 = vmul.f32 1.442695, %v12596_v51  ;;  %v14673_v48 = vadd.f32 %v20082_v45, %v12229_v50 }
0x1665   :  { %v15334_v18 = vpop.eup %15333  ;;  %v12775_v19 = vmin.f32 %v12743_v16, 1.0  ;;  %v12686_v33 = vadd.f32 1.0, %v15332_v29  ;;  %15351 = vpow2.f32 %v12648_v25  ;;  %v12652_v56 = vmul.f32 1.442695, %v12597_v41 }
0x1666   :  { %v15336_v57 = vpop.eup %15335  ;;  %v12776_v9 = vmin.f32 %v12744_v0, 1.0  ;;  %v12687_v60 = vadd.f32 1.0, %v15334_v18  ;;  %15353 = vpow2.f32 %v12650_v61  ;;  %v12566_v24 = vadd.f32 %v14673_v48, %v20087_v28 }
0x1667   :  { %v15338_v20 = vpop.eup %15337  ;;  %12807 = vst [vmem:[%s20290_s5 + $0x48] sm:$0xff] %v12775_v19  ;;  %v12745_v1 = vmax.f32 %v15336_v57, 0.0  ;;  %15355 = vrcp.f32 %v12686_v33  ;;  %v14674_v45 = vadd.f32 %v20084_v22, %v12231_v27 }
0x1668   :  { %v15340_v52 = vpop.eup %15339  ;;  %12808 = vst [vmem:[%s20290_s5 + $0x50] sm:$0xff] %v12776_v9  ;;  %v12746_v8 = vmax.f32 %v15338_v20, 0.0  ;;  %15357 = vrcp.f32 %v12687_v60  ;;  %v12598_v40 = vsub.f32 0.0, %v12566_v24 }
0x1669   :  { %v15342_v63 = vpop.eup %15341  ;;  %v12777_v53 = vmin.f32 %v12745_v1, 1.0  ;;  %v12688_v38 = vadd.f32 1.0, %v15340_v52  ;;  %15359 = vpow2.f32 %v12652_v56  ;;  %v12567_v62 = vadd.f32 %v14674_v45, %v20090_v55 }
0x166a   :  { %v15344_v5 = vpop.eup %15343  ;;  %v12778_v39 = vmin.f32 %v12746_v8, 1.0  ;;  %v12747_v44 = vmax.f32 %v15342_v63, 0.0  ;;  %v12654_v2 = vmul.f32 1.442695, %v12598_v40 }
0x166b   :  { %12809 = vst [vmem:[%s20290_s5 + $0x58] sm:$0xff] %v12777_v53  ;;  %15361 = vrcp.f32 %v12688_v38  ;;  %v12689_v22 = vadd.f32 1.0, %v15344_v5  ;;  %v12599_v42 = vsub.f32 0.0, %v12567_v62 }
0x166c   :  { %v15346_v4 = vpop.eup %15345  ;;  %12810 = vst [vmem:[%s20290_s5 + $0x60] sm:$0xff] %v12778_v39  ;;  %v12779_v37 = vmin.f32 %v12747_v44, 1.0  ;;  %15363 = vpow2.f32 %v12654_v2 }
0x166d   :  { %v15348_v14 = vpop.eup %15347  ;;  %15365 = vrcp.f32 %v12689_v22  ;;  %v12690_v34 = vadd.f32 1.0, %v15346_v4  ;;  %v12656_v31 = vmul.f32 1.442695, %v12599_v42 }
0x166e   :  { %v15350_v43 = vpop.eup %15349  ;;  %12811 = vst [vmem:[%s20290_s5 + $0x68] sm:$0xff] %v12779_v37  ;;  %v12748_v32 = vmax.f32 %v15348_v14, 0.0 }
0x166f   :  { %v15352_v10 = vpop.eup %15351  ;;  %v12749_v3 = vmax.f32 %v15350_v43, 0.0  ;;  %15367 = vrcp.f32 %v12690_v34  ;;  %v12450_v46 = vpop.f32.mrb[150].mxu1 }
0x1670   :  { %v15354_v23 = vpop.eup %15353  ;;  %v12780_v13 = vmin.f32 %v12748_v32, 1.0  ;;  %v12691_v36 = vadd.f32 1.0, %v15352_v10  ;;  %15369 = vpow2.f32 %v12656_v31  ;;  %v12568_v35 = vadd.f32 %v20087_v28, %v12450_v46  ;;  %v12452_v21 = vpop.f32.mrb[151].mxu1 }
0x1671   :  { %v15356_v50 = vpop.eup %15355  ;;  %v12781_v12 = vmin.f32 %v12749_v3, 1.0  ;;  %v12692_v17 = vadd.f32 1.0, %v15354_v23  ;;  %v12569_v15 = vadd.f32 %v20090_v55, %v12452_v21 }
0x1672   :  { %v15358_v58 = vpop.eup %15357  ;;  %12812 = vst [vmem:[%s20290_s5 + $0x70] sm:$0xff] %v12780_v13  ;;  %v12750_v27 = vmax.f32 %v15356_v50, 0.0  ;;  %15371 = vrcp.f32 %v12691_v36  ;;  %v12600_v54 = vsub.f32 0.0, %v12568_v35 }
0x1673   :  { %v15360_v30 = vpop.eup %15359  ;;  %12813 = vst [vmem:[%s20290_s5 + $0x78] sm:$0xff] %v12781_v12  ;;  %v12751_v7 = vmax.f32 %v15358_v58, 0.0  ;;  %15373 = vrcp.f32 %v12692_v17  ;;  %v12601_v6 = vsub.f32 0.0, %v12569_v15  ;;  %v12456_v49 = vpop.f32.mrb[152].mxu1 }
0x1674   :  { %v12782_v47 = vmin.f32 %v12750_v27, 1.0  ;;  %v12693_v26 = vadd.f32 1.0, %v15360_v30  ;;  %v12658_v59 = vmul.f32 1.442695, %v12600_v54  ;;  %v12570_v51 = vadd.f32 %v20087_v28, %v12456_v49  ;;  %v12458_v11 = vpop.f32.mrb[153].mxu1 }
0x1675   :  { %v15362_v16 = vpop.eup %15361  ;;  %v12783_v25 = vmin.f32 %v12751_v7, 1.0  ;;  %v12660_v41 = vmul.f32 1.442695, %v12601_v6  ;;  %v12571_v29 = vadd.f32 %v20090_v55, %v12458_v11 }
0x1676   :  { %v15364_v0 = vpop.eup %15363  ;;  %12814 = vst [vmem:[%s20290_s5 + $0x80] sm:$0xff] %v12782_v47  ;;  %v12752_v61 = vmax.f32 %v15362_v16, 0.0  ;;  %15375 = vrcp.f32 %v12693_v26  ;;  %v12602_v48 = vsub.f32 0.0, %v12570_v51 }
0x1677   :  { %v15366_v18 = vpop.eup %15365  ;;  %12815 = vst [vmem:[%s20290_s5 + $0x88] sm:$0xff] %v12783_v25  ;;  %v12694_v19 = vadd.f32 1.0, %v15364_v0  ;;  %15377 = vpow2.f32 %v12658_v59  ;;  %v12603_v33 = vsub.f32 0.0, %v12571_v29  ;;  %v12462_v56 = vpop.f32.mrb[154].mxu1 }
0x1678   :  { %v12784_v57 = vmin.f32 %v12752_v61, 1.0  ;;  %v12753_v9 = vmax.f32 %v15366_v18, 0.0  ;;  %15379 = vpow2.f32 %v12660_v41  ;;  %v12662_v60 = vmul.f32 1.442695, %v12602_v48  ;;  %v12464_v24 = vpop.f32.mrb[155].mxu1 }
0x1679   :  { %v15368_v20 = vpop.eup %15367  ;;  %15381 = vrcp.f32 %v12694_v19  ;;  %v12664_v1 = vmul.f32 1.442695, %v12603_v33  ;;  %v12572_v45 = vadd.f32 %v20087_v28, %v12462_v56  ;;  %v12573_v52 = vadd.f32 %v20090_v55, %v12464_v24 }
0x167a   :  { %v15370_v8 = vpop.eup %15369  ;;  %12816 = vst [vmem:[%s20290_s5 + $0x90] sm:$0xff] %v12784_v57  ;;  %v12785_v40 = vmin.f32 %v12753_v9, 1.0  ;;  %v12754_v63 = vmax.f32 %v15368_v20, 0.0  ;;  %15383 = vpow2.f32 %v12662_v60 }
0x167b   :  { %v12695_v53 = vadd.f32 1.0, %v15370_v8  ;;  %15385 = vpow2.f32 %v12664_v1  ;;  %v12604_v38 = vsub.f32 0.0, %v12572_v45  ;;  %v12605_v62 = vsub.f32 0.0, %v12573_v52 }
0x167c   :  { %v15372_v5 = vpop.eup %15371  ;;  %12817 = vst [vmem:[%s20290_s5 + $0x98] sm:$0xff] %v12785_v40  ;;  %v12786_v28 = vmin.f32 %v12754_v63, 1.0 }
0x167d   :  { %v15374_v39 = vpop.eup %15373  ;;  %v12755_v55 = vmax.f32 %v15372_v5, 0.0  ;;  %15387 = vrcp.f32 %v12695_v53  ;;  %v12666_v44 = vmul.f32 1.442695, %v12604_v38  ;;  %v12668_v2 = vmul.f32 1.442695, %v12605_v62 }
0x167e   :  { %12818 = vst [vmem:[%s20290_s5 + $0xa0] sm:$0xff] %v12786_v28  ;;  %v12756_v22 = vmax.f32 %v15374_v39, 0.0 }
0x167f   :  { %v12787_v42 = vmin.f32 %v12755_v55, 1.0  ;;  %15389 = vpow2.f32 %v12666_v44 }
0x1680   :  { %v15376_v4 = vpop.eup %15375  ;;  %v12788_v37 = vmin.f32 %v12756_v22, 1.0  ;;  %15391 = vpow2.f32 %v12668_v2 }
0x1681   :  { %v15378_v14 = vpop.eup %15377  ;;  %12819 = vst [vmem:[%s20290_s5 + $0xa8] sm:$0xff] %v12787_v42  ;;  %v12757_v34 = vmax.f32 %v15376_v4, 0.0 }
0x1682   :  { %v15380_v31 = vpop.eup %15379  ;;  %12820 = vst [vmem:[%s20290_s5 + $0xb0] sm:$0xff] %v12788_v37  ;;  %v12696_v43 = vadd.f32 1.0, %v15378_v14 }
0x1683   :  { %v15382_v32 = vpop.eup %15381  ;;  %v12789_v10 = vmin.f32 %v12757_v34, 1.0  ;;  %v12697_v3 = vadd.f32 1.0, %v15380_v31 }
0x1684   :  { %v15384_v46 = vpop.eup %15383  ;;  %v12758_v23 = vmax.f32 %v15382_v32, 0.0  ;;  %15393 = vrcp.f32 %v12696_v43 }
0x1685   :  { %v15386_v13 = vpop.eup %15385  ;;  %12821 = vst [vmem:[%s20290_s5 + $0xb8] sm:$0xff] %v12789_v10  ;;  %15395 = vrcp.f32 %v12697_v3  ;;  %v12698_v36 = vadd.f32 1.0, %v15384_v46 }
0x1686   :  { %v12790_v35 = vmin.f32 %v12758_v23, 1.0  ;;  %v12699_v21 = vadd.f32 1.0, %v15386_v13 }
0x1687   :  { %v15388_v50 = vpop.eup %15387  ;;  %15397 = vrcp.f32 %v12698_v36 }
0x1688   :  { %12822 = vst [vmem:[%s20290_s5 + $0xc0] sm:$0xff] %v12790_v35  ;;  %v12759_v12 = vmax.f32 %v15388_v50, 0.0  ;;  %15399 = vrcp.f32 %v12699_v21 }
0x1689   :  { %v15390_v17 = vpop.eup %15389 }
0x168a   :  { %v15392_v15 = vpop.eup %15391  ;;  %v12791_v58 = vmin.f32 %v12759_v12, 1.0  ;;  %v12700_v27 = vadd.f32 1.0, %v15390_v17 }
0x168b   :  { %v12701_v54 = vadd.f32 1.0, %v15392_v15 }
0x168c   :  { %12823 = vst [vmem:[%s20290_s5 + $0xc8] sm:$0xff] %v12791_v58  ;;  %15401 = vrcp.f32 %v12700_v27 }
0x168d   :  { %15403 = vrcp.f32 %v12701_v54 }
0x168e   :  { %v15394_v30 = vpop.eup %15393 }
0x168f   :  { %v15396_v7 = vpop.eup %15395  ;;  %v12760_v6 = vmax.f32 %v15394_v30, 0.0 }
0x1690   :  { %v12761_v49 = vmax.f32 %v15396_v7, 0.0 }
0x1691   :  { %v15398_v47 = vpop.eup %15397  ;;  %v12792_v26 = vmin.f32 %v12760_v6, 1.0 }
0x1692   :  { %v15400_v59 = vpop.eup %15399  ;;  %v12793_v51 = vmin.f32 %v12761_v49, 1.0  ;;  %v12762_v11 = vmax.f32 %v15398_v47, 0.0 }
0x1693   :  { %12824 = vst [vmem:[%s20290_s5 + $0xd0] sm:$0xff] %v12792_v26  ;;  %v12763_v16 = vmax.f32 %v15400_v59, 0.0 }
0x1694   :  { %12825 = vst [vmem:[%s20290_s5 + $0xd8] sm:$0xff] %v12793_v51  ;;  %v12794_v25 = vmin.f32 %v12762_v11, 1.0 }
0x1695   :  { %v12795_v41 = vmin.f32 %v12763_v16, 1.0 }
0x1696   :  { %v15402_v29 = vpop.eup %15401  ;;  %12826 = vst [vmem:[%s20290_s5 + $0xe0] sm:$0xff] %v12794_v25 }
0x1697   :  { %v15404_v0 = vpop.eup %15403  ;;  %12827 = vst [vmem:[%s20290_s5 + $0xe8] sm:$0xff] %v12795_v41  ;;  %v12764_v61 = vmax.f32 %v15402_v29, 0.0 }
0x1698   :  { %v12765_v48 = vmax.f32 %v15404_v0, 0.0 }
0x1699   :  { %v12796_v18 = vmin.f32 %v12764_v61, 1.0 }
0x169a   :  { %v12797_v19 = vmin.f32 %v12765_v48, 1.0 }
0x169b   :  { %12828 = vst [vmem:[%s20290_s5 + $0xf0] sm:$0x3] %v12796_v18 }
0x169c   :  { %12829 = vst [vmem:[%s20290_s5 + $0xf8] sm:$0x3] %v12797_v19 }
0x169d   :  { %12834 = vsyncpa [#allocation7], 1 }
0x169e   :  { %12835 = vsyncpa [#allocation9], 1 }
0x169f   :  { %12836 = vsyncpa [#allocation12], 1 }
0x16a0   :  { %12837 = vsyncpa [#allocation15], 1 }
0x16a1   :  { %12838 = vsyncpa [#allocation18], 1 }
0x16a2   :  { %12839 = vsyncpa [#allocation21], 1 }
0x16a3   :  { %12840 = vsyncpa [#allocation24], 1 }
0x16a4   :  { %12841 = vsyncpa [#allocation27], 1 }
0x16a5   :  { %12842 = vsyncmov [#allocation5] }
0x16a8   :  { %s12843_s18 = vpop.sfrf %12842 }
0x16a9   :  { %p13401_p0 = scmp.ne.s32.totalorder %s12843_s18, 0 }
0x16ab   :  { %12847 = shalt.err (%p13401_p0)  }
0x16ac   :  { %12849 = vsyncmov [#allocation5 + $0x1] }
0x16af   :  { %s12850_s0 = vpop.sfrf %12849 }
0x16b0   :  { %p13402_p1 = scmp.ne.s32.totalorder %s12850_s0, 0 }
0x16b2   :  { %12854 = shalt.err (%p13402_p1)  }
0x16b3   :  { %12856 = vsyncmov [#allocation5 + $0x2] }
0x16b6   :  { %s12857_s9 = vpop.sfrf %12856 }
0x16b7   :  { %p13403_p2 = scmp.ne.s32.totalorder %s12857_s9, 0 }
0x16b9   :  { %12861 = shalt.err (%p13403_p2)  }

</bundles_post_ra>
